<compile_context>
chip_gen: v6e
topology: v6e:2x2x1
jax: 0.10.0
libtpu: 0.0.40
codegen_flags: <defaults>
</compile_context>

<pallas_src>
import functools

import jax
import jax.numpy as jnp
from jax import lax
from jax.experimental import pallas as pl
from jax.experimental.pallas import tpu as pltpu

EPS = 1e-5  # PyTorch GroupNorm default eps

# Row-table layout (indices into the packed (R, PC) parameter rows).
_GN1_G, _GN1_B, _B1 = 0, 1, 2
_GN2_G, _GN2_B, _B2 = 3, 4, 5
_GG1_G, _GG1_B, _BG1 = 6, 7, 8
_GG2_G, _GG2_B, _BG2 = 9, 10, 11
_DW_B = 12
_DW_W0 = 13          # K*K depthwise taps follow

# Weight-stack layout (planes of the (4, PC, PC) array).
_W1, _W2, _WG1, _WG2 = 0, 1, 2, 3


# ----------------------------------------------------------------------------
# Pallas kernel
# ----------------------------------------------------------------------------
def _block_kernel(xpad_ref, rows_ref, wmats_ref, mcg_ref, mgc_ref, o_ref,
                  *, H, W, PC, PG, Cg, K, pad):
    HW = H * W
    f32 = jnp.float32

    xp = xpad_ref[0]          # (H+2p, W+2p, PC), zero padded
    mcg = mcg_ref[...]        # (PC, PG) packed channel -> packed group
    mgc = mgc_ref[...]        # (PG, PC) packed group   -> packed channel

    def prow(i):              # (1, PC) parameter row (static index)
        return rows_ref[pl.ds(i, 1), :]

    # Row-1 selectors used to stack [sum; sumsq] / [mean; var] without concat.
    rm_c = lax.broadcasted_iota(jnp.int32, (2, PC), 0) == 1
    rm_g = lax.broadcasted_iota(jnp.int32, (2, PG), 0) == 1

    def group_norm(v, gamma, beta):
        # v: (N, PC).  Per packed group: stats over N * Cg elements.
        inv_cnt = 1.0 / (v.shape[0] * Cg)
        s = jnp.sum(v, axis=0, keepdims=True)                     # (1, PC)
        ss = jnp.sum(v * v, axis=0, keepdims=True)                # (1, PC)
        stats = jnp.where(rm_c, ss, s)                            # (2, PC): [s; ss]
        g = jnp.dot(stats, mcg, preferred_element_type=f32) * inv_cnt  # (2, PG)
        mean_g = g[0:1]
        gm = g - jnp.where(rm_g, mean_g * mean_g, 0.0)            # (2, PG): [mean; var]
        gm = jnp.where(rm_g, jnp.maximum(gm, 0.0), gm)            # clamp var >= 0
        bc = jnp.dot(gm, mgc, preferred_element_type=f32)         # (2, PC)
        inv = lax.rsqrt(bc[1:2] + EPS)
        return (v - bc[0:1]) * (inv * gamma) + beta

    def conv1x1(v, widx, bidx):
        # Grouped 1x1 conv as dense matmul with block-diagonal (PC, PC) weight.
        w_t = wmats_ref[widx]
        return jnp.dot(v, w_t, preferred_element_type=f32) + prow(bidx)

    # ----- hoisted W (sublane) shifts: K column slabs (H+2p, W, PC) ----------
    cols = [xp[:, dx:dx + W, :] for dx in range(K)]
    x2 = cols[pad][pad:pad + H].reshape(HW, PC)          # interior x, (HW, PC)

    # ---------------- layer1 + gate1 (local-average gate) --------------------
    n1 = group_norm(x2, prow(_GN1_G), prow(_GN1_B))
    l1 = conv1x1(n1, _W1, _B1)

    acc = None   # depthwise KxK conv; accumulator seeded by the first tap
    for dy in range(K):
        for dx in range(K):
            wrow = prow(_DW_W0 + dy * K + dx).reshape(1, 1, PC)
            term = cols[dx][dy:dy + H] * wrow
            acc = term if acc is None else acc + term
    dw = acc.reshape(HW, PC) + prow(_DW_B)

    ng1 = group_norm(dw, prow(_GG1_G), prow(_GG1_B))
    g1 = jax.nn.sigmoid(conv1x1(ng1, _WG1, _BG1))

    x1 = x2 + g1 * l1

    # ---------------- layer2 + gate2 (global-average gate) -------------------
    n2 = group_norm(x1, prow(_GN2_G), prow(_GN2_B))
    l2 = conv1x1(n2, _W2, _B2)

    pooled = jnp.mean(x1, axis=0, keepdims=True)          # (1, PC)
    ng2 = group_norm(pooled, prow(_GG2_G), prow(_GG2_B))
    g2 = jax.nn.sigmoid(conv1x1(ng2, _WG2, _BG2))         # (1, PC), row-broadcast

    out = x1 + g2 * l2
    o_ref[0] = out.reshape(H, W, PC)


# ----------------------------------------------------------------------------
# Wrapper
# ----------------------------------------------------------------------------
def _block_diag_t(w, groups):
    """(C_out, C_in_per_group) PyTorch grouped 1x1 weight -> dense (C_in, C_out)."""
    c = w.shape[0]
    cg = c // groups
    full = jnp.zeros((c, c), jnp.float32)
    for g in range(groups):
        full = full.at[g * cg:(g + 1) * cg, g * cg:(g + 1) * cg].set(
            w[g * cg:(g + 1) * cg, :])
    return full.T


def block_forward(x_nhwc, params, *, groups, kernel_size, lane_target=128):
    B, H, W, C = x_nhwc.shape
    G, K = groups, kernel_size
    Cg = C // G
    pad = (K - 1) // 2

    # Pack P batch images along the channel (lane) axis: pick the largest
    # divisor of B such that P*C <= lane_target (128 lanes on all TPU gens).
    max_pack = max(1, lane_target // C)
    P = 1
    for cand in range(min(B, max_pack), 0, -1):
        if B % cand == 0:
            P = cand
            break
    Bp, PC, PG = B // P, P * C, P * G

    x = x_nhwc.astype(jnp.float32)
    x = x.reshape(Bp, P, H, W, C).transpose(0, 2, 3, 1, 4).reshape(Bp, H, W, PC)
    xpad = jnp.pad(x, ((0, 0), (pad, pad), (pad, pad), (0, 0)))   # single DMA'd input

    # Packed-channel <-> packed-group membership (packed group id = channel // Cg).
    mcg = (jnp.arange(PC)[:, None] // Cg == jnp.arange(PG)[None, :]).astype(jnp.float32)
    mgc = mcg.T

    tile = lambda v: jnp.tile(v.astype(jnp.float32).reshape(-1), P)        # (PC,)
    dww = jnp.transpose(params["dw_w"][:, 0, :, :], (1, 2, 0)).reshape(K * K, C)

    rows = jnp.stack(
        [tile(params["gn1_g"]), tile(params["gn1_b"]), tile(params["b1"]),
         tile(params["gn2_g"]), tile(params["gn2_b"]), tile(params["b2"]),
         tile(params["gg1_g"]), tile(params["gg1_b"]), tile(params["bg1"]),
         tile(params["gg2_g"]), tile(params["gg2_b"]), tile(params["bg2"]),
         tile(params["dw_b"])]
        + [tile(dww[i]) for i in range(K * K)], axis=0)                    # (13+K*K, PC)

    eye_p = jnp.eye(P, dtype=jnp.float32)
    wmats = jnp.stack(
        [jnp.kron(eye_p, _block_diag_t(params[k], G))
         for k in ("w1", "w2", "wg1", "wg2")], axis=0)                     # (4, PC, PC)

    def full_spec(shape):
        nd = len(shape)
        return pl.BlockSpec(shape, lambda b, nd=nd: (0,) * nd)

    in_specs = [
        pl.BlockSpec((1, H + 2 * pad, W + 2 * pad, PC), lambda b: (b, 0, 0, 0)),
        full_spec(rows.shape), full_spec(wmats.shape),
        full_spec(mcg.shape), full_spec(mgc.shape),
    ]

    kernel = functools.partial(_block_kernel, H=H, W=W, PC=PC, PG=PG,
                               Cg=Cg, K=K, pad=pad)
    out = pl.pallas_call(
        kernel,
        out_shape=jax.ShapeDtypeStruct((Bp, H, W, PC), jnp.float32),
        grid=(Bp,),
        in_specs=in_specs,
        out_specs=pl.BlockSpec((1, H, W, PC), lambda b: (b, 0, 0, 0)),
        compiler_params=pltpu.CompilerParams(
            dimension_semantics=("parallel",),
            vmem_limit_bytes=32 * 1024 * 1024),
    )(xpad, rows, wmats, mcg, mgc)

    # Unpack lanes back to (B, H, W, C).
    return out.reshape(Bp, H, W, P, C).transpose(0, 3, 1, 2, 4).reshape(B, H, W, C)


# ----------------------------------------------------------------------------
# Pure-JAX reference (for correctness check)
# ----------------------------------------------------------------------------
def _ref_group_norm(x, gamma, beta, G):
    B, H, W, C = x.shape
    xr = x.reshape(B, H, W, G, C // G)
    mean = xr.mean(axis=(1, 2, 4), keepdims=True)
    var = ((xr - mean) ** 2).mean(axis=(1, 2, 4), keepdims=True)
    xn = ((xr - mean) / jnp.sqrt(var + EPS)).reshape(B, H, W, C)
    return xn * gamma.reshape(1, 1, 1, C) + beta.reshape(1, 1, 1, C)


def _ref_conv1x1(x, w, b, G):
    rhs = jnp.transpose(w[:, :, None, None], (2, 3, 1, 0))          # HWIO
    y = lax.conv_general_dilated(x, rhs, (1, 1), "SAME",
                                 dimension_numbers=("NHWC", "HWIO", "NHWC"),
                                 feature_group_count=G)
    return y + b.reshape(1, 1, 1, -1)


def _ref_depthwise(x, w, b):
    C = x.shape[-1]
    rhs = jnp.transpose(w, (2, 3, 1, 0))                            # (K, K, 1, C)
    y = lax.conv_general_dilated(x, rhs, (1, 1), "SAME",
                                 dimension_numbers=("NHWC", "HWIO", "NHWC"),
                                 feature_group_count=C)
    return y + b.reshape(1, 1, 1, -1)


def block_forward_ref(x, p, *, groups):
    G = groups
    l1 = _ref_conv1x1(_ref_group_norm(x, p["gn1_g"], p["gn1_b"], G), p["w1"], p["b1"], G)
    g1 = jax.nn.sigmoid(_ref_conv1x1(
        _ref_group_norm(_ref_depthwise(x, p["dw_w"], p["dw_b"]), p["gg1_g"], p["gg1_b"], G),
        p["wg1"], p["bg1"], G))
    x1 = x + g1 * l1
    l2 = _ref_conv1x1(_ref_group_norm(x1, p["gn2_g"], p["gn2_b"], G), p["w2"], p["b2"], G)
    pooled = x1.mean(axis=(1, 2), keepdims=True)
    g2 = jax.nn.sigmoid(_ref_conv1x1(
        _ref_group_norm(pooled, p["gg2_g"], p["gg2_b"], G), p["wg2"], p["bg2"], G))
    return x1 + g2 * l2


# ----------------------------------------------------------------------------
# Main
# ----------------------------------------------------------------------------
if __name__ == "__main__":
    # B=8, C=32 -> pack P=4 images per grid step (4*32 = 128 lanes), grid = (2,).
    B, C, H, W = 8, 32, 16, 16
    GROUPS, K = 4, 3
    Cg = C // GROUPS

    key = jax.random.PRNGKey(0)
    keys = jax.random.split(key, 20)

    # Deterministic synthetic parameters (PyTorch layouts).
    params = {
        "gn1_g": 1.0 + 0.1 * jax.random.normal(keys[0], (C,)),
        "gn1_b": 0.1 * jax.random.normal(keys[1], (C,)),
        "w1": 0.2 * jax.random.normal(keys[2], (C, Cg)),
        "b1": 0.1 * jax.random.normal(keys[3], (C,)),
        "gn2_g": 1.0 + 0.1 * jax.random.normal(keys[4], (C,)),
        "gn2_b": 0.1 * jax.random.normal(keys[5], (C,)),
        "w2": 0.2 * jax.random.normal(keys[6], (C, Cg)),
        "b2": 0.1 * jax.random.normal(keys[7], (C,)),
        "dw_w": jnp.full((C, 1, K, K), 1.0 / K ** 2, jnp.float32),   # module fills 1/k^2
        "dw_b": 0.05 * jax.random.normal(keys[8], (C,)),
        "gg1_g": 1.0 + 0.1 * jax.random.normal(keys[9], (C,)),
        "gg1_b": 0.1 * jax.random.normal(keys[10], (C,)),
        "wg1": 0.2 * jax.random.normal(keys[11], (C, Cg)),
        "bg1": 0.1 * jax.random.normal(keys[12], (C,)),
        "gg2_g": 1.0 + 0.1 * jax.random.normal(keys[13], (C,)),
        "gg2_b": 0.1 * jax.random.normal(keys[14], (C,)),
        "wg2": 0.2 * jax.random.normal(keys[15], (C, Cg)),
        "bg2": 0.1 * jax.random.normal(keys[16], (C,)),
    }
    params = {k: v.astype(jnp.float32) for k, v in params.items()}

    # PyTorch-style NCHW input, transposed to the kernel's NHWC layout.
    x_nchw = jax.random.normal(keys[17], (B, C, H, W), jnp.float32)
    x_nhwc = jnp.transpose(x_nchw, (0, 2, 3, 1))

    out = block_forward(x_nhwc, params, groups=GROUPS, kernel_size=K)
    out = jax.block_until_ready(out)

    ref = jax.block_until_ready(block_forward_ref(x_nhwc, params, groups=GROUPS))
    err = float(jnp.max(jnp.abs(out - ref)))
    assert err < 2e-3, f"mismatch vs reference: max abs err = {err}"

    print("KERNEL_OK")
</pallas_src>

<mosaic_0001>
module attributes {stable_mosaic.version = 11 : i64} {
  func.func @_block_kernel(%arg0: i32, %arg1: memref<1x18x18x128xf32, #tpu.memory_space<vmem>>, %arg2: memref<22x128xf32, #tpu.memory_space<vmem>>, %arg3: memref<4x128x128xf32, #tpu.memory_space<vmem>>, %arg4: memref<128x16xf32, #tpu.memory_space<vmem>>, %arg5: memref<16x128xf32, #tpu.memory_space<vmem>>, %arg6: memref<1x16x16x128xf32, #tpu.memory_space<vmem>>) attributes {dimension_semantics = [#tpu.dimension_semantics<parallel>], iteration_bounds = array<i64: 2>, scalar_prefetch = 0 : i64, scratch_operands = 0 : i64, tpu.core_type = #tpu.core_type<tc>, window_params = [{transform_indices = @transform_0, window_bounds = array<i64: 1, 18, 18, 128>}, {pipeline_mode = #tpu.pipeline_mode<synchronous>, transform_indices = @transform_1, window_bounds = array<i64: 22, 128>}, {pipeline_mode = #tpu.pipeline_mode<synchronous>, transform_indices = @transform_2, window_bounds = array<i64: 4, 128, 128>}, {pipeline_mode = #tpu.pipeline_mode<synchronous>, transform_indices = @transform_3, window_bounds = array<i64: 128, 16>}, {pipeline_mode = #tpu.pipeline_mode<synchronous>, transform_indices = @transform_4, window_bounds = array<i64: 16, 128>}, {transform_indices = @transform_5, window_bounds = array<i64: 1, 16, 16, 128>}]} {
    %c0 = arith.constant 0 : index
    %c0_0 = arith.constant 0 : index
    %c0_1 = arith.constant 0 : index
    %c0_2 = arith.constant 0 : index
    %0 = vector.load %arg1[%c0, %c0_0, %c0_1, %c0_2] : memref<1x18x18x128xf32, #tpu.memory_space<vmem>>, vector<1x18x18x128xf32>
    %1 = vector.shape_cast %0 : vector<1x18x18x128xf32> to vector<18x18x128xf32>
    %c0_3 = arith.constant 0 : index
    %c0_4 = arith.constant 0 : index
    %2 = vector.load %arg4[%c0_3, %c0_4] : memref<128x16xf32, #tpu.memory_space<vmem>>, vector<128x16xf32>
    %c0_5 = arith.constant 0 : index
    %c0_6 = arith.constant 0 : index
    %3 = vector.load %arg5[%c0_5, %c0_6] : memref<16x128xf32, #tpu.memory_space<vmem>>, vector<16x128xf32>
    %4 = tpu.iota {dimensions = array<i32: 0>} : vector<2x128xi32>
    %c1_i32 = arith.constant 1 : i32
    %5 = vector.broadcast %c1_i32 : i32 to vector<2x128xi32>
    %6 = arith.cmpi eq, %4, %5 : vector<2x128xi32>
    %7 = tpu.iota {dimensions = array<i32: 0>} : vector<2x16xi32>
    %c1_i32_7 = arith.constant 1 : i32
    %8 = vector.broadcast %c1_i32_7 : i32 to vector<2x16xi32>
    %9 = arith.cmpi eq, %7, %8 : vector<2x16xi32>
    %10 = vector.extract_strided_slice %1 {offsets = [0, 0, 0], sizes = [18, 16, 128], strides = [1, 1, 1]} : vector<18x18x128xf32> to vector<18x16x128xf32>
    %11 = vector.extract_strided_slice %1 {offsets = [0, 1, 0], sizes = [18, 16, 128], strides = [1, 1, 1]} : vector<18x18x128xf32> to vector<18x16x128xf32>
    %12 = vector.extract_strided_slice %1 {offsets = [0, 2, 0], sizes = [18, 16, 128], strides = [1, 1, 1]} : vector<18x18x128xf32> to vector<18x16x128xf32>
    %13 = vector.extract_strided_slice %11 {offsets = [1, 0, 0], sizes = [16, 16, 128], strides = [1, 1, 1]} : vector<18x16x128xf32> to vector<16x16x128xf32>
    %14 = vector.shape_cast %13 : vector<16x16x128xf32> to vector<256x128xf32>
    %c0_8 = arith.constant 0 : index
    %c0_9 = arith.constant 0 : index
    %15 = vector.load %arg2[%c0_8, %c0_9] : memref<22x128xf32, #tpu.memory_space<vmem>>, vector<1x128xf32>
    %c1 = arith.constant 1 : index
    %c0_10 = arith.constant 0 : index
    %16 = vector.load %arg2[%c1, %c0_10] : memref<22x128xf32, #tpu.memory_space<vmem>>, vector<1x128xf32>
    %cst = arith.constant dense<0.000000e+00> : vector<128xf32>
    %17 = vector.multi_reduction <add>, %14, %cst [0] : vector<256x128xf32> to vector<128xf32>
    %18 = vector.shape_cast %17 : vector<128xf32> to vector<1x128xf32>
    %19 = arith.mulf %14, %14 : vector<256x128xf32>
    %cst_11 = arith.constant dense<0.000000e+00> : vector<128xf32>
    %20 = vector.multi_reduction <add>, %19, %cst_11 [0] : vector<256x128xf32> to vector<128xf32>
    %21 = vector.shape_cast %20 : vector<128xf32> to vector<1x128xf32>
    %22 = vector.shape_cast %21 : vector<1x128xf32> to vector<1x128xf32>
    %23 = vector.broadcast %22 : vector<1x128xf32> to vector<2x128xf32>
    %24 = vector.shape_cast %18 : vector<1x128xf32> to vector<1x128xf32>
    %25 = vector.broadcast %24 : vector<1x128xf32> to vector<2x128xf32>
    %26 = arith.select %6, %23, %25 : vector<2x128xi1>, vector<2x128xf32>
    %cst_12 = arith.constant dense<0.000000e+00> : vector<2x16xf32>
    %27 = tpu.matmul %26, %2, %cst_12 {dimension_numbers = #tpu.dot_dimension_numbers<[1], [0], [0], [1], [0, 0, 1, 1], [], []>} : vector<2x128xf32>, vector<128x16xf32>, vector<2x16xf32> -> vector<2x16xf32>
    %cst_13 = arith.constant 4.8828125E-4 : f32
    %28 = vector.broadcast %cst_13 : f32 to vector<2x16xf32>
    %29 = arith.mulf %27, %28 : vector<2x16xf32>
    %30 = vector.extract_strided_slice %29 {offsets = [0, 0], sizes = [1, 16], strides = [1, 1]} : vector<2x16xf32> to vector<1x16xf32>
    %31 = arith.mulf %30, %30 : vector<1x16xf32>
    %cst_14 = arith.constant 0.000000e+00 : f32
    %32 = vector.shape_cast %31 : vector<1x16xf32> to vector<1x16xf32>
    %33 = vector.broadcast %32 : vector<1x16xf32> to vector<2x16xf32>
    %34 = vector.broadcast %cst_14 : f32 to vector<2x16xf32>
    %35 = arith.select %9, %33, %34 : vector<2x16xi1>, vector<2x16xf32>
    %36 = arith.subf %29, %35 : vector<2x16xf32>
    %cst_15 = arith.constant 0.000000e+00 : f32
    %37 = vector.broadcast %cst_15 : f32 to vector<2x16xf32>
    %38 = arith.maximumf %36, %37 : vector<2x16xf32>
    %39 = arith.select %9, %38, %36 : vector<2x16xi1>, vector<2x16xf32>
    %cst_16 = arith.constant dense<0.000000e+00> : vector<2x128xf32>
    %40 = tpu.matmul %39, %3, %cst_16 {dimension_numbers = #tpu.dot_dimension_numbers<[1], [0], [0], [1], [0, 0, 1, 1], [], []>} : vector<2x16xf32>, vector<16x128xf32>, vector<2x128xf32> -> vector<2x128xf32>
    %41 = vector.extract_strided_slice %40 {offsets = [1, 0], sizes = [1, 128], strides = [1, 1]} : vector<2x128xf32> to vector<1x128xf32>
    %cst_17 = arith.constant 9.99999974E-6 : f32
    %42 = vector.broadcast %cst_17 : f32 to vector<1x128xf32>
    %43 = arith.addf %41, %42 : vector<1x128xf32>
    %44 = math.rsqrt %43 : vector<1x128xf32>
    %45 = vector.extract_strided_slice %40 {offsets = [0, 0], sizes = [1, 128], strides = [1, 1]} : vector<2x128xf32> to vector<1x128xf32>
    %46 = vector.broadcast %45 : vector<1x128xf32> to vector<256x128xf32>
    %47 = arith.subf %14, %46 : vector<256x128xf32>
    %48 = arith.mulf %44, %15 : vector<1x128xf32>
    %49 = vector.broadcast %48 : vector<1x128xf32> to vector<256x128xf32>
    %50 = arith.mulf %47, %49 : vector<256x128xf32>
    %51 = vector.broadcast %16 : vector<1x128xf32> to vector<256x128xf32>
    %52 = arith.addf %50, %51 : vector<256x128xf32>
    %c0_18 = arith.constant 0 : index
    %c0_19 = arith.constant 0 : index
    %c0_20 = arith.constant 0 : index
    %53 = vector.load %arg3[%c0_18, %c0_19, %c0_20] : memref<4x128x128xf32, #tpu.memory_space<vmem>>, vector<1x128x128xf32>
    %54 = vector.shape_cast %53 : vector<1x128x128xf32> to vector<128x128xf32>
    %cst_21 = arith.constant dense<0.000000e+00> : vector<256x128xf32>
    %55 = tpu.matmul %52, %54, %cst_21 {dimension_numbers = #tpu.dot_dimension_numbers<[1], [0], [0], [1], [0, 0, 1, 1], [], []>} : vector<256x128xf32>, vector<128x128xf32>, vector<256x128xf32> -> vector<256x128xf32>
    %c2 = arith.constant 2 : index
    %c0_22 = arith.constant 0 : index
    %56 = vector.load %arg2[%c2, %c0_22] : memref<22x128xf32, #tpu.memory_space<vmem>>, vector<1x128xf32>
    %57 = vector.broadcast %56 : vector<1x128xf32> to vector<256x128xf32>
    %58 = arith.addf %55, %57 : vector<256x128xf32>
    %c13 = arith.constant 13 : index
    %c0_23 = arith.constant 0 : index
    %59 = vector.load %arg2[%c13, %c0_23] : memref<22x128xf32, #tpu.memory_space<vmem>>, vector<1x128xf32>
    %60 = vector.shape_cast %59 : vector<1x128xf32> to vector<1x1x128xf32>
    %61 = vector.extract_strided_slice %10 {offsets = [0, 0, 0], sizes = [16, 16, 128], strides = [1, 1, 1]} : vector<18x16x128xf32> to vector<16x16x128xf32>
    %62 = vector.broadcast %60 : vector<1x1x128xf32> to vector<16x16x128xf32>
    %63 = arith.mulf %61, %62 : vector<16x16x128xf32>
    %c14 = arith.constant 14 : index
    %c0_24 = arith.constant 0 : index
    %64 = vector.load %arg2[%c14, %c0_24] : memref<22x128xf32, #tpu.memory_space<vmem>>, vector<1x128xf32>
    %65 = vector.shape_cast %64 : vector<1x128xf32> to vector<1x1x128xf32>
    %66 = vector.extract_strided_slice %11 {offsets = [0, 0, 0], sizes = [16, 16, 128], strides = [1, 1, 1]} : vector<18x16x128xf32> to vector<16x16x128xf32>
    %67 = vector.broadcast %65 : vector<1x1x128xf32> to vector<16x16x128xf32>
    %68 = arith.mulf %66, %67 : vector<16x16x128xf32>
    %69 = arith.addf %63, %68 : vector<16x16x128xf32>
    %c15 = arith.constant 15 : index
    %c0_25 = arith.constant 0 : index
    %70 = vector.load %arg2[%c15, %c0_25] : memref<22x128xf32, #tpu.memory_space<vmem>>, vector<1x128xf32>
    %71 = vector.shape_cast %70 : vector<1x128xf32> to vector<1x1x128xf32>
    %72 = vector.extract_strided_slice %12 {offsets = [0, 0, 0], sizes = [16, 16, 128], strides = [1, 1, 1]} : vector<18x16x128xf32> to vector<16x16x128xf32>
    %73 = vector.broadcast %71 : vector<1x1x128xf32> to vector<16x16x128xf32>
    %74 = arith.mulf %72, %73 : vector<16x16x128xf32>
    %75 = arith.addf %69, %74 : vector<16x16x128xf32>
    %c16 = arith.constant 16 : index
    %c0_26 = arith.constant 0 : index
    %76 = vector.load %arg2[%c16, %c0_26] : memref<22x128xf32, #tpu.memory_space<vmem>>, vector<1x128xf32>
    %77 = vector.shape_cast %76 : vector<1x128xf32> to vector<1x1x128xf32>
    %78 = vector.extract_strided_slice %10 {offsets = [1, 0, 0], sizes = [16, 16, 128], strides = [1, 1, 1]} : vector<18x16x128xf32> to vector<16x16x128xf32>
    %79 = vector.broadcast %77 : vector<1x1x128xf32> to vector<16x16x128xf32>
    %80 = arith.mulf %78, %79 : vector<16x16x128xf32>
    %81 = arith.addf %75, %80 : vector<16x16x128xf32>
    %c17 = arith.constant 17 : index
    %c0_27 = arith.constant 0 : index
    %82 = vector.load %arg2[%c17, %c0_27] : memref<22x128xf32, #tpu.memory_space<vmem>>, vector<1x128xf32>
    %83 = vector.shape_cast %82 : vector<1x128xf32> to vector<1x1x128xf32>
    %84 = vector.extract_strided_slice %11 {offsets = [1, 0, 0], sizes = [16, 16, 128], strides = [1, 1, 1]} : vector<18x16x128xf32> to vector<16x16x128xf32>
    %85 = vector.broadcast %83 : vector<1x1x128xf32> to vector<16x16x128xf32>
    %86 = arith.mulf %84, %85 : vector<16x16x128xf32>
    %87 = arith.addf %81, %86 : vector<16x16x128xf32>
    %c18 = arith.constant 18 : index
    %c0_28 = arith.constant 0 : index
    %88 = vector.load %arg2[%c18, %c0_28] : memref<22x128xf32, #tpu.memory_space<vmem>>, vector<1x128xf32>
    %89 = vector.shape_cast %88 : vector<1x128xf32> to vector<1x1x128xf32>
    %90 = vector.extract_strided_slice %12 {offsets = [1, 0, 0], sizes = [16, 16, 128], strides = [1, 1, 1]} : vector<18x16x128xf32> to vector<16x16x128xf32>
    %91 = vector.broadcast %89 : vector<1x1x128xf32> to vector<16x16x128xf32>
    %92 = arith.mulf %90, %91 : vector<16x16x128xf32>
    %93 = arith.addf %87, %92 : vector<16x16x128xf32>
    %c19 = arith.constant 19 : index
    %c0_29 = arith.constant 0 : index
    %94 = vector.load %arg2[%c19, %c0_29] : memref<22x128xf32, #tpu.memory_space<vmem>>, vector<1x128xf32>
    %95 = vector.shape_cast %94 : vector<1x128xf32> to vector<1x1x128xf32>
    %96 = vector.extract_strided_slice %10 {offsets = [2, 0, 0], sizes = [16, 16, 128], strides = [1, 1, 1]} : vector<18x16x128xf32> to vector<16x16x128xf32>
    %97 = vector.broadcast %95 : vector<1x1x128xf32> to vector<16x16x128xf32>
    %98 = arith.mulf %96, %97 : vector<16x16x128xf32>
    %99 = arith.addf %93, %98 : vector<16x16x128xf32>
    %c20 = arith.constant 20 : index
    %c0_30 = arith.constant 0 : index
    %100 = vector.load %arg2[%c20, %c0_30] : memref<22x128xf32, #tpu.memory_space<vmem>>, vector<1x128xf32>
    %101 = vector.shape_cast %100 : vector<1x128xf32> to vector<1x1x128xf32>
    %102 = vector.extract_strided_slice %11 {offsets = [2, 0, 0], sizes = [16, 16, 128], strides = [1, 1, 1]} : vector<18x16x128xf32> to vector<16x16x128xf32>
    %103 = vector.broadcast %101 : vector<1x1x128xf32> to vector<16x16x128xf32>
    %104 = arith.mulf %102, %103 : vector<16x16x128xf32>
    %105 = arith.addf %99, %104 : vector<16x16x128xf32>
    %c21 = arith.constant 21 : index
    %c0_31 = arith.constant 0 : index
    %106 = vector.load %arg2[%c21, %c0_31] : memref<22x128xf32, #tpu.memory_space<vmem>>, vector<1x128xf32>
    %107 = vector.shape_cast %106 : vector<1x128xf32> to vector<1x1x128xf32>
    %108 = vector.extract_strided_slice %12 {offsets = [2, 0, 0], sizes = [16, 16, 128], strides = [1, 1, 1]} : vector<18x16x128xf32> to vector<16x16x128xf32>
    %109 = vector.broadcast %107 : vector<1x1x128xf32> to vector<16x16x128xf32>
    %110 = arith.mulf %108, %109 : vector<16x16x128xf32>
    %111 = arith.addf %105, %110 : vector<16x16x128xf32>
    %112 = vector.shape_cast %111 : vector<16x16x128xf32> to vector<256x128xf32>
    %c12 = arith.constant 12 : index
    %c0_32 = arith.constant 0 : index
    %113 = vector.load %arg2[%c12, %c0_32] : memref<22x128xf32, #tpu.memory_space<vmem>>, vector<1x128xf32>
    %114 = vector.broadcast %113 : vector<1x128xf32> to vector<256x128xf32>
    %115 = arith.addf %112, %114 : vector<256x128xf32>
    %c6 = arith.constant 6 : index
    %c0_33 = arith.constant 0 : index
    %116 = vector.load %arg2[%c6, %c0_33] : memref<22x128xf32, #tpu.memory_space<vmem>>, vector<1x128xf32>
    %c7 = arith.constant 7 : index
    %c0_34 = arith.constant 0 : index
    %117 = vector.load %arg2[%c7, %c0_34] : memref<22x128xf32, #tpu.memory_space<vmem>>, vector<1x128xf32>
    %cst_35 = arith.constant dense<0.000000e+00> : vector<128xf32>
    %118 = vector.multi_reduction <add>, %115, %cst_35 [0] : vector<256x128xf32> to vector<128xf32>
    %119 = vector.shape_cast %118 : vector<128xf32> to vector<1x128xf32>
    %120 = arith.mulf %115, %115 : vector<256x128xf32>
    %cst_36 = arith.constant dense<0.000000e+00> : vector<128xf32>
    %121 = vector.multi_reduction <add>, %120, %cst_36 [0] : vector<256x128xf32> to vector<128xf32>
    %122 = vector.shape_cast %121 : vector<128xf32> to vector<1x128xf32>
    %123 = vector.shape_cast %122 : vector<1x128xf32> to vector<1x128xf32>
    %124 = vector.broadcast %123 : vector<1x128xf32> to vector<2x128xf32>
    %125 = vector.shape_cast %119 : vector<1x128xf32> to vector<1x128xf32>
    %126 = vector.broadcast %125 : vector<1x128xf32> to vector<2x128xf32>
    %127 = arith.select %6, %124, %126 : vector<2x128xi1>, vector<2x128xf32>
    %cst_37 = arith.constant dense<0.000000e+00> : vector<2x16xf32>
    %128 = tpu.matmul %127, %2, %cst_37 {dimension_numbers = #tpu.dot_dimension_numbers<[1], [0], [0], [1], [0, 0, 1, 1], [], []>} : vector<2x128xf32>, vector<128x16xf32>, vector<2x16xf32> -> vector<2x16xf32>
    %cst_38 = arith.constant 4.8828125E-4 : f32
    %129 = vector.broadcast %cst_38 : f32 to vector<2x16xf32>
    %130 = arith.mulf %128, %129 : vector<2x16xf32>
    %131 = vector.extract_strided_slice %130 {offsets = [0, 0], sizes = [1, 16], strides = [1, 1]} : vector<2x16xf32> to vector<1x16xf32>
    %132 = arith.mulf %131, %131 : vector<1x16xf32>
    %cst_39 = arith.constant 0.000000e+00 : f32
    %133 = vector.shape_cast %132 : vector<1x16xf32> to vector<1x16xf32>
    %134 = vector.broadcast %133 : vector<1x16xf32> to vector<2x16xf32>
    %135 = vector.broadcast %cst_39 : f32 to vector<2x16xf32>
    %136 = arith.select %9, %134, %135 : vector<2x16xi1>, vector<2x16xf32>
    %137 = arith.subf %130, %136 : vector<2x16xf32>
    %cst_40 = arith.constant 0.000000e+00 : f32
    %138 = vector.broadcast %cst_40 : f32 to vector<2x16xf32>
    %139 = arith.maximumf %137, %138 : vector<2x16xf32>
    %140 = arith.select %9, %139, %137 : vector<2x16xi1>, vector<2x16xf32>
    %cst_41 = arith.constant dense<0.000000e+00> : vector<2x128xf32>
    %141 = tpu.matmul %140, %3, %cst_41 {dimension_numbers = #tpu.dot_dimension_numbers<[1], [0], [0], [1], [0, 0, 1, 1], [], []>} : vector<2x16xf32>, vector<16x128xf32>, vector<2x128xf32> -> vector<2x128xf32>
    %142 = vector.extract_strided_slice %141 {offsets = [1, 0], sizes = [1, 128], strides = [1, 1]} : vector<2x128xf32> to vector<1x128xf32>
    %cst_42 = arith.constant 9.99999974E-6 : f32
    %143 = vector.broadcast %cst_42 : f32 to vector<1x128xf32>
    %144 = arith.addf %142, %143 : vector<1x128xf32>
    %145 = math.rsqrt %144 : vector<1x128xf32>
    %146 = vector.extract_strided_slice %141 {offsets = [0, 0], sizes = [1, 128], strides = [1, 1]} : vector<2x128xf32> to vector<1x128xf32>
    %147 = vector.broadcast %146 : vector<1x128xf32> to vector<256x128xf32>
    %148 = arith.subf %115, %147 : vector<256x128xf32>
    %149 = arith.mulf %145, %116 : vector<1x128xf32>
    %150 = vector.broadcast %149 : vector<1x128xf32> to vector<256x128xf32>
    %151 = arith.mulf %148, %150 : vector<256x128xf32>
    %152 = vector.broadcast %117 : vector<1x128xf32> to vector<256x128xf32>
    %153 = arith.addf %151, %152 : vector<256x128xf32>
    %c2_43 = arith.constant 2 : index
    %c0_44 = arith.constant 0 : index
    %c0_45 = arith.constant 0 : index
    %154 = vector.load %arg3[%c2_43, %c0_44, %c0_45] : memref<4x128x128xf32, #tpu.memory_space<vmem>>, vector<1x128x128xf32>
    %155 = vector.shape_cast %154 : vector<1x128x128xf32> to vector<128x128xf32>
    %cst_46 = arith.constant dense<0.000000e+00> : vector<256x128xf32>
    %156 = tpu.matmul %153, %155, %cst_46 {dimension_numbers = #tpu.dot_dimension_numbers<[1], [0], [0], [1], [0, 0, 1, 1], [], []>} : vector<256x128xf32>, vector<128x128xf32>, vector<256x128xf32> -> vector<256x128xf32>
    %c8 = arith.constant 8 : index
    %c0_47 = arith.constant 0 : index
    %157 = vector.load %arg2[%c8, %c0_47] : memref<22x128xf32, #tpu.memory_space<vmem>>, vector<1x128xf32>
    %158 = vector.broadcast %157 : vector<1x128xf32> to vector<256x128xf32>
    %159 = arith.addf %156, %158 : vector<256x128xf32>
    %160 = arith.negf %159 : vector<256x128xf32>
    %161 = math.exp %160 : vector<256x128xf32>
    %cst_48 = arith.constant 1.000000e+00 : f32
    %162 = vector.broadcast %cst_48 : f32 to vector<256x128xf32>
    %163 = arith.addf %162, %161 : vector<256x128xf32>
    %164 = arith.divf %162, %163 : vector<256x128xf32>
    %165 = arith.mulf %164, %58 : vector<256x128xf32>
    %166 = arith.addf %14, %165 : vector<256x128xf32>
    %c3 = arith.constant 3 : index
    %c0_49 = arith.constant 0 : index
    %167 = vector.load %arg2[%c3, %c0_49] : memref<22x128xf32, #tpu.memory_space<vmem>>, vector<1x128xf32>
    %c4 = arith.constant 4 : index
    %c0_50 = arith.constant 0 : index
    %168 = vector.load %arg2[%c4, %c0_50] : memref<22x128xf32, #tpu.memory_space<vmem>>, vector<1x128xf32>
    %cst_51 = arith.constant dense<0.000000e+00> : vector<128xf32>
    %169 = vector.multi_reduction <add>, %166, %cst_51 [0] : vector<256x128xf32> to vector<128xf32>
    %170 = vector.shape_cast %169 : vector<128xf32> to vector<1x128xf32>
    %171 = arith.mulf %166, %166 : vector<256x128xf32>
    %cst_52 = arith.constant dense<0.000000e+00> : vector<128xf32>
    %172 = vector.multi_reduction <add>, %171, %cst_52 [0] : vector<256x128xf32> to vector<128xf32>
    %173 = vector.shape_cast %172 : vector<128xf32> to vector<1x128xf32>
    %174 = vector.shape_cast %173 : vector<1x128xf32> to vector<1x128xf32>
    %175 = vector.broadcast %174 : vector<1x128xf32> to vector<2x128xf32>
    %176 = vector.shape_cast %170 : vector<1x128xf32> to vector<1x128xf32>
    %177 = vector.broadcast %176 : vector<1x128xf32> to vector<2x128xf32>
    %178 = arith.select %6, %175, %177 : vector<2x128xi1>, vector<2x128xf32>
    %cst_53 = arith.constant dense<0.000000e+00> : vector<2x16xf32>
    %179 = tpu.matmul %178, %2, %cst_53 {dimension_numbers = #tpu.dot_dimension_numbers<[1], [0], [0], [1], [0, 0, 1, 1], [], []>} : vector<2x128xf32>, vector<128x16xf32>, vector<2x16xf32> -> vector<2x16xf32>
    %cst_54 = arith.constant 4.8828125E-4 : f32
    %180 = vector.broadcast %cst_54 : f32 to vector<2x16xf32>
    %181 = arith.mulf %179, %180 : vector<2x16xf32>
    %182 = vector.extract_strided_slice %181 {offsets = [0, 0], sizes = [1, 16], strides = [1, 1]} : vector<2x16xf32> to vector<1x16xf32>
    %183 = arith.mulf %182, %182 : vector<1x16xf32>
    %cst_55 = arith.constant 0.000000e+00 : f32
    %184 = vector.shape_cast %183 : vector<1x16xf32> to vector<1x16xf32>
    %185 = vector.broadcast %184 : vector<1x16xf32> to vector<2x16xf32>
    %186 = vector.broadcast %cst_55 : f32 to vector<2x16xf32>
    %187 = arith.select %9, %185, %186 : vector<2x16xi1>, vector<2x16xf32>
    %188 = arith.subf %181, %187 : vector<2x16xf32>
    %cst_56 = arith.constant 0.000000e+00 : f32
    %189 = vector.broadcast %cst_56 : f32 to vector<2x16xf32>
    %190 = arith.maximumf %188, %189 : vector<2x16xf32>
    %191 = arith.select %9, %190, %188 : vector<2x16xi1>, vector<2x16xf32>
    %cst_57 = arith.constant dense<0.000000e+00> : vector<2x128xf32>
    %192 = tpu.matmul %191, %3, %cst_57 {dimension_numbers = #tpu.dot_dimension_numbers<[1], [0], [0], [1], [0, 0, 1, 1], [], []>} : vector<2x16xf32>, vector<16x128xf32>, vector<2x128xf32> -> vector<2x128xf32>
    %193 = vector.extract_strided_slice %192 {offsets = [1, 0], sizes = [1, 128], strides = [1, 1]} : vector<2x128xf32> to vector<1x128xf32>
    %cst_58 = arith.constant 9.99999974E-6 : f32
    %194 = vector.broadcast %cst_58 : f32 to vector<1x128xf32>
    %195 = arith.addf %193, %194 : vector<1x128xf32>
    %196 = math.rsqrt %195 : vector<1x128xf32>
    %197 = vector.extract_strided_slice %192 {offsets = [0, 0], sizes = [1, 128], strides = [1, 1]} : vector<2x128xf32> to vector<1x128xf32>
    %198 = vector.broadcast %197 : vector<1x128xf32> to vector<256x128xf32>
    %199 = arith.subf %166, %198 : vector<256x128xf32>
    %200 = arith.mulf %196, %167 : vector<1x128xf32>
    %201 = vector.broadcast %200 : vector<1x128xf32> to vector<256x128xf32>
    %202 = arith.mulf %199, %201 : vector<256x128xf32>
    %203 = vector.broadcast %168 : vector<1x128xf32> to vector<256x128xf32>
    %204 = arith.addf %202, %203 : vector<256x128xf32>
    %c1_59 = arith.constant 1 : index
    %c0_60 = arith.constant 0 : index
    %c0_61 = arith.constant 0 : index
    %205 = vector.load %arg3[%c1_59, %c0_60, %c0_61] : memref<4x128x128xf32, #tpu.memory_space<vmem>>, vector<1x128x128xf32>
    %206 = vector.shape_cast %205 : vector<1x128x128xf32> to vector<128x128xf32>
    %cst_62 = arith.constant dense<0.000000e+00> : vector<256x128xf32>
    %207 = tpu.matmul %204, %206, %cst_62 {dimension_numbers = #tpu.dot_dimension_numbers<[1], [0], [0], [1], [0, 0, 1, 1], [], []>} : vector<256x128xf32>, vector<128x128xf32>, vector<256x128xf32> -> vector<256x128xf32>
    %c5 = arith.constant 5 : index
    %c0_63 = arith.constant 0 : index
    %208 = vector.load %arg2[%c5, %c0_63] : memref<22x128xf32, #tpu.memory_space<vmem>>, vector<1x128xf32>
    %209 = vector.broadcast %208 : vector<1x128xf32> to vector<256x128xf32>
    %210 = arith.addf %207, %209 : vector<256x128xf32>
    %cst_64 = arith.constant dense<0.000000e+00> : vector<128xf32>
    %211 = vector.multi_reduction <add>, %166, %cst_64 [0] : vector<256x128xf32> to vector<128xf32>
    %212 = vector.shape_cast %211 : vector<128xf32> to vector<1x128xf32>
    %cst_65 = arith.constant 2.560000e+02 : f32
    %213 = vector.broadcast %cst_65 : f32 to vector<1x128xf32>
    %214 = arith.divf %212, %213 : vector<1x128xf32>
    %c9 = arith.constant 9 : index
    %c0_66 = arith.constant 0 : index
    %215 = vector.load %arg2[%c9, %c0_66] : memref<22x128xf32, #tpu.memory_space<vmem>>, vector<1x128xf32>
    %c10 = arith.constant 10 : index
    %c0_67 = arith.constant 0 : index
    %216 = vector.load %arg2[%c10, %c0_67] : memref<22x128xf32, #tpu.memory_space<vmem>>, vector<1x128xf32>
    %cst_68 = arith.constant dense<0.000000e+00> : vector<128xf32>
    %217 = vector.multi_reduction <add>, %214, %cst_68 [0] : vector<1x128xf32> to vector<128xf32>
    %218 = vector.shape_cast %217 : vector<128xf32> to vector<1x128xf32>
    %219 = arith.mulf %214, %214 : vector<1x128xf32>
    %cst_69 = arith.constant dense<0.000000e+00> : vector<128xf32>
    %220 = vector.multi_reduction <add>, %219, %cst_69 [0] : vector<1x128xf32> to vector<128xf32>
    %221 = vector.shape_cast %220 : vector<128xf32> to vector<1x128xf32>
    %222 = vector.shape_cast %221 : vector<1x128xf32> to vector<1x128xf32>
    %223 = vector.broadcast %222 : vector<1x128xf32> to vector<2x128xf32>
    %224 = vector.shape_cast %218 : vector<1x128xf32> to vector<1x128xf32>
    %225 = vector.broadcast %224 : vector<1x128xf32> to vector<2x128xf32>
    %226 = arith.select %6, %223, %225 : vector<2x128xi1>, vector<2x128xf32>
    %cst_70 = arith.constant dense<0.000000e+00> : vector<2x16xf32>
    %227 = tpu.matmul %226, %2, %cst_70 {dimension_numbers = #tpu.dot_dimension_numbers<[1], [0], [0], [1], [0, 0, 1, 1], [], []>} : vector<2x128xf32>, vector<128x16xf32>, vector<2x16xf32> -> vector<2x16xf32>
    %cst_71 = arith.constant 1.250000e-01 : f32
    %228 = vector.broadcast %cst_71 : f32 to vector<2x16xf32>
    %229 = arith.mulf %227, %228 : vector<2x16xf32>
    %230 = vector.extract_strided_slice %229 {offsets = [0, 0], sizes = [1, 16], strides = [1, 1]} : vector<2x16xf32> to vector<1x16xf32>
    %231 = arith.mulf %230, %230 : vector<1x16xf32>
    %cst_72 = arith.constant 0.000000e+00 : f32
    %232 = vector.shape_cast %231 : vector<1x16xf32> to vector<1x16xf32>
    %233 = vector.broadcast %232 : vector<1x16xf32> to vector<2x16xf32>
    %234 = vector.broadcast %cst_72 : f32 to vector<2x16xf32>
    %235 = arith.select %9, %233, %234 : vector<2x16xi1>, vector<2x16xf32>
    %236 = arith.subf %229, %235 : vector<2x16xf32>
    %cst_73 = arith.constant 0.000000e+00 : f32
    %237 = vector.broadcast %cst_73 : f32 to vector<2x16xf32>
    %238 = arith.maximumf %236, %237 : vector<2x16xf32>
    %239 = arith.select %9, %238, %236 : vector<2x16xi1>, vector<2x16xf32>
    %cst_74 = arith.constant dense<0.000000e+00> : vector<2x128xf32>
    %240 = tpu.matmul %239, %3, %cst_74 {dimension_numbers = #tpu.dot_dimension_numbers<[1], [0], [0], [1], [0, 0, 1, 1], [], []>} : vector<2x16xf32>, vector<16x128xf32>, vector<2x128xf32> -> vector<2x128xf32>
    %241 = vector.extract_strided_slice %240 {offsets = [1, 0], sizes = [1, 128], strides = [1, 1]} : vector<2x128xf32> to vector<1x128xf32>
    %cst_75 = arith.constant 9.99999974E-6 : f32
    %242 = vector.broadcast %cst_75 : f32 to vector<1x128xf32>
    %243 = arith.addf %241, %242 : vector<1x128xf32>
    %244 = math.rsqrt %243 : vector<1x128xf32>
    %245 = vector.extract_strided_slice %240 {offsets = [0, 0], sizes = [1, 128], strides = [1, 1]} : vector<2x128xf32> to vector<1x128xf32>
    %246 = arith.subf %214, %245 : vector<1x128xf32>
    %247 = arith.mulf %244, %215 : vector<1x128xf32>
    %248 = arith.mulf %246, %247 : vector<1x128xf32>
    %249 = arith.addf %248, %216 : vector<1x128xf32>
    %c3_76 = arith.constant 3 : index
    %c0_77 = arith.constant 0 : index
    %c0_78 = arith.constant 0 : index
    %250 = vector.load %arg3[%c3_76, %c0_77, %c0_78] : memref<4x128x128xf32, #tpu.memory_space<vmem>>, vector<1x128x128xf32>
    %251 = vector.shape_cast %250 : vector<1x128x128xf32> to vector<128x128xf32>
    %cst_79 = arith.constant dense<0.000000e+00> : vector<1x128xf32>
    %252 = tpu.matmul %249, %251, %cst_79 {dimension_numbers = #tpu.dot_dimension_numbers<[1], [0], [0], [1], [0, 0, 1, 1], [], []>} : vector<1x128xf32>, vector<128x128xf32>, vector<1x128xf32> -> vector<1x128xf32>
    %c11 = arith.constant 11 : index
    %c0_80 = arith.constant 0 : index
    %253 = vector.load %arg2[%c11, %c0_80] : memref<22x128xf32, #tpu.memory_space<vmem>>, vector<1x128xf32>
    %254 = arith.addf %252, %253 : vector<1x128xf32>
    %255 = arith.negf %254 : vector<1x128xf32>
    %256 = math.exp %255 : vector<1x128xf32>
    %cst_81 = arith.constant 1.000000e+00 : f32
    %257 = vector.broadcast %cst_81 : f32 to vector<1x128xf32>
    %258 = arith.addf %257, %256 : vector<1x128xf32>
    %259 = arith.divf %257, %258 : vector<1x128xf32>
    %260 = vector.broadcast %259 : vector<1x128xf32> to vector<256x128xf32>
    %261 = arith.mulf %260, %210 : vector<256x128xf32>
    %262 = arith.addf %166, %261 : vector<256x128xf32>
    %263 = vector.shape_cast %262 : vector<256x128xf32> to vector<16x16x128xf32>
    %c0_82 = arith.constant 0 : index
    %c0_83 = arith.constant 0 : index
    %c0_84 = arith.constant 0 : index
    %c0_85 = arith.constant 0 : index
    %264 = vector.load %arg6[%c0_82, %c0_83, %c0_84, %c0_85] : memref<1x16x16x128xf32, #tpu.memory_space<vmem>>, vector<1x16x16x128xf32>
    %265 = vector.shape_cast %264 : vector<1x16x16x128xf32> to vector<16x16x128xf32>
    %266 = vector.shape_cast %263 : vector<16x16x128xf32> to vector<1x16x16x128xf32>
    tpu.vector_store %arg6[%c0_82, %c0_83, %c0_84, %c0_85], %266 {strides = array<i32>} : memref<1x16x16x128xf32, #tpu.memory_space<vmem>>, vector<1x16x16x128xf32>,
    return
  }
  func.func @transform_0(%arg0: i32) -> (i32, i32, i32, i32) {
    %c0_i32 = arith.constant 0 : i32
    %c0_i32_0 = arith.constant 0 : i32
    %c0_i32_1 = arith.constant 0 : i32
    %c0_i32_2 = arith.constant 0 : i32
    return %arg0, %c0_i32, %c0_i32_0, %c0_i32_1 : i32, i32, i32, i32
  }
  func.func @transform_1(%arg0: i32) -> (i32, i32) {
    %c0_i32 = arith.constant 0 : i32
    %c0_i32_0 = arith.constant 0 : i32
    %c0_i32_1 = arith.constant 0 : i32
    return %c0_i32, %c0_i32_0 : i32, i32
  }
  func.func @transform_2(%arg0: i32) -> (i32, i32, i32) {
    %c0_i32 = arith.constant 0 : i32
    %c0_i32_0 = arith.constant 0 : i32
    %c0_i32_1 = arith.constant 0 : i32
    %c0_i32_2 = arith.constant 0 : i32
    return %c0_i32, %c0_i32_0, %c0_i32_1 : i32, i32, i32
  }
  func.func @transform_3(%arg0: i32) -> (i32, i32) {
    %c0_i32 = arith.constant 0 : i32
    %c0_i32_0 = arith.constant 0 : i32
    %c0_i32_1 = arith.constant 0 : i32
    return %c0_i32, %c0_i32_0 : i32, i32
  }
  func.func @transform_4(%arg0: i32) -> (i32, i32) {
    %c0_i32 = arith.constant 0 : i32
    %c0_i32_0 = arith.constant 0 : i32
    %c0_i32_1 = arith.constant 0 : i32
    return %c0_i32, %c0_i32_0 : i32, i32
  }
  func.func @transform_5(%arg0: i32) -> (i32, i32, i32, i32) {
    %c0_i32 = arith.constant 0 : i32
    %c0_i32_0 = arith.constant 0 : i32
    %c0_i32_1 = arith.constant 0 : i32
    %c0_i32_2 = arith.constant 0 : i32
    return %arg0, %c0_i32, %c0_i32_0, %c0_i32_1 : i32, i32, i32, i32
  }
}

</mosaic_0001>

<bundles_post_ra>
// kernel: tpu_custom_call.1
= control target key start
LH: loop header
LB: loop body
LE: loop exit
PB: predicated region body
PF: predicated region fallthrough
CT: control target
= control target key end

     0   :  { %10 = vsyncpa [#allocation3], 0  ;;  %s10949_s0 = inlined_call_operand.vmem [shape: f32[2,18,18,128], index: 0, kind: input, shape index: {}]   ;;  %s10950_s1 = inlined_call_operand.vmem [shape: f32[22,128], index: 1, kind: input, shape index: {}]   ;;  %s10951_s2 = inlined_call_operand.vmem [shape: f32[4,128,128], index: 2, kind: input, shape index: {}]   ;;  %s10952_s3 = inlined_call_operand.vmem [shape: f32[128,16], index: 3, kind: input, shape index: {}]   ;;  %s10953_s4 = inlined_call_operand.vmem [shape: f32[16,128], index: 4, kind: input, shape index: {}]   ;;  %s10954_s5 = inlined_call_operand.hbm [shape: f32[2,16,16,128], index: 5, kind: output, shape index: {}]  }
   0x1   :  { %12 = vsyncpa [#allocation3 + $0x1], 0  ;;  %s5900_s18 = smov 0   ;;  %s5902_s19 = smov 0  }
   0x2   :  { %s5904_s20 = smov 0   ;;  %s5906_s21 = smov 0  }
   0x3 LB: > { %s5921_s22 = sadd.s32 4294967295, %s5863_s21   ;;  %s4710_s23 = sadd.s32 4294967294, %s5863_s21   ;;  %s5863_s21 = sphi %s5906_s21, %s12023_s21   ;;  %s5859_s20 = sphi %s5904_s20, %s12022_s20   ;;  %s5855_s19 = sphi %s5902_s19, %s12021_s19   ;;  %s5851_s18 = sphi %s5900_s18, %s12020_s18  }
   0x4   : > { %s5925_s24 = sadd.s32 1, %s5863_s21   ;;  %s135_s25 = sadd.s32 1, %s5859_s20 }
   0x5   : > { %s132_s26 = ssub.s32 %s5863_s21, %s5925_s24  ;;  %p145_p0 = scmp.ne.s32.totalorder %s5859_s20, %s5855_s19 }
   0x6   : > { %p133_p1 = scmp.eq.s32.totalorder %s132_s26, 0  ;;  %p146_p2 = scmp.eq.s32.totalorder %s5921_s22, 1 }
   0x7   : > { %p151_p3 = scmp.ne.s32.totalorder %s5855_s19, %s5851_s18  ;;  %p152_p4 = scmp.eq.s32.totalorder %s4710_s23, 1 }
   0x8   : > { %s5936_s27 = scalar_select %p133_p1, %s5859_s20, %s135_s25  }
   0x9   : > { %p5938_p5 = por %p146_p2, %p145_p0  ;;  %p5942_p6 = por %p152_p4, %p151_p3 }
   0xa   : > { %p4713_p7 = scmp.ge.s32.totalorder %s5863_s21, 1  ;;  %p190_p8 = scmp.lt.s32.totalorder %s5863_s21, 3 }
   0xc   : > { %p191_p9 = pnand %p4713_p7, %p190_p8 }
   0xe   : > { %194 = sbr.rel (%p191_p9) target bundleno = 1918 (0x77e), region = 40 }
  0x13   : > { %v5951_v0 = vld [vmem:[%s10952_s3 + $0x78] sm:$0xff]  ;;  %p218_p10 = scmp.lt.s32.totalorder %s5921_s22, 1  ;;  %v10955_v1 = vmov 0.0   ;;  %v5958_v2 = vld [vmem:[%s10952_s3 + $0x70] sm:$0xff]  ;;  %vm5866_vm0 = vmmov 0   ;;  %v5969_v3 = vld [vmem:[%s10952_s3 + $0x68] sm:$0xff] }
  0x14   : > { %11215 = vst [vmem:[#allocation5_spill] sm:$0xff] %v5951_v0  ;;  %5064 = vmatprep.subr.mxu0 %v10955_v1  ;;  %11216 = vst [vmem:[#allocation6_spill] sm:$0xff] %v5958_v2  ;;  %5096 = vmatprep.mubr.msk.f32.mxu0 %vm5866_vm0, %v10955_v1  ;;  %v5978_v4 = vld [vmem:[%s10952_s3 + $0x60] sm:$0xff]  ;;  %v5984_v5 = vld [vmem:[%s10952_s3 + $0x58] sm:$0xff]  ;;  %vm346_vm1 = vcmask 1046528   ;;  %vm1465_vm3 = vcmask 1045504  }
  0x15   : > { %5065 = vmatpush3.msra.mxu0 %v5951_v0  ;;  %s219_s9 = scalar_select %p218_p10, %s5921_s22, 1  ;;  %5099 = vmatprep.subr.mxu1 %v10955_v1  ;;  %11217 = vst [vmem:[#allocation7_spill] sm:$0xff] %v5969_v3  ;;  %11218 = vst [vmem:[#allocation8_spill] sm:$0xff] %v5978_v4  ;;  %v6006_v9 = vld [vmem:[%s10952_s3 + $0x50] sm:$0xff]  ;;  %v6022_v15 = vld [vmem:[%s10952_s3 + $0x48] sm:$0xff]  ;;  %vm648_vm4 = vcmask 130048  }
  0x16   : > { %5066 = vmatprep.subr.mxu0 %v10955_v1  ;;  %5103 = vmatprep.mubr.msk.f32.mxu1 %vm5866_vm0, %v10955_v1  ;;  %11219 = vst [vmem:[#allocation9_spill] sm:$0xff] %v5984_v5  ;;  %11222 = vst [vmem:[#allocation12_spill] sm:$0xff] %v6006_v9  ;;  %v6029_v16 = vld [vmem:[%s10952_s3 + $0x40] sm:$0xff]  ;;  %v6049_v23 = vld [vmem:[%s10952_s3 + $0x38] sm:$0xff]  ;;  %s215_s23 = sand.u32 1, %s5855_s19   ;;  %s4822_s6 = sshll.u32 %s5921_s22, 12 }
  0x17   : > { %5067 = vmatpush3.msra.mxu0 %v5958_v2  ;;  %s5507_s12 = smul.u32 432, %s219_s9  ;;  %11225 = vst [vmem:[#allocation15_spill] sm:$0xff] %v6022_v15  ;;  %11226 = vst [vmem:[#allocation16_spill] sm:$0xff] %v6029_v16  ;;  %v6056_v24 = vld [vmem:[%s10952_s3 + $0x30] sm:$0xff]  ;;  %v6074_v30 = vld [vmem:[%s10952_s3 + $0x28] sm:$0xff]  ;;  %s4714_s26 = sshll.u32 %s215_s23, 8 }
  0x18   : > { %5068 = vmatprep.subr.mxu0 %v10955_v1  ;;  %11230 = vst [vmem:[#allocation20_spill] sm:$0xff] %v6049_v23  ;;  %11231 = vst [vmem:[#allocation21_spill] sm:$0xff] %v6056_v24  ;;  %v6081_v31 = vld [vmem:[%s10952_s3 + $0x20] sm:$0xff]  ;;  %v6097_v37 = vld [vmem:[%s10952_s3 + $0x18] sm:$0xff]  ;;  %s10802_s30 = scalar_lea.vmem [#allocation2], %s4714_s26  ;;  %s10900_s9 = scalar_lea.hbm %s10954_s5, %s4822_s6 }
  0x19   : > { %5069 = vmatpush3.msra.mxu0 %v5969_v3  ;;  %s5989_s25 = scalar_lea.vmem %s10949_s0, %s5507_s12  ;;  %11235 = vst [vmem:[#allocation25_spill] sm:$0xff] %v6074_v30  ;;  %11236 = vst [vmem:[#allocation26_spill] sm:$0xff] %v6081_v31  ;;  %v6110_v40 = vld [vmem:[%s10952_s3 + $0x10] sm:$0xff]  ;;  %v6125_v45 = vld [vmem:[%s10952_s3 + $0x8] sm:$0xff]  ;;  %s10909_s22 = scalar_lea.sflag [#allocation3], %s215_s23 }
  0x1a   : > { %5070 = vmatprep.subr.mxu0 %v10955_v1  ;;  %v5993_v6 = vld [vmem:[%s5989_s25 + $0x18] sm:$0xff]  ;;  %v5996_v7 = vld [vmem:[%s5989_s25 + $0x20] sm:$0xff]  ;;  %v5999_v8 = vld [vmem:[%s5989_s25 + $0x28] sm:$0x3]  ;;  %11239 = vst [vmem:[#allocation29_spill] sm:$0xff] %v6097_v37  ;;  %s5867_s11 = smov [#allocation2]  }
  0x1b   : > { %11220 = vst [vmem:[#allocation10_spill] sm:$0xff] %v5993_v6  ;;  %11221 = vst [vmem:[#allocation11_spill] sm:$0xff] %v5996_v7  ;;  %5071 = vmatpush3.msra.mxu0 %v5978_v4  ;;  %v347_v10 = vrot.slane %v5993_v6, 1  ;;  %v348_v11 = vrot.slane %v5996_v7, 1  ;;  %v350_v12 = vrot.slane %v5999_v8, 1  ;;  %v6013_v13 = vld [vmem:[%s5989_s25 + $0x30] sm:$0xff] }
  0x1c   : > { %5072 = vmatprep.subr.mxu0 %v10955_v1  ;;  %11223 = vst [vmem:[#allocation13_spill] sm:$0xff] %v6013_v13  ;;  %v6016_v14 = vld [vmem:[%s5989_s25 + $0x38] sm:$0xff]  ;;  %v352_v19 = vrot.slane %v6013_v13, 1  ;;  %v6041_v21 = vld [vmem:[%s5989_s25 + $0x40] sm:$0x3]  ;;  %v6064_v27 = vld [vmem:[%s5989_s25 + $0x48] sm:$0xff] }
  0x1d   : > { %5073 = vmatpush3.msra.mxu0 %v5984_v5  ;;  %11224 = vst [vmem:[#allocation14_spill] sm:$0xff] %v6016_v14  ;;  %v6032_v17 = vsel %vm346_vm1, %v347_v10, %v348_v11  ;;  %v6035_v18 = vsel %vm346_vm1, %v348_v11, %v350_v12  ;;  %v353_v20 = vrot.slane %v6016_v14, 1  ;;  %11229 = vst [vmem:[#allocation19_spill] sm:$0xff] %v6041_v21  ;;  %v355_v26 = vrot.slane %v6041_v21, 1  ;;  %v6067_v28 = vld [vmem:[%s5989_s25 + $0x50] sm:$0xff]  ;;  %v6101_v38 = vld [vmem:[%s5989_s25 + $0x60] sm:$0xff] }
  0x1e   : > { %5074 = vmatprep.subr.mxu0 %v10955_v1  ;;  %11227 = vst [vmem:[#allocation17_spill] sm:$0xff] %v6032_v17  ;;  %11228 = vst [vmem:[#allocation18_spill] sm:$0xff] %v6035_v18  ;;  %v461_v22 = vadd.f32 %v6035_v18, %v6032_v17  ;;  %v357_v33 = vrot.slane %v6064_v27, 1  ;;  %v358_v34 = vrot.slane %v6067_v28, 1  ;;  %v6090_v35 = vld [vmem:[%s5989_s25 + $0x58] sm:$0x3]  ;;  %v498_v11 = vmul.f32 %v6032_v17, %v6032_v17 }
  0x1f   : > { %5075 = vmatpush3.msra.mxu0 %v6006_v9  ;;  %v6059_v25 = vsel %vm346_vm1, %v352_v19, %v353_v20  ;;  %11233 = vst [vmem:[#allocation23_spill] sm:$0xff] %v6064_v27  ;;  %11234 = vst [vmem:[#allocation24_spill] sm:$0xff] %v6067_v28  ;;  %v6084_v32 = vsel %vm346_vm1, %v353_v20, %v355_v26  ;;  %v6104_v39 = vld [vmem:[%s5989_s25 + $0x68] sm:$0xff]  ;;  %v360_v42 = vrot.slane %v6090_v35, 1  ;;  %v6118_v43 = vld [vmem:[%s5989_s25 + $0x70] sm:$0x3] }
  0x20   : > { %5076 = vmatprep.subr.mxu0 %v10955_v1  ;;  %11232 = vst [vmem:[#allocation22_spill] sm:$0xff] %v6059_v25  ;;  %v462_v29 = vadd.f32 %v461_v22, %v6059_v25  ;;  %11237 = vst [vmem:[#allocation27_spill] sm:$0xff] %v6084_v32  ;;  %v6113_v41 = vsel %vm346_vm1, %v357_v33, %v358_v34  ;;  %v362_v46 = vrot.slane %v6101_v38, 1  ;;  %v363_v47 = vrot.slane %v6104_v39, 1  ;;  %v6131_v48 = vld [vmem:[%s5989_s25 + $0x78] sm:$0xff]  ;;  %v6134_v49 = vld [vmem:[%s5989_s25 + $0x80] sm:$0xff] }
  0x21   : > { %5077 = vmatpush3.msra.mxu0 %v6022_v15  ;;  %11238 = vst [vmem:[#allocation28_spill] sm:$0xff] %v6090_v35  ;;  %11240 = vst [vmem:[#allocation30_spill] sm:$0xff] %v6101_v38  ;;  %v6140_v50 = vld [vmem:[%s10952_s3] sm:$0xff]  ;;  %v6143_v51 = vsel %vm346_vm1, %v358_v34, %v360_v42  ;;  %v365_v52 = vrot.slane %v6118_v43, 1  ;;  %v6148_v53 = vld [vmem:[%s5989_s25 + $0x88] sm:$0x3]  ;;  %v499_v26 = vmul.f32 %v6035_v18, %v6035_v18 }
  0x22   : > { %5078 = vmatprep.subr.mxu0 %v10955_v1  ;;  %v463_v36 = vadd.f32 %v462_v29, %v6084_v32  ;;  %11241 = vst [vmem:[#allocation31_spill] sm:$0xff] %v6104_v39  ;;  %11242 = vst [vmem:[#allocation32_spill] sm:$0xff] %v6110_v40  ;;  %v6153_v55 = vsel %vm346_vm1, %v362_v46, %v363_v47  ;;  %v367_v56 = vrot.slane %v6131_v48, 1  ;;  %v368_v57 = vrot.slane %v6134_v49, 1  ;;  %v6159_v58 = vld [vmem:[%s5989_s25 + $0x90] sm:$0xff]  ;;  %v6162_v59 = vld [vmem:[%s5989_s25 + $0x98] sm:$0xff] }
  0x23   : > { %5079 = vmatpush3.msra.mxu0 %v6029_v16  ;;  %11243 = vst [vmem:[#allocation33_spill] sm:$0xff] %v6113_v41  ;;  %11244 = vst [vmem:[#allocation34_spill] sm:$0xff] %v6118_v43  ;;  %v6167_v61 = vsel %vm346_vm1, %v363_v47, %v365_v52  ;;  %v370_v62 = vrot.slane %v6148_v53, 1  ;;  %v6171_v63 = vld [vmem:[%s5989_s25 + $0xa0] sm:$0x3]  ;;  %v6177_v12 = vld [vmem:[%s5989_s25 + $0xa8] sm:$0xff]  ;;  %v500_v42 = vmul.f32 %v6059_v25, %v6059_v25 }
  0x24   : > { %5080 = vmatprep.subr.mxu0 %v10955_v1  ;;  %v464_v44 = vadd.f32 %v463_v36, %v6113_v41  ;;  %11245 = vst [vmem:[#allocation35_spill] sm:$0xff] %v6125_v45  ;;  %11246 = vst [vmem:[#allocation36_spill] sm:$0xff] %v6131_v48  ;;  %v6180_v19 = vsel %vm346_vm1, %v367_v56, %v368_v57  ;;  %v372_v20 = vrot.slane %v6159_v58, 1  ;;  %v373_v22 = vrot.slane %v6162_v59, 1  ;;  %v6187_v29 = vld [vmem:[%s5989_s25 + $0xb0] sm:$0xff]  ;;  %v6202_v52 = vld [vmem:[%s5989_s25 + $0xc0] sm:$0xff] }
  0x25   : > { %5081 = vmatpush3.msra.mxu0 %v6049_v23  ;;  %11247 = vst [vmem:[#allocation37_spill] sm:$0xff] %v6134_v49  ;;  %11248 = vst [vmem:[#allocation38_spill] sm:$0xff] %v6140_v50  ;;  %v6191_v34 = vsel %vm346_vm1, %v368_v57, %v370_v62  ;;  %v375_v36 = vrot.slane %v6171_v63, 1  ;;  %v377_v46 = vrot.slane %v6177_v12, 1  ;;  %v378_v56 = vrot.slane %v6187_v29, 1  ;;  %v6211_v62 = vld [vmem:[%s5989_s25 + $0xc8] sm:$0xff] }
  0x26   : > { %5082 = vmatprep.subr.mxu0 %v10955_v1  ;;  %11249 = vst [vmem:[#allocation39_spill] sm:$0xff] %v6143_v51  ;;  %11250 = vst [vmem:[#allocation40_spill] sm:$0xff] %v6148_v53  ;;  %v465_v54 = vadd.f32 %v464_v44, %v6143_v51  ;;  %v6197_v44 = vld [vmem:[%s5989_s25 + $0xb8] sm:$0x3]  ;;  %v501_v57 = vmul.f32 %v6084_v32, %v6084_v32  ;;  %v6221_v18 = vld [vmem:[%s5989_s25 + $0xd0] sm:$0x3] }
  0x27   : > { %5083 = vmatpush3.msra.mxu0 %v6056_v24  ;;  %11251 = vst [vmem:[#allocation41_spill] sm:$0xff] %v6153_v55  ;;  %11252 = vst [vmem:[#allocation42_spill] sm:$0xff] %v6159_v58  ;;  %v382_v32 = vrot.slane %v6202_v52, 1  ;;  %v6293_v23 = vld [vmem:[%s5989_s25 + $0x118] sm:$0x3]  ;;  %s5807_s12 = sshll.u32 %s5867_s11, 4  ;;  %s5808_s12 = int_to_ptr.vmem [resolvable:$false] %s5807_s12 }
  0x28   : > { %5084 = vmatprep.subr.mxu0 %v10955_v1  ;;  %11253 = vst [vmem:[#allocation43_spill] sm:$0xff] %v6162_v59  ;;  %v466_v60 = vadd.f32 %v465_v54, %v6153_v55  ;;  %11254 = vst [vmem:[#allocation44_spill] sm:$0xff] %v6167_v61  ;;  %v6205_v54 = vsel %vm346_vm1, %v372_v20, %v373_v22  ;;  %v502_v20 = vmul.f32 %v6113_v41, %v6113_v41  ;;  %v6317_v9 = vld [vmem:[%s5989_s25 + $0x130] sm:$0x3]  ;;  %v6341_v3 = vld [vmem:[%s5989_s25 + $0x148] sm:$0x3] }
  0x29   : > { %5085 = vmatpush3.msra.mxu0 %v6074_v30  ;;  %11255 = vst [vmem:[#allocation45_spill] sm:$0xff] %v6171_v63  ;;  %11256 = vst [vmem:[#allocation46_spill] sm:$0xff] %v6177_v12  ;;  %v6359_v2 = vld [vmem:[%s5989_s25 + $0x160] sm:$0x3]  ;;  %s5809_s13 = scalar_lea.vmem %s5808_s12, 8192 }
  0x2a   : > { %5086 = vmatprep.subr.mxu0 %v10955_v1  ;;  %v467_v10 = vadd.f32 %v466_v60, %v6167_v61  ;;  %11257 = vst [vmem:[#allocation47_spill] sm:$0xff] %v6180_v19  ;;  %11258 = vst [vmem:[#allocation48_spill] sm:$0xff] %v6187_v29  ;;  %v530_v60 = vadd.f32 %v499_v26, %v498_v11  ;;  %v6226_v26 = vld [vmem:[%s5989_s25 + $0xd8] sm:$0xff] }
  0x2b   : > { %5087 = vmatpush3.msra.mxu0 %v6081_v31  ;;  %11259 = vst [vmem:[#allocation49_spill] sm:$0xff] %v6191_v34  ;;  %11260 = vst [vmem:[#allocation50_spill] sm:$0xff] %v6197_v44  ;;  %v6269_v31 = vld [vmem:[%s5989_s25 + $0x100] sm:$0x3] }
  0x2c   : > { %5088 = vmatprep.subr.mxu0 %v10955_v1  ;;  %v468_v33 = vadd.f32 %v467_v10, %v6180_v19  ;;  %11261 = vst [vmem:[#allocation51_spill] sm:$0xff] %v6202_v52  ;;  %11262 = vst [vmem:[#allocation52_spill] sm:$0xff] %v6205_v54  ;;  %v531_v25 = vadd.f32 %v530_v60, %v500_v42  ;;  %v6235_v42 = vld [vmem:[%s5989_s25 + $0xe0] sm:$0xff] }
  0x2d   : > { %5089 = vmatpush3.msra.mxu0 %v6097_v37  ;;  %11263 = vst [vmem:[#allocation53_spill] sm:$0xff] %v6211_v62  ;;  %11265 = vst [vmem:[#allocation55_spill] sm:$0xff] %v6221_v18 }
  0x2e   : > { %5090 = vmatprep.subr.mxu0 %v10955_v1  ;;  %v469_v47 = vadd.f32 %v468_v33, %v6191_v34  ;;  %v380_v33 = vrot.slane %v6197_v44, 1  ;;  %11266 = vst [vmem:[#allocation56_spill] sm:$0xff] %v6226_v26  ;;  %v532_v41 = vadd.f32 %v531_v25, %v501_v57  ;;  %11268 = vst [vmem:[#allocation58_spill] sm:$0xff] %v6235_v42  ;;  %v6250_v57 = vld [vmem:[%s5989_s25 + $0xf0] sm:$0xff] }
  0x2f   : > { %5091 = vmatpush3.msra.mxu0 %v6110_v40  ;;  %11271 = vst [vmem:[#allocation61_spill] sm:$0xff] %v6250_v57  ;;  %11275 = vst [vmem:[#allocation65_spill] sm:$0xff] %v6269_v31 }
  0x30   : > { %5092 = vmatprep.subr.mxu0 %v10955_v1  ;;  %v470_v10 = vadd.f32 %v469_v47, %v6205_v54  ;;  %v6229_v47 = vsel %vm346_vm1, %v377_v46, %v378_v56  ;;  %v6239_v17 = vsel %vm346_vm1, %v378_v56, %v380_v33  ;;  %v504_v46 = vmul.f32 %v6153_v55, %v6153_v55 }
  0x31   : > { %5093 = vmatpush3.msra.mxu0 %v6125_v45  ;;  %11267 = vst [vmem:[#allocation57_spill] sm:$0xff] %v6229_v47  ;;  %11269 = vst [vmem:[#allocation59_spill] sm:$0xff] %v6239_v17  ;;  %v6245_v45 = vld [vmem:[%s5989_s25 + $0xe8] sm:$0x3]  ;;  %v388_v56 = vrot.slane %v6235_v42, 1  ;;  %v505_v33 = vmul.f32 %v6167_v61, %v6167_v61  ;;  %v392_v61 = vrot.slane %v6250_v57, 1 }
  0x32   : > { %5094 = vmatprep.subr.mxu0 %v10955_v1  ;;  %11270 = vst [vmem:[#allocation60_spill] sm:$0xff] %v6245_v45  ;;  %11280 = vst [vmem:[#allocation70_spill] sm:$0xff] %v6293_v23 }
  0x33   : > { %5095 = vmatpush3.msra.mxu0 %v6140_v50  ;;  %v533_v50 = vadd.f32 %v532_v41, %v502_v20  ;;  %v6259_v41 = vld [vmem:[%s5989_s25 + $0xf8] sm:$0xff]  ;;  %11285 = vst [vmem:[#allocation75_spill] sm:$0xff] %v6317_v9  ;;  %11290 = vst [vmem:[#allocation80_spill] sm:$0xff] %v6341_v3 }
  0x34   : > { %5186 = vmatprep.subr.mxu0 %v10955_v1  ;;  %v6215_v1 = vsel %vm346_vm1, %v373_v22, %v375_v36  ;;  %v383_v22 = vrot.slane %v6211_v62, 1  ;;  %v503_v36 = vmul.f32 %v6143_v51, %v6143_v51  ;;  %v387_v51 = vrot.slane %v6226_v26, 1  ;;  %11273 = vst [vmem:[#allocation63_spill] sm:$0xff] %v6259_v41  ;;  %11294 = vst [vmem:[#allocation84_spill] sm:$0xff] %v6359_v2 }
  0x35   : > { %11264 = vst [vmem:[#allocation54_spill] sm:$0xff] %v6215_v1  ;;  %v471_v11 = vadd.f32 %v470_v10, %v6215_v1  ;;  %v385_v10 = vrot.slane %v6221_v18, 1  ;;  %v6395_v18 = vld [vmem:[%s5989_s25 + $0x188] sm:$0xff] }
  0x36   : > { %v534_v55 = vadd.f32 %v533_v50, %v503_v36  ;;  %v6274_v36 = vld [vmem:[%s5989_s25 + $0x108] sm:$0xff]  ;;  %11302 = vst [vmem:[#allocation92_spill] sm:$0xff] %v6395_v18 }
  0x37   : > { %v472_v60 = vadd.f32 %v471_v11, %v6229_v47  ;;  %v6253_v11 = vsel %vm346_vm1, %v382_v32, %v383_v22  ;;  %v6263_v40 = vsel %vm346_vm1, %v383_v22, %v385_v10  ;;  %v506_v32 = vmul.f32 %v6180_v19, %v6180_v19  ;;  %11276 = vst [vmem:[#allocation66_spill] sm:$0xff] %v6274_v36 }
  0x38   : > { %11272 = vst [vmem:[#allocation62_spill] sm:$0xff] %v6253_v11  ;;  %11274 = vst [vmem:[#allocation64_spill] sm:$0xff] %v6263_v40  ;;  %v535_v37 = vadd.f32 %v534_v55, %v504_v46  ;;  %v393_v22 = vrot.slane %v6259_v41, 1  ;;  %v507_v10 = vmul.f32 %v6191_v34, %v6191_v34  ;;  %v6283_v55 = vld [vmem:[%s5989_s25 + $0x110] sm:$0xff]  ;;  %v397_v34 = vrot.slane %v6274_v36, 1 }
  0x39   : > { %v473_v25 = vadd.f32 %v472_v60, %v6239_v17  ;;  %v390_v60 = vrot.slane %v6245_v45, 1  ;;  %11278 = vst [vmem:[#allocation68_spill] sm:$0xff] %v6283_v55 }
  0x3a   : > { %v536_v19 = vadd.f32 %v535_v37, %v505_v33  ;;  %v6298_v33 = vld [vmem:[%s5989_s25 + $0x120] sm:$0xff] }
  0x3b   : > { %v474_v20 = vadd.f32 %v473_v25, %v6253_v11  ;;  %v6277_v25 = vsel %vm346_vm1, %v387_v51, %v388_v56  ;;  %v6287_v30 = vsel %vm346_vm1, %v388_v56, %v390_v60  ;;  %v508_v51 = vmul.f32 %v6205_v54, %v6205_v54  ;;  %11281 = vst [vmem:[#allocation71_spill] sm:$0xff] %v6298_v33 }
  0x3c   : > { %11277 = vst [vmem:[#allocation67_spill] sm:$0xff] %v6277_v25  ;;  %11279 = vst [vmem:[#allocation69_spill] sm:$0xff] %v6287_v30  ;;  %v537_v24 = vadd.f32 %v536_v19, %v506_v32  ;;  %v398_v56 = vrot.slane %v6283_v55, 1  ;;  %v509_v60 = vmul.f32 %v6215_v1, %v6215_v1  ;;  %v6307_v19 = vld [vmem:[%s5989_s25 + $0x128] sm:$0xff]  ;;  %v402_v1 = vrot.slane %v6298_v33, 1 }
  0x3d   : > { %v475_v50 = vadd.f32 %v474_v20, %v6263_v40  ;;  %v395_v20 = vrot.slane %v6269_v31, 1  ;;  %11283 = vst [vmem:[#allocation73_spill] sm:$0xff] %v6307_v19  ;;  %v514_v0 = vmul.f32 %v6277_v25, %v6277_v25 }
  0x3e   : > { %v538_v54 = vadd.f32 %v537_v24, %v507_v10  ;;  %v6322_v10 = vld [vmem:[%s5989_s25 + $0x138] sm:$0xff] }
  0x3f   : > { %v476_v46 = vadd.f32 %v475_v50, %v6277_v25  ;;  %v6301_v50 = vsel %vm346_vm1, %v392_v61, %v393_v22  ;;  %v6311_v16 = vsel %vm346_vm1, %v393_v22, %v395_v20  ;;  %v510_v61 = vmul.f32 %v6229_v47, %v6229_v47  ;;  %11286 = vst [vmem:[#allocation76_spill] sm:$0xff] %v6322_v10  ;;  %v6384_v25 = vld [vmem:[%s5989_s25 + $0x178] sm:$0x3] }
  0x40   : > { %11282 = vst [vmem:[#allocation72_spill] sm:$0xff] %v6301_v50  ;;  %11284 = vst [vmem:[#allocation74_spill] sm:$0xff] %v6311_v16  ;;  %v539_v15 = vadd.f32 %v538_v54, %v508_v51  ;;  %v403_v22 = vrot.slane %v6307_v19, 1  ;;  %v511_v20 = vmul.f32 %v6239_v17, %v6239_v17  ;;  %v6331_v54 = vld [vmem:[%s5989_s25 + $0x140] sm:$0xff]  ;;  %v407_v17 = vrot.slane %v6322_v10, 1 }
  0x41   : > { %v477_v37 = vadd.f32 %v476_v46, %v6287_v30  ;;  %v400_v46 = vrot.slane %v6293_v23, 1  ;;  %11288 = vst [vmem:[#allocation78_spill] sm:$0xff] %v6331_v54  ;;  %v6379_v23 = vld [vmem:[%s5989_s25 + $0x170] sm:$0xff]  ;;  %11299 = vst [vmem:[#allocation89_spill] sm:$0xff] %v6384_v25 }
  0x42   : > { %v540_v47 = vadd.f32 %v539_v15, %v509_v60  ;;  %v6346_v60 = vld [vmem:[%s5989_s25 + $0x150] sm:$0xff]  ;;  %11298 = vst [vmem:[#allocation88_spill] sm:$0xff] %v6379_v23  ;;  %v418_v44 = vrot.slane %v6379_v23, 1 }
  0x43   : > { %v478_v32 = vadd.f32 %v477_v37, %v6301_v50  ;;  %v6325_v37 = vsel %vm346_vm1, %v397_v34, %v398_v56  ;;  %v6335_v5 = vsel %vm346_vm1, %v398_v56, %v400_v46  ;;  %v512_v34 = vmul.f32 %v6253_v11, %v6253_v11  ;;  %11291 = vst [vmem:[#allocation81_spill] sm:$0xff] %v6346_v60 }
  0x44   : > { %11287 = vst [vmem:[#allocation77_spill] sm:$0xff] %v6325_v37  ;;  %11289 = vst [vmem:[#allocation79_spill] sm:$0xff] %v6335_v5  ;;  %v541_v4 = vadd.f32 %v540_v47, %v510_v61  ;;  %v408_v56 = vrot.slane %v6331_v54, 1  ;;  %v513_v46 = vmul.f32 %v6263_v40, %v6263_v40  ;;  %v6355_v47 = vld [vmem:[%s5989_s25 + $0x158] sm:$0xff] }
  0x45   : > { %v479_v24 = vadd.f32 %v478_v32, %v6311_v16  ;;  %v405_v32 = vrot.slane %v6317_v9, 1  ;;  %11293 = vst [vmem:[#allocation83_spill] sm:$0xff] %v6355_v47 }
  0x46   : > { %v542_v11 = vadd.f32 %v541_v4, %v511_v20  ;;  %v412_v4 = vrot.slane %v6346_v60, 1  ;;  %v6373_v40 = vsel %vm346_vm1, %v407_v17, %v408_v56  ;;  %v516_v17 = vmul.f32 %v6301_v50, %v6301_v50 }
  0x47   : > { %v480_v51 = vadd.f32 %v479_v24, %v6325_v37  ;;  %v6349_v24 = vsel %vm346_vm1, %v402_v1, %v403_v22  ;;  %v410_v1 = vrot.slane %v6341_v3, 1  ;;  %11297 = vst [vmem:[#allocation87_spill] sm:$0xff] %v6373_v40 }
  0x48   : > { %11292 = vst [vmem:[#allocation82_spill] sm:$0xff] %v6349_v24  ;;  %v543_v9 = vadd.f32 %v542_v11, %v512_v34  ;;  %v415_v11 = vrot.slane %v6359_v2, 1 }
  0x49   : > { %v481_v15 = vadd.f32 %v480_v51, %v6335_v5  ;;  %v6362_v51 = vsel %vm346_vm1, %v403_v22, %v405_v32  ;;  %v413_v22 = vrot.slane %v6355_v47, 1  ;;  %v515_v32 = vmul.f32 %v6287_v30, %v6287_v30 }
  0x4a   : > { %11295 = vst [vmem:[#allocation85_spill] sm:$0xff] %v6362_v51  ;;  %v544_v3 = vadd.f32 %v543_v9, %v513_v46  ;;  %v6390_v31 = vsel %vm346_vm1, %v408_v56, %v410_v1  ;;  %v273_v9 = vld [vmem:[%s5989_s25 + $0x190] sm:$0x3]  ;;  %v295_v46 = vlaneseq  ;;  %v517_v56 = vmul.f32 %v6311_v16, %v6311_v16 }
  0x4b   : > { %v482_v61 = vadd.f32 %v481_v15, %v6349_v24  ;;  %v6370_v15 = vld [vmem:[%s5989_s25 + $0x168] sm:$0xff]  ;;  %11301 = vst [vmem:[#allocation91_spill] sm:$0xff] %v6390_v31  ;;  %v6407_v50 = vsel %vm346_vm1, %v413_v22, %v415_v11  ;;  %v425_v53 = vrot.slane %v273_v9, 1 }
  0x4c   : > { %11296 = vst [vmem:[#allocation86_spill] sm:$0xff] %v6370_v15  ;;  %v545_v45 = vadd.f32 %v544_v3, %v514_v0  ;;  %v417_v30 = vrot.slane %v6370_v15, 1  ;;  %11304 = vst [vmem:[#allocation94_spill] sm:$0xff] %v6407_v50  ;;  %v420_v0 = vrot.slane %v6384_v25, 1 }
  0x4d   : > { %v483_v20 = vadd.f32 %v482_v61, %v6362_v51  ;;  %v6387_v61 = vld [vmem:[%s5989_s25 + $0x180] sm:$0xff] }
  0x4e   : > { %11300 = vst [vmem:[#allocation90_spill] sm:$0xff] %v6387_v61  ;;  %v546_v1 = vadd.f32 %v545_v45, %v515_v32  ;;  %v422_v3 = vrot.slane %v6387_v61, 1  ;;  %v6418_v45 = vld [vmem:[%s10950_s1 + $0xe] ss:$0 sm:$0xff]  ;;  %v6425_v32 = vshrl.u32 %v295_v46, 7 }
  0x4f   : > { %v484_v34 = vadd.f32 %v483_v20, %v6373_v40  ;;  %v6401_v20 = vsel %vm346_vm1, %v412_v4, %v413_v22  ;;  %v518_v4 = vmul.f32 %v6325_v37, %v6325_v37  ;;  %v6423_v22 = vld [vmem:[%s10950_s1 + $0x11] ss:$0 sm:$0xff]  ;;  %v6430_v11 = vmul.f32 %v6418_v45, %v5999_v8 }
  0x50   : > { %11303 = vst [vmem:[#allocation93_spill] sm:$0xff] %v6401_v20  ;;  %v547_v43 = vadd.f32 %v546_v1, %v516_v17  ;;  %11305 = vst [vmem:[#allocation95_spill] sm:$0xff] %v6423_v22  ;;  %v6435_v17 = vld [vmem:[%s10950_s1 + $0xf] ss:$0 sm:$0xff]  ;;  %v6438_v1 = vsel %vm346_vm1, %v417_v30, %v418_v44  ;;  %v519_v37 = vmul.f32 %v6335_v5, %v6335_v5  ;;  %vm297_vm2 = vcmp.eq.s32.totalorder %v6425_v32, 1 }
  0x51   : > { %v485_v2 = vadd.f32 %v484_v34, %v6390_v31  ;;  %v423_v34 = vrot.slane %v6395_v18, 1  ;;  %11306 = vst [vmem:[#allocation96_spill] sm:$0xff] %v6425_v32  ;;  %11307 = vst [vmem:[#allocation97_spill] sm:$0xff] %v6435_v17  ;;  %v6444_v46 = vmul.f32 %v6435_v17, %v5999_v8  ;;  %v6452_v18 = vsel %vm346_vm1, %v418_v44, %v420_v0 }
  0x52   : > { %11308 = vst [vmem:[#allocation98_spill] sm:$0xff] %v6438_v1  ;;  %v548_v16 = vadd.f32 %v547_v43, %v517_v56  ;;  %11310 = vst [vmem:[#allocation100_spill] sm:$0xff] %v6452_v18  ;;  %v6457_v30 = vmul.f32 %v6423_v22, %v5999_v8  ;;  %v520_v44 = vmul.f32 %v6349_v24, %v6349_v24 }
  0x53   : > { %v486_v63 = vadd.f32 %v485_v2, %v6401_v20  ;;  %11309 = vst [vmem:[#allocation99_spill] sm:$0xff] %v6444_v46  ;;  %v6464_v56 = vsel %vm346_vm1, %v422_v3, %v423_v34  ;;  %v6467_v5 = vsel %vm346_vm1, %v423_v34, %v425_v53  ;;  %v521_v8 = vmul.f32 %v6362_v51, %v6362_v51 }
  0x54   : > { %11311 = vst [vmem:[#allocation101_spill] sm:$0xff] %v6457_v30  ;;  %11313 = vst [vmem:[#allocation103_spill] sm:$0xff] %v6464_v56  ;;  %v549_v0 = vadd.f32 %v548_v16, %v518_v4  ;;  %v522_v17 = vmul.f32 %v6373_v40, %v6373_v40  ;;  %v523_v53 = vmul.f32 %v6390_v31, %v6390_v31 }
  0x55   : > { %v487_v2 = vadd.f32 %v486_v63, %v6407_v50  ;;  %v6449_v63 = vld [vmem:[%s10950_s1 + $0xd] ss:$0 sm:$0xff]  ;;  %11314 = vst [vmem:[#allocation104_spill] sm:$0xff] %v6467_v5  ;;  %v524_v16 = vmul.f32 %v6401_v20, %v6401_v20  ;;  %v526_v4 = vmul.f32 %v6438_v1, %v6438_v1  ;;  %v527_v40 = vmul.f32 %v6452_v18, %v6452_v18 }
  0x56   : > { %v6461_v43 = vmul.f32 %v6449_v63, %v5993_v6  ;;  %v6478_v3 = vmul.f32 %v6449_v63, %v5996_v7  ;;  %v550_v34 = vadd.f32 %v549_v0, %v519_v37  ;;  %v6492_v51 = vmul.f32 %v6464_v56, %v6464_v56  ;;  %v6502_v0 = vld [vmem:[%s5989_s25] sm:$0xff] }
  0x57   : > { %v488_v61 = vadd.f32 %v487_v2, %v6438_v1  ;;  %v6496_v31 = vmul.f32 %v6467_v5, %v6467_v5  ;;  %11316 = vst [vmem:[#allocation106_spill] sm:$0xff] %v6502_v0  ;;  %v6505_v1 = vld [vmem:[%s5989_s25 + $0x8] sm:$0xff]  ;;  %v6525_v37 = vmul.f32 %v6449_v63, %v6016_v14  ;;  %v6554_v46 = vmul.f32 %v6449_v63, %v6159_v58 }
  0x58   : > { %11312 = vst [vmem:[#allocation102_spill] sm:$0xff] %v6461_v43  ;;  %11315 = vst [vmem:[#allocation105_spill] sm:$0xff] %v6478_v3  ;;  %v551_v24 = vadd.f32 %v550_v34, %v520_v44  ;;  %v6513_v43 = vmul.f32 %v6449_v63, %v6502_v0  ;;  %v6517_v44 = vmul.f32 %v6449_v63, %v6505_v1 }
  0x59   : > { %v489_v2 = vadd.f32 %v488_v61, %v6452_v18  ;;  %v525_v61 = vmul.f32 %v6407_v50, %v6407_v50  ;;  %11317 = vst [vmem:[#allocation107_spill] sm:$0xff] %v6505_v1  ;;  %v6508_v18 = vmul.f32 %v6423_v22, %v273_v9  ;;  %v6521_v34 = vmul.f32 %v6449_v63, %v6013_v13 }
  0x5a   : > { %11319 = vst [vmem:[#allocation109_spill] sm:$0xff] %v6517_v44  ;;  %11321 = vst [vmem:[#allocation111_spill] sm:$0xff] %v6525_v37  ;;  %v6529_v9 = vmul.f32 %v6449_v63, %v6064_v27  ;;  %v6533_v3 = vmul.f32 %v6449_v63, %v6067_v28  ;;  %v6537_v50 = vmul.f32 %v6449_v63, %v6101_v38 }
  0x5b   : > { %v490_v20 = vadd.f32 %v489_v2, %v6464_v56  ;;  %11318 = vst [vmem:[#allocation108_spill] sm:$0xff] %v6508_v18  ;;  %v552_v2 = vadd.f32 %v551_v24, %v521_v8  ;;  %11320 = vst [vmem:[#allocation110_spill] sm:$0xff] %v6521_v34  ;;  %v6541_v24 = vmul.f32 %v6449_v63, %v6104_v39 }
  0x5c   : > { %11322 = vst [vmem:[#allocation112_spill] sm:$0xff] %v6529_v9  ;;  %11323 = vst [vmem:[#allocation113_spill] sm:$0xff] %v6533_v3  ;;  %v6545_v8 = vmul.f32 %v6449_v63, %v6131_v48  ;;  %v6550_v22 = vmul.f32 %v6449_v63, %v6134_v49 }
  0x5d   : > { %11324 = vst [vmem:[#allocation114_spill] sm:$0xff] %v6537_v50  ;;  %11325 = vst [vmem:[#allocation115_spill] sm:$0xff] %v6541_v24  ;;  %v491_v56 = vadd.f32 %v490_v20, %v6467_v5  ;;  %v553_v30 = vadd.f32 %v552_v2, %v522_v17  ;;  %v6558_v50 = vmul.f32 %v6449_v63, %v6162_v59 }
  0x5e   : > { %11326 = vst [vmem:[#allocation116_spill] sm:$0xff] %v6545_v8  ;;  %11327 = vst [vmem:[#allocation117_spill] sm:$0xff] %v6550_v22  ;;  %v6562_v24 = vmul.f32 %v6449_v63, %v6177_v12  ;;  %v6566_v20 = vmul.f32 %v6449_v63, %v6187_v29  ;;  %v6570_v17 = vmul.f32 %v6449_v63, %v6202_v52 }
  0x5f   : > { %11328 = vst [vmem:[#allocation118_spill] sm:$0xff] %v6554_v46  ;;  %11329 = vst [vmem:[#allocation119_spill] sm:$0xff] %v6558_v50  ;;  %v554_v2 = vadd.f32 %v553_v30, %v523_v53  ;;  %v6574_v5 = vmul.f32 %v6449_v63, %v6211_v62  ;;  %v6578_v50 = vmul.f32 %v6449_v63, %v6226_v26  ;;  %v6601_v46 = vld [vmem:[%s5989_s25 + $0x10] sm:$0x3] }
  0x60   : > { %11330 = vst [vmem:[#allocation120_spill] sm:$0xff] %v6562_v24  ;;  %11331 = vst [vmem:[#allocation121_spill] sm:$0xff] %v6566_v20  ;;  %v6582_v24 = vmul.f32 %v6449_v63, %v6235_v42  ;;  %v6586_v20 = vmul.f32 %v6449_v63, %v6250_v57  ;;  %v6594_v30 = vmul.f32 %v6449_v63, %v6274_v36 }
  0x61   : > { %11332 = vst [vmem:[#allocation122_spill] sm:$0xff] %v6570_v17  ;;  %11333 = vst [vmem:[#allocation123_spill] sm:$0xff] %v6574_v5  ;;  %v6590_v17 = vmul.f32 %v6449_v63, %v6259_v41  ;;  %v6598_v53 = vmul.f32 %v6449_v63, %v6283_v55  ;;  %v555_v5 = vadd.f32 %v554_v2, %v524_v16 }
  0x62   : > { %11334 = vst [vmem:[#allocation124_spill] sm:$0xff] %v6578_v50  ;;  %11335 = vst [vmem:[#allocation125_spill] sm:$0xff] %v6582_v24  ;;  %v492_v50 = vrot.slane %v491_v56, 4  ;;  %v6605_v24 = vmul.f32 %v6449_v63, %v6298_v33  ;;  %v6621_v16 = vmul.f32 %v6449_v63, %v6346_v60  ;;  %v6625_v2 = vmul.f32 %v6449_v63, %v6355_v47 }
  0x63   : > { %11336 = vst [vmem:[#allocation126_spill] sm:$0xff] %v6586_v20  ;;  %11337 = vst [vmem:[#allocation127_spill] sm:$0xff] %v6590_v17  ;;  %v6609_v20 = vmul.f32 %v6449_v63, %v6307_v19  ;;  %v6613_v17 = vmul.f32 %v6449_v63, %v6322_v10 }
  0x64   : > { %11338 = vst [vmem:[#allocation128_spill] sm:$0xff] %v6594_v30  ;;  %11339 = vst [vmem:[#allocation129_spill] sm:$0xff] %v6598_v53  ;;  %v6617_v30 = vmul.f32 %v6449_v63, %v6331_v54 }
  0x65   : > { %11340 = vst [vmem:[#allocation130_spill] sm:$0xff] %v6601_v46  ;;  %11341 = vst [vmem:[#allocation131_spill] sm:$0xff] %v6605_v24  ;;  %v556_v24 = vadd.f32 %v555_v5, %v525_v61  ;;  %v6649_v5 = vmul.f32 %v6418_v45, %v5993_v6  ;;  %v493_v61 = vadd.f32 %v492_v50, %v491_v56 }
  0x66   : > { %11342 = vst [vmem:[#allocation132_spill] sm:$0xff] %v6609_v20  ;;  %11343 = vst [vmem:[#allocation133_spill] sm:$0xff] %v6613_v17  ;;  %v6629_v20 = vmul.f32 %v6449_v63, %v6370_v15  ;;  %v6633_v17 = vmul.f32 %v6449_v63, %v6379_v23  ;;  %v6653_v63 = vmul.f32 %v6418_v45, %v5996_v7 }
  0x67   : > { %11344 = vst [vmem:[#allocation134_spill] sm:$0xff] %v6617_v30  ;;  %11345 = vst [vmem:[#allocation135_spill] sm:$0xff] %v6621_v16  ;;  %v6637_v30 = vmul.f32 %v6418_v45, %v6502_v0  ;;  %v6641_v16 = vmul.f32 %v6418_v45, %v6505_v1  ;;  %v6657_v0 = vmul.f32 %v6418_v45, %v6013_v13  ;;  %v1225_v9 = vrot.slane %v6649_v5, 1 }
  0x68   : > { %11346 = vst [vmem:[#allocation136_spill] sm:$0xff] %v6625_v2  ;;  %11347 = vst [vmem:[#allocation137_spill] sm:$0xff] %v6629_v20  ;;  %v6645_v2 = vmul.f32 %v6418_v45, %v6601_v46  ;;  %v6661_v1 = vmul.f32 %v6418_v45, %v6016_v14  ;;  %v6665_v46 = vmul.f32 %v6418_v45, %v6041_v21  ;;  %v11349_v14 = vld [vmem:[#allocation34_spill] sm:$0xff] }
  0x69   : > { %11348 = vst [vmem:[#allocation138_spill] sm:$0xff] %v6633_v17  ;;  %v557_v17 = vadd.f32 %v556_v24, %v526_v4  ;;  %v6669_v6 = vmul.f32 %v6418_v45, %v6064_v27  ;;  %v6673_v50 = vmul.f32 %v6418_v45, %v6067_v28  ;;  %v6677_v56 = vmul.f32 %v6418_v45, %v6090_v35 }
  0x6a   : > { %v6681_v24 = vmul.f32 %v6418_v45, %v6101_v38  ;;  %v6685_v21 = vmul.f32 %v6418_v45, %v6104_v39  ;;  %v6689_v27 = vmul.f32 %v6418_v45, %v11349_v14  ;;  %v6693_v28 = vmul.f32 %v6418_v45, %v6131_v48  ;;  %v11351_v48 = vld [vmem:[#allocation45_spill] sm:$0xff] }
  0x6b   : > { %v558_v4 = vadd.f32 %v557_v17, %v527_v40  ;;  %v6697_v35 = vmul.f32 %v6418_v45, %v6134_v49  ;;  %v11350_v40 = vld [vmem:[#allocation40_spill] sm:$0xff]  ;;  %v6705_v39 = vmul.f32 %v6418_v45, %v6159_v58  ;;  %v494_v38 = vrot.slane %v493_v61, 2  ;;  %v11352_v58 = vld [vmem:[#allocation50_spill] sm:$0xff] }
  0x6c   : > { %v6701_v17 = vmul.f32 %v6418_v45, %v11350_v40  ;;  %v6710_v13 = vmul.f32 %v6418_v45, %v6162_v59  ;;  %v6714_v7 = vmul.f32 %v6418_v45, %v11351_v48  ;;  %v6718_v49 = vmul.f32 %v6418_v45, %v6177_v12  ;;  %v11353_v12 = vld [vmem:[#allocation55_spill] sm:$0xff] }
  0x6d   : > { %v559_v14 = vadd.f32 %v558_v4, %v6492_v51  ;;  %v6722_v40 = vmul.f32 %v6418_v45, %v6187_v29  ;;  %v6726_v20 = vmul.f32 %v6418_v45, %v11352_v58  ;;  %v6730_v51 = vmul.f32 %v6418_v45, %v6202_v52  ;;  %v11354_v52 = vld [vmem:[#allocation60_spill] sm:$0xff] }
  0x6e   : > { %v6735_v48 = vmul.f32 %v6418_v45, %v6211_v62  ;;  %v6739_v59 = vmul.f32 %v6418_v45, %v11353_v12  ;;  %v6743_v29 = vmul.f32 %v6418_v45, %v6226_v26  ;;  %v6747_v58 = vmul.f32 %v6418_v45, %v6235_v42  ;;  %v11355_v26 = vld [vmem:[#allocation65_spill] sm:$0xff] }
  0x6f   : > { %v560_v4 = vadd.f32 %v559_v14, %v6496_v31  ;;  %v6751_v53 = vmul.f32 %v6418_v45, %v11354_v52  ;;  %v6755_v14 = vmul.f32 %v6418_v45, %v6250_v57  ;;  %v6759_v31 = vmul.f32 %v6418_v45, %v6259_v41  ;;  %v11356_v52 = vld [vmem:[#allocation70_spill] sm:$0xff] }
  0x70   : > { %v495_v12 = vadd.f32 %v494_v38, %v493_v61  ;;  %v6763_v22 = vmul.f32 %v6418_v45, %v11355_v26  ;;  %v6767_v42 = vmul.f32 %v6418_v45, %v6274_v36  ;;  %v6772_v57 = vmul.f32 %v6418_v45, %v6283_v55  ;;  %v11357_v26 = vld [vmem:[#allocation75_spill] sm:$0xff] }
  0x71   : > { %v561_v62 = vrot.slane %v560_v4, 4  ;;  %v6776_v41 = vmul.f32 %v6418_v45, %v11356_v52  ;;  %v6780_v38 = vmul.f32 %v6418_v45, %v6298_v33  ;;  %v6784_v61 = vmul.f32 %v6418_v45, %v6307_v19 }
  0x72   : > { %v6788_v8 = vmul.f32 %v6418_v45, %v11357_v26  ;;  %v6792_v55 = vmul.f32 %v6418_v45, %v6322_v10  ;;  %v1220_v52 = vrot.slane %v6637_v30, 1  ;;  %v1221_v3 = vrot.slane %v6641_v16, 1  ;;  %v11358_v26 = vld [vmem:[#allocation80_spill] sm:$0xff] }
  0x73   : > { %v562_v36 = vadd.f32 %v561_v62, %v560_v4  ;;  %v1223_v33 = vrot.slane %v6645_v2, 1  ;;  %v1226_v19 = vrot.slane %v6653_v63, 1  ;;  %v496_v37 = vrot.slane %v495_v12, 1  ;;  %v11359_v2 = vld [vmem:[#allocation84_spill] sm:$0xff] }
  0x74   : > { %v6801_v4 = vmul.f32 %v6418_v45, %v6331_v54  ;;  %v6805_v10 = vmul.f32 %v6418_v45, %v11358_v26  ;;  %v6809_v30 = vmul.f32 %v6418_v45, %v6346_v60  ;;  %v6813_v16 = vmul.f32 %v6418_v45, %v6355_v47 }
  0x75   : > { %v563_v62 = vrot.slane %v562_v36, 2  ;;  %v6817_v5 = vmul.f32 %v6418_v45, %v11359_v2  ;;  %v6821_v63 = vmul.f32 %v6418_v45, %v6370_v15  ;;  %v6825_v26 = vmul.f32 %v6418_v45, %v6379_v23 }
  0x76   : > { %v6829_v60 = vmul.f32 %v6418_v45, %v6384_v25  ;;  %v1230_v47 = vrot.slane %v6657_v0, 1  ;;  %v6833_v34 = vsel %vm346_vm1, %v1220_v52, %v1221_v3  ;;  %v6836_v2 = vsel %vm346_vm1, %v1221_v3, %v1223_v33 }
  0x77   : > { %v564_v54 = vadd.f32 %v563_v62, %v562_v36  ;;  %v6839_v15 = vsel %vm346_vm1, %v1225_v9, %v1226_v19  ;;  %v1231_v36 = vrot.slane %v6661_v1, 1  ;;  %v497_v62 = vadd.f32 %v496_v37, %v495_v12 }
  0x78   : > { %11360 = vst [vmem:[#allocation139_spill] sm:$0xff] %v6839_v15  ;;  %v1233_v44 = vrot.slane %v6665_v46, 1  ;;  %v1235_v45 = vrot.slane %v6669_v6, 1  ;;  %v1236_v25 = vrot.slane %v6673_v50, 1  ;;  %v1238_v0 = vrot.slane %v6677_v56, 1 }
  0x79   : > { %v565_v23 = vrot.slane %v564_v54, 1  ;;  %v1240_v52 = vrot.slane %v6681_v24, 1  ;;  %v1241_v33 = vrot.slane %v6685_v21, 1  ;;  %v1243_v9 = vrot.slane %v6689_v27, 1 }
  0x7a   : > { %v1245_v15 = vrot.slane %v6693_v28, 1  ;;  %v1246_v12 = vrot.slane %v6697_v35, 1  ;;  %v1248_v1 = vrot.slane %v6701_v17, 1  ;;  %v1250_v46 = vrot.slane %v6705_v39, 1 }
  0x7b   : > { %v566_v3 = vadd.f32 %v565_v23, %v564_v54  ;;  %v1251_v6 = vrot.slane %v6710_v13, 1  ;;  %v1253_v37 = vrot.slane %v6714_v7, 1  ;;  %v1255_v21 = vrot.slane %v6718_v49, 1  ;;  %v11362_v49 = vld [vmem:[#allocation5_spill] sm:$0xff]  ;;  %v11457_v54 = vld [vmem:[#allocation50_spill] sm:$0xff] }
  0x7c   : > { %v1256_v23 = vrot.slane %v6722_v40, 1  ;;  %v1258_v27 = vrot.slane %v6726_v20, 1  ;;  %v11361_v28 = vrot.slane %v6430_v11, 1  ;;  %v6866_v39 = vsel %vm346_vm1, %v1230_v47, %v1231_v36  ;;  %v11364_v40 = vld [vmem:[#allocation6_spill] sm:$0xff] }
  0x7d   : > { %v567_v50 = vsel %vm297_vm2, %v566_v3, %v497_v62  ;;  %v1260_v7 = vrot.slane %v6730_v51, 1  ;;  %v1261_v13 = vrot.slane %v6735_v48, 1  ;;  %v11363_v56 = vmov 0.0  }
  0x7e   : > { %5097 = vmatmul.mubr.f32.vlgmr.msra.gmra.mxu0 %v567_v50  ;;  %v6863_v35 = vsel %vm346_vm1, %v1226_v19, %v11361_v28  ;;  %v6875_v20 = vsel %vm346_vm1, %v1231_v36, %v1233_v44  ;;  %v6878_v19 = vsel %vm346_vm1, %v1235_v45, %v1236_v25  ;;  %v6881_v47 = vsel %vm346_vm1, %v1236_v25, %v1238_v0 }
  0x7f   : > { %5187 = vmatpush3.msra.mxu0 %v11362_v49  ;;  %5218 = vmatprep.mubr.msk.f32.mxu0 %vm5866_vm0, %v11363_v56  ;;  %v6885_v48 = vsel %vm346_vm1, %v1240_v52, %v1241_v33  ;;  %v6888_v11 = vsel %vm346_vm1, %v1241_v33, %v1243_v9  ;;  %v6891_v24 = vsel %vm346_vm1, %v1245_v15, %v1246_v12  ;;  %v1263_v62 = vrot.slane %v6739_v59, 1  ;;  %v11365_v52 = vld [vmem:[#allocation7_spill] sm:$0xff] }
  0x80   : > { %5188 = vmatprep.subr.mxu0 %v11363_v56  ;;  %v6894_v44 = vsel %vm346_vm1, %v1246_v12, %v1248_v1  ;;  %v6898_v17 = vsel %vm346_vm1, %v1250_v46, %v1251_v6  ;;  %v6901_v25 = vsel %vm346_vm1, %v1251_v6, %v1253_v37  ;;  %v6904_v51 = vsel %vm346_vm1, %v1255_v21, %v1256_v23  ;;  %v11366_v46 = vld [vmem:[#allocation8_spill] sm:$0xff]  ;;  %v11367_v6 = vld [vmem:[#allocation9_spill] sm:$0xff] }
  0x81   : > { %5189 = vmatpush3.msra.mxu0 %v11364_v40  ;;  %v6907_v36 = vsel %vm346_vm1, %v1256_v23, %v1258_v27  ;;  %v6911_v15 = vsel %vm346_vm1, %v1260_v7, %v1261_v13  ;;  %v1265_v45 = vrot.slane %v6743_v29, 1  ;;  %v1266_v0 = vrot.slane %v6747_v58, 1  ;;  %v11368_v37 = vld [vmem:[#allocation12_spill] sm:$0xff]  ;;  %v11369_v7 = vld [vmem:[#allocation15_spill] sm:$0xff]  ;;  %v11370_v40 = vld [vmem:[#allocation109_spill] sm:$0xff] }
  0x82   : > { %5190 = vmatprep.subr.mxu0 %v11363_v56  ;;  %v1268_v33 = vrot.slane %v6751_v53, 1  ;;  %v1270_v3 = vrot.slane %v6755_v14, 1  ;;  %v1271_v9 = vrot.slane %v6759_v31, 1  ;;  %v1273_v12 = vrot.slane %v6763_v22, 1 }
  0x83   : > { %5191 = vmatpush3.msra.mxu0 %v11365_v52  ;;  %v1275_v1 = vrot.slane %v6767_v42, 1  ;;  %v1276_v59 = vrot.slane %v6772_v57, 1  ;;  %v1278_v29 = vrot.slane %v6776_v41, 1  ;;  %v1280_v58 = vrot.slane %v6780_v38, 1 }
  0x84   : > { %5192 = vmatprep.subr.mxu0 %v11363_v56  ;;  %v1281_v53 = vrot.slane %v6784_v61, 1  ;;  %v1283_v14 = vrot.slane %v6788_v8, 1  ;;  %v1285_v31 = vrot.slane %v6792_v55, 1  ;;  %v1286_v22 = vrot.slane %v6801_v4, 1 }
  0x85   : > { %5193 = vmatpush3.msra.mxu0 %v11366_v46  ;;  %v1288_v42 = vrot.slane %v6805_v10, 1  ;;  %v1290_v57 = vrot.slane %v6809_v30, 1  ;;  %v1291_v41 = vrot.slane %v6813_v16, 1  ;;  %v1293_v38 = vrot.slane %v6817_v5, 1 }
  0x86   : > { %5194 = vmatprep.subr.mxu0 %v11363_v56  ;;  %v1264_v61 = vsel %vm346_vm1, %v1261_v13, %v1263_v62  ;;  %v1267_v8 = vsel %vm346_vm1, %v1265_v45, %v1266_v0  ;;  %v1295_v55 = vrot.slane %v6821_v63, 1  ;;  %v1296_v4 = vrot.slane %v6825_v26, 1  ;;  %v11371_v45 = vld [vmem:[#allocation102_spill] sm:$0xff] }
  0x87   : > { %5195 = vmatpush3.msra.mxu0 %v11367_v6  ;;  %v1269_v10 = vsel %vm346_vm1, %v1266_v0, %v1268_v33  ;;  %v1272_v30 = vsel %vm346_vm1, %v1270_v3, %v1271_v9  ;;  %v1274_v16 = vsel %vm346_vm1, %v1271_v9, %v1273_v12  ;;  %v1298_v5 = vrot.slane %v6829_v60, 1  ;;  %v11372_v0 = vld [vmem:[#allocation139_spill] sm:$0xff]  ;;  %v11373_v3 = vld [vmem:[#allocation105_spill] sm:$0xff]  ;;  %v11374_v12 = vld [vmem:[#allocation110_spill] sm:$0xff] }
  0x88   : > { %5196 = vmatprep.subr.mxu0 %v11363_v56  ;;  %v1277_v50 = vsel %vm346_vm1, %v1275_v1, %v1276_v59  ;;  %v1279_v21 = vsel %vm346_vm1, %v1276_v59, %v1278_v29  ;;  %v1282_v63 = vsel %vm346_vm1, %v1280_v58, %v1281_v53  ;;  %v1284_v26 = vsel %vm346_vm1, %v1281_v53, %v1283_v14  ;;  %v11376_v1 = vld [vmem:[#allocation16_spill] sm:$0xff]  ;;  %v11378_v58 = vld [vmem:[#allocation113_spill] sm:$0xff] }
  0x89   : > { %5197 = vmatpush3.msra.mxu0 %v11368_v37  ;;  %v1287_v23 = vsel %vm346_vm1, %v1285_v31, %v1286_v22  ;;  %v1289_v27 = vsel %vm346_vm1, %v1286_v22, %v1288_v42  ;;  %v1292_v28 = vsel %vm346_vm1, %v1290_v57, %v1291_v41  ;;  %v1294_v60 = vsel %vm346_vm1, %v1291_v41, %v1293_v38  ;;  %v11377_v59 = vld [vmem:[#allocation112_spill] sm:$0xff]  ;;  %v11403_v37 = vld [vmem:[#allocation125_spill] sm:$0xff] }
  0x8a   : > { %5198 = vmatprep.subr.mxu0 %v11363_v56  ;;  %v1297_v13 = vsel %vm346_vm1, %v1295_v55, %v1296_v4  ;;  %v6960_v49 = vadd.f32 %v6833_v34, %v6513_v43  ;;  %v6964_v62 = vadd.f32 %v6836_v2, %v11370_v40  ;;  %v6968_v52 = vadd.f32 %v11372_v0, %v11371_v45  ;;  %v11375_v34 = vld [vmem:[#allocation111_spill] sm:$0xff]  ;;  %v11393_v41 = vld [vmem:[#allocation120_spill] sm:$0xff]  ;;  %v11409_v0 = vld [vmem:[#allocation21_spill] sm:$0xff] }
  0x8b   : > { %5199 = vmatpush3.msra.mxu0 %v11369_v7  ;;  %v1299_v33 = vsel %vm346_vm1, %v1296_v4, %v1298_v5  ;;  %v6974_v9 = vadd.f32 %v6863_v35, %v11373_v3  ;;  %v6978_v43 = vadd.f32 %v6866_v39, %v11374_v12  ;;  %v6982_v2 = vadd.f32 %v6875_v20, %v11375_v34  ;;  %v11380_v35 = vld [vmem:[#allocation114_spill] sm:$0xff]  ;;  %v11382_v39 = vld [vmem:[#allocation115_spill] sm:$0xff]  ;;  %v11384_v20 = vld [vmem:[#allocation116_spill] sm:$0xff] }
  0x8c   : > { %5200 = vmatprep.subr.mxu0 %v11363_v56  ;;  %v6987_v29 = vadd.f32 %v6878_v19, %v11377_v59  ;;  %v6991_v46 = vadd.f32 %v6881_v47, %v11378_v58  ;;  %v6995_v53 = vadd.f32 %v6885_v48, %v11380_v35  ;;  %v6999_v14 = vadd.f32 %v6888_v11, %v11382_v39  ;;  %v11386_v19 = vld [vmem:[#allocation117_spill] sm:$0xff]  ;;  %v11388_v47 = vld [vmem:[#allocation118_spill] sm:$0xff]  ;;  %v11390_v48 = vld [vmem:[#allocation119_spill] sm:$0xff] }
  0x8d   : > { %5201 = vmatpush3.msra.mxu0 %v11376_v1  ;;  %v7004_v31 = vadd.f32 %v6891_v24, %v11384_v20  ;;  %v7008_v22 = vadd.f32 %v6894_v44, %v11386_v19  ;;  %v7012_v42 = vadd.f32 %v6898_v17, %v11388_v47  ;;  %v7016_v57 = vadd.f32 %v6901_v25, %v11390_v48  ;;  %v11392_v11 = vld [vmem:[#allocation20_spill] sm:$0xff]  ;;  %v11395_v24 = vld [vmem:[#allocation121_spill] sm:$0xff]  ;;  %v11397_v44 = vld [vmem:[#allocation122_spill] sm:$0xff] }
  0x8e   : > { %11379 = vst [vmem:[#allocation5_spill] sm:$0xff] %v6991_v46  ;;  %11381 = vst [vmem:[#allocation6_spill] sm:$0xff] %v6995_v53  ;;  %5202 = vmatprep.subr.mxu0 %v11363_v56  ;;  %v7021_v38 = vadd.f32 %v6904_v51, %v11393_v41  ;;  %v7025_v6 = vadd.f32 %v6907_v36, %v11395_v24  ;;  %v7029_v55 = vadd.f32 %v6911_v15, %v11397_v44  ;;  %v11399_v17 = vld [vmem:[#allocation123_spill] sm:$0xff]  ;;  %v11401_v25 = vld [vmem:[#allocation124_spill] sm:$0xff] }
  0x8f   : > { %11383 = vst [vmem:[#allocation7_spill] sm:$0xff] %v6999_v14  ;;  %11385 = vst [vmem:[#allocation8_spill] sm:$0xff] %v7004_v31  ;;  %5203 = vmatpush3.msra.mxu0 %v11392_v11  ;;  %v7032_v4 = vadd.f32 %v1264_v61, %v11399_v17  ;;  %v7036_v5 = vadd.f32 %v1267_v8, %v11401_v25  ;;  %v7039_v7 = vadd.f32 %v1269_v10, %v11403_v37  ;;  %v11405_v51 = vld [vmem:[#allocation126_spill] sm:$0xff]  ;;  %v11407_v36 = vld [vmem:[#allocation127_spill] sm:$0xff] }
  0x90   : > { %11387 = vst [vmem:[#allocation9_spill] sm:$0xff] %v7008_v22  ;;  %11389 = vst [vmem:[#allocation12_spill] sm:$0xff] %v7012_v42  ;;  %5204 = vmatprep.subr.mxu0 %v11363_v56  ;;  %v7042_v40 = vadd.f32 %v1272_v30, %v11405_v51  ;;  %v7045_v45 = vadd.f32 %v1274_v16, %v11407_v36  ;;  %v11410_v15 = vld [vmem:[#allocation128_spill] sm:$0xff]  ;;  %v11412_v61 = vld [vmem:[#allocation129_spill] sm:$0xff] }
  0x91   : > { %11391 = vst [vmem:[#allocation15_spill] sm:$0xff] %v7016_v57  ;;  %11394 = vst [vmem:[#allocation109_spill] sm:$0xff] %v7021_v38  ;;  %5205 = vmatpush3.msra.mxu0 %v11409_v0  ;;  %v7049_v3 = vadd.f32 %v1277_v50, %v11410_v15  ;;  %v7052_v12 = vadd.f32 %v1279_v21, %v11412_v61  ;;  %v11414_v34 = vld [vmem:[#allocation131_spill] sm:$0xff]  ;;  %v11416_v1 = vld [vmem:[#allocation132_spill] sm:$0xff] }
  0x92   : > { %11396 = vst [vmem:[#allocation102_spill] sm:$0xff] %v7025_v6  ;;  %11398 = vst [vmem:[#allocation139_spill] sm:$0xff] %v7029_v55  ;;  %v7055_v8 = vadd.f32 %v1282_v63, %v11414_v34  ;;  %v7058_v10 = vadd.f32 %v1284_v26, %v11416_v1  ;;  %5206 = vmatprep.subr.mxu0 %v11363_v56  ;;  %v11418_v30 = vld [vmem:[#allocation133_spill] sm:$0xff]  ;;  %v11420_v16 = vld [vmem:[#allocation134_spill] sm:$0xff] }
  0x93   : > { %11400 = vst [vmem:[#allocation105_spill] sm:$0xff] %v7032_v4  ;;  %11402 = vst [vmem:[#allocation110_spill] sm:$0xff] %v7036_v5  ;;  %v7062_v59 = vadd.f32 %v1287_v23, %v11418_v30  ;;  %v7065_v58 = vadd.f32 %v1289_v27, %v11420_v16  ;;  %v11422_v35 = vld [vmem:[#allocation135_spill] sm:$0xff]  ;;  %v11424_v39 = vld [vmem:[#allocation136_spill] sm:$0xff] }
  0x94   : > { %11404 = vst [vmem:[#allocation111_spill] sm:$0xff] %v7039_v7  ;;  %11406 = vst [vmem:[#allocation16_spill] sm:$0xff] %v7042_v40  ;;  %v7068_v50 = vadd.f32 %v1292_v28, %v11422_v35  ;;  %v7071_v21 = vadd.f32 %v1294_v60, %v11424_v39  ;;  %v11426_v20 = vld [vmem:[#allocation25_spill] sm:$0xff]  ;;  %v11429_v26 = vld [vmem:[#allocation138_spill] sm:$0xff] }
  0x95   : > { %11408 = vst [vmem:[#allocation112_spill] sm:$0xff] %v7045_v45  ;;  %11411 = vst [vmem:[#allocation113_spill] sm:$0xff] %v7049_v3  ;;  %5207 = vmatpush3.msra.mxu0 %v11426_v20  ;;  %v11427_v63 = vld [vmem:[#allocation137_spill] sm:$0xff]  ;;  %v7078_v47 = vadd.f32 %v1299_v33, %v11429_v26  ;;  %v11431_v48 = vld [vmem:[#allocation106_spill] sm:$0xff] }
  0x96   : > { %11413 = vst [vmem:[#allocation114_spill] sm:$0xff] %v7052_v12  ;;  %11415 = vst [vmem:[#allocation115_spill] sm:$0xff] %v7055_v8  ;;  %v7075_v19 = vadd.f32 %v1297_v13, %v11427_v63  ;;  %v11432_v23 = vld [vmem:[#allocation97_spill] sm:$0xff]  ;;  %v11433_v27 = vld [vmem:[#allocation107_spill] sm:$0xff]  ;;  %5208 = vmatprep.subr.mxu0 %v11363_v56 }
  0x97   : > { %11417 = vst [vmem:[#allocation116_spill] sm:$0xff] %v7058_v10  ;;  %11419 = vst [vmem:[#allocation117_spill] sm:$0xff] %v7062_v59  ;;  %v7082_v11 = vmul.f32 %v11432_v23, %v11431_v48  ;;  %v7086_v41 = vmul.f32 %v11432_v23, %v11433_v27  ;;  %v11434_v28 = vld [vmem:[#allocation130_spill] sm:$0xff]  ;;  %v11436_v33 = vld [vmem:[#allocation11_spill] sm:$0xff]  ;;  %v7176_v32 = vmul.f32 %v11432_v23, %v11457_v54 }
  0x98   : > { %11421 = vst [vmem:[#allocation118_spill] sm:$0xff] %v7065_v58  ;;  %11423 = vst [vmem:[#allocation119_spill] sm:$0xff] %v7068_v50  ;;  %v7091_v60 = vmul.f32 %v11432_v23, %v11434_v28  ;;  %v11435_v24 = vld [vmem:[#allocation10_spill] sm:$0xff]  ;;  %v7099_v44 = vmul.f32 %v11432_v23, %v11436_v33  ;;  %v11437_v17 = vld [vmem:[#allocation13_spill] sm:$0xff] }
  0x99   : > { %11425 = vst [vmem:[#allocation20_spill] sm:$0xff] %v7071_v21  ;;  %11428 = vst [vmem:[#allocation120_spill] sm:$0xff] %v7075_v19  ;;  %v7095_v13 = vmul.f32 %v11432_v23, %v11435_v24  ;;  %v7103_v25 = vmul.f32 %v11432_v23, %v11437_v17  ;;  %v11438_v37 = vld [vmem:[#allocation26_spill] sm:$0xff]  ;;  %v11440_v0 = vld [vmem:[#allocation19_spill] sm:$0xff]  ;;  %v1467_v55 = vrot.slane %v7086_v41, 2 }
  0x9a   : > { %11430 = vst [vmem:[#allocation121_spill] sm:$0xff] %v7078_v47  ;;  %5209 = vmatpush3.msra.mxu0 %v11438_v37  ;;  %v11439_v51 = vld [vmem:[#allocation14_spill] sm:$0xff]  ;;  %v7112_v15 = vmul.f32 %v11432_v23, %v11440_v0  ;;  %v11441_v61 = vld [vmem:[#allocation23_spill] sm:$0xff]  ;;  %v11442_v1 = vld [vmem:[#allocation24_spill] sm:$0xff]  ;;  %v1472_v57 = vrot.slane %v7099_v44, 2 }
  0x9b   : > { %v7108_v36 = vmul.f32 %v11432_v23, %v11439_v51  ;;  %v7116_v34 = vmul.f32 %v11432_v23, %v11441_v61  ;;  %v7120_v30 = vmul.f32 %v11432_v23, %v11442_v1  ;;  %5210 = vmatprep.subr.mxu0 %v11363_v56  ;;  %v11443_v16 = vld [vmem:[#allocation28_spill] sm:$0xff]  ;;  %v11444_v39 = vld [vmem:[#allocation30_spill] sm:$0xff]  ;;  %v11445_v63 = vld [vmem:[#allocation31_spill] sm:$0xff]  ;;  %v1476_v31 = vrot.slane %v7103_v25, 2 }
  0x9c   : > { %v7125_v35 = vmul.f32 %v11432_v23, %v11443_v16  ;;  %v7129_v20 = vmul.f32 %v11432_v23, %v11444_v39  ;;  %v7133_v26 = vmul.f32 %v11432_v23, %v11445_v63  ;;  %v11446_v48 = vld [vmem:[#allocation34_spill] sm:$0xff]  ;;  %v11447_v28 = vld [vmem:[#allocation29_spill] sm:$0xff]  ;;  %v11448_v24 = vld [vmem:[#allocation36_spill] sm:$0xff] }
  0x9d   : > { %v7137_v27 = vmul.f32 %v11432_v23, %v11446_v48  ;;  %5211 = vmatpush3.msra.mxu0 %v11447_v28  ;;  %v7142_v33 = vmul.f32 %v11432_v23, %v11448_v24  ;;  %v11449_v17 = vld [vmem:[#allocation37_spill] sm:$0xff]  ;;  %v11450_v51 = vld [vmem:[#allocation40_spill] sm:$0xff]  ;;  %v11451_v61 = vld [vmem:[#allocation42_spill] sm:$0xff]  ;;  %v1481_v53 = vrot.slane %v7116_v34, 2  ;;  %v1482_v25 = vrot.slane %v7120_v30, 2 }
  0x9e   : > { %v7146_v37 = vmul.f32 %v11432_v23, %v11449_v17  ;;  %v7150_v0 = vmul.f32 %v11432_v23, %v11450_v51  ;;  %v7154_v1 = vmul.f32 %v11432_v23, %v11451_v61  ;;  %5212 = vmatprep.subr.mxu0 %v11363_v56  ;;  %v11452_v16 = vld [vmem:[#allocation43_spill] sm:$0xff]  ;;  %v11453_v63 = vld [vmem:[#allocation45_spill] sm:$0xff]  ;;  %v11454_v28 = vld [vmem:[#allocation46_spill] sm:$0xff] }
  0x9f   : > { %v7159_v39 = vmul.f32 %v11432_v23, %v11452_v16  ;;  %v7163_v48 = vmul.f32 %v11432_v23, %v11453_v63  ;;  %v7167_v24 = vmul.f32 %v11432_v23, %v11454_v28  ;;  %v11455_v17 = vld [vmem:[#allocation48_spill] sm:$0xff]  ;;  %v11458_v16 = vld [vmem:[#allocation51_spill] sm:$0xff]  ;;  %v11459_v63 = vld [vmem:[#allocation53_spill] sm:$0xff]  ;;  %v1491_v34 = vrot.slane %v7142_v33, 2 }
  0xa0   : > { %v7171_v51 = vmul.f32 %v11432_v23, %v11455_v17  ;;  %v11456_v61 = vld [vmem:[#allocation32_spill] sm:$0xff]  ;;  %v7180_v18 = vmul.f32 %v11432_v23, %v11458_v16  ;;  %v7184_v47 = vmul.f32 %v11432_v23, %v11459_v63  ;;  %v11460_v28 = vld [vmem:[#allocation55_spill] sm:$0xff]  ;;  %v11462_v54 = vld [vmem:[#allocation58_spill] sm:$0xff] }
  0xa1   : > { %5213 = vmatpush3.msra.mxu0 %v11456_v61  ;;  %v7188_v19 = vmul.f32 %v11432_v23, %v11460_v28  ;;  %v11461_v17 = vld [vmem:[#allocation56_spill] sm:$0xff]  ;;  %v7197_v21 = vmul.f32 %v11432_v23, %v11462_v54  ;;  %v11464_v63 = vld [vmem:[#allocation61_spill] sm:$0xff]  ;;  %v11465_v28 = vld [vmem:[#allocation35_spill] sm:$0xff]  ;;  %v1499_v30 = vrot.slane %v7163_v48, 2 }
  0xa2   : > { %5214 = vmatprep.subr.mxu0 %v11363_v56  ;;  %v7193_v61 = vmul.f32 %v11432_v23, %v11461_v17  ;;  %v11463_v16 = vld [vmem:[#allocation60_spill] sm:$0xff]  ;;  %v7205_v58 = vmul.f32 %v11432_v23, %v11464_v63  ;;  %v11466_v59 = vld [vmem:[#allocation63_spill] sm:$0xff]  ;;  %v11467_v17 = vld [vmem:[#allocation65_spill] sm:$0xff]  ;;  %v1506_v33 = vrot.slane %v7180_v18, 2 }
  0xa3   : > { %v7201_v50 = vmul.f32 %v11432_v23, %v11463_v16  ;;  %5215 = vmatpush3.msra.mxu0 %v11465_v28  ;;  %v7210_v10 = vmul.f32 %v11432_v23, %v11466_v59  ;;  %v7214_v8 = vmul.f32 %v11432_v23, %v11467_v17  ;;  %v11468_v54 = vld [vmem:[#allocation66_spill] sm:$0xff]  ;;  %v11469_v16 = vld [vmem:[#allocation68_spill] sm:$0xff]  ;;  %v11471_v59 = vld [vmem:[#allocation71_spill] sm:$0xff] }
  0xa4   : > { %v7218_v12 = vmul.f32 %v11432_v23, %v11468_v54  ;;  %v7222_v3 = vmul.f32 %v11432_v23, %v11469_v16  ;;  %5216 = vmatprep.subr.mxu0 %v11363_v56  ;;  %v11470_v63 = vld [vmem:[#allocation70_spill] sm:$0xff]  ;;  %v7231_v45 = vmul.f32 %v11432_v23, %v11471_v59  ;;  %v11472_v17 = vld [vmem:[#allocation73_spill] sm:$0xff]  ;;  %v11473_v54 = vld [vmem:[#allocation75_spill] sm:$0xff]  ;;  %v1469_v59 = vrot.slane %v7091_v60, 2 }
  0xa5   : > { %v7227_v28 = vmul.f32 %v11432_v23, %v11470_v63  ;;  %v7235_v40 = vmul.f32 %v11432_v23, %v11472_v17  ;;  %v7239_v7 = vmul.f32 %v11432_v23, %v11473_v54  ;;  %v11474_v16 = vld [vmem:[#allocation38_spill] sm:$0xff]  ;;  %v11475_v5 = vld [vmem:[#allocation76_spill] sm:$0xff]  ;;  %v1466_v63 = vrot.slane %v7082_v11, 2  ;;  %v11479_v41 = vld [vmem:[#allocation83_spill] sm:$0xff] }
  0xa6   : > { %5217 = vmatpush3.msra.mxu0 %v11474_v16  ;;  %v7244_v4 = vmul.f32 %v11432_v23, %v11475_v5  ;;  %v11476_v6 = vld [vmem:[#allocation78_spill] sm:$0xff]  ;;  %v11477_v38 = vld [vmem:[#allocation80_spill] sm:$0xff]  ;;  %v1471_v16 = vrot.slane %v7095_v13, 2  ;;  %v11478_v5 = vld [vmem:[#allocation81_spill] sm:$0xff]  ;;  %v7266_v60 = vmul.f32 %v11432_v23, %v11479_v41  ;;  %v1477_v41 = vrot.slane %v7108_v36, 2 }
  0xa7   : > { %v7251_v17 = vmul.f32 %v11432_v23, %v11476_v6  ;;  %v7255_v54 = vmul.f32 %v11432_v23, %v11477_v38  ;;  %5221 = vmatprep.subr.mxu0 %v11363_v56  ;;  %v7262_v11 = vmul.f32 %v11432_v23, %v11478_v5  ;;  %v11480_v6 = vld [vmem:[#allocation84_spill] sm:$0xff]  ;;  %v11481_v38 = vld [vmem:[#allocation86_spill] sm:$0xff]  ;;  %v11483_v56 = vld [vmem:[#allocation89_spill] sm:$0xff]  ;;  %v7287_v14 = vsel %vm1465_vm3, %v1466_v63, %v1467_v55 }
  0xa8   : > { %v7270_v42 = vmul.f32 %v11432_v23, %v11480_v6  ;;  %v7274_v22 = vmul.f32 %v11432_v23, %v11481_v38  ;;  %v11482_v13 = vld [vmem:[#allocation88_spill] sm:$0xff]  ;;  %v7282_v5 = vmul.f32 %v11432_v23, %v11483_v56  ;;  %v7290_v6 = vsel %vm1465_vm3, %v1467_v55, %v1469_v59  ;;  %v11484_v46 = vld [vmem:[#allocation99_spill] sm:$0xff] }
  0xa9   : > { %v7278_v44 = vmul.f32 %v11432_v23, %v11482_v13  ;;  %v1479_v38 = vrot.slane %v7112_v15, 2  ;;  %v7295_v13 = vsel %vm1465_vm3, %v1471_v16, %v1472_v57  ;;  %v11485_v56 = vrot.slane %v11484_v46, 2 }
  0xaa   : > { %v1484_v36 = vrot.slane %v7125_v35, 2  ;;  %v1486_v63 = vrot.slane %v7129_v20, 2  ;;  %v1487_v55 = vrot.slane %v7133_v26, 2  ;;  %v1489_v15 = vrot.slane %v7137_v27, 2 }
  0xab   : > { %v7300_v23 = vsel %vm1465_vm3, %v1472_v57, %v11485_v56  ;;  %v1492_v59 = vrot.slane %v7146_v37, 2  ;;  %v1494_v16 = vrot.slane %v7150_v0, 2  ;;  %v1496_v46 = vrot.slane %v7154_v1, 2 }
  0xac   : > { %v1497_v57 = vrot.slane %v7159_v39, 2  ;;  %v1501_v35 = vrot.slane %v7167_v24, 2  ;;  %v1502_v20 = vrot.slane %v7171_v51, 2  ;;  %v1504_v26 = vrot.slane %v7176_v32, 2 }
  0xad   : > { %v1478_v27 = vsel %vm1465_vm3, %v1476_v31, %v1477_v41  ;;  %v1507_v37 = vrot.slane %v7184_v47, 2  ;;  %v1509_v0 = vrot.slane %v7188_v19, 2  ;;  %v1480_v1 = vsel %vm1465_vm3, %v1477_v41, %v1479_v38 }
  0xae   : > { %v1483_v39 = vsel %vm1465_vm3, %v1481_v53, %v1482_v25  ;;  %v1485_v48 = vsel %vm1465_vm3, %v1482_v25, %v1484_v36  ;;  %v1488_v24 = vsel %vm1465_vm3, %v1486_v63, %v1487_v55  ;;  %v1490_v51 = vsel %vm1465_vm3, %v1487_v55, %v1489_v15 }
  0xaf   : > { %v1493_v32 = vsel %vm1465_vm3, %v1491_v34, %v1492_v59  ;;  %v1495_v31 = vsel %vm1465_vm3, %v1492_v59, %v1494_v16  ;;  %v1498_v18 = vsel %vm1465_vm3, %v1496_v46, %v1497_v57  ;;  %v1500_v47 = vsel %vm1465_vm3, %v1497_v57, %v1499_v30 }
  0xb0   : > { %v1503_v19 = vsel %vm1465_vm3, %v1501_v35, %v1502_v20  ;;  %v1505_v38 = vsel %vm1465_vm3, %v1502_v20, %v1504_v26  ;;  %v1511_v53 = vrot.slane %v7193_v61, 2  ;;  %v1508_v41 = vsel %vm1465_vm3, %v1506_v33, %v1507_v37 }
  0xb1   : > { %v1510_v56 = vsel %vm1465_vm3, %v1507_v37, %v1509_v0  ;;  %v1512_v25 = vrot.slane %v7197_v21, 2  ;;  %v1514_v36 = vrot.slane %v7201_v50, 2  ;;  %v1516_v63 = vrot.slane %v7205_v58, 2 }
  0xb2   : > { %v1517_v55 = vrot.slane %v7210_v10, 2  ;;  %v1519_v15 = vrot.slane %v7214_v8, 2  ;;  %v1521_v34 = vrot.slane %v7218_v12, 2  ;;  %v1522_v59 = vrot.slane %v7222_v3, 2 }
  0xb3   : > { %v1524_v61 = vrot.slane %v7227_v28, 2  ;;  %v1526_v16 = vrot.slane %v7231_v45, 2  ;;  %v1527_v46 = vrot.slane %v7235_v40, 2  ;;  %v1529_v21 = vrot.slane %v7239_v7, 2 }
  0xb4   : > { %v1531_v50 = vrot.slane %v7244_v4, 2  ;;  %v1532_v58 = vrot.slane %v7251_v17, 2  ;;  %v1534_v10 = vrot.slane %v7255_v54, 2  ;;  %v1513_v8 = vsel %vm1465_vm3, %v1511_v53, %v1512_v25 }
  0xb5   : > { %v1536_v12 = vrot.slane %v7262_v11, 2  ;;  %v1537_v3 = vrot.slane %v7266_v60, 2  ;;  %v1539_v28 = vrot.slane %v7270_v42, 2  ;;  %v1515_v45 = vsel %vm1465_vm3, %v1512_v25, %v1514_v36  ;;  %v11487_v25 = vld [vmem:[#allocation6_spill] sm:$0xff] }
  0xb6   : > { %v1541_v40 = vrot.slane %v7274_v22, 2  ;;  %v1542_v7 = vrot.slane %v7278_v44, 2  ;;  %v1544_v4 = vrot.slane %v7282_v5, 2  ;;  %v1518_v17 = vsel %vm1465_vm3, %v1516_v63, %v1517_v55 }
  0xb7   : > { %v1520_v54 = vsel %vm1465_vm3, %v1517_v55, %v1519_v15  ;;  %v1523_v57 = vsel %vm1465_vm3, %v1521_v34, %v1522_v59  ;;  %v1525_v11 = vsel %vm1465_vm3, %v1522_v59, %v1524_v61  ;;  %v1528_v60 = vsel %vm1465_vm3, %v1526_v16, %v1527_v46  ;;  %v11500_v16 = vld [vmem:[#allocation112_spill] sm:$0xff] }
  0xb8   : > { %v1530_v42 = vsel %vm1465_vm3, %v1527_v46, %v1529_v21  ;;  %v1533_v30 = vsel %vm1465_vm3, %v1531_v50, %v1532_v58  ;;  %v1535_v22 = vsel %vm1465_vm3, %v1532_v58, %v1534_v10  ;;  %v1538_v44 = vsel %vm1465_vm3, %v1536_v12, %v1537_v3  ;;  %v11501_v46 = vld [vmem:[#allocation113_spill] sm:$0xff]  ;;  %v7447_v50 = vld [vmem:[%s10950_s1 + $0x10] ss:$0 sm:$0xff] }
  0xb9   : > { %v1540_v5 = vsel %vm1465_vm3, %v1537_v3, %v1539_v28  ;;  %v7368_v35 = vadd.f32 %v7287_v14, %v6960_v49  ;;  %v7372_v20 = vadd.f32 %v7290_v6, %v6964_v62  ;;  %v1543_v26 = vsel %vm1465_vm3, %v1541_v40, %v1542_v7  ;;  %v11486_v14 = vld [vmem:[#allocation5_spill] sm:$0xff]  ;;  %v11503_v58 = vld [vmem:[#allocation115_spill] sm:$0xff] }
  0xba   : > { %v1545_v33 = vsel %vm1465_vm3, %v1542_v7, %v1544_v4  ;;  %v7378_v37 = vadd.f32 %v7295_v13, %v6968_v52  ;;  %v7382_v0 = vadd.f32 %v7300_v23, %v6974_v9  ;;  %v7385_v53 = vadd.f32 %v1478_v27, %v6978_v43  ;;  %v11488_v52 = vld [vmem:[#allocation7_spill] sm:$0xff]  ;;  %v11489_v9 = vld [vmem:[#allocation8_spill] sm:$0xff]  ;;  %v11490_v43 = vld [vmem:[#allocation9_spill] sm:$0xff] }
  0xbb   : > { %v7388_v49 = vadd.f32 %v1480_v1, %v6982_v2  ;;  %v7391_v62 = vadd.f32 %v1483_v39, %v6987_v29  ;;  %v7394_v6 = vadd.f32 %v1485_v48, %v11486_v14  ;;  %v7397_v36 = vadd.f32 %v1488_v24, %v11487_v25  ;;  %v11491_v2 = vld [vmem:[#allocation12_spill] sm:$0xff]  ;;  %v11492_v29 = vld [vmem:[#allocation15_spill] sm:$0xff]  ;;  %v11493_v48 = vld [vmem:[#allocation109_spill] sm:$0xff] }
  0xbc   : > { %v7400_v13 = vadd.f32 %v1490_v51, %v11488_v52  ;;  %v7403_v23 = vadd.f32 %v1493_v32, %v11489_v9  ;;  %v7406_v27 = vadd.f32 %v1495_v31, %v11490_v43  ;;  %v7409_v1 = vadd.f32 %v1498_v18, %v11491_v2  ;;  %v11494_v24 = vld [vmem:[#allocation102_spill] sm:$0xff]  ;;  %v11495_v51 = vld [vmem:[#allocation139_spill] sm:$0xff]  ;;  %v11496_v32 = vld [vmem:[#allocation105_spill] sm:$0xff] }
  0xbd   : > { %v7412_v39 = vadd.f32 %v1500_v47, %v11492_v29  ;;  %v7415_v63 = vadd.f32 %v1503_v19, %v11493_v48  ;;  %v7418_v55 = vadd.f32 %v1505_v38, %v11494_v24  ;;  %v7421_v15 = vadd.f32 %v1508_v41, %v11495_v51  ;;  %v11497_v31 = vld [vmem:[#allocation110_spill] sm:$0xff]  ;;  %v11498_v18 = vld [vmem:[#allocation111_spill] sm:$0xff]  ;;  %v11499_v47 = vld [vmem:[#allocation16_spill] sm:$0xff] }
  0xbe   : > { %v7424_v34 = vadd.f32 %v1510_v56, %v11496_v32  ;;  %v7427_v59 = vadd.f32 %v1513_v8, %v11497_v31  ;;  %v7430_v61 = vadd.f32 %v1515_v45, %v11498_v18  ;;  %v7433_v19 = vadd.f32 %v1518_v17, %v11499_v47  ;;  %v11502_v56 = vld [vmem:[#allocation114_spill] sm:$0xff]  ;;  %v11505_v8 = vld [vmem:[#allocation116_spill] sm:$0xff]  ;;  %v11507_v3 = vld [vmem:[#allocation117_spill] sm:$0xff] }
  0xbf   : > { %v7436_v38 = vadd.f32 %v1520_v54, %v11500_v16  ;;  %v7439_v41 = vadd.f32 %v1523_v57, %v11501_v46  ;;  %v7442_v21 = vadd.f32 %v1525_v11, %v11502_v56  ;;  %v7450_v10 = vadd.f32 %v1528_v60, %v11503_v58  ;;  %v11509_v45 = vld [vmem:[#allocation118_spill] sm:$0xff]  ;;  %v11511_v7 = vld [vmem:[#allocation119_spill] sm:$0xff]  ;;  %v11513_v17 = vld [vmem:[#allocation20_spill] sm:$0xff] }
  0xc0   : > { %v7453_v12 = vadd.f32 %v1530_v42, %v11505_v8  ;;  %v7456_v28 = vadd.f32 %v1533_v30, %v11507_v3  ;;  %v7459_v40 = vadd.f32 %v1535_v22, %v11509_v45  ;;  %v7462_v4 = vadd.f32 %v1538_v44, %v11511_v7  ;;  %v11515_v57 = vld [vmem:[#allocation120_spill] sm:$0xff]  ;;  %v11517_v60 = vld [vmem:[#allocation121_spill] sm:$0xff]  ;;  %v7494_v52 = vld [vmem:[%s5989_s25 + $0x48] sm:$0xff] }
  0xc1   : > { %11504 = vst [vmem:[#allocation122_spill] sm:$0xff] %v7450_v10  ;;  %v7465_v54 = vadd.f32 %v1540_v5, %v11513_v17  ;;  %v7468_v11 = vadd.f32 %v1543_v26, %v11515_v57  ;;  %v7471_v42 = vadd.f32 %v1545_v33, %v11517_v60  ;;  %v7474_v30 = vld [vmem:[%s5989_s25 + $0x18] sm:$0xff]  ;;  %v7479_v14 = vld [vmem:[%s5989_s25 + $0x20] sm:$0xff]  ;;  %v7484_v5 = vld [vmem:[%s5989_s25 + $0x30] sm:$0xff]  ;;  %v1619_v9 = vmul.f32 %v7494_v52, %v7447_v50 }
  0xc2   : > { %11506 = vst [vmem:[#allocation123_spill] sm:$0xff] %v7453_v12  ;;  %11508 = vst [vmem:[#allocation124_spill] sm:$0xff] %v7456_v28  ;;  %v1615_v22 = vmul.f32 %v7474_v30, %v7447_v50  ;;  %v1616_v44 = vmul.f32 %v7479_v14, %v7447_v50  ;;  %v1617_v26 = vmul.f32 %v7484_v5, %v7447_v50  ;;  %v7489_v33 = vld [vmem:[%s5989_s25 + $0x38] sm:$0xff]  ;;  %v7499_v43 = vld [vmem:[%s5989_s25 + $0x50] sm:$0xff] }
  0xc3   : > { %11510 = vst [vmem:[#allocation125_spill] sm:$0xff] %v7459_v40  ;;  %11512 = vst [vmem:[#allocation126_spill] sm:$0xff] %v7462_v4  ;;  %v1618_v25 = vmul.f32 %v7489_v33, %v7447_v50  ;;  %v1620_v2 = vmul.f32 %v7499_v43, %v7447_v50  ;;  %v7504_v29 = vld [vmem:[%s5989_s25 + $0x60] sm:$0xff]  ;;  %v7509_v24 = vld [vmem:[%s5989_s25 + $0x68] sm:$0xff] }
  0xc4   : > { %11514 = vst [vmem:[#allocation127_spill] sm:$0xff] %v7465_v54  ;;  %11516 = vst [vmem:[#allocation21_spill] sm:$0xff] %v7468_v11  ;;  %v1621_v48 = vmul.f32 %v7504_v29, %v7447_v50  ;;  %v1622_v51 = vmul.f32 %v7509_v24, %v7447_v50  ;;  %v7514_v32 = vld [vmem:[%s5989_s25 + $0x78] sm:$0xff]  ;;  %v7519_v18 = vld [vmem:[%s5989_s25 + $0x80] sm:$0xff]  ;;  %v7622_v10 = vadd.f32 %v1615_v22, %v7368_v35 }
  0xc5   : > { %11518 = vst [vmem:[#allocation128_spill] sm:$0xff] %v7471_v42  ;;  %11519 = vst [vmem:[#allocation129_spill] sm:$0xff] %v7474_v30  ;;  %v1623_v31 = vmul.f32 %v7514_v32, %v7447_v50  ;;  %v1624_v47 = vmul.f32 %v7519_v18, %v7447_v50  ;;  %v7524_v16 = vld [vmem:[%s5989_s25 + $0x90] sm:$0xff]  ;;  %v7529_v56 = vld [vmem:[%s5989_s25 + $0x98] sm:$0xff] }
  0xc6   : > { %11520 = vst [vmem:[#allocation131_spill] sm:$0xff] %v7479_v14  ;;  %11521 = vst [vmem:[#allocation132_spill] sm:$0xff] %v7484_v5  ;;  %v1625_v46 = vmul.f32 %v7524_v16, %v7447_v50  ;;  %v1626_v58 = vmul.f32 %v7529_v56, %v7447_v50  ;;  %v7534_v8 = vld [vmem:[%s5989_s25 + $0xa8] sm:$0xff]  ;;  %v7539_v45 = vld [vmem:[%s5989_s25 + $0xb0] sm:$0xff]  ;;  %v7643_v35 = vadd.f32 %v1622_v51, %v7394_v6 }
  0xc7   : > { %11522 = vst [vmem:[#allocation133_spill] sm:$0xff] %v7489_v33  ;;  %11523 = vst [vmem:[#allocation134_spill] sm:$0xff] %v7494_v52  ;;  %v1627_v3 = vmul.f32 %v7534_v8, %v7447_v50  ;;  %v1628_v7 = vmul.f32 %v7539_v45, %v7447_v50  ;;  %v7544_v17 = vld [vmem:[%s5989_s25 + $0xc0] sm:$0xff]  ;;  %v7549_v60 = vld [vmem:[%s5989_s25 + $0xc8] sm:$0xff] }
  0xc8   : > { %11524 = vst [vmem:[#allocation135_spill] sm:$0xff] %v7499_v43  ;;  %11525 = vst [vmem:[#allocation136_spill] sm:$0xff] %v7504_v29  ;;  %v1629_v57 = vmul.f32 %v7544_v17, %v7447_v50  ;;  %v7574_v29 = vld [vmem:[%s5989_s25 + $0x108] sm:$0xff]  ;;  %v7579_v43 = vld [vmem:[%s5989_s25 + $0x110] sm:$0xff] }
  0xc9   : > { %11526 = vst [vmem:[#allocation25_spill] sm:$0xff] %v7509_v24  ;;  %11527 = vst [vmem:[#allocation137_spill] sm:$0xff] %v7514_v32  ;;  %v7564_v32 = vld [vmem:[%s5989_s25 + $0xf0] sm:$0xff]  ;;  %v7569_v24 = vld [vmem:[%s5989_s25 + $0xf8] sm:$0xff] }
  0xca   : > { %11528 = vst [vmem:[#allocation138_spill] sm:$0xff] %v7519_v18  ;;  %11529 = vst [vmem:[#allocation106_spill] sm:$0xff] %v7524_v16  ;;  %v7554_v16 = vld [vmem:[%s5989_s25 + $0xd8] sm:$0xff]  ;;  %v7559_v18 = vld [vmem:[%s5989_s25 + $0xe0] sm:$0xff]  ;;  %v7664_v6 = vadd.f32 %v1629_v57, %v7415_v63 }
  0xcb   : > { %11530 = vst [vmem:[#allocation97_spill] sm:$0xff] %v7529_v56  ;;  %11531 = vst [vmem:[#allocation107_spill] sm:$0xff] %v7534_v8  ;;  %v1630_v56 = vmul.f32 %v7549_v60, %v7447_v50  ;;  %v1631_v8 = vmul.f32 %v7554_v16, %v7447_v50  ;;  %v7584_v52 = vld [vmem:[%s5989_s25 + $0x120] sm:$0xff]  ;;  %v7589_v33 = vld [vmem:[%s5989_s25 + $0x128] sm:$0xff] }
  0xcc   : > { %11532 = vst [vmem:[#allocation130_spill] sm:$0xff] %v7539_v45  ;;  %11533 = vst [vmem:[#allocation10_spill] sm:$0xff] %v7544_v17  ;;  %v1632_v45 = vmul.f32 %v7559_v18, %v7447_v50  ;;  %v1633_v17 = vmul.f32 %v7564_v32, %v7447_v50  ;;  %v7594_v5 = vld [vmem:[%s5989_s25 + $0x138] sm:$0xff]  ;;  %v7599_v14 = vld [vmem:[%s5989_s25 + $0x140] sm:$0xff] }
  0xcd   : > { %11534 = vst [vmem:[#allocation11_spill] sm:$0xff] %v7549_v60  ;;  %11535 = vst [vmem:[#allocation13_spill] sm:$0xff] %v7554_v16  ;;  %v1634_v60 = vmul.f32 %v7569_v24, %v7447_v50  ;;  %v1635_v16 = vmul.f32 %v7574_v29, %v7447_v50  ;;  %v7604_v30 = vld [vmem:[%s5989_s25 + $0x150] sm:$0xff]  ;;  %v7609_v42 = vld [vmem:[%s5989_s25 + $0x158] sm:$0xff] }
  0xce   : > { %11536 = vst [vmem:[#allocation26_spill] sm:$0xff] %v7559_v18  ;;  %11537 = vst [vmem:[#allocation14_spill] sm:$0xff] %v7564_v32  ;;  %v1636_v18 = vmul.f32 %v7579_v43, %v7447_v50  ;;  %v1637_v32 = vmul.f32 %v7584_v52, %v7447_v50  ;;  %v11547_v11 = vld [vmem:[#allocation86_spill] sm:$0xff]  ;;  %v11548_v4 = vld [vmem:[#allocation88_spill] sm:$0xff] }
  0xcf   : > { %11538 = vst [vmem:[#allocation19_spill] sm:$0xff] %v7569_v24  ;;  %11539 = vst [vmem:[#allocation23_spill] sm:$0xff] %v7574_v29  ;;  %v1638_v24 = vmul.f32 %v7589_v33, %v7447_v50  ;;  %v1639_v29 = vmul.f32 %v7594_v5, %v7447_v50  ;;  %v1643_v54 = vmul.f32 %v7447_v50, %v11547_v11  ;;  %v11549_v40 = vld [vmem:[#allocation90_spill] sm:$0xff]  ;;  %v7769_v57 = vld [vmem:[%s5989_s25 + $0x70] sm:$0x3] }
  0xd0   : > { %11540 = vst [vmem:[#allocation24_spill] sm:$0xff] %v7579_v43  ;;  %11541 = vst [vmem:[#allocation28_spill] sm:$0xff] %v7584_v52  ;;  %v1640_v43 = vmul.f32 %v7599_v14, %v7447_v50  ;;  %v1641_v52 = vmul.f32 %v7604_v30, %v7447_v50  ;;  %v1645_v28 = vmul.f32 %v7447_v50, %v11549_v40 }
  0xd1   : > { %11542 = vst [vmem:[#allocation30_spill] sm:$0xff] %v7589_v33  ;;  %11543 = vst [vmem:[#allocation31_spill] sm:$0xff] %v7594_v5  ;;  %v1642_v33 = vmul.f32 %v7609_v42, %v7447_v50  ;;  %v1644_v5 = vmul.f32 %v7447_v50, %v11548_v4  ;;  %v7631_v11 = vadd.f32 %v1618_v25, %v7382_v0 }
  0xd2   : > { %11544 = vst [vmem:[#allocation34_spill] sm:$0xff] %v7599_v14  ;;  %11545 = vst [vmem:[#allocation29_spill] sm:$0xff] %v7604_v30  ;;  %v11550_v14 = vld [vmem:[#allocation92_spill] sm:$0xff]  ;;  %v7625_v30 = vadd.f32 %v1616_v44, %v7372_v20  ;;  %v7634_v4 = vadd.f32 %v1619_v9, %v7385_v53  ;;  %v7637_v40 = vadd.f32 %v1620_v2, %v7388_v49  ;;  %v11574_v44 = vld [vmem:[#allocation125_spill] sm:$0xff] }
  0xd3   : > { %11546 = vst [vmem:[#allocation36_spill] sm:$0xff] %v7609_v42  ;;  %v1646_v12 = vmul.f32 %v7447_v50, %v11550_v14  ;;  %v7628_v42 = vadd.f32 %v1617_v26, %v7378_v37  ;;  %v7640_v50 = vadd.f32 %v1621_v48, %v7391_v62  ;;  %11551 = vst [vmem:[#allocation37_spill] sm:$0xff] %v7643_v35  ;;  %v11576_v26 = vld [vmem:[#allocation126_spill] sm:$0xff]  ;;  %v11584_v48 = vld [vmem:[#allocation95_spill] sm:$0xff] }
  0xd4   : > { %v7646_v20 = vadd.f32 %v1623_v31, %v7397_v36  ;;  %v7649_v37 = vadd.f32 %v1624_v47, %v7400_v13  ;;  %v7652_v0 = vadd.f32 %v1625_v46, %v7403_v23  ;;  %v7655_v53 = vadd.f32 %v1626_v58, %v7406_v27  ;;  %11558 = vst [vmem:[#allocation32_spill] sm:$0xff] %v7664_v6  ;;  %v7739_v31 = vld [vmem:[%s5989_s25 + $0x40] sm:$0x3]  ;;  %v11590_v47 = vld [vmem:[#allocation134_spill] sm:$0xff]  ;;  %v11591_v46 = vld [vmem:[#allocation135_spill] sm:$0xff] }
  0xd5   : > { %v7658_v49 = vadd.f32 %v1627_v3, %v7409_v1  ;;  %v7661_v62 = vadd.f32 %v1628_v7, %v7412_v39  ;;  %v7667_v36 = vadd.f32 %v1630_v56, %v7418_v55  ;;  %v7670_v13 = vadd.f32 %v1631_v8, %v7421_v15  ;;  %11589 = vst [vmem:[#allocation38_spill] sm:$0xff] %v7739_v31  ;;  %v7754_v58 = vld [vmem:[%s5989_s25 + $0x58] sm:$0x3]  ;;  %v11594_v7 = vld [vmem:[#allocation25_spill] sm:$0xff] }
  0xd6   : > { %11552 = vst [vmem:[#allocation40_spill] sm:$0xff] %v7646_v20  ;;  %11553 = vst [vmem:[#allocation42_spill] sm:$0xff] %v7649_v37  ;;  %v7673_v23 = vadd.f32 %v1632_v45, %v7424_v34  ;;  %v7676_v27 = vadd.f32 %v1633_v17, %v7427_v59  ;;  %v7679_v1 = vadd.f32 %v1634_v60, %v7430_v61  ;;  %v11568_v34 = vld [vmem:[#allocation122_spill] sm:$0xff]  ;;  %v11570_v59 = vld [vmem:[#allocation123_spill] sm:$0xff] }
  0xd7   : > { %11554 = vst [vmem:[#allocation43_spill] sm:$0xff] %v7652_v0  ;;  %11555 = vst [vmem:[#allocation45_spill] sm:$0xff] %v7655_v53  ;;  %v7682_v39 = vadd.f32 %v1635_v16, %v7433_v19  ;;  %v7685_v63 = vadd.f32 %v1636_v18, %v7436_v38  ;;  %v7688_v55 = vadd.f32 %v1637_v32, %v7439_v41  ;;  %v11572_v61 = vld [vmem:[#allocation124_spill] sm:$0xff]  ;;  %v11578_v41 = vld [vmem:[#allocation127_spill] sm:$0xff] }
  0xd8   : > { %11556 = vst [vmem:[#allocation46_spill] sm:$0xff] %v7658_v49  ;;  %11557 = vst [vmem:[#allocation48_spill] sm:$0xff] %v7661_v62  ;;  %v7691_v15 = vadd.f32 %v1638_v24, %v7442_v21  ;;  %v7694_v22 = vadd.f32 %v1639_v29, %v11568_v34  ;;  %v7697_v14 = vadd.f32 %v1640_v43, %v11570_v59  ;;  %v11580_v21 = vld [vmem:[#allocation21_spill] sm:$0xff]  ;;  %v11582_v29 = vld [vmem:[#allocation128_spill] sm:$0xff] }
  0xd9   : > { %11559 = vst [vmem:[#allocation50_spill] sm:$0xff] %v7667_v36  ;;  %11560 = vst [vmem:[#allocation51_spill] sm:$0xff] %v7670_v13  ;;  %v7700_v19 = vadd.f32 %v1641_v52, %v11572_v61  ;;  %v7703_v38 = vadd.f32 %v1642_v33, %v11574_v44  ;;  %v7706_v25 = vadd.f32 %v1643_v54, %v11576_v26  ;;  %v11585_v24 = vld [vmem:[#allocation129_spill] sm:$0xff]  ;;  %v11586_v33 = vld [vmem:[#allocation131_spill] sm:$0xff] }
  0xda   : > { %11561 = vst [vmem:[#allocation53_spill] sm:$0xff] %v7673_v23  ;;  %11562 = vst [vmem:[#allocation55_spill] sm:$0xff] %v7676_v27  ;;  %v7709_v9 = vadd.f32 %v1644_v5, %v11578_v41  ;;  %v7712_v2 = vadd.f32 %v1645_v28, %v11580_v21  ;;  %v7715_v43 = vadd.f32 %v1646_v12, %v11582_v29  ;;  %v7728_v54 = vld [vmem:[%s10950_s1 + $0x11] ss:$0 sm:$0xff]  ;;  %v11587_v5 = vld [vmem:[#allocation132_spill] sm:$0xff] }
  0xdb   : > { %11563 = vst [vmem:[#allocation56_spill] sm:$0xff] %v7679_v1  ;;  %11564 = vst [vmem:[#allocation58_spill] sm:$0xff] %v7682_v39  ;;  %v7719_v52 = vmul.f32 %v11585_v24, %v11584_v48  ;;  %v7723_v51 = vmul.f32 %v11586_v33, %v11584_v48  ;;  %v7732_v28 = vmul.f32 %v7728_v54, %v11587_v5  ;;  %v11588_v12 = vld [vmem:[#allocation133_spill] sm:$0xff]  ;;  %v11593_v3 = vld [vmem:[#allocation136_spill] sm:$0xff] }
  0xdc   : > { %11565 = vst [vmem:[#allocation60_spill] sm:$0xff] %v7685_v63  ;;  %11566 = vst [vmem:[#allocation61_spill] sm:$0xff] %v7688_v55  ;;  %v7736_v32 = vmul.f32 %v7728_v54, %v11588_v12  ;;  %v7743_v18 = vmul.f32 %v7739_v31, %v7728_v54  ;;  %v7747_v16 = vmul.f32 %v7728_v54, %v11590_v47  ;;  %v11596_v34 = vld [vmem:[#allocation137_spill] sm:$0xff]  ;;  %v11597_v61 = vld [vmem:[#allocation138_spill] sm:$0xff] }
  0xdd   : > { %11567 = vst [vmem:[#allocation35_spill] sm:$0xff] %v7691_v15  ;;  %11569 = vst [vmem:[#allocation63_spill] sm:$0xff] %v7694_v22  ;;  %v7751_v56 = vmul.f32 %v7728_v54, %v11591_v46  ;;  %v7758_v8 = vmul.f32 %v7754_v58, %v7728_v54  ;;  %v7762_v45 = vmul.f32 %v7728_v54, %v11593_v3  ;;  %v7784_v26 = vld [vmem:[%s5989_s25 + $0x88] sm:$0x3]  ;;  %v11600_v48 = vld [vmem:[#allocation97_spill] sm:$0xff]  ;;  %v1780_v39 = vrot.slane %v7719_v52, 1 }
  0xde   : > { %11571 = vst [vmem:[#allocation65_spill] sm:$0xff] %v7697_v14  ;;  %11573 = vst [vmem:[#allocation66_spill] sm:$0xff] %v7700_v19  ;;  %v7766_v17 = vmul.f32 %v7728_v54, %v11594_v7  ;;  %v7773_v60 = vmul.f32 %v7769_v57, %v7728_v54  ;;  %v7777_v59 = vmul.f32 %v7728_v54, %v11596_v34  ;;  %v11599_v21 = vld [vmem:[#allocation106_spill] sm:$0xff]  ;;  %v7799_v34 = vld [vmem:[%s5989_s25 + $0xa0] sm:$0x3]  ;;  %v1785_v23 = vrot.slane %v7732_v28, 1 }
  0xdf   : > { %11575 = vst [vmem:[#allocation68_spill] sm:$0xff] %v7703_v38  ;;  %11577 = vst [vmem:[#allocation70_spill] sm:$0xff] %v7706_v25  ;;  %v7781_v44 = vmul.f32 %v7728_v54, %v11597_v61  ;;  %v7788_v41 = vmul.f32 %v7784_v26, %v7728_v54  ;;  %v7792_v29 = vmul.f32 %v7728_v54, %v11599_v21  ;;  %v11602_v7 = vld [vmem:[#allocation107_spill] sm:$0xff]  ;;  %v7814_v21 = vld [vmem:[%s5989_s25 + $0xb8] sm:$0x3]  ;;  %v1786_v13 = vrot.slane %v7736_v32, 1 }
  0xe0   : > { %11579 = vst [vmem:[#allocation71_spill] sm:$0xff] %v7709_v9  ;;  %11581 = vst [vmem:[#allocation73_spill] sm:$0xff] %v7712_v2  ;;  %v7803_v61 = vmul.f32 %v7799_v34, %v7728_v54  ;;  %v7807_v3 = vmul.f32 %v7728_v54, %v11602_v7  ;;  %v11605_v46 = vld [vmem:[#allocation10_spill] sm:$0xff]  ;;  %v7829_v7 = vld [vmem:[%s5989_s25 + $0xd0] sm:$0x3]  ;;  %v1790_v49 = vrot.slane %v7747_v16, 1 }
  0xe1   : > { %11583 = vst [vmem:[#allocation75_spill] sm:$0xff] %v7715_v43  ;;  %11592 = vst [vmem:[#allocation76_spill] sm:$0xff] %v7754_v58  ;;  %v7822_v47 = vmul.f32 %v7728_v54, %v11605_v46  ;;  %v11608_v12 = vld [vmem:[#allocation13_spill] sm:$0xff]  ;;  %v7844_v46 = vld [vmem:[%s5989_s25 + $0xe8] sm:$0x3]  ;;  %v1793_v20 = vrot.slane %v7758_v8, 1  ;;  %v7977_v35 = vsel %vm346_vm1, %v1785_v23, %v1786_v13 }
  0xe2   : > { %11595 = vst [vmem:[#allocation78_spill] sm:$0xff] %v7769_v57  ;;  %11598 = vst [vmem:[#allocation80_spill] sm:$0xff] %v7784_v26  ;;  %v7796_v57 = vmul.f32 %v7728_v54, %v11600_v48  ;;  %v11603_v26 = vld [vmem:[#allocation130_spill] sm:$0xff]  ;;  %v7818_v48 = vmul.f32 %v7814_v21, %v7728_v54  ;;  %v7837_v5 = vmul.f32 %v7728_v54, %v11608_v12  ;;  %v7859_v12 = vld [vmem:[%s5989_s25 + $0x100] sm:$0x3]  ;;  %v1798_v16 = vrot.slane %v7773_v60, 1 }
  0xe3   : > { %11601 = vst [vmem:[#allocation81_spill] sm:$0xff] %v7799_v34  ;;  %v7811_v58 = vmul.f32 %v7728_v54, %v11603_v26  ;;  %11604 = vst [vmem:[#allocation83_spill] sm:$0xff] %v7814_v21  ;;  %v11606_v34 = vld [vmem:[#allocation11_spill] sm:$0xff]  ;;  %v7833_v26 = vmul.f32 %v7829_v7, %v7728_v54  ;;  %v11609_v21 = vld [vmem:[#allocation26_spill] sm:$0xff]  ;;  %v1808_v8 = vrot.slane %v7803_v61, 1  ;;  %v1810_v23 = vrot.slane %v7807_v3, 1 }
  0xe4   : > { %v7826_v31 = vmul.f32 %v7728_v54, %v11606_v34  ;;  %11607 = vst [vmem:[#allocation84_spill] sm:$0xff] %v7829_v7  ;;  %v7841_v33 = vmul.f32 %v7728_v54, %v11609_v21  ;;  %11610 = vst [vmem:[#allocation89_spill] sm:$0xff] %v7844_v46  ;;  %v7848_v34 = vmul.f32 %v7844_v46, %v7728_v54  ;;  %v11611_v24 = vld [vmem:[#allocation14_spill] sm:$0xff]  ;;  %v11612_v7 = vld [vmem:[#allocation19_spill] sm:$0xff]  ;;  %v1815_v60 = vrot.slane %v7822_v47, 1 }
  0xe5   : > { %v7852_v43 = vmul.f32 %v7728_v54, %v11611_v24  ;;  %v7856_v2 = vmul.f32 %v7728_v54, %v11612_v7  ;;  %11613 = vst [vmem:[#allocation99_spill] sm:$0xff] %v7859_v12  ;;  %v7863_v21 = vmul.f32 %v7859_v12, %v7728_v54  ;;  %v11614_v9 = vld [vmem:[#allocation23_spill] sm:$0xff]  ;;  %v11615_v46 = vld [vmem:[#allocation24_spill] sm:$0xff]  ;;  %v11618_v12 = vld [vmem:[#allocation30_spill] sm:$0xff] }
  0xe6   : > { %v7867_v25 = vmul.f32 %v7728_v54, %v11614_v9  ;;  %v7871_v38 = vmul.f32 %v7728_v54, %v11615_v46  ;;  %v7874_v24 = vld [vmem:[%s5989_s25 + $0x118] sm:$0x3]  ;;  %v7886_v9 = vmul.f32 %v7728_v54, %v11618_v12  ;;  %v7889_v22 = vld [vmem:[%s5989_s25 + $0x130] sm:$0x3]  ;;  %v11621_v55 = vld [vmem:[#allocation34_spill] sm:$0xff]  ;;  %v1821_v61 = vrot.slane %v7841_v33, 1 }
  0xe7   : > { %11616 = vst [vmem:[#allocation5_spill] sm:$0xff] %v7874_v24  ;;  %v7878_v7 = vmul.f32 %v7874_v24, %v7728_v54  ;;  %v11617_v19 = vld [vmem:[#allocation28_spill] sm:$0xff]  ;;  %11619 = vst [vmem:[#allocation6_spill] sm:$0xff] %v7889_v22  ;;  %v7893_v46 = vmul.f32 %v7889_v22, %v7728_v54  ;;  %v11620_v15 = vld [vmem:[#allocation31_spill] sm:$0xff]  ;;  %v1781_v22 = vrot.slane %v7723_v51, 1 }
  0xe8   : > { %v7882_v14 = vmul.f32 %v7728_v54, %v11617_v19  ;;  %v7897_v24 = vmul.f32 %v7728_v54, %v11620_v15  ;;  %v7901_v19 = vmul.f32 %v7728_v54, %v11621_v55  ;;  %v7904_v63 = vld [vmem:[%s5989_s25 + $0x148] sm:$0x3]  ;;  %v11623_v1 = vld [vmem:[#allocation29_spill] sm:$0xff]  ;;  %v11624_v27 = vld [vmem:[#allocation36_spill] sm:$0xff] }
  0xe9   : > { %11622 = vst [vmem:[#allocation7_spill] sm:$0xff] %v7904_v63  ;;  %v7908_v12 = vmul.f32 %v7904_v63, %v7728_v54  ;;  %v7914_v15 = vmul.f32 %v7728_v54, %v11623_v1  ;;  %v7918_v55 = vmul.f32 %v7728_v54, %v11624_v27  ;;  %v7923_v36 = vld [vmem:[%s5989_s25 + $0x160] sm:$0x3]  ;;  %v7930_v63 = vld [vmem:[%s5989_s25 + $0x168] sm:$0xff]  ;;  %v7937_v1 = vld [vmem:[%s5989_s25 + $0x170] sm:$0xff]  ;;  %v7967_v53 = vsel %vm346_vm1, %v1780_v39, %v1781_v22 }
  0xea   : > { %11625 = vst [vmem:[#allocation8_spill] sm:$0xff] %v7923_v36  ;;  %v7927_v52 = vmul.f32 %v7923_v36, %v7728_v54  ;;  %11626 = vst [vmem:[#allocation9_spill] sm:$0xff] %v7930_v63  ;;  %v7934_v51 = vmul.f32 %v7930_v63, %v7728_v54  ;;  %v7941_v27 = vmul.f32 %v7937_v1, %v7728_v54  ;;  %v7944_v28 = vld [vmem:[%s5989_s25 + $0x178] sm:$0x3]  ;;  %v7951_v36 = vld [vmem:[%s5989_s25 + $0x180] sm:$0xff]  ;;  %v1800_v39 = vrot.slane %v7777_v59, 1 }
  0xeb   : > { %11627 = vst [vmem:[#allocation12_spill] sm:$0xff] %v7937_v1  ;;  %11628 = vst [vmem:[#allocation15_spill] sm:$0xff] %v7944_v28  ;;  %v7948_v32 = vmul.f32 %v7944_v28, %v7728_v54  ;;  %v7955_v6 = vmul.f32 %v7951_v36, %v7728_v54  ;;  %v7958_v63 = vld [vmem:[%s5989_s25 + $0x188] sm:$0xff]  ;;  %v1788_v1 = vrot.slane %v7743_v18, 1  ;;  %v11631_v28 = vld [vmem:[#allocation101_spill] sm:$0xff]  ;;  %v1796_v18 = vrot.slane %v7766_v17, 1 }
  0xec   : > { %11629 = vst [vmem:[#allocation109_spill] sm:$0xff] %v7951_v36  ;;  %11630 = vst [vmem:[#allocation102_spill] sm:$0xff] %v7958_v63  ;;  %v7962_v62 = vmul.f32 %v7958_v63, %v7728_v54  ;;  %v11632_v0 = vrot.slane %v11631_v28, 1  ;;  %v1791_v36 = vrot.slane %v7751_v56, 1  ;;  %v1795_v54 = vrot.slane %v7762_v45, 1 }
  0xed   : > { %v1801_v28 = vrot.slane %v7781_v44, 1  ;;  %v1806_v56 = vrot.slane %v7796_v57, 1  ;;  %v1811_v45 = vrot.slane %v7811_v58, 1  ;;  %v1813_v17 = vrot.slane %v7818_v48, 1 }
  0xee   : > { %v7972_v37 = vsel %vm346_vm1, %v1781_v22, %v11632_v0  ;;  %v1803_v0 = vrot.slane %v7788_v41, 1  ;;  %v1805_v22 = vrot.slane %v7792_v29, 1  ;;  %v1816_v59 = vrot.slane %v7826_v31, 1 }
  0xef   : > { %v1818_v44 = vrot.slane %v7833_v26, 1  ;;  %v1789_v41 = vsel %vm346_vm1, %v1786_v13, %v1788_v1  ;;  %v1792_v29 = vsel %vm346_vm1, %v1790_v49, %v1791_v36  ;;  %v1820_v57 = vrot.slane %v7837_v5, 1 }
  0xf0   : > { %v1794_v3 = vsel %vm346_vm1, %v1791_v36, %v1793_v20  ;;  %v1797_v58 = vsel %vm346_vm1, %v1795_v54, %v1796_v18  ;;  %v1799_v48 = vsel %vm346_vm1, %v1796_v18, %v1798_v16  ;;  %v1802_v47 = vsel %vm346_vm1, %v1800_v39, %v1801_v28 }
  0xf1   : > { %v1804_v31 = vsel %vm346_vm1, %v1801_v28, %v1803_v0  ;;  %v1807_v26 = vsel %vm346_vm1, %v1805_v22, %v1806_v56  ;;  %v1809_v13 = vsel %vm346_vm1, %v1806_v56, %v1808_v8  ;;  %v1812_v49 = vsel %vm346_vm1, %v1810_v23, %v1811_v45 }
  0xf2   : > { %v1814_v1 = vsel %vm346_vm1, %v1811_v45, %v1813_v17  ;;  %v1817_v33 = vsel %vm346_vm1, %v1815_v60, %v1816_v59  ;;  %v1819_v20 = vsel %vm346_vm1, %v1816_v59, %v1818_v44  ;;  %v1823_v36 = vrot.slane %v7848_v34, 1 }
  0xf3   : > { %v1822_v5 = vsel %vm346_vm1, %v1820_v57, %v1821_v61  ;;  %v1825_v54 = vrot.slane %v7852_v43, 1  ;;  %v1826_v18 = vrot.slane %v7856_v2, 1  ;;  %v1828_v16 = vrot.slane %v7863_v21, 1  ;;  %v11633_v57 = vld [vmem:[#allocation108_spill] sm:$0xff] }
  0xf4   : > { %v1830_v39 = vrot.slane %v7867_v25, 1  ;;  %v1831_v28 = vrot.slane %v7871_v38, 1  ;;  %v1833_v0 = vrot.slane %v7878_v7, 1  ;;  %v1835_v22 = vrot.slane %v7882_v14, 1 }
  0xf5   : > { %v1836_v56 = vrot.slane %v7886_v9, 1  ;;  %v1838_v34 = vrot.slane %v7893_v46, 1  ;;  %v1840_v8 = vrot.slane %v7897_v24, 1  ;;  %v1841_v43 = vrot.slane %v7901_v19, 1 }
  0xf6   : > { %v1843_v2 = vrot.slane %v7908_v12, 1  ;;  %v1845_v21 = vrot.slane %v7914_v15, 1  ;;  %v1846_v25 = vrot.slane %v7918_v55, 1  ;;  %v1848_v38 = vrot.slane %v7927_v52, 1 }
  0xf7   : > { %v1824_v7 = vsel %vm346_vm1, %v1821_v61, %v1823_v36  ;;  %v1850_v14 = vrot.slane %v7934_v51, 1  ;;  %v1851_v9 = vrot.slane %v7941_v27, 1  ;;  %v1853_v46 = vrot.slane %v7948_v32, 1 }
  0xf8   : > { %v1827_v24 = vsel %vm346_vm1, %v1825_v54, %v1826_v18  ;;  %v1829_v19 = vsel %vm346_vm1, %v1826_v18, %v1828_v16  ;;  %v1855_v12 = vrot.slane %v7955_v6, 1  ;;  %v1856_v15 = vrot.slane %v7962_v62, 1 }
  0xf9   : > { %v1832_v55 = vsel %vm346_vm1, %v1830_v39, %v1831_v28  ;;  %v1834_v52 = vsel %vm346_vm1, %v1831_v28, %v1833_v0  ;;  %v1837_v23 = vsel %vm346_vm1, %v1835_v22, %v1836_v56  ;;  %v1839_v51 = vsel %vm346_vm1, %v1836_v56, %v1838_v34  ;;  %v11637_v39 = vld [vmem:[#allocation40_spill] sm:$0xff] }
  0xfa   : > { %v1842_v27 = vsel %vm346_vm1, %v1840_v8, %v1841_v43  ;;  %v1844_v32 = vsel %vm346_vm1, %v1841_v43, %v1843_v2  ;;  %v1847_v45 = vsel %vm346_vm1, %v1845_v21, %v1846_v25  ;;  %v1849_v17 = vsel %vm346_vm1, %v1846_v25, %v1848_v38 }
  0xfb   : > { %v1852_v6 = vsel %vm346_vm1, %v1850_v14, %v1851_v9  ;;  %v1854_v62 = vsel %vm346_vm1, %v1851_v9, %v1853_v46  ;;  %v8046_v60 = vadd.f32 %v7967_v53, %v7622_v10  ;;  %v8050_v59 = vadd.f32 %v7972_v37, %v7625_v30  ;;  %v11635_v37 = vld [vmem:[#allocation37_spill] sm:$0xff]  ;;  %v11669_v14 = vld [vmem:[#allocation63_spill] sm:$0xff] }
  0xfc   : > { %v1857_v44 = vsel %vm346_vm1, %v1855_v12, %v1856_v15  ;;  %v11634_v61 = vrot.slane %v11633_v57, 1  ;;  %v8058_v54 = vadd.f32 %v7977_v35, %v7628_v42  ;;  %v8061_v18 = vadd.f32 %v1789_v41, %v7631_v11  ;;  %v11639_v42 = vld [vmem:[#allocation42_spill] sm:$0xff]  ;;  %v11641_v11 = vld [vmem:[#allocation43_spill] sm:$0xff]  ;;  %v11671_v46 = vld [vmem:[#allocation65_spill] sm:$0xff] }
  0xfd   : > { %v8064_v10 = vadd.f32 %v1792_v29, %v7634_v4  ;;  %v8067_v53 = vadd.f32 %v1794_v3, %v7637_v40  ;;  %v8070_v30 = vadd.f32 %v1797_v58, %v7640_v50  ;;  %v8073_v16 = vadd.f32 %v1799_v48, %v11635_v37  ;;  %v11643_v4 = vld [vmem:[#allocation45_spill] sm:$0xff]  ;;  %v11645_v40 = vld [vmem:[#allocation46_spill] sm:$0xff]  ;;  %v11647_v50 = vld [vmem:[#allocation48_spill] sm:$0xff] }
  0xfe   : > { %v1859_v36 = vsel %vm346_vm1, %v1856_v15, %v11634_v61  ;;  %v8076_v28 = vadd.f32 %v1802_v47, %v11637_v39  ;;  %v8079_v35 = vadd.f32 %v1804_v31, %v11639_v42  ;;  %v8082_v41 = vadd.f32 %v1807_v26, %v11641_v11  ;;  %v11649_v48 = vld [vmem:[#allocation32_spill] sm:$0xff]  ;;  %v11651_v47 = vld [vmem:[#allocation50_spill] sm:$0xff]  ;;  %v11653_v31 = vld [vmem:[#allocation51_spill] sm:$0xff] }
  0xff   : > { %11636 = vst [vmem:[#allocation139_spill] sm:$0xff] %v8073_v16  ;;  %v8085_v29 = vadd.f32 %v1809_v13, %v11643_v4  ;;  %v8088_v3 = vadd.f32 %v1812_v49, %v11645_v40  ;;  %v8091_v58 = vadd.f32 %v1814_v1, %v11647_v50  ;;  %v8094_v0 = vadd.f32 %v1817_v33, %v11649_v48  ;;  %v11655_v26 = vld [vmem:[#allocation53_spill] sm:$0xff]  ;;  %v11657_v13 = vld [vmem:[#allocation55_spill] sm:$0xff]  ;;  %v11659_v49 = vld [vmem:[#allocation56_spill] sm:$0xff] }
 0x100   : > { %11638 = vst [vmem:[#allocation105_spill] sm:$0xff] %v8076_v28  ;;  %11640 = vst [vmem:[#allocation110_spill] sm:$0xff] %v8079_v35  ;;  %v8097_v22 = vadd.f32 %v1819_v20, %v11651_v47  ;;  %v8100_v56 = vadd.f32 %v1822_v5, %v11653_v31  ;;  %v8103_v34 = vadd.f32 %v1824_v7, %v11655_v26  ;;  %v11661_v1 = vld [vmem:[#allocation58_spill] sm:$0xff]  ;;  %v11663_v33 = vld [vmem:[#allocation60_spill] sm:$0xff] }
 0x101   : > { %11642 = vst [vmem:[#allocation111_spill] sm:$0xff] %v8082_v41  ;;  %11644 = vst [vmem:[#allocation16_spill] sm:$0xff] %v8085_v29  ;;  %v8106_v8 = vadd.f32 %v1827_v24, %v11657_v13  ;;  %v8109_v43 = vadd.f32 %v1829_v19, %v11659_v49  ;;  %v8112_v2 = vadd.f32 %v1832_v55, %v11661_v1  ;;  %v11665_v20 = vld [vmem:[#allocation61_spill] sm:$0xff]  ;;  %v11667_v5 = vld [vmem:[#allocation35_spill] sm:$0xff] }
 0x102   : > { %11646 = vst [vmem:[#allocation112_spill] sm:$0xff] %v8088_v3  ;;  %11648 = vst [vmem:[#allocation113_spill] sm:$0xff] %v8091_v58  ;;  %v8115_v21 = vadd.f32 %v1834_v52, %v11663_v33  ;;  %v8118_v25 = vadd.f32 %v1837_v23, %v11665_v20  ;;  %v8121_v38 = vadd.f32 %v1839_v51, %v11667_v5  ;;  %v8126_v7 = vld [vmem:[%s10950_s1 + $0x12] ss:$0 sm:$0xff]  ;;  %v11673_v19 = vld [vmem:[#allocation66_spill] sm:$0xff] }
 0x103   : > { %11650 = vst [vmem:[#allocation114_spill] sm:$0xff] %v8094_v0  ;;  %11652 = vst [vmem:[#allocation115_spill] sm:$0xff] %v8097_v22  ;;  %v8129_v9 = vadd.f32 %v1842_v27, %v11669_v14  ;;  %v8132_v24 = vadd.f32 %v1844_v32, %v11671_v46  ;;  %v8135_v12 = vadd.f32 %v1847_v45, %v11673_v19  ;;  %v11675_v15 = vld [vmem:[#allocation68_spill] sm:$0xff]  ;;  %v11677_v52 = vld [vmem:[#allocation70_spill] sm:$0xff] }
 0x104   : > { %11654 = vst [vmem:[#allocation116_spill] sm:$0xff] %v8100_v56  ;;  %11656 = vst [vmem:[#allocation117_spill] sm:$0xff] %v8103_v34  ;;  %v8138_v55 = vadd.f32 %v1849_v17, %v11675_v15  ;;  %v8141_v23 = vadd.f32 %v1852_v6, %v11677_v52  ;;  %v11679_v51 = vld [vmem:[#allocation71_spill] sm:$0xff]  ;;  %v11681_v61 = vld [vmem:[#allocation73_spill] sm:$0xff] }
 0x105   : > { %11658 = vst [vmem:[#allocation118_spill] sm:$0xff] %v8106_v8  ;;  %11660 = vst [vmem:[#allocation119_spill] sm:$0xff] %v8109_v43  ;;  %v8144_v57 = vadd.f32 %v1854_v62, %v11679_v51  ;;  %v8147_v37 = vadd.f32 %v1857_v44, %v11681_v61  ;;  %v11683_v27 = vld [vmem:[#allocation75_spill] sm:$0xff]  ;;  %v11685_v32 = vld [vmem:[#allocation129_spill] sm:$0xff] }
 0x106   : > { %11662 = vst [vmem:[#allocation20_spill] sm:$0xff] %v8112_v2  ;;  %11664 = vst [vmem:[#allocation120_spill] sm:$0xff] %v8115_v21  ;;  %v8150_v39 = vadd.f32 %v1859_v36, %v11683_v27  ;;  %v1929_v42 = vmul.f32 %v11685_v32, %v8126_v7  ;;  %v11686_v45 = vld [vmem:[#allocation131_spill] sm:$0xff]  ;;  %v5738_v17 = vld [vmem:[%s5989_s25 + $0x28] sm:$0x3] }
 0x107   : > { %11666 = vst [vmem:[#allocation121_spill] sm:$0xff] %v8118_v25  ;;  %11668 = vst [vmem:[#allocation86_spill] sm:$0xff] %v8121_v38  ;;  %v1930_v11 = vmul.f32 %v11686_v45, %v8126_v7  ;;  %v1931_v4 = vmul.f32 %v5738_v17, %v8126_v7  ;;  %v11687_v6 = vld [vmem:[#allocation132_spill] sm:$0xff]  ;;  %v11688_v62 = vld [vmem:[#allocation133_spill] sm:$0xff] }
 0x108   : > { %11670 = vst [vmem:[#allocation88_spill] sm:$0xff] %v8129_v9  ;;  %11672 = vst [vmem:[#allocation90_spill] sm:$0xff] %v8132_v24  ;;  %v1932_v40 = vmul.f32 %v11687_v6, %v8126_v7  ;;  %v1933_v50 = vmul.f32 %v11688_v62, %v8126_v7  ;;  %v11689_v44 = vld [vmem:[#allocation38_spill] sm:$0xff]  ;;  %v11691_v31 = vld [vmem:[#allocation135_spill] sm:$0xff]  ;;  %v2025_v34 = vrot.slane %v1929_v42, 2 }
 0x109   : > { %11674 = vst [vmem:[#allocation92_spill] sm:$0xff] %v8135_v12  ;;  %11676 = vst [vmem:[#allocation122_spill] sm:$0xff] %v8138_v55  ;;  %v1934_v48 = vmul.f32 %v11689_v44, %v8126_v7  ;;  %v11690_v36 = vld [vmem:[#allocation134_spill] sm:$0xff]  ;;  %v8170_v26 = vmul.f32 %v11691_v31, %v8126_v7  ;;  %v11692_v13 = vld [vmem:[#allocation76_spill] sm:$0xff]  ;;  %v2028_v56 = vrot.slane %v1931_v4, 2 }
 0x10a   : > { %11678 = vst [vmem:[#allocation123_spill] sm:$0xff] %v8141_v23  ;;  %11680 = vst [vmem:[#allocation124_spill] sm:$0xff] %v8144_v57  ;;  %v8166_v47 = vmul.f32 %v11690_v36, %v8126_v7  ;;  %v8174_v49 = vmul.f32 %v11692_v13, %v8126_v7  ;;  %v11693_v1 = vld [vmem:[#allocation136_spill] sm:$0xff]  ;;  %v11694_v20 = vld [vmem:[#allocation25_spill] sm:$0xff]  ;;  %v2030_v22 = vrot.slane %v1932_v40, 2  ;;  %v2031_v0 = vrot.slane %v1933_v50, 2 }
 0x10b   : > { %11682 = vst [vmem:[#allocation125_spill] sm:$0xff] %v8147_v37  ;;  %11684 = vst [vmem:[#allocation126_spill] sm:$0xff] %v8150_v39  ;;  %v8178_v33 = vmul.f32 %v11693_v1, %v8126_v7  ;;  %v8182_v5 = vmul.f32 %v11694_v20, %v8126_v7  ;;  %v11695_v14 = vld [vmem:[#allocation78_spill] sm:$0xff]  ;;  %v11696_v19 = vld [vmem:[#allocation137_spill] sm:$0xff]  ;;  %v2033_v41 = vrot.slane %v1934_v48, 2  ;;  %v2036_v35 = vrot.slane %v8170_v26, 2 }
 0x10c   : > { %v8186_v46 = vmul.f32 %v11695_v14, %v8126_v7  ;;  %v8190_v15 = vmul.f32 %v11696_v19, %v8126_v7  ;;  %v11697_v52 = vld [vmem:[#allocation138_spill] sm:$0xff]  ;;  %v11698_v61 = vld [vmem:[#allocation80_spill] sm:$0xff]  ;;  %v11700_v17 = vld [vmem:[#allocation97_spill] sm:$0xff]  ;;  %v8344_v28 = vsel %vm1465_vm3, %v2030_v22, %v2031_v0 }
 0x10d   : > { %v8194_v51 = vmul.f32 %v11697_v52, %v8126_v7  ;;  %v8198_v27 = vmul.f32 %v11698_v61, %v8126_v7  ;;  %v11699_v32 = vld [vmem:[#allocation106_spill] sm:$0xff]  ;;  %v8206_v14 = vmul.f32 %v11700_v17, %v8126_v7  ;;  %v11701_v13 = vld [vmem:[#allocation81_spill] sm:$0xff]  ;;  %v11702_v19 = vld [vmem:[#allocation107_spill] sm:$0xff]  ;;  %v8348_v16 = vsel %vm1465_vm3, %v2031_v0, %v2033_v41 }
 0x10e   : > { %v8202_v45 = vmul.f32 %v11699_v32, %v8126_v7  ;;  %v8210_v44 = vmul.f32 %v11701_v13, %v8126_v7  ;;  %v8214_v52 = vmul.f32 %v11702_v19, %v8126_v7  ;;  %v11703_v20 = vld [vmem:[#allocation130_spill] sm:$0xff]  ;;  %v11704_v1 = vld [vmem:[#allocation83_spill] sm:$0xff]  ;;  %v11707_v62 = vld [vmem:[#allocation84_spill] sm:$0xff]  ;;  %v2043_v26 = vrot.slane %v8186_v46, 2 }
 0x10f   : > { %v8218_v61 = vmul.f32 %v11703_v20, %v8126_v7  ;;  %v8222_v32 = vmul.f32 %v11704_v1, %v8126_v7  ;;  %v11705_v31 = vld [vmem:[#allocation10_spill] sm:$0xff]  ;;  %v11706_v36 = vld [vmem:[#allocation11_spill] sm:$0xff]  ;;  %v8234_v19 = vmul.f32 %v11707_v62, %v8126_v7  ;;  %v11708_v6 = vld [vmem:[#allocation13_spill] sm:$0xff] }
 0x110   : > { %v8226_v17 = vmul.f32 %v11705_v31, %v8126_v7  ;;  %v8230_v13 = vmul.f32 %v11706_v36, %v8126_v7  ;;  %v8238_v20 = vmul.f32 %v11708_v6, %v8126_v7  ;;  %v11709_v39 = vld [vmem:[#allocation26_spill] sm:$0xff]  ;;  %v11710_v37 = vld [vmem:[#allocation89_spill] sm:$0xff]  ;;  %v11712_v23 = vld [vmem:[#allocation19_spill] sm:$0xff]  ;;  %v2050_v22 = vrot.slane %v8202_v45, 2 }
 0x111   : > { %v8242_v1 = vmul.f32 %v11709_v39, %v8126_v7  ;;  %v8246_v31 = vmul.f32 %v11710_v37, %v8126_v7  ;;  %v11711_v57 = vld [vmem:[#allocation14_spill] sm:$0xff]  ;;  %v8254_v62 = vmul.f32 %v11712_v23, %v8126_v7  ;;  %v11713_v55 = vld [vmem:[#allocation99_spill] sm:$0xff]  ;;  %v11715_v24 = vld [vmem:[#allocation24_spill] sm:$0xff]  ;;  %v2055_v41 = vrot.slane %v8214_v52, 2 }
 0x112   : > { %v8250_v36 = vmul.f32 %v11711_v57, %v8126_v7  ;;  %v8258_v6 = vmul.f32 %v11713_v55, %v8126_v7  ;;  %v11714_v12 = vld [vmem:[#allocation23_spill] sm:$0xff]  ;;  %v8266_v37 = vmul.f32 %v11715_v24, %v8126_v7  ;;  %v11716_v9 = vld [vmem:[#allocation5_spill] sm:$0xff]  ;;  %v11717_v38 = vld [vmem:[#allocation28_spill] sm:$0xff]  ;;  %v2056_v0 = vrot.slane %v8218_v61, 2 }
 0x113   : > { %v8262_v39 = vmul.f32 %v11714_v12, %v8126_v7  ;;  %v8270_v57 = vmul.f32 %v11716_v9, %v8126_v7  ;;  %v8274_v23 = vmul.f32 %v11717_v38, %v8126_v7  ;;  %v11718_v25 = vld [vmem:[#allocation30_spill] sm:$0xff]  ;;  %v11720_v2 = vld [vmem:[#allocation31_spill] sm:$0xff]  ;;  %v2061_v46 = vrot.slane %v8230_v13, 2 }
 0x114   : > { %v8278_v55 = vmul.f32 %v11718_v25, %v8126_v7  ;;  %v11719_v21 = vld [vmem:[#allocation6_spill] sm:$0xff]  ;;  %v8286_v24 = vmul.f32 %v11720_v2, %v8126_v7  ;;  %v11722_v8 = vld [vmem:[#allocation7_spill] sm:$0xff]  ;;  %v2026_v25 = vrot.slane %v1930_v11, 2  ;;  %v11724_v2 = vld [vmem:[#allocation36_spill] sm:$0xff] }
 0x115   : > { %v8282_v12 = vmul.f32 %v11719_v21, %v8126_v7  ;;  %v11721_v43 = vld [vmem:[#allocation34_spill] sm:$0xff]  ;;  %v8294_v38 = vmul.f32 %v11722_v8, %v8126_v7  ;;  %v11723_v21 = vld [vmem:[#allocation29_spill] sm:$0xff]  ;;  %v8302_v3 = vmul.f32 %v11724_v2, %v8126_v7  ;;  %v11727_v11 = vld [vmem:[#allocation12_spill] sm:$0xff] }
 0x116   : > { %v8290_v9 = vmul.f32 %v11721_v43, %v8126_v7  ;;  %v8298_v58 = vmul.f32 %v11723_v21, %v8126_v7  ;;  %v11725_v43 = vld [vmem:[#allocation8_spill] sm:$0xff]  ;;  %v11726_v8 = vld [vmem:[#allocation9_spill] sm:$0xff]  ;;  %v8314_v4 = vmul.f32 %v11727_v11, %v8126_v7  ;;  %v11728_v40 = vld [vmem:[#allocation15_spill] sm:$0xff]  ;;  %v2035_v11 = vrot.slane %v8166_v47, 2 }
 0x117   : > { %v8306_v29 = vmul.f32 %v11725_v43, %v8126_v7  ;;  %v8310_v42 = vmul.f32 %v11726_v8, %v8126_v7  ;;  %v8318_v50 = vmul.f32 %v11728_v40, %v8126_v7  ;;  %v11729_v2 = vld [vmem:[#allocation109_spill] sm:$0xff]  ;;  %v8326_v43 = vmul.f32 %v7958_v63, %v8126_v7  ;;  %v8329_v48 = vld [vmem:[%s5989_s25 + $0x190] sm:$0x3] }
 0x118   : > { %v8322_v21 = vmul.f32 %v11729_v2, %v8126_v7  ;;  %11730 = vst [vmem:[#allocation127_spill] sm:$0xff] %v8329_v48  ;;  %v8333_v8 = vmul.f32 %v8329_v48, %v8126_v7  ;;  %v8338_v40 = vsel %vm1465_vm3, %v2025_v34, %v2026_v25  ;;  %v8341_v2 = vsel %vm1465_vm3, %v2026_v25, %v2028_v56 }
 0x119   : > { %v2038_v63 = vrot.slane %v8174_v49, 2  ;;  %v2040_v7 = vrot.slane %v8178_v33, 2  ;;  %v2041_v47 = vrot.slane %v8182_v5, 2  ;;  %v2045_v34 = vrot.slane %v8190_v15, 2 }
 0x11a   : > { %v2046_v48 = vrot.slane %v8194_v51, 2  ;;  %v2048_v56 = vrot.slane %v8198_v27, 2  ;;  %v2051_v25 = vrot.slane %v8206_v14, 2  ;;  %v2053_v49 = vrot.slane %v8210_v44, 2 }
 0x11b   : > { %v2058_v33 = vrot.slane %v8222_v32, 2  ;;  %v2060_v5 = vrot.slane %v8226_v17, 2  ;;  %v2063_v15 = vrot.slane %v8234_v19, 2  ;;  %v2037_v51 = vsel %vm1465_vm3, %v2035_v11, %v2036_v35 }
 0x11c   : > { %v2065_v27 = vrot.slane %v8238_v20, 2  ;;  %v2066_v14 = vrot.slane %v8242_v1, 2  ;;  %v2068_v44 = vrot.slane %v8246_v31, 2  ;;  %v2039_v52 = vsel %vm1465_vm3, %v2036_v35, %v2038_v63 }
 0x11d   : > { %v2042_v61 = vsel %vm1465_vm3, %v2040_v7, %v2041_v47  ;;  %v2044_v32 = vsel %vm1465_vm3, %v2041_v47, %v2043_v26  ;;  %v2047_v45 = vsel %vm1465_vm3, %v2045_v34, %v2046_v48  ;;  %v2049_v13 = vsel %vm1465_vm3, %v2046_v48, %v2048_v56 }
 0x11e   : > { %v2052_v19 = vsel %vm1465_vm3, %v2050_v22, %v2051_v25  ;;  %v2054_v17 = vsel %vm1465_vm3, %v2051_v25, %v2053_v49  ;;  %v2057_v20 = vsel %vm1465_vm3, %v2055_v41, %v2056_v0  ;;  %v2059_v1 = vsel %vm1465_vm3, %v2056_v0, %v2058_v33 }
 0x11f   : > { %v2062_v31 = vsel %vm1465_vm3, %v2060_v5, %v2061_v46  ;;  %v2064_v63 = vsel %vm1465_vm3, %v2061_v46, %v2063_v15  ;;  %v2070_v35 = vrot.slane %v8250_v36, 2  ;;  %v2067_v11 = vsel %vm1465_vm3, %v2065_v27, %v2066_v14 }
 0x120   : > { %v2069_v7 = vsel %vm1465_vm3, %v2066_v14, %v2068_v44  ;;  %v2071_v48 = vrot.slane %v8254_v62, 2  ;;  %v2073_v47 = vrot.slane %v8258_v6, 2  ;;  %v2075_v26 = vrot.slane %v8262_v39, 2 }
 0x121   : > { %v2076_v34 = vrot.slane %v8266_v37, 2  ;;  %v2078_v56 = vrot.slane %v8270_v57, 2  ;;  %v2080_v22 = vrot.slane %v8274_v23, 2  ;;  %v2081_v25 = vrot.slane %v8278_v55, 2 }
 0x122   : > { %v2083_v36 = vrot.slane %v8282_v12, 2  ;;  %v2085_v49 = vrot.slane %v8286_v24, 2  ;;  %v2086_v41 = vrot.slane %v8290_v9, 2  ;;  %v2088_v62 = vrot.slane %v8294_v38, 2 }
 0x123   : > { %v2090_v6 = vrot.slane %v8298_v58, 2  ;;  %v2091_v39 = vrot.slane %v8302_v3, 2  ;;  %v2093_v37 = vrot.slane %v8306_v29, 2  ;;  %v2072_v57 = vsel %vm1465_vm3, %v2070_v35, %v2071_v48 }
 0x124   : > { %v2095_v23 = vrot.slane %v8310_v42, 2  ;;  %v2096_v55 = vrot.slane %v8314_v4, 2  ;;  %v2098_v12 = vrot.slane %v8318_v50, 2  ;;  %v2074_v24 = vsel %vm1465_vm3, %v2071_v48, %v2073_v47  ;;  %v11732_v48 = vld [vmem:[#allocation105_spill] sm:$0xff] }
 0x125   : > { %v2100_v9 = vrot.slane %v8322_v21, 2  ;;  %v2101_v38 = vrot.slane %v8326_v43, 2  ;;  %v2103_v58 = vrot.slane %v8333_v8, 2  ;;  %v2077_v3 = vsel %vm1465_vm3, %v2075_v26, %v2076_v34 }
 0x126   : > { %v2079_v29 = vsel %vm1465_vm3, %v2076_v34, %v2078_v56  ;;  %v2082_v0 = vsel %vm1465_vm3, %v2080_v22, %v2081_v25  ;;  %v2084_v42 = vsel %vm1465_vm3, %v2081_v25, %v2083_v36  ;;  %v2087_v4 = vsel %vm1465_vm3, %v2085_v49, %v2086_v41 }
 0x127   : > { %v2089_v50 = vsel %vm1465_vm3, %v2086_v41, %v2088_v62  ;;  %v2092_v33 = vsel %vm1465_vm3, %v2090_v6, %v2091_v39  ;;  %v2094_v21 = vsel %vm1465_vm3, %v2091_v39, %v2093_v37  ;;  %v2097_v43 = vsel %vm1465_vm3, %v2095_v23, %v2096_v55  ;;  %v11751_v39 = vld [vmem:[#allocation88_spill] sm:$0xff] }
 0x128   : > { %v2099_v8 = vsel %vm1465_vm3, %v2096_v55, %v2098_v12  ;;  %v8417_v5 = vadd.f32 %v8338_v40, %v8046_v60  ;;  %v8421_v46 = vadd.f32 %v8341_v2, %v8050_v59  ;;  %v2102_v15 = vsel %vm1465_vm3, %v2100_v9, %v2101_v38  ;;  %v11731_v2 = vld [vmem:[#allocation139_spill] sm:$0xff]  ;;  %v11755_v55 = vld [vmem:[#allocation92_spill] sm:$0xff] }
 0x129   : > { %v2104_v27 = vsel %vm1465_vm3, %v2101_v38, %v2103_v58  ;;  %v8427_v14 = vadd.f32 %v8344_v28, %v8058_v54  ;;  %v8431_v44 = vadd.f32 %v8348_v16, %v8061_v18  ;;  %v8434_v35 = vadd.f32 %v2037_v51, %v8064_v10  ;;  %v11733_v54 = vld [vmem:[#allocation110_spill] sm:$0xff]  ;;  %v11734_v18 = vld [vmem:[#allocation111_spill] sm:$0xff]  ;;  %v11735_v10 = vld [vmem:[#allocation16_spill] sm:$0xff] }
 0x12a   : > { %v8437_v60 = vadd.f32 %v2039_v52, %v8067_v53  ;;  %v8440_v59 = vadd.f32 %v2042_v61, %v8070_v30  ;;  %v8443_v40 = vadd.f32 %v2044_v32, %v11731_v2  ;;  %v8446_v47 = vadd.f32 %v2047_v45, %v11732_v48  ;;  %v11736_v53 = vld [vmem:[#allocation112_spill] sm:$0xff]  ;;  %v11737_v30 = vld [vmem:[#allocation113_spill] sm:$0xff]  ;;  %v11738_v32 = vld [vmem:[#allocation114_spill] sm:$0xff] }
 0x12b   : > { %v8449_v28 = vadd.f32 %v2049_v13, %v11733_v54  ;;  %v8452_v16 = vadd.f32 %v2052_v19, %v11734_v18  ;;  %v8455_v51 = vadd.f32 %v2054_v17, %v11735_v10  ;;  %v8458_v52 = vadd.f32 %v2057_v20, %v11736_v53  ;;  %v11739_v45 = vld [vmem:[#allocation115_spill] sm:$0xff]  ;;  %v11740_v13 = vld [vmem:[#allocation116_spill] sm:$0xff]  ;;  %v11741_v19 = vld [vmem:[#allocation117_spill] sm:$0xff] }
 0x12c   : > { %v8461_v61 = vadd.f32 %v2059_v1, %v11737_v30  ;;  %v8464_v26 = vadd.f32 %v2062_v31, %v11738_v32  ;;  %v8467_v34 = vadd.f32 %v2064_v63, %v11739_v45  ;;  %v8470_v56 = vadd.f32 %v2067_v11, %v11740_v13  ;;  %v11742_v17 = vld [vmem:[#allocation118_spill] sm:$0xff]  ;;  %v11743_v20 = vld [vmem:[#allocation119_spill] sm:$0xff]  ;;  %v11744_v1 = vld [vmem:[#allocation20_spill] sm:$0xff] }
 0x12d   : > { %v8473_v22 = vadd.f32 %v2069_v7, %v11741_v19  ;;  %v8476_v25 = vadd.f32 %v2072_v57, %v11742_v17  ;;  %v8479_v36 = vadd.f32 %v2074_v24, %v11743_v20  ;;  %v8482_v49 = vadd.f32 %v2077_v3, %v11744_v1  ;;  %v11745_v31 = vld [vmem:[#allocation120_spill] sm:$0xff]  ;;  %v11747_v63 = vld [vmem:[#allocation121_spill] sm:$0xff]  ;;  %v11749_v11 = vld [vmem:[#allocation86_spill] sm:$0xff] }
 0x12e   : > { %v8485_v41 = vadd.f32 %v2079_v29, %v11745_v31  ;;  %v8488_v62 = vadd.f32 %v2082_v0, %v11747_v63  ;;  %v8491_v6 = vadd.f32 %v2084_v42, %v11749_v11  ;;  %v4725_v7 = vld [vmem:[%s10950_s1 + $0x13] ss:$0 sm:$0xff]  ;;  %v8497_v37 = vadd.f32 %v2087_v4, %v11751_v39  ;;  %v11753_v57 = vld [vmem:[#allocation90_spill] sm:$0xff]  ;;  %v11761_v3 = vld [vmem:[#allocation124_spill] sm:$0xff] }
 0x12f   : > { %v8500_v23 = vadd.f32 %v2089_v50, %v11753_v57  ;;  %v8503_v12 = vadd.f32 %v2092_v33, %v11755_v55  ;;  %v11757_v24 = vld [vmem:[#allocation122_spill] sm:$0xff]  ;;  %v11759_v38 = vld [vmem:[#allocation123_spill] sm:$0xff]  ;;  %v8512_v29 = vadd.f32 %v2099_v8, %v11761_v3  ;;  %v11763_v0 = vld [vmem:[#allocation125_spill] sm:$0xff] }
 0x130   : > { %11746 = vst [vmem:[#allocation21_spill] sm:$0xff] %v8485_v41  ;;  %11748 = vst [vmem:[#allocation128_spill] sm:$0xff] %v8488_v62  ;;  %v8506_v9 = vadd.f32 %v2094_v21, %v11757_v24  ;;  %v8509_v58 = vadd.f32 %v2097_v43, %v11759_v38  ;;  %v8515_v42 = vadd.f32 %v2102_v15, %v11763_v0  ;;  %v11765_v4 = vld [vmem:[#allocation126_spill] sm:$0xff]  ;;  %v11767_v50 = vld [vmem:[#allocation132_spill] sm:$0xff] }
 0x131   : > { %11750 = vst [vmem:[#allocation95_spill] sm:$0xff] %v8491_v6  ;;  %11752 = vst [vmem:[#allocation101_spill] sm:$0xff] %v8497_v37  ;;  %v8518_v2 = vadd.f32 %v2104_v27, %v11765_v4  ;;  %v2174_v48 = vmul.f32 %v11767_v50, %v4725_v7  ;;  %v11768_v54 = vld [vmem:[#allocation133_spill] sm:$0xff]  ;;  %v11769_v18 = vld [vmem:[#allocation134_spill] sm:$0xff] }
 0x132   : > { %11754 = vst [vmem:[#allocation108_spill] sm:$0xff] %v8500_v23  ;;  %11756 = vst [vmem:[#allocation37_spill] sm:$0xff] %v8503_v12  ;;  %v2175_v33 = vmul.f32 %v11768_v54, %v4725_v7  ;;  %v2176_v21 = vmul.f32 %v11769_v18, %v4725_v7  ;;  %v11770_v10 = vld [vmem:[#allocation135_spill] sm:$0xff]  ;;  %v11771_v43 = vld [vmem:[#allocation136_spill] sm:$0xff] }
 0x133   : > { %11758 = vst [vmem:[#allocation40_spill] sm:$0xff] %v8506_v9  ;;  %11760 = vst [vmem:[#allocation42_spill] sm:$0xff] %v8509_v58  ;;  %v2177_v53 = vmul.f32 %v11770_v10, %v4725_v7  ;;  %v2178_v30 = vmul.f32 %v11771_v43, %v4725_v7  ;;  %v11772_v32 = vld [vmem:[#allocation25_spill] sm:$0xff]  ;;  %v11774_v15 = vld [vmem:[#allocation138_spill] sm:$0xff] }
 0x134   : > { %11762 = vst [vmem:[#allocation43_spill] sm:$0xff] %v8512_v29  ;;  %11764 = vst [vmem:[#allocation45_spill] sm:$0xff] %v8515_v42  ;;  %v2179_v8 = vmul.f32 %v11772_v32, %v4725_v7  ;;  %v11773_v45 = vld [vmem:[#allocation137_spill] sm:$0xff]  ;;  %v2181_v19 = vmul.f32 %v11774_v15, %v4725_v7  ;;  %v11775_v17 = vld [vmem:[#allocation106_spill] sm:$0xff]  ;;  %v8562_v41 = vadd.f32 %v2175_v33, %v8421_v46 }
 0x135   : > { %11766 = vst [vmem:[#allocation46_spill] sm:$0xff] %v8518_v2  ;;  %v2180_v13 = vmul.f32 %v11773_v45, %v4725_v7  ;;  %v2182_v27 = vmul.f32 %v11775_v17, %v4725_v7  ;;  %v11776_v20 = vld [vmem:[#allocation97_spill] sm:$0xff]  ;;  %v11777_v31 = vld [vmem:[#allocation107_spill] sm:$0xff]  ;;  %v11778_v11 = vld [vmem:[#allocation130_spill] sm:$0xff] }
 0x136   : > { %v2183_v1 = vmul.f32 %v11776_v20, %v4725_v7  ;;  %v2184_v63 = vmul.f32 %v11777_v31, %v4725_v7  ;;  %v2185_v39 = vmul.f32 %v11778_v11, %v4725_v7  ;;  %v11779_v57 = vld [vmem:[#allocation10_spill] sm:$0xff]  ;;  %v11780_v24 = vld [vmem:[#allocation11_spill] sm:$0xff]  ;;  %v11781_v3 = vld [vmem:[#allocation13_spill] sm:$0xff] }
 0x137   : > { %v2186_v55 = vmul.f32 %v11779_v57, %v4725_v7  ;;  %v2187_v38 = vmul.f32 %v11780_v24, %v4725_v7  ;;  %v2188_v0 = vmul.f32 %v11781_v3, %v4725_v7  ;;  %v11782_v4 = vld [vmem:[#allocation26_spill] sm:$0xff]  ;;  %v8537_v45 = vld [vmem:[%s5989_s25 + $0x198] sm:$0xff]  ;;  %v11785_v17 = vld [vmem:[#allocation19_spill] sm:$0xff]  ;;  %v8583_v46 = vadd.f32 %v2182_v27, %v8446_v47 }
 0x138   : > { %v2189_v32 = vmul.f32 %v11782_v4, %v4725_v7  ;;  %11783 = vst [vmem:[#allocation48_spill] sm:$0xff] %v8537_v45  ;;  %v11784_v15 = vld [vmem:[#allocation14_spill] sm:$0xff]  ;;  %v2191_v10 = vmul.f32 %v11785_v17, %v4725_v7  ;;  %v11786_v20 = vld [vmem:[#allocation23_spill] sm:$0xff]  ;;  %v11787_v54 = vld [vmem:[#allocation24_spill] sm:$0xff] }
 0x139   : > { %v2190_v43 = vmul.f32 %v11784_v15, %v4725_v7  ;;  %v2192_v18 = vmul.f32 %v11786_v20, %v4725_v7  ;;  %v2193_v31 = vmul.f32 %v11787_v54, %v4725_v7  ;;  %v11788_v50 = vld [vmem:[#allocation28_spill] sm:$0xff]  ;;  %v11789_v2 = vld [vmem:[#allocation30_spill] sm:$0xff]  ;;  %v11790_v42 = vld [vmem:[#allocation31_spill] sm:$0xff]  ;;  %11801 = vst [vmem:[#allocation53_spill] sm:$0xff] %v8583_v46 }
 0x13a   : > { %v2194_v11 = vmul.f32 %v11788_v50, %v4725_v7  ;;  %v2195_v57 = vmul.f32 %v11789_v2, %v4725_v7  ;;  %v2196_v24 = vmul.f32 %v11790_v42, %v4725_v7  ;;  %v11791_v29 = vld [vmem:[#allocation34_spill] sm:$0xff]  ;;  %v8548_v58 = vld [vmem:[%s5989_s25 + $0x1a0] sm:$0xff]  ;;  %v11794_v12 = vld [vmem:[#allocation36_spill] sm:$0xff]  ;;  %v2204_v2 = vmul.f32 %v4725_v7, %v8537_v45 }
 0x13b   : > { %v2197_v3 = vmul.f32 %v11791_v29, %v4725_v7  ;;  %11792 = vst [vmem:[#allocation32_spill] sm:$0xff] %v8548_v58  ;;  %v11793_v4 = vld [vmem:[#allocation29_spill] sm:$0xff]  ;;  %v2199_v15 = vmul.f32 %v11794_v12, %v4725_v7  ;;  %v11796_v37 = vld [vmem:[#allocation12_spill] sm:$0xff]  ;;  %v11798_v62 = vld [vmem:[#allocation102_spill] sm:$0xff]  ;;  %v2205_v42 = vmul.f32 %v4725_v7, %v8548_v58  ;;  %v8559_v29 = vadd.f32 %v2174_v48, %v8417_v5 }
 0x13c   : > { %v2198_v9 = vmul.f32 %v11793_v4, %v4725_v7  ;;  %v11795_v23 = vld [vmem:[#allocation9_spill] sm:$0xff]  ;;  %v2201_v20 = vmul.f32 %v11796_v37, %v4725_v7  ;;  %v2203_v50 = vmul.f32 %v11798_v62, %v4725_v7  ;;  %v8565_v12 = vadd.f32 %v2176_v21, %v8427_v14 }
 0x13d   : > { %v2200_v17 = vmul.f32 %v11795_v23, %v4725_v7  ;;  %v11797_v6 = vld [vmem:[#allocation109_spill] sm:$0xff]  ;;  %v8568_v23 = vadd.f32 %v2177_v53, %v8431_v44  ;;  %v8574_v62 = vadd.f32 %v2179_v8, %v8437_v60  ;;  %v8580_v5 = vadd.f32 %v2181_v19, %v8443_v40 }
 0x13e   : > { %v2202_v54 = vmul.f32 %v11797_v6, %v4725_v7  ;;  %v8571_v6 = vadd.f32 %v2178_v30, %v8434_v35  ;;  %v8577_v7 = vadd.f32 %v2180_v13, %v8440_v59  ;;  %v8586_v14 = vadd.f32 %v2183_v1, %v8449_v28  ;;  %v11830_v13 = vld [vmem:[#allocation43_spill] sm:$0xff]  ;;  %v11832_v27 = vld [vmem:[#allocation45_spill] sm:$0xff] }
 0x13f   : > { %11800 = vst [vmem:[#allocation51_spill] sm:$0xff] %v8580_v5  ;;  %v8589_v44 = vadd.f32 %v2184_v63, %v8452_v16  ;;  %v8592_v35 = vadd.f32 %v2185_v39, %v8455_v51  ;;  %v8595_v60 = vadd.f32 %v2186_v55, %v8458_v52  ;;  %v8598_v59 = vadd.f32 %v2187_v38, %v8461_v61 }
 0x140   : > { %11799 = vst [vmem:[#allocation50_spill] sm:$0xff] %v8577_v7  ;;  %11802 = vst [vmem:[#allocation55_spill] sm:$0xff] %v8586_v14  ;;  %v8601_v40 = vadd.f32 %v2188_v0, %v8464_v26  ;;  %v8604_v47 = vadd.f32 %v2189_v32, %v8467_v34  ;;  %v8607_v28 = vadd.f32 %v2190_v43, %v8470_v56  ;;  %v11814_v26 = vld [vmem:[#allocation21_spill] sm:$0xff]  ;;  %v11816_v34 = vld [vmem:[#allocation128_spill] sm:$0xff]  ;;  %v11882_v7 = vmov 0.0  }
 0x141   : > { %11803 = vst [vmem:[#allocation56_spill] sm:$0xff] %v8589_v44  ;;  %11804 = vst [vmem:[#allocation58_spill] sm:$0xff] %v8592_v35  ;;  %v8610_v16 = vadd.f32 %v2191_v10, %v8473_v22  ;;  %v8613_v51 = vadd.f32 %v2192_v18, %v8476_v25  ;;  %v8616_v52 = vadd.f32 %v2193_v31, %v8479_v36  ;;  %v11818_v56 = vld [vmem:[#allocation95_spill] sm:$0xff]  ;;  %v11820_v25 = vld [vmem:[#allocation101_spill] sm:$0xff] }
 0x142   : > { %11805 = vst [vmem:[#allocation60_spill] sm:$0xff] %v8595_v60  ;;  %11806 = vst [vmem:[#allocation61_spill] sm:$0xff] %v8598_v59  ;;  %v8619_v61 = vadd.f32 %v2194_v11, %v8482_v49  ;;  %v8622_v48 = vadd.f32 %v2195_v57, %v11814_v26  ;;  %v8625_v33 = vadd.f32 %v2196_v24, %v11816_v34  ;;  %v8633_v22 = vld [vmem:[%s10950_s1 + $0x14] ss:$0 sm:$0xff]  ;;  %v11822_v18 = vld [vmem:[#allocation108_spill] sm:$0xff] }
 0x143   : > { %11807 = vst [vmem:[#allocation35_spill] sm:$0xff] %v8601_v40  ;;  %11808 = vst [vmem:[#allocation63_spill] sm:$0xff] %v8604_v47  ;;  %v8628_v21 = vadd.f32 %v2197_v3, %v11818_v56  ;;  %v8636_v36 = vadd.f32 %v2198_v9, %v11820_v25  ;;  %v8639_v49 = vadd.f32 %v2199_v15, %v11822_v18  ;;  %v11824_v10 = vld [vmem:[#allocation37_spill] sm:$0xff]  ;;  %v11826_v43 = vld [vmem:[#allocation40_spill] sm:$0xff] }
 0x144   : > { %11809 = vst [vmem:[#allocation65_spill] sm:$0xff] %v8607_v28  ;;  %11810 = vst [vmem:[#allocation66_spill] sm:$0xff] %v8610_v16  ;;  %v8642_v53 = vadd.f32 %v2200_v17, %v11824_v10  ;;  %v8645_v30 = vadd.f32 %v2201_v20, %v11826_v43  ;;  %v11828_v32 = vld [vmem:[#allocation42_spill] sm:$0xff]  ;;  %v8651_v19 = vadd.f32 %v2203_v50, %v11830_v13  ;;  %v11836_v15 = vld [vmem:[#allocation132_spill] sm:$0xff] }
 0x145   : > { %11811 = vst [vmem:[#allocation68_spill] sm:$0xff] %v8613_v51  ;;  %11812 = vst [vmem:[#allocation70_spill] sm:$0xff] %v8616_v52  ;;  %v8648_v8 = vadd.f32 %v2202_v54, %v11828_v32  ;;  %v8654_v1 = vadd.f32 %v2204_v2, %v11832_v27  ;;  %v11834_v9 = vld [vmem:[#allocation46_spill] sm:$0xff]  ;;  %v2243_v63 = vmul.f32 %v11836_v15, %v8633_v22  ;;  %v11837_v17 = vld [vmem:[#allocation133_spill] sm:$0xff] }
 0x146   : > { %11813 = vst [vmem:[#allocation71_spill] sm:$0xff] %v8619_v61  ;;  %11815 = vst [vmem:[#allocation73_spill] sm:$0xff] %v8622_v48  ;;  %v8657_v31 = vadd.f32 %v2205_v42, %v11834_v9  ;;  %v2244_v11 = vmul.f32 %v11837_v17, %v8633_v22  ;;  %v11838_v20 = vld [vmem:[#allocation38_spill] sm:$0xff]  ;;  %v11840_v50 = vld [vmem:[#allocation135_spill] sm:$0xff] }
 0x147   : > { %11817 = vst [vmem:[#allocation75_spill] sm:$0xff] %v8625_v33  ;;  %11819 = vst [vmem:[#allocation129_spill] sm:$0xff] %v8628_v21  ;;  %v2245_v39 = vmul.f32 %v11838_v20, %v8633_v22  ;;  %v11839_v54 = vld [vmem:[#allocation134_spill] sm:$0xff]  ;;  %v2247_v55 = vmul.f32 %v11840_v50, %v8633_v22  ;;  %v11841_v2 = vld [vmem:[#allocation76_spill] sm:$0xff]  ;;  %v2339_v47 = vrot.slane %v2243_v63, 1 }
 0x148   : > { %11821 = vst [vmem:[#allocation131_spill] sm:$0xff] %v8636_v36  ;;  %11823 = vst [vmem:[#allocation139_spill] sm:$0xff] %v8639_v49  ;;  %v2246_v57 = vmul.f32 %v11839_v54, %v8633_v22  ;;  %v2248_v24 = vmul.f32 %v11841_v2, %v8633_v22  ;;  %v11842_v42 = vld [vmem:[#allocation136_spill] sm:$0xff]  ;;  %v11843_v3 = vld [vmem:[#allocation25_spill] sm:$0xff] }
 0x149   : > { %11825 = vst [vmem:[#allocation105_spill] sm:$0xff] %v8642_v53  ;;  %11827 = vst [vmem:[#allocation110_spill] sm:$0xff] %v8645_v30  ;;  %v8673_v38 = vmul.f32 %v11842_v42, %v8633_v22  ;;  %v8677_v0 = vmul.f32 %v11843_v3, %v8633_v22  ;;  %v11844_v26 = vld [vmem:[#allocation78_spill] sm:$0xff]  ;;  %v11845_v56 = vld [vmem:[#allocation137_spill] sm:$0xff]  ;;  %v2342_v59 = vrot.slane %v2245_v39, 1 }
 0x14a   : > { %11829 = vst [vmem:[#allocation111_spill] sm:$0xff] %v8648_v8  ;;  %11831 = vst [vmem:[#allocation16_spill] sm:$0xff] %v8651_v19  ;;  %v8681_v34 = vmul.f32 %v11844_v26, %v8633_v22  ;;  %v8685_v25 = vmul.f32 %v11845_v56, %v8633_v22  ;;  %v11846_v18 = vld [vmem:[#allocation138_spill] sm:$0xff]  ;;  %v11847_v43 = vld [vmem:[#allocation80_spill] sm:$0xff]  ;;  %v2344_v60 = vrot.slane %v2246_v57, 1 }
 0x14b   : > { %11833 = vst [vmem:[#allocation112_spill] sm:$0xff] %v8654_v1  ;;  %11835 = vst [vmem:[#allocation113_spill] sm:$0xff] %v8657_v31  ;;  %v8689_v10 = vmul.f32 %v11846_v18, %v8633_v22  ;;  %v8693_v32 = vmul.f32 %v11847_v43, %v8633_v22  ;;  %v11848_v13 = vld [vmem:[#allocation106_spill] sm:$0xff]  ;;  %v11849_v9 = vld [vmem:[#allocation97_spill] sm:$0xff] }
 0x14c   : > { %v8697_v27 = vmul.f32 %v11848_v13, %v8633_v22  ;;  %v8701_v15 = vmul.f32 %v11849_v9, %v8633_v22  ;;  %v11850_v17 = vld [vmem:[#allocation81_spill] sm:$0xff]  ;;  %v11851_v54 = vld [vmem:[#allocation107_spill] sm:$0xff]  ;;  %v11852_v2 = vld [vmem:[#allocation130_spill] sm:$0xff] }
 0x14d   : > { %v8705_v20 = vmul.f32 %v11850_v17, %v8633_v22  ;;  %v8709_v50 = vmul.f32 %v11851_v54, %v8633_v22  ;;  %v8713_v42 = vmul.f32 %v11852_v2, %v8633_v22  ;;  %v11853_v3 = vld [vmem:[#allocation83_spill] sm:$0xff]  ;;  %v11854_v56 = vld [vmem:[#allocation10_spill] sm:$0xff]  ;;  %v11856_v9 = vld [vmem:[#allocation84_spill] sm:$0xff]  ;;  %v2355_v5 = vrot.slane %v8689_v10, 1 }
 0x14e   : > { %v8717_v26 = vmul.f32 %v11853_v3, %v8633_v22  ;;  %v8721_v18 = vmul.f32 %v11854_v56, %v8633_v22  ;;  %v11855_v43 = vld [vmem:[#allocation11_spill] sm:$0xff]  ;;  %v8729_v17 = vmul.f32 %v11856_v9, %v8633_v22  ;;  %v11857_v54 = vld [vmem:[#allocation13_spill] sm:$0xff]  ;;  %v11858_v31 = vld [vmem:[#allocation26_spill] sm:$0xff] }
 0x14f   : > { %v8725_v13 = vmul.f32 %v11855_v43, %v8633_v22  ;;  %v8733_v2 = vmul.f32 %v11857_v54, %v8633_v22  ;;  %v8737_v3 = vmul.f32 %v11858_v31, %v8633_v22  ;;  %v11859_v1 = vld [vmem:[#allocation89_spill] sm:$0xff]  ;;  %v11860_v19 = vld [vmem:[#allocation14_spill] sm:$0xff]  ;;  %v11861_v8 = vld [vmem:[#allocation19_spill] sm:$0xff] }
 0x150   : > { %v8741_v56 = vmul.f32 %v11859_v1, %v8633_v22  ;;  %v8745_v43 = vmul.f32 %v11860_v19, %v8633_v22  ;;  %v8749_v9 = vmul.f32 %v11861_v8, %v8633_v22  ;;  %v11862_v54 = vld [vmem:[#allocation99_spill] sm:$0xff]  ;;  %v11864_v1 = vld [vmem:[#allocation24_spill] sm:$0xff]  ;;  %v11865_v19 = vld [vmem:[#allocation5_spill] sm:$0xff]  ;;  %v2369_v10 = vrot.slane %v8721_v18, 1 }
 0x151   : > { %v8753_v30 = vmul.f32 %v11862_v54, %v8633_v22  ;;  %v11863_v31 = vld [vmem:[#allocation23_spill] sm:$0xff]  ;;  %v8761_v49 = vmul.f32 %v11864_v1, %v8633_v22  ;;  %v8765_v36 = vmul.f32 %v11865_v19, %v8633_v22  ;;  %v11866_v21 = vld [vmem:[#allocation28_spill] sm:$0xff]  ;;  %v11867_v33 = vld [vmem:[#allocation30_spill] sm:$0xff] }
 0x152   : > { %v8757_v53 = vmul.f32 %v11863_v31, %v8633_v22  ;;  %v8769_v8 = vmul.f32 %v11866_v21, %v8633_v22  ;;  %v8773_v54 = vmul.f32 %v11867_v33, %v8633_v22  ;;  %v11868_v48 = vld [vmem:[#allocation6_spill] sm:$0xff]  ;;  %v11869_v61 = vld [vmem:[#allocation31_spill] sm:$0xff]  ;;  %v8793_v33 = vmul.f32 %v11793_v4, %v8633_v22  ;;  %v11872_v16 = vld [vmem:[#allocation36_spill] sm:$0xff] }
 0x153   : > { %v8777_v31 = vmul.f32 %v11868_v48, %v8633_v22  ;;  %v8781_v1 = vmul.f32 %v11869_v61, %v8633_v22  ;;  %v11870_v52 = vld [vmem:[#allocation34_spill] sm:$0xff]  ;;  %v11871_v51 = vld [vmem:[#allocation7_spill] sm:$0xff]  ;;  %v8797_v48 = vmul.f32 %v11872_v16, %v8633_v22  ;;  %v11873_v28 = vld [vmem:[#allocation8_spill] sm:$0xff]  ;;  %v8812_v4 = vmul.f32 %v11796_v37, %v8633_v22 }
 0x154   : > { %v8785_v19 = vmul.f32 %v11870_v52, %v8633_v22  ;;  %v8789_v21 = vmul.f32 %v11871_v51, %v8633_v22  ;;  %v8801_v61 = vmul.f32 %v11873_v28, %v8633_v22  ;;  %v8804_v40 = vld [vmem:[%s5989_s25 + $0x1a8] sm:$0x3]  ;;  %v2340_v52 = vrot.slane %v2244_v11, 1  ;;  %v11875_v35 = vld [vmem:[#allocation9_spill] sm:$0xff]  ;;  %v11876_v16 = vld [vmem:[#allocation15_spill] sm:$0xff] }
 0x155   : > { %11874 = vst [vmem:[#allocation114_spill] sm:$0xff] %v8804_v40  ;;  %v2345_v51 = vrot.slane %v2247_v55, 1  ;;  %v8808_v44 = vmul.f32 %v11875_v35, %v8633_v22  ;;  %v8816_v14 = vmul.f32 %v11876_v16, %v8633_v22  ;;  %v2347_v28 = vrot.slane %v2248_v24, 1  ;;  %v11877_v63 = vld [vmem:[#allocation109_spill] sm:$0xff]  ;;  %v11878_v11 = vld [vmem:[#allocation102_spill] sm:$0xff]  ;;  %v11879_v35 = vld [vmem:[#allocation127_spill] sm:$0xff] }
 0x156   : > { %v8820_v46 = vmul.f32 %v11877_v63, %v8633_v22  ;;  %v8824_v39 = vmul.f32 %v11878_v11, %v8633_v22  ;;  %v8828_v57 = vmul.f32 %v11879_v35, %v8633_v22  ;;  %v8832_v37 = vmul.f32 %v8633_v22, %v8537_v45  ;;  %v8847_v11 = vld [vmem:[%s10953_s4 + $0x8] sm:$0xff]  ;;  %v8852_v35 = vld [vmem:[%s10953_s4] sm:$0xff] }
 0x157   : > { %v8836_v55 = vmul.f32 %v8633_v22, %v8548_v58  ;;  %v8840_v24 = vmul.f32 %v8633_v22, %v8804_v40  ;;  %v2349_v16 = vrot.slane %v8673_v38, 1  ;;  %v2350_v63 = vrot.slane %v8677_v0, 1  ;;  %11880 = vst [vmem:[#allocation115_spill] sm:$0xff] %v8847_v11  ;;  %11881 = vst [vmem:[#allocation116_spill] sm:$0xff] %v8852_v35  ;;  %5100 = vmatpush3.msra.mxu1 %v8847_v11 }
 0x158   : > { %v8855_v58 = vsel %vm346_vm1, %v2339_v47, %v2340_v52  ;;  %v8858_v22 = vsel %vm346_vm1, %v2340_v52, %v2342_v59  ;;  %v8861_v38 = vsel %vm346_vm1, %v2344_v60, %v2345_v51  ;;  %v2352_v0 = vrot.slane %v8681_v34, 1  ;;  %5101 = vmatprep.subr.mxu1 %v11882_v7  ;;  %v8893_v7 = vpop.f32.mrf.mxu0 }
 0x159   : > { %v8866_v40 = vsel %vm346_vm1, %v2345_v51, %v2347_v28  ;;  %v2354_v45 = vrot.slane %v8685_v25, 1  ;;  %v2357_v47 = vrot.slane %v8693_v32, 1  ;;  %v2359_v59 = vrot.slane %v8697_v27, 1  ;;  %5102 = vmatpush3.msra.mxu1 %v8852_v35 }
 0x15a   : > { %v2360_v60 = vrot.slane %v8701_v15, 1  ;;  %v2362_v52 = vrot.slane %v8705_v20, 1  ;;  %v2364_v34 = vrot.slane %v8709_v50, 1  ;;  %v2365_v51 = vrot.slane %v8713_v42, 1 }
 0x15b   : > { %v2367_v25 = vrot.slane %v8717_v26, 1  ;;  %v2370_v32 = vrot.slane %v8725_v13, 1  ;;  %v2372_v28 = vrot.slane %v8729_v17, 1  ;;  %v2374_v27 = vrot.slane %v8733_v2, 1 }
 0x15c   : > { %v2375_v15 = vrot.slane %v8737_v3, 1  ;;  %v2377_v20 = vrot.slane %v8741_v56, 1  ;;  %v2351_v50 = vsel %vm346_vm1, %v2349_v16, %v2350_v63  ;;  %v2379_v35 = vrot.slane %v8745_v43, 1 }
 0x15d   : > { %v2380_v42 = vrot.slane %v8749_v9, 1  ;;  %v2382_v26 = vrot.slane %v8753_v30, 1  ;;  %v2353_v18 = vsel %vm346_vm1, %v2350_v63, %v2352_v0  ;;  %v2356_v13 = vsel %vm346_vm1, %v2354_v45, %v2355_v5  ;;  %v5098_v63 = vpop.f32.mrf.mxu0 }
 0x15e   : > { %v2358_v17 = vsel %vm346_vm1, %v2355_v5, %v2357_v47  ;;  %v2361_v2 = vsel %vm346_vm1, %v2359_v59, %v2360_v60  ;;  %v2363_v3 = vsel %vm346_vm1, %v2360_v60, %v2362_v52  ;;  %v2366_v56 = vsel %vm346_vm1, %v2364_v34, %v2365_v51 }
 0x15f   : > { %v2368_v43 = vsel %vm346_vm1, %v2365_v51, %v2367_v25  ;;  %v2371_v9 = vsel %vm346_vm1, %v2369_v10, %v2370_v32  ;;  %v2373_v30 = vsel %vm346_vm1, %v2370_v32, %v2372_v28  ;;  %v2376_v16 = vsel %vm346_vm1, %v2374_v27, %v2375_v15 }
 0x160   : > { %v2378_v45 = vsel %vm346_vm1, %v2375_v15, %v2377_v20  ;;  %v2384_v5 = vrot.slane %v8757_v53, 1  ;;  %v2381_v0 = vsel %vm346_vm1, %v2379_v35, %v2380_v42  ;;  %v2383_v47 = vsel %vm346_vm1, %v2380_v42, %v2382_v26 }
 0x161   : > { %v2385_v59 = vrot.slane %v8761_v49, 1  ;;  %v2387_v60 = vrot.slane %v8765_v36, 1  ;;  %v2389_v52 = vrot.slane %v8769_v8, 1  ;;  %v2390_v34 = vrot.slane %v8773_v54, 1 }
 0x162   : > { %v2392_v51 = vrot.slane %v8777_v31, 1  ;;  %v2394_v25 = vrot.slane %v8781_v1, 1  ;;  %v2395_v10 = vrot.slane %v8785_v19, 1  ;;  %v2397_v53 = vrot.slane %v8789_v21, 1 }
 0x163   : > { %v2399_v35 = vrot.slane %v8793_v33, 1  ;;  %v2400_v32 = vrot.slane %v8797_v48, 1  ;;  %v2402_v49 = vrot.slane %v8801_v61, 1  ;;  %v2404_v36 = vrot.slane %v8808_v44, 1 }
 0x164   : > { %v2405_v8 = vrot.slane %v8812_v4, 1  ;;  %v2407_v54 = vrot.slane %v8816_v14, 1  ;;  %v2386_v31 = vsel %vm346_vm1, %v2384_v5, %v2385_v59  ;;  %v2409_v1 = vrot.slane %v8820_v46, 1 }
 0x165   : > { %v2410_v19 = vrot.slane %v8824_v39, 1  ;;  %v2412_v21 = vrot.slane %v8828_v57, 1  ;;  %v2388_v33 = vsel %vm346_vm1, %v2385_v59, %v2387_v60  ;;  %v2414_v48 = vrot.slane %v8832_v37, 1  ;;  %v11887_v59 = vld [vmem:[#allocation51_spill] sm:$0xff] }
 0x166   : > { %v2415_v61 = vrot.slane %v8836_v55, 1  ;;  %v2417_v44 = vrot.slane %v8840_v24, 1  ;;  %v2391_v4 = vsel %vm346_vm1, %v2389_v52, %v2390_v34  ;;  %v2393_v14 = vsel %vm346_vm1, %v2390_v34, %v2392_v51  ;;  %v11888_v52 = vld [vmem:[#allocation53_spill] sm:$0xff] }
 0x167   : > { %v2396_v28 = vsel %vm346_vm1, %v2394_v25, %v2395_v10  ;;  %v2398_v46 = vsel %vm346_vm1, %v2395_v10, %v2397_v53  ;;  %v2401_v39 = vsel %vm346_vm1, %v2399_v35, %v2400_v32  ;;  %v2403_v57 = vsel %vm346_vm1, %v2400_v32, %v2402_v49  ;;  %v11898_v35 = vld [vmem:[#allocation68_spill] sm:$0xff]  ;;  %v11899_v32 = vld [vmem:[#allocation70_spill] sm:$0xff]  ;;  %v11903_v49 = vld [vmem:[#allocation73_spill] sm:$0xff] }
 0x168   : > { %v2406_v27 = vsel %vm346_vm1, %v2404_v36, %v2405_v8  ;;  %v2408_v37 = vsel %vm346_vm1, %v2405_v8, %v2407_v54  ;;  %v2411_v55 = vsel %vm346_vm1, %v2409_v1, %v2410_v19  ;;  %v8937_v24 = vsel %vm346_vm1, %v2410_v19, %v2412_v21  ;;  %v11907_v54 = vld [vmem:[#allocation129_spill] sm:$0xff]  ;;  %v11909_v1 = vld [vmem:[#allocation131_spill] sm:$0xff] }
 0x169   : > { %11883 = vst [vmem:[#allocation117_spill] sm:$0xff] %v8937_v24  ;;  %v8941_v15 = vadd.f32 %v8855_v58, %v8559_v29  ;;  %v8945_v20 = vadd.f32 %v8858_v22, %v8562_v41  ;;  %v8948_v42 = vsel %vm346_vm1, %v2414_v48, %v2415_v61  ;;  %v8951_v26 = vsel %vm346_vm1, %v2415_v61, %v2417_v44  ;;  %v11886_v29 = vld [vmem:[#allocation50_spill] sm:$0xff]  ;;  %v11911_v21 = vld [vmem:[#allocation139_spill] sm:$0xff]  ;;  %v11913_v48 = vld [vmem:[#allocation105_spill] sm:$0xff] }
 0x16a   : > { %11884 = vst [vmem:[#allocation118_spill] sm:$0xff] %v8948_v42  ;;  %11885 = vst [vmem:[#allocation119_spill] sm:$0xff] %v8951_v26  ;;  %v8955_v5 = vadd.f32 %v8861_v38, %v8565_v12  ;;  %v8959_v63 = vadd.f32 %v8866_v40, %v8568_v23  ;;  %v8962_v58 = vadd.f32 %v2351_v50, %v8571_v6  ;;  %v11889_v12 = vld [vmem:[#allocation55_spill] sm:$0xff]  ;;  %v11890_v23 = vld [vmem:[#allocation56_spill] sm:$0xff] }
 0x16b   : > { %v8965_v41 = vadd.f32 %v2353_v18, %v8574_v62  ;;  %v8968_v22 = vadd.f32 %v2356_v13, %v11886_v29  ;;  %v8971_v60 = vadd.f32 %v2358_v17, %v11887_v59  ;;  %v8974_v34 = vadd.f32 %v2361_v2, %v11888_v52  ;;  %v11891_v6 = vld [vmem:[#allocation58_spill] sm:$0xff]  ;;  %v11892_v62 = vld [vmem:[#allocation60_spill] sm:$0xff]  ;;  %v11893_v13 = vld [vmem:[#allocation61_spill] sm:$0xff] }
 0x16c   : > { %v8977_v38 = vadd.f32 %v2363_v3, %v11889_v12  ;;  %v8980_v40 = vadd.f32 %v2366_v56, %v11890_v23  ;;  %v8983_v50 = vadd.f32 %v2368_v43, %v11891_v6  ;;  %v8986_v18 = vadd.f32 %v2371_v9, %v11892_v62  ;;  %v11894_v17 = vld [vmem:[#allocation35_spill] sm:$0xff]  ;;  %v11896_v3 = vld [vmem:[#allocation65_spill] sm:$0xff]  ;;  %v11897_v56 = vld [vmem:[#allocation66_spill] sm:$0xff] }
 0x16d   : > { %v8989_v51 = vadd.f32 %v2373_v30, %v11893_v13  ;;  %v8992_v25 = vadd.f32 %v2376_v16, %v11894_v17  ;;  %v11895_v2 = vld [vmem:[#allocation63_spill] sm:$0xff]  ;;  %v8998_v53 = vadd.f32 %v2381_v0, %v11896_v3  ;;  %v9001_v43 = vadd.f32 %v2383_v47, %v11897_v56  ;;  %v11915_v44 = vld [vmem:[#allocation110_spill] sm:$0xff]  ;;  %v5742_v59 = vld [vmem:[%s5989_s25 + $0x40] sm:$0x3] }
 0x16e   : > { %v8995_v10 = vadd.f32 %v2378_v45, %v11895_v2  ;;  %v9004_v9 = vadd.f32 %v2386_v31, %v11898_v35  ;;  %v9007_v30 = vadd.f32 %v2388_v33, %v11899_v32  ;;  %v9012_v16 = vld [vmem:[%s10950_s1 + $0x15] ss:$0 sm:$0xff]  ;;  %v9018_v36 = vadd.f32 %v2393_v14, %v11903_v49  ;;  %v5743_v52 = vld [vmem:[%s5989_s25 + $0x48] sm:$0xff]  ;;  %v5745_v23 = vld [vmem:[%s5989_s25 + $0x58] sm:$0x3] }
 0x16f   : > { %v11901_v45 = vld [vmem:[#allocation71_spill] sm:$0xff]  ;;  %v9024_v31 = vadd.f32 %v2398_v46, %v11907_v54  ;;  %v9027_v19 = vadd.f32 %v2401_v39, %v11909_v1  ;;  %v9030_v33 = vadd.f32 %v2403_v57, %v11911_v21  ;;  %v9033_v61 = vadd.f32 %v2406_v27, %v11913_v48  ;;  %v5741_v39 = vld [vmem:[%s5989_s25 + $0x38] sm:$0xff]  ;;  %v5746_v62 = vld [vmem:[%s5989_s25 + $0x60] sm:$0xff] }
 0x170   : > { %11900 = vst [vmem:[#allocation20_spill] sm:$0xff] %v9007_v30  ;;  %v9015_v0 = vadd.f32 %v2391_v4, %v11901_v45  ;;  %11904 = vst [vmem:[#allocation121_spill] sm:$0xff] %v9018_v36  ;;  %v11905_v47 = vld [vmem:[#allocation75_spill] sm:$0xff]  ;;  %v9036_v4 = vadd.f32 %v2408_v37, %v11915_v44  ;;  %v2489_v57 = vmul.f32 %v5741_v39, %v9012_v16  ;;  %v5747_v17 = vld [vmem:[%s5989_s25 + $0x68] sm:$0xff] }
 0x171   : > { %v9021_v8 = vadd.f32 %v2396_v28, %v11905_v47  ;;  %11908 = vst [vmem:[#allocation88_spill] sm:$0xff] %v9024_v31  ;;  %11910 = vst [vmem:[#allocation90_spill] sm:$0xff] %v9027_v19  ;;  %v11917_v14 = vld [vmem:[#allocation111_spill] sm:$0xff]  ;;  %v2490_v27 = vmul.f32 %v5742_v59, %v9012_v16  ;;  %v9049_v37 = vmul.f32 %v5743_v52, %v9012_v16  ;;  %v5749_v35 = vld [vmem:[%s5989_s25 + $0x78] sm:$0xff] }
 0x172   : > { %11902 = vst [vmem:[#allocation120_spill] sm:$0xff] %v9015_v0  ;;  %11912 = vst [vmem:[#allocation92_spill] sm:$0xff] %v9030_v33  ;;  %v9039_v28 = vadd.f32 %v2411_v55, %v11917_v14  ;;  %v5740_v46 = vld [vmem:[%s5989_s25 + $0x30] sm:$0xff]  ;;  %v9057_v6 = vmul.f32 %v5745_v23, %v9012_v16  ;;  %v9061_v13 = vmul.f32 %v5746_v62, %v9012_v16  ;;  %v5750_v45 = vld [vmem:[%s5989_s25 + $0x80] sm:$0xff] }
 0x173   : > { %11906 = vst [vmem:[#allocation86_spill] sm:$0xff] %v9021_v8  ;;  %11914 = vst [vmem:[#allocation122_spill] sm:$0xff] %v9033_v61  ;;  %v2488_v29 = vmul.f32 %v5740_v46, %v9012_v16  ;;  %v5744_v12 = vld [vmem:[%s5989_s25 + $0x50] sm:$0xff]  ;;  %v9065_v2 = vmul.f32 %v5747_v17, %v9012_v16  ;;  %v9073_v32 = vmul.f32 %v5749_v35, %v9012_v16  ;;  %v5751_v47 = vld [vmem:[%s5989_s25 + $0x88] sm:$0x3]  ;;  %v2587_v23 = vrot.slane %v2490_v27, 2 }
 0x174   : > { %11916 = vst [vmem:[#allocation123_spill] sm:$0xff] %v9036_v4  ;;  %11918 = vst [vmem:[#allocation124_spill] sm:$0xff] %v9039_v28  ;;  %v9053_v55 = vmul.f32 %v5744_v12, %v9012_v16  ;;  %v5748_v3 = vld [vmem:[%s5989_s25 + $0x70] sm:$0x3]  ;;  %v9077_v49 = vmul.f32 %v5750_v45, %v9012_v16  ;;  %v9081_v54 = vmul.f32 %v5751_v47, %v9012_v16  ;;  %v5753_v48 = vld [vmem:[%s5989_s25 + $0x98] sm:$0xff]  ;;  %v2585_v12 = vrot.slane %v2489_v57, 2 }
 0x175   : > { %v9069_v56 = vmul.f32 %v5748_v3, %v9012_v16  ;;  %v5752_v1 = vld [vmem:[%s5989_s25 + $0x90] sm:$0xff]  ;;  %v9089_v44 = vmul.f32 %v5753_v48, %v9012_v16  ;;  %v5754_v14 = vld [vmem:[%s5989_s25 + $0xa0] sm:$0x3]  ;;  %v5755_v39 = vld [vmem:[%s5989_s25 + $0xa8] sm:$0xff]  ;;  %v2584_v52 = vrot.slane %v2488_v29, 2  ;;  %v2592_v42 = vrot.slane %v9057_v6, 2 }
 0x176   : > { %v9085_v21 = vmul.f32 %v5752_v1, %v9012_v16  ;;  %v9093_v46 = vmul.f32 %v5754_v14, %v9012_v16  ;;  %v9097_v59 = vmul.f32 %v5755_v39, %v9012_v16  ;;  %v5756_v62 = vld [vmem:[%s5989_s25 + $0xb0] sm:$0xff]  ;;  %v5757_v3 = vld [vmem:[%s5989_s25 + $0xb8] sm:$0x3]  ;;  %v5758_v45 = vld [vmem:[%s5989_s25 + $0xc0] sm:$0xff]  ;;  %v2589_v39 = vrot.slane %v9049_v37, 2 }
 0x177   : > { %v9101_v17 = vmul.f32 %v5756_v62, %v9012_v16  ;;  %v9105_v35 = vmul.f32 %v5757_v3, %v9012_v16  ;;  %v9109_v47 = vmul.f32 %v5758_v45, %v9012_v16  ;;  %v5759_v1 = vld [vmem:[%s5989_s25 + $0xc8] sm:$0xff]  ;;  %v5760_v57 = vld [vmem:[%s5989_s25 + $0xd0] sm:$0x3]  ;;  %v5761_v48 = vld [vmem:[%s5989_s25 + $0xd8] sm:$0xff]  ;;  %v2590_v62 = vrot.slane %v9053_v55, 2 }
 0x178   : > { %v9113_v29 = vmul.f32 %v5759_v1, %v9012_v16  ;;  %v9117_v27 = vmul.f32 %v5760_v57, %v9012_v16  ;;  %v9121_v14 = vmul.f32 %v5761_v48, %v9012_v16  ;;  %v5762_v3 = vld [vmem:[%s5989_s25 + $0xe0] sm:$0xff]  ;;  %v5763_v1 = vld [vmem:[%s5989_s25 + $0xe8] sm:$0x3]  ;;  %v5764_v57 = vld [vmem:[%s5989_s25 + $0xf0] sm:$0xff]  ;;  %v2595_v33 = vrot.slane %v9065_v2, 2 }
 0x179   : > { %v9127_v45 = vmul.f32 %v5762_v3, %v9012_v16  ;;  %v9131_v11 = vmul.f32 %v5763_v1, %v9012_v16  ;;  %v9135_v48 = vmul.f32 %v5764_v57, %v9012_v16  ;;  %v5765_v26 = vld [vmem:[%s5989_s25 + $0xf8] sm:$0xff]  ;;  %v5766_v55 = vld [vmem:[%s5989_s25 + $0x100] sm:$0x3]  ;;  %v2586_v3 = vsel %vm1465_vm3, %v2584_v52, %v2585_v12  ;;  %v5767_v4 = vld [vmem:[%s5989_s25 + $0x108] sm:$0xff] }
 0x17a   : > { %v9139_v37 = vmul.f32 %v5765_v26, %v9012_v16  ;;  %v9143_v28 = vmul.f32 %v5766_v55, %v9012_v16  ;;  %v2588_v1 = vsel %vm1465_vm3, %v2585_v12, %v2587_v23  ;;  %v9150_v57 = vmul.f32 %v5767_v4, %v9012_v16  ;;  %v5768_v24 = vld [vmem:[%s5989_s25 + $0x110] sm:$0xff]  ;;  %v5769_v61 = vld [vmem:[%s5989_s25 + $0x118] sm:$0x3]  ;;  %v5770_v52 = vld [vmem:[%s5989_s25 + $0x120] sm:$0xff] }
 0x17b   : > { %v9154_v26 = vmul.f32 %v5768_v24, %v9012_v16  ;;  %v9158_v55 = vmul.f32 %v5769_v61, %v9012_v16  ;;  %v9162_v12 = vmul.f32 %v5770_v52, %v9012_v16  ;;  %v5771_v6 = vld [vmem:[%s5989_s25 + $0x128] sm:$0xff]  ;;  %v2591_v4 = vsel %vm1465_vm3, %v2589_v39, %v2590_v62  ;;  %v5772_v19 = vld [vmem:[%s5989_s25 + $0x130] sm:$0x3]  ;;  %v5773_v31 = vld [vmem:[%s5989_s25 + $0x138] sm:$0xff] }
 0x17c   : > { %v9166_v23 = vmul.f32 %v5771_v6, %v9012_v16  ;;  %v2594_v24 = vrot.slane %v9061_v13, 2  ;;  %v9173_v61 = vmul.f32 %v5772_v19, %v9012_v16  ;;  %v9177_v52 = vmul.f32 %v5773_v31, %v9012_v16  ;;  %v5774_v8 = vld [vmem:[%s5989_s25 + $0x140] sm:$0xff]  ;;  %v5775_v2 = vld [vmem:[%s5989_s25 + $0x148] sm:$0x3]  ;;  %v9194_v31 = vld [vmem:[%s10950_s1 + $0xc] ss:$0 sm:$0xff] }
 0x17d   : > { %v2696_v6 = vadd.f32 %v2586_v3, %v8941_v15  ;;  %v2697_v39 = vadd.f32 %v2588_v1, %v8945_v20  ;;  %v9183_v13 = vmul.f32 %v5774_v8, %v9012_v16  ;;  %v9187_v36 = vmul.f32 %v5775_v2, %v9012_v16  ;;  %v5776_v15 = vld [vmem:[%s5989_s25 + $0x150] sm:$0xff]  ;;  %v5777_v3 = vld [vmem:[%s5989_s25 + $0x158] sm:$0xff]  ;;  %v5778_v1 = vld [vmem:[%s5989_s25 + $0x160] sm:$0x3] }
 0x17e   : > { %v2593_v19 = vsel %vm1465_vm3, %v2590_v62, %v2592_v42  ;;  %v2597_v0 = vrot.slane %v9069_v56, 2  ;;  %v9198_v20 = vmul.f32 %v5776_v15, %v9012_v16  ;;  %v9202_v8 = vmul.f32 %v5777_v3, %v9012_v16  ;;  %v5779_v56 = vld [vmem:[%s5989_s25 + $0x168] sm:$0xff] }
 0x17f   : > { %11919 = vst [vmem:[#allocation125_spill] sm:$0xff] %v9187_v36  ;;  %v9206_v2 = vmul.f32 %v5778_v1, %v9012_v16  ;;  %v2698_v42 = vadd.f32 %v2591_v4, %v8955_v5  ;;  %v9211_v62 = vmul.f32 %v5779_v56, %v9012_v16  ;;  %v2596_v30 = vsel %vm1465_vm3, %v2594_v24, %v2595_v33 }
 0x180   : > { %11920 = vst [vmem:[#allocation126_spill] sm:$0xff] %v9198_v20  ;;  %11921 = vst [vmem:[#allocation29_spill] sm:$0xff] %v9202_v8  ;;  %v2599_v15 = vrot.slane %v9073_v32, 2  ;;  %v2600_v20 = vrot.slane %v9077_v49, 2  ;;  %v2602_v3 = vrot.slane %v9081_v54, 2  ;;  %v2699_v8 = vadd.f32 %v2593_v19, %v8959_v63  ;;  %v5780_v49 = vld [vmem:[%s5989_s25 + $0x170] sm:$0xff] }
 0x181   : > { %v9219_v36 = vadd.f32 %v9194_v31, %v2696_v6  ;;  %v9222_v1 = vadd.f32 %v9194_v31, %v2697_v39  ;;  %v2598_v5 = vsel %vm1465_vm3, %v2595_v33, %v2597_v0  ;;  %v2604_v4 = vrot.slane %v9085_v21, 2 }
 0x182   : > { %v2605_v24 = vrot.slane %v9089_v44, 2  ;;  %v2607_v32 = vrot.slane %v9093_v46, 2  ;;  %v9230_v54 = vmul.f32 %v5780_v49, %v9012_v16  ;;  %v2700_v63 = vadd.f32 %v2596_v30, %v8962_v58 }
 0x183   : > { %v9234_v6 = vadd.f32 %v9194_v31, %v2698_v42  ;;  %v2767_v0 = vadd.f32 %v9222_v1, %v9219_v36  ;;  %v2601_v33 = vsel %vm1465_vm3, %v2599_v15, %v2600_v20  ;;  %v2609_v21 = vrot.slane %v9097_v59, 2  ;;  %v5781_v42 = vld [vmem:[%s5989_s25 + $0x178] sm:$0x3]  ;;  %v5782_v15 = vld [vmem:[%s5989_s25 + $0x180] sm:$0xff] }
 0x184   : > { %v2610_v44 = vrot.slane %v9101_v17, 2  ;;  %v2612_v46 = vrot.slane %v9105_v35, 2  ;;  %v2603_v39 = vsel %vm1465_vm3, %v2600_v20, %v2602_v3  ;;  %v2701_v19 = vadd.f32 %v2598_v5, %v8965_v41 }
 0x185   : > { %v9245_v58 = vadd.f32 %v9194_v31, %v2699_v8  ;;  %v2768_v30 = vadd.f32 %v2767_v0, %v9234_v6  ;;  %v9250_v56 = vmul.f32 %v5781_v42, %v9012_v16  ;;  %v9254_v59 = vmul.f32 %v5782_v15, %v9012_v16 }
 0x186   : > { %v2606_v17 = vsel %vm1465_vm3, %v2604_v4, %v2605_v24  ;;  %v2608_v35 = vsel %vm1465_vm3, %v2605_v24, %v2607_v32  ;;  %v2614_v20 = vrot.slane %v9109_v47, 2  ;;  %v2702_v41 = vadd.f32 %v2601_v33, %v8968_v22 }
 0x187   : > { %v9261_v8 = vadd.f32 %v9194_v31, %v2700_v63  ;;  %v2769_v3 = vadd.f32 %v2768_v30, %v9245_v58  ;;  %v2611_v5 = vsel %vm1465_vm3, %v2609_v21, %v2610_v44  ;;  %v2613_v49 = vsel %vm1465_vm3, %v2610_v44, %v2612_v46  ;;  %v11922_v30 = vld [vmem:[#allocation96_spill] sm:$0xff] }
 0x188   : > { %v2615_v0 = vrot.slane %v9113_v29, 2  ;;  %v2703_v42 = vadd.f32 %v2603_v39, %v8971_v60  ;;  %v9269_v4 = vadd.f32 %v9194_v31, %v2701_v19  ;;  %v2804_v22 = vmul.f32 %v9219_v36, %v9219_v36 }
 0x189   : > { %v2770_v47 = vadd.f32 %v2769_v3, %v9261_v8  ;;  %v2805_v24 = vmul.f32 %v9222_v1, %v9222_v1  ;;  %v2617_v32 = vrot.slane %v9117_v27, 2  ;;  %v2619_v63 = vrot.slane %v9121_v14, 2 }
 0x18a   : > { %v2620_v33 = vrot.slane %v9127_v45, 2  ;;  %v2704_v29 = vadd.f32 %v2606_v17, %v8974_v34  ;;  %v2622_v60 = vrot.slane %v9131_v11, 2  ;;  %v9282_v21 = vadd.f32 %v9194_v31, %v2702_v41 }
 0x18b   : > { %v2771_v44 = vadd.f32 %v2770_v47, %v9269_v4  ;;  %v2806_v46 = vmul.f32 %v9234_v6, %v9234_v6  ;;  %v2624_v39 = vrot.slane %v9135_v48, 2  ;;  %v2705_v27 = vadd.f32 %v2608_v35, %v8977_v38 }
 0x18c   : > { %v9290_v14 = vadd.f32 %v9194_v31, %v2703_v42  ;;  %v2807_v34 = vmul.f32 %v9245_v58, %v9245_v58  ;;  %v2836_v45 = vadd.f32 %v2805_v24, %v2804_v22  ;;  %v638_v19 = vmul.f32 0.00048828125, %v8893_v7 }
 0x18d   : > { %v2772_v11 = vadd.f32 %v2771_v44, %v9282_v21  ;;  %v9297_v15 = vsub.s32 0, %v11922_v30  ;;  %v2616_v17 = vsel %vm1465_vm3, %v2614_v20, %v2615_v0  ;;  %v2618_v48 = vsel %vm1465_vm3, %v2615_v0, %v2617_v32 }
 0x18e   : > { %v2706_v38 = vadd.f32 %v2611_v5, %v8980_v40  ;;  %v9303_v35 = vadd.f32 %v9194_v31, %v2704_v29  ;;  %v2808_v3 = vmul.f32 %v9261_v8, %v9261_v8  ;;  %v2837_v42 = vadd.f32 %v2836_v45, %v2806_v46 }
 0x18f   : > { %v2773_v41 = vadd.f32 %v2772_v11, %v9290_v14  ;;  %v639_v47 = vmul.f32 %v638_v19, %v638_v19  ;;  %v2625_v7 = vrot.slane %v9139_v37, 2  ;;  %v2627_v22 = vrot.slane %v9143_v28, 2 }
 0x190   : > { %v2707_v20 = vadd.f32 %v2613_v49, %v8983_v50  ;;  %v9312_v0 = vadd.f32 %v9194_v31, %v2705_v27  ;;  %v2809_v5 = vmul.f32 %v9269_v4, %v9269_v4  ;;  %v2838_v24 = vadd.f32 %v2837_v42, %v2807_v34 }
 0x191   : > { %v2774_v40 = vadd.f32 %v2773_v41, %v9303_v35  ;;  %v643_v32 = vrot.slane %v639_v47, %v9297_v15  ;;  %v2621_v29 = vsel %vm1465_vm3, %v2619_v63, %v2620_v33  ;;  %v2623_v44 = vsel %vm1465_vm3, %v2620_v33, %v2622_v60 }
 0x192   : > { %v2708_v37 = vadd.f32 %v2616_v17, %v8986_v18  ;;  %v9322_v28 = vadd.f32 %v9194_v31, %v2706_v38  ;;  %v2810_v49 = vmul.f32 %v9282_v21, %v9282_v21  ;;  %v2839_v46 = vadd.f32 %v2838_v24, %v2808_v3 }
 0x193   : > { %v2775_v50 = vadd.f32 %v2774_v40, %v9312_v0  ;;  %v644_v27 = vsel %vm297_vm2, %v643_v32, 0.0  ;;  %v2629_v34 = vrot.slane %v9150_v57, 2  ;;  %v2630_v63 = vrot.slane %v9154_v26, 2 }
 0x194   : > { %v2709_v33 = vadd.f32 %v2618_v48, %v8989_v51  ;;  %v645_v60 = vsub.f32 %v638_v19, %v644_v27  ;;  %v9333_v18 = vadd.f32 %v9194_v31, %v2707_v20  ;;  %v2811_v45 = vmul.f32 %v9290_v14, %v9290_v14 }
 0x195   : > { %v2776_v11 = vadd.f32 %v2775_v50, %v9322_v28  ;;  %v2840_v17 = vadd.f32 %v2839_v46, %v2809_v5  ;;  %v2626_v38 = vsel %vm1465_vm3, %v2624_v39, %v2625_v7  ;;  %v2710_v41 = vadd.f32 %v2621_v29, %v8992_v25 }
 0x196   : > { %v646_v3 = vmax.f32 %v645_v60, 0.0  ;;  %v9341_v57 = vadd.f32 %v9194_v31, %v2708_v37  ;;  %v2812_v26 = vmul.f32 %v9303_v35, %v9303_v35  ;;  %v2628_v48 = vsel %vm1465_vm3, %v2625_v7, %v2627_v22  ;;  %v5783_v37 = vld [vmem:[%s5989_s25 + $0x188] sm:$0xff] }
 0x197   : > { %v2777_v51 = vadd.f32 %v2776_v11, %v9333_v18  ;;  %v2841_v19 = vadd.f32 %v2840_v17, %v2810_v49  ;;  %v2632_v42 = vrot.slane %v9158_v55, 2  ;;  %v2711_v39 = vadd.f32 %v2623_v44, %v8995_v10 }
 0x198   : > { %v647_v25 = vsel %vm297_vm2, %v646_v3, %v645_v60  ;;  %v9352_v47 = vadd.f32 %v9194_v31, %v2709_v33  ;;  %v2813_v40 = vmul.f32 %v9312_v0, %v9312_v0  ;;  %v2631_v7 = vsel %vm1465_vm3, %v2629_v34, %v2630_v63 }
 0x199   : > { %v2778_v20 = vadd.f32 %v2777_v51, %v9341_v57  ;;  %v2842_v5 = vadd.f32 %v2841_v19, %v2811_v45  ;;  %5104 = vmatmul.mubr.msk.f32.vlgmr.msra.gmra.mxu1 %vm648_vm4, %v647_v25  ;;  %v2634_v55 = vrot.slane %v9162_v12, 2  ;;  %v2635_v10 = vrot.slane %v9166_v23, 2  ;;  %v11925_v25 = vld [vmem:[#allocation126_spill] sm:$0xff] }
 0x19a   : > { %v2712_v22 = vadd.f32 %v2626_v38, %v8998_v53  ;;  %v9363_v24 = vadd.f32 %v9194_v31, %v2710_v41  ;;  %v2814_v29 = vmul.f32 %v9322_v28, %v9322_v28  ;;  %v9370_v50 = vmul.f32 %v5783_v37, %v9012_v16  ;;  %v5784_v38 = vld [vmem:[%s5989_s25 + $0x190] sm:$0x3]  ;;  %s4648_s25 = sshll.u32 %s10802_s30, 4  ;;  %s10902_s25 = int_to_ptr.vmem [resolvable:$true] %s4648_s25 }
 0x19b   : > { %v2779_v32 = vadd.f32 %v2778_v20, %v9352_v47  ;;  %v2843_v44 = vadd.f32 %v2842_v5, %v2812_v26  ;;  %v2633_v12 = vsel %vm1465_vm3, %v2630_v63, %v2632_v42  ;;  %v2637_v23 = vrot.slane %v9173_v61, 2  ;;  %s5803_s10 = scalar_lea.vmem %s10902_s25, 4096  ;;  %p5810_p0 = scmp.lt.s32.totalorder %s10902_s25, %s5808_s12 }
 0x19c   : > { %v2713_v53 = vadd.f32 %v2628_v48, %v9001_v43  ;;  %v9376_v49 = vadd.f32 %v9194_v31, %v2711_v39  ;;  %v2815_v27 = vmul.f32 %v9333_v18, %v9333_v18  ;;  %v2636_v33 = vsel %vm1465_vm3, %v2634_v55, %v2635_v10  ;;  %p5804_p11 = scmp.ne.s32.totalorder %s10902_s25, %s5803_s10  ;;  %p5811_p1 = scmp.lt.s32.totalorder %s5809_s13, %s5803_s10 }
 0x19d   : > { %v2780_v46 = vadd.f32 %v2779_v32, %v9363_v24  ;;  %v2844_v34 = vadd.f32 %v2843_v44, %v2813_v40  ;;  %v2639_v60 = vrot.slane %v9177_v52, 2  ;;  %v2640_v11 = vrot.slane %v9183_v13, 2  ;;  %v11923_v52 = vld [vmem:[#allocation125_spill] sm:$0xff]  ;;  %v11924_v13 = vld [vmem:[#allocation20_spill] sm:$0xff] }
 0x19e   : > { %v2714_v63 = vadd.f32 %v2631_v7, %v9004_v9  ;;  %v9386_v61 = vadd.f32 %v9194_v31, %v2712_v22  ;;  %v2816_v45 = vmul.f32 %v9341_v57, %v9341_v57  ;;  %v9393_v41 = vmul.f32 %v5784_v38, %v9012_v16  ;;  %v11926_v40 = vld [vmem:[#allocation29_spill] sm:$0xff]  ;;  %v11927_v7 = vld [vmem:[#allocation120_spill] sm:$0xff]  ;;  %p5805_p12 = pnand %p5804_p11, %p5938_p5  ;;  %p5812_p2 = por %p5811_p1, %p5810_p0 }
 0x19f   : > { %v2781_v43 = vadd.f32 %v2780_v46, %v9376_v49  ;;  %v2845_v17 = vadd.f32 %v2844_v34, %v2814_v29  ;;  %v2638_v3 = vsel %vm1465_vm3, %v2635_v10, %v2637_v23  ;;  %v2642_v51 = vrot.slane %v11923_v52, 2  ;;  %v11928_v44 = vld [vmem:[#allocation48_spill] sm:$0xff] }
 0x1a0   : > { %v2715_v26 = vadd.f32 %v2633_v12, %v11924_v13  ;;  %v9399_v9 = vadd.f32 %v9194_v31, %v2713_v53  ;;  %v2817_v48 = vmul.f32 %v9352_v47, %v9352_v47  ;;  %v2641_v39 = vsel %vm1465_vm3, %v2639_v60, %v2640_v11  ;;  %v11929_v53 = vld [vmem:[#allocation121_spill] sm:$0xff]  ;;  %p5806_p13 = pneg %p5805_p12 }
 0x1a1   : > { %v2782_v19 = vadd.f32 %v2781_v43, %v9386_v61  ;;  %v2846_v42 = vadd.f32 %v2845_v17, %v2815_v27  ;;  %v2644_v20 = vrot.slane %v11925_v25, 2  ;;  %v2645_v5 = vrot.slane %v11926_v40, 2 }
 0x1a2   : > { %v2716_v55 = vadd.f32 %v2636_v33, %v11927_v7  ;;  %v9409_v10 = vadd.f32 %v9194_v31, %v2714_v63  ;;  %v2818_v32 = vmul.f32 %v9363_v24, %v9363_v24  ;;  %v2533_v37 = vmul.f32 %v9012_v16, %v11928_v44  ;;  %v11934_v44 = vld [vmem:[#allocation114_spill] sm:$0xff]  ;;  %p5813_p3 = pnand %p5812_p2, %p5806_p13 }
 0x1a3   : > { %v2783_v22 = vadd.f32 %v2782_v19, %v9399_v9  ;;  %v2847_v29 = vadd.f32 %v2846_v42, %v2816_v45  ;;  %v2643_v12 = vsel %vm1465_vm3, %v2640_v11, %v2642_v51  ;;  %v2647_v23 = vrot.slane %v9206_v2, 2  ;;  %v11930_v11 = vld [vmem:[#allocation86_spill] sm:$0xff]  ;;  %v11931_v51 = vld [vmem:[#allocation32_spill] sm:$0xff] }
 0x1a4   : > { %v2717_v46 = vadd.f32 %v2638_v3, %v11929_v53  ;;  %v9420_v27 = vadd.f32 %v9194_v31, %v2715_v26  ;;  %v2819_v33 = vmul.f32 %v9376_v49, %v9376_v49  ;;  %v2646_v63 = vsel %vm1465_vm3, %v2644_v20, %v2645_v5  ;;  %v11932_v19 = vld [vmem:[#allocation88_spill] sm:$0xff] }
 0x1a5   : > { %v2784_v34 = vadd.f32 %v2783_v22, %v9409_v10  ;;  %v2848_v60 = vadd.f32 %v2847_v29, %v2817_v48  ;;  %v2649_v43 = vrot.slane %v9211_v62, 2  ;;  %v2650_v45 = vrot.slane %v9230_v54, 2  ;;  %v11935_v53 = vld [vmem:[#allocation92_spill] sm:$0xff] }
 0x1a6   : > { %v2718_v17 = vadd.f32 %v2641_v39, %v11930_v11  ;;  %v9430_v2 = vadd.f32 %v9194_v31, %v2716_v55  ;;  %v2820_v3 = vmul.f32 %v9386_v61, %v9386_v61  ;;  %v2534_v13 = vmul.f32 %v9012_v16, %v11931_v51  ;;  %v11938_v51 = vld [vmem:[#allocation117_spill] sm:$0xff] }
 0x1a7   : > { %v2785_v38 = vadd.f32 %v2784_v34, %v9420_v27  ;;  %v2849_v52 = vadd.f32 %v2848_v60, %v2818_v32  ;;  %v2648_v26 = vsel %vm1465_vm3, %v2645_v5, %v2647_v23  ;;  %v2652_v62 = vrot.slane %v9250_v56, 2  ;;  %v11933_v5 = vld [vmem:[#allocation90_spill] sm:$0xff] }
 0x1a8   : > { %v2719_v54 = vadd.f32 %v2643_v12, %v11932_v19  ;;  %v9441_v48 = vadd.f32 %v9194_v31, %v2717_v46  ;;  %v2821_v39 = vmul.f32 %v9399_v9, %v9399_v9  ;;  %v2651_v20 = vsel %vm1465_vm3, %v2649_v43, %v2650_v45 }
 0x1a9   : > { %v2786_v42 = vadd.f32 %v2785_v38, %v9430_v2  ;;  %v2850_v25 = vadd.f32 %v2849_v52, %v2819_v33  ;;  %v2654_v40 = vrot.slane %v9254_v59, 2  ;;  %v2655_v7 = vrot.slane %v9370_v50, 2  ;;  %v11937_v52 = vld [vmem:[#allocation16_spill] sm:$0xff] }
 0x1aa   : > { %v2720_v55 = vadd.f32 %v2646_v63, %v11933_v5  ;;  %v9451_v56 = vadd.f32 %v9194_v31, %v2718_v17  ;;  %v2822_v32 = vmul.f32 %v9409_v10, %v9409_v10  ;;  %v2535_v12 = vmul.f32 %v9012_v16, %v11934_v44  ;;  %v11936_v16 = vld [vmem:[#allocation122_spill] sm:$0xff] }
 0x1ab   : > { %v2787_v22 = vadd.f32 %v2786_v42, %v9441_v48  ;;  %v2851_v29 = vadd.f32 %v2850_v25, %v2820_v3  ;;  %v2653_v23 = vsel %vm1465_vm3, %v2650_v45, %v2652_v62  ;;  %v2657_v59 = vrot.slane %v9393_v41, 2 }
 0x1ac   : > { %v2721_v50 = vadd.f32 %v2648_v26, %v11935_v53  ;;  %v9462_v46 = vadd.f32 %v9194_v31, %v2719_v54  ;;  %v2823_v33 = vmul.f32 %v9420_v27, %v9420_v27  ;;  %v2656_v63 = vsel %vm1465_vm3, %v2654_v40, %v2655_v7  ;;  %v11939_v54 = vld [vmem:[#allocation123_spill] sm:$0xff]  ;;  %v11941_v40 = vld [vmem:[#allocation118_spill] sm:$0xff] }
 0x1ad   : > { %v2788_v34 = vadd.f32 %v2787_v22, %v9451_v56  ;;  %v2852_v60 = vadd.f32 %v2851_v29, %v2821_v39  ;;  %v2659_v43 = vrot.slane %v2533_v37, 2  ;;  %v2660_v11 = vrot.slane %v2534_v13, 2  ;;  %v11942_v22 = vld [vmem:[#allocation124_spill] sm:$0xff] }
 0x1ae   : > { %v2722_v17 = vadd.f32 %v2651_v20, %v11936_v16  ;;  %v9470_v45 = vadd.f32 %v9194_v31, %v2720_v55  ;;  %v2824_v38 = vmul.f32 %v9430_v2, %v9430_v2  ;;  %v2480_v26 = vadd.f32 %v11938_v51, %v11937_v52  ;;  %v11940_v20 = vld [vmem:[#allocation112_spill] sm:$0xff] }
 0x1af   : > { %v2789_v41 = vadd.f32 %v2788_v34, %v9462_v46  ;;  %v2853_v3 = vadd.f32 %v2852_v60, %v2822_v32  ;;  %v2658_v62 = vsel %vm1465_vm3, %v2655_v7, %v2657_v59  ;;  %v2662_v19 = vrot.slane %v2535_v12, 2  ;;  %v11944_v59 = vld [vmem:[#allocation119_spill] sm:$0xff] }
 0x1b0   : > { %v2723_v37 = vadd.f32 %v2653_v23, %v11939_v54  ;;  %v9480_v13 = vadd.f32 %v9194_v31, %v2721_v50  ;;  %v2825_v39 = vmul.f32 %v9441_v48, %v9441_v48  ;;  %v2481_v5 = vadd.f32 %v11941_v40, %v11940_v20  ;;  %v11943_v23 = vld [vmem:[#allocation113_spill] sm:$0xff] }
 0x1b1   : > { %v2790_v42 = vadd.f32 %v2789_v41, %v9470_v45  ;;  %v2854_v25 = vadd.f32 %v2853_v3, %v2823_v33  ;;  %v2661_v55 = vsel %vm1465_vm3, %v2659_v43, %v2660_v11  ;;  %v2724_v32 = vadd.f32 %v2656_v63, %v11942_v22 }
 0x1b2   : > { %v9490_v7 = vadd.f32 %v9194_v31, %v2722_v17  ;;  %v2826_v44 = vmul.f32 %v9451_v56, %v9451_v56  ;;  %v2482_v53 = vadd.f32 %v11944_v59, %v11943_v23  ;;  %v2663_v50 = vsel %vm1465_vm3, %v2660_v11, %v2662_v19 }
 0x1b3   : > { %v2791_v29 = vadd.f32 %v2790_v42, %v9480_v13  ;;  %v2855_v12 = vadd.f32 %v2854_v25, %v2824_v38  ;;  %v2725_v34 = vadd.f32 %v2658_v62, %v2480_v26  ;;  %v9499_v33 = vadd.f32 %v9194_v31, %v2723_v37 }
 0x1b4   : > { %v2827_v63 = vmul.f32 %v9462_v46, %v9462_v46  ;;  %v2726_v16 = vadd.f32 %v2661_v55, %v2481_v5  ;;  %v9505_v17 = vadd.f32 %v9194_v31, %v2724_v32  ;;  %v2828_v38 = vmul.f32 %v9470_v45, %v9470_v45 }
 0x1b5   : > { %11945 = vst [vmem:[#allocation12_spill] sm:$0xff] %v9499_v33  ;;  %v2792_v60 = vadd.f32 %v2791_v29, %v9490_v7  ;;  %v2856_v43 = vadd.f32 %v2855_v12, %v2825_v39  ;;  %v2727_v3 = vadd.f32 %v2663_v50, %v2482_v53  ;;  %v9511_v52 = vadd.f32 %v9194_v31, %v2725_v34 }
 0x1b6   : > { %11946 = vst [vmem:[#allocation21_spill] sm:$0xff] %v9505_v17  ;;  %v2829_v26 = vmul.f32 %v9480_v13, %v9480_v13  ;;  %v9517_v19 = vadd.f32 %v9194_v31, %v2726_v16  ;;  %v2830_v37 = vmul.f32 %v9490_v7, %v9490_v7  ;;  %v2831_v20 = vmul.f32 %v9499_v33, %v9499_v33 }
 0x1b7   : > { %v2793_v41 = vadd.f32 %v2792_v60, %v9499_v33  ;;  %v2857_v11 = vadd.f32 %v2856_v43, %v2826_v44  ;;  %11947 = vst [vmem:[#allocation128_spill] sm:$0xff] %v9511_v52  ;;  %v9523_v39 = vadd.f32 %v9194_v31, %v2727_v3  ;;  %v2832_v55 = vmul.f32 %v9505_v17, %v9505_v17 }
 0x1b8   : > { %11948 = vst [vmem:[#allocation95_spill] sm:$0xff] %v9517_v19  ;;  %v2833_v29 = vmul.f32 %v9511_v52, %v9511_v52  ;;  %v2834_v31 = vmul.f32 %v9517_v19, %v9517_v19 }
 0x1b9   : > { %v2794_v51 = vadd.f32 %v2793_v41, %v9505_v17  ;;  %v2858_v62 = vadd.f32 %v2857_v11, %v2827_v63  ;;  %11949 = vst [vmem:[#allocation101_spill] sm:$0xff] %v9523_v39  ;;  %v2835_v59 = vmul.f32 %v9523_v39, %v9523_v39 }
 0x1bb   : > { %v2795_v54 = vadd.f32 %v2794_v51, %v9511_v52  ;;  %v2859_v42 = vadd.f32 %v2858_v62, %v2828_v38 }
 0x1bd   : > { %v2796_v25 = vadd.f32 %v2795_v54, %v9517_v19  ;;  %v2860_v40 = vadd.f32 %v2859_v42, %v2829_v26  ;;  %v11950_v54 = vld [vmem:[#allocation115_spill] sm:$0xff]  ;;  %v11952_v42 = vld [vmem:[#allocation116_spill] sm:$0xff] }
 0x1be   : > { %v4745_v19 = vld [vmem:[%s10951_s2 + $0x170] sm:$0xff] }
 0x1bf   : > { %v2797_v5 = vadd.f32 %v2796_v25, %v9523_v39  ;;  %v2861_v22 = vadd.f32 %v2860_v40, %v2830_v37  ;;  %v11951_v37 = vmov 0.0   ;;  %v851_v25 = vld [vmem:[%s10951_s2 + $0x78] sm:$0xff]  ;;  %v849_v40 = vld [vmem:[%s10951_s2 + $0x68] sm:$0xff] }
 0x1c0   : > { %5106 = vmatprep.subr.mxu1 %v851_v25 }
 0x1c1   : > { %v2798_v32 = vrot.slane %v2797_v5, 4  ;;  %v2862_v44 = vadd.f32 %v2861_v22, %v2831_v20  ;;  %v850_v20 = vld [vmem:[%s10951_s2 + $0x70] sm:$0xff]  ;;  %5107 = vmatpush3.msra.mxu1 %v851_v25  ;;  %v9562_v22 = vld [vmem:[%s10951_s2 + $0x178] sm:$0xff]  ;;  %v11954_v25 = vld [vmem:[#allocation18_spill] sm:$0xff] }
 0x1c2   : > { %5108 = vmatprep.subr.mxu1 %v850_v20 }
 0x1c3   : > { %v2799_v12 = vadd.f32 %v2798_v32, %v2797_v5  ;;  %v2863_v23 = vadd.f32 %v2862_v44, %v2832_v55  ;;  %5109 = vmatpush3.msra.mxu1 %v850_v20  ;;  %v848_v5 = vld [vmem:[%s10951_s2 + $0x60] sm:$0xff]  ;;  %v847_v55 = vld [vmem:[%s10951_s2 + $0x58] sm:$0xff]  ;;  %v846_v32 = vld [vmem:[%s10951_s2 + $0x50] sm:$0xff] }
 0x1c4   : > { %5110 = vmatprep.subr.mxu1 %v849_v40  ;;  %v844_v44 = vld [vmem:[%s10951_s2 + $0x40] sm:$0xff] }
 0x1c5   : > { %v2864_v53 = vadd.f32 %v2863_v23, %v2833_v29  ;;  %v2800_v50 = vrot.slane %v2799_v12, 2  ;;  %5111 = vmatpush3.msra.mxu1 %v849_v40  ;;  %v845_v29 = vld [vmem:[%s10951_s2 + $0x48] sm:$0xff] }
 0x1c6   : > { %5112 = vmatprep.subr.mxu1 %v848_v5  ;;  %v841_v23 = vld [vmem:[%s10951_s2 + $0x28] sm:$0xff] }
 0x1c7   : > { %v2865_v34 = vadd.f32 %v2864_v53, %v2834_v31  ;;  %v2801_v63 = vadd.f32 %v2800_v50, %v2799_v12  ;;  %5113 = vmatpush3.msra.mxu1 %v848_v5  ;;  %v843_v12 = vld [vmem:[%s10951_s2 + $0x38] sm:$0xff]  ;;  %v842_v31 = vld [vmem:[%s10951_s2 + $0x30] sm:$0xff]  ;;  %v11955_v40 = vld [vmem:[#allocation22_spill] sm:$0xff] }
 0x1c8   : > { %5114 = vmatprep.subr.mxu1 %v847_v55  ;;  %v839_v53 = vld [vmem:[%s10951_s2 + $0x18] sm:$0xff]  ;;  %v838_v50 = vld [vmem:[%s10951_s2 + $0x10] sm:$0xff] }
 0x1c9   : > { %v2866_v60 = vadd.f32 %v2865_v34, %v2835_v59  ;;  %v2802_v41 = vrot.slane %v2801_v63, 1  ;;  %5115 = vmatpush3.msra.mxu1 %v847_v55  ;;  %v840_v59 = vld [vmem:[%s10951_s2 + $0x20] sm:$0xff]  ;;  %v837_v34 = vld [vmem:[%s10951_s2 + $0x8] sm:$0xff] }
 0x1ca   : > { %5116 = vmatprep.subr.mxu1 %v846_v32  ;;  %v9620_v55 = vld [vmem:[%s10950_s1 + $0x1] ss:$0 sm:$0xff] }
 0x1cb   : > { %v2867_v43 = vrot.slane %v2866_v60, 4  ;;  %v2803_v3 = vadd.f32 %v2802_v41, %v2801_v63  ;;  %5117 = vmatpush3.msra.mxu1 %v846_v32  ;;  %v459_v41 = vld [vmem:[%s10950_s1] sm:$0x1] }
 0x1cc   : > { %5118 = vmatprep.subr.mxu1 %v845_v29 }
 0x1cd   : > { %v2868_v16 = vadd.f32 %v2867_v43, %v2866_v60  ;;  %5119 = vmatpush3.msra.mxu1 %v845_v29  ;;  %v836_v60 = vld [vmem:[%s10951_s2] sm:$0xff] }
 0x1ce   : > { %5120 = vmatprep.subr.mxu1 %v844_v44 }
 0x1cf   : > { %v2869_v38 = vrot.slane %v2868_v16, 2  ;;  %5121 = vmatpush3.msra.mxu1 %v844_v44 }
 0x1d0   : > { %5122 = vmatprep.subr.mxu1 %v843_v12 }
 0x1d1   : > { %v2870_v11 = vadd.f32 %v2869_v38, %v2868_v16  ;;  %5123 = vmatpush3.msra.mxu1 %v843_v12  ;;  %v761_v38 = vrot.slane %v459_v41, 7  ;;  %v11956_v12 = vld [vmem:[#allocation27_spill] sm:$0xff] }
 0x1d2   : > { %5124 = vmatprep.subr.mxu1 %v842_v31 }
 0x1d3   : > { %v2871_v51 = vrot.slane %v2870_v11, 1  ;;  %5125 = vmatpush3.msra.mxu1 %v842_v31 }
 0x1d4   : > { %5126 = vmatprep.subr.mxu1 %v841_v23 }
 0x1d5   : > { %v2872_v26 = vadd.f32 %v2871_v51, %v2870_v11  ;;  %5127 = vmatpush3.msra.mxu1 %v841_v23  ;;  %v9603_v11 = vsub.s32 1, %v11922_v30 }
 0x1d6   : > { %5128 = vmatprep.subr.mxu1 %v840_v59 }
 0x1d7   : > { %v2873_v62 = vsel %vm297_vm2, %v2872_v26, %v2803_v3  ;;  %5129 = vmatpush3.msra.mxu1 %v840_v59 }
 0x1d8   : > { %5219 = vmatmul.mubr.f32.vlgmr.msra.gmra.mxu0 %v2873_v62  ;;  %5130 = vmatprep.subr.mxu1 %v839_v53 }
 0x1d9   : > { %5222 = vmatpush3.msra.mxu0 %v11950_v54  ;;  %5225 = vmatprep.mubr.msk.f32.mxu0 %vm5866_vm0, %v11951_v37  ;;  %v11953_v54 = vld [vmem:[#allocation17_spill] sm:$0xff] }
 0x1da   : > { %5223 = vmatprep.subr.mxu0 %v11951_v37  ;;  %5131 = vmatpush3.msra.mxu1 %v839_v53  ;;  %v11957_v53 = vld [vmem:[#allocation33_spill] sm:$0xff] }
 0x1db   : > { %5224 = vmatpush3.msra.mxu0 %v11952_v42  ;;  %5132 = vmatprep.subr.mxu1 %v838_v50 }
 0x1dc   : > { %5228 = vmatprep.subr.mxu0 %v9562_v22  ;;  %5133 = vmatpush3.msra.mxu1 %v838_v50 }
 0x1dd   : > { %5134 = vmatprep.subr.mxu1 %v837_v34 }
 0x1de   : > { %5135 = vmatpush3.msra.mxu1 %v837_v34 }
 0x1df   : > { %5136 = vmatprep.subr.mxu1 %v836_v60 }
 0x1e0   : > { %5137 = vmatpush3.msra.mxu1 %v836_v60 }
 0x1e1   : > { %5308 = vmatprep.subr.mxu1 %v11951_v37 }
 0x259   : > { %v718_v63 = vpop.f32.mrf.mxu1 }
 0x25a   : > { %v722_v43 = vadd.f32 1e-05, %v718_v63  ;;  %v9606_v3 = vrot.slane %v718_v63, %v9297_v15 }
 0x25b   : > { %v5105_v16 = vpop.f32.mrf.mxu1 }
 0x25c   : > { %5551 = vrsqrt.f32 %v722_v43  ;;  %v728_v42 = vsub.f32 %v11953_v54, %v9606_v3  ;;  %v729_v20 = vsub.f32 %v11954_v25, %v9606_v3  ;;  %v730_v5 = vsub.f32 %v11955_v40, %v9606_v3  ;;  %v9637_v43 = vld [vmem:[%s10952_s3 + $0x78] sm:$0xff] }
 0x25d   : > { %v731_v31 = vsub.f32 %v11956_v12, %v9606_v3  ;;  %v732_v50 = vsub.f32 %v11957_v53, %v9606_v3 }
 0x269   : > { %v5552_v51 = vpop.eup %5551 }
 0x26a   : > { %v763_v26 = vmul.f32 %v5552_v51, %v761_v38  ;;  %v9646_v38 = vld [vmem:[%s10952_s3 + $0x70] sm:$0xff]  ;;  %v9653_v51 = vld [vmem:[%s10952_s3 + $0x68] sm:$0xff] }
 0x26c   : > { %v9609_v62 = vrot.slane %v763_v26, %v9603_v11  ;;  %v9660_v26 = vld [vmem:[%s10952_s3 + $0x60] sm:$0xff] }
 0x26e   : > { %v768_v32 = vmul.f32 %v9609_v62, %v728_v42  ;;  %v769_v29 = vmul.f32 %v9609_v62, %v729_v20  ;;  %v770_v44 = vmul.f32 %v9609_v62, %v730_v5  ;;  %v771_v34 = vmul.f32 %v9609_v62, %v731_v31  ;;  %v9667_v42 = vld [vmem:[%s10952_s3 + $0x58] sm:$0xff]  ;;  %v9674_v20 = vld [vmem:[%s10952_s3 + $0x50] sm:$0xff]  ;;  %v9681_v5 = vld [vmem:[%s10952_s3 + $0x48] sm:$0xff] }
 0x26f   : > { %v772_v63 = vmul.f32 %v9609_v62, %v732_v50  ;;  %v9709_v31 = vld [vmem:[%s10952_s3 + $0x28] sm:$0xff]  ;;  %v9730_v50 = vld [vmem:[%s10952_s3 + $0x10] sm:$0xff] }
 0x270   : > { %v804_v23 = vadd.f32 %v9620_v55, %v768_v32  ;;  %v805_v59 = vadd.f32 %v9620_v55, %v769_v29  ;;  %v806_v60 = vadd.f32 %v9620_v55, %v770_v44  ;;  %v807_v16 = vadd.f32 %v9620_v55, %v771_v34  ;;  %v9688_v32 = vld [vmem:[%s10952_s3 + $0x40] sm:$0xff]  ;;  %v9695_v29 = vld [vmem:[%s10952_s3 + $0x38] sm:$0xff]  ;;  %v9702_v44 = vld [vmem:[%s10952_s3 + $0x30] sm:$0xff] }
 0x271   : > { %v808_v41 = vadd.f32 %v9620_v55, %v772_v63  ;;  %v9737_v34 = vld [vmem:[%s10952_s3 + $0x8] sm:$0xff] }
 0x272   : > { %5138 = vmatprep.mubr.f32.mxu1 %v804_v23  ;;  %v9716_v23 = vld [vmem:[%s10952_s3 + $0x20] sm:$0xff] }
 0x273   : > { %5139 = vmatmul.mubr.f32.vlgmr.msra.gmra.mxu1 %v805_v59  ;;  %v9723_v59 = vld [vmem:[%s10952_s3 + $0x18] sm:$0xff] }
 0x274   : > { %5141 = vmatprep.mubr.f32.mxu1 %v806_v60  ;;  %5309 = vmatpush3.msra.mxu1 %v9637_v43  ;;  %v9744_v60 = vld [vmem:[%s10952_s3] sm:$0xff] }
 0x275   : > { %5310 = vmatprep.subr.mxu1 %v11951_v37 }
 0x276   : > { %5311 = vmatpush3.msra.mxu1 %v9646_v38 }
 0x277   : > { %5142 = vmatmul.mubr.f32.gmra.mxu1 %v807_v16  ;;  %5312 = vmatprep.subr.mxu1 %v11951_v37 }
 0x278   : > { %5144 = vmatprep.mubr.f32.mxu1 %v808_v41  ;;  %5313 = vmatpush3.msra.mxu1 %v9653_v51 }
 0x279   : > { %5314 = vmatprep.subr.mxu1 %v11951_v37 }
 0x27a   : > { %5315 = vmatpush3.msra.mxu1 %v9660_v26 }
 0x27b   : > { %5316 = vmatprep.subr.mxu1 %v11951_v37 }
 0x27c   : > { %5317 = vmatpush3.msra.mxu1 %v9667_v42 }
 0x27d   : > { %5318 = vmatprep.subr.mxu1 %v11951_v37 }
 0x27e   : > { %5319 = vmatpush3.msra.mxu1 %v9674_v20 }
 0x27f   : > { %5320 = vmatprep.subr.mxu1 %v11951_v37 }
 0x280   : > { %5321 = vmatpush3.msra.mxu1 %v9681_v5 }
 0x281   : > { %5322 = vmatprep.subr.mxu1 %v11951_v37 }
 0x282   : > { %5323 = vmatpush3.msra.mxu1 %v9688_v32 }
 0x283   : > { %5324 = vmatprep.subr.mxu1 %v11951_v37 }
 0x284   : > { %5325 = vmatpush3.msra.mxu1 %v9695_v29 }
 0x285   : > { %5326 = vmatprep.subr.mxu1 %v11951_v37 }
 0x286   : > { %5327 = vmatpush3.msra.mxu1 %v9702_v44 }
 0x287   : > { %5328 = vmatprep.subr.mxu1 %v11951_v37 }
 0x288   : > { %5329 = vmatpush3.msra.mxu1 %v9709_v31 }
 0x289   : > { %5330 = vmatprep.subr.mxu1 %v11951_v37 }
 0x28a   : > { %5331 = vmatpush3.msra.mxu1 %v9716_v23 }
 0x28b   : > { %5332 = vmatprep.subr.mxu1 %v11951_v37 }
 0x28c   : > { %5333 = vmatpush3.msra.mxu1 %v9723_v59 }
 0x28d   : > { %5334 = vmatprep.subr.mxu1 %v11951_v37 }
 0x28e   : > { %5335 = vmatpush3.msra.mxu1 %v9730_v50 }
 0x28f   : > { %5336 = vmatprep.subr.mxu1 %v11951_v37 }
 0x290   : > { %5337 = vmatpush3.msra.mxu1 %v9737_v34 }
 0x291   : > { %5338 = vmatprep.subr.mxu1 %v11951_v37 }
 0x292   : > { %5339 = vmatpush3.msra.mxu1 %v9744_v60 }
 0x293   : > { %5343 = vmatprep.subr.mxu1 %v11951_v37 }
 0x298   : > { %v2940_v63 = vpop.f32.mrf.mxu0 }
 0x299   : > { %v2944_v16 = vmul.f32 0.00048828125, %v2940_v63 }
 0x29a   : > { %v5220_v41 = vpop.f32.mrf.mxu0 }
 0x29b   : > { %v2945_v53 = vmul.f32 %v2944_v16, %v2944_v16  ;;  %v11961_v41 = vld [vmem:[#allocation47_spill] sm:$0xff] }
 0x29c   : > { %v736_v30 = vsub.f32 %v11961_v41, %v9606_v3 }
 0x29d   : > { %v2949_v40 = vrot.slane %v2945_v53, %v9297_v15  ;;  %v4744_v53 = vld [vmem:[%s10951_s2 + $0x168] sm:$0xff] }
 0x29f   : > { %v2950_v12 = vsel %vm297_vm2, %v2949_v40, 0.0  ;;  %v11958_v40 = vld [vmem:[#allocation39_spill] sm:$0xff] }
 0x2a0   : > { %v2951_v54 = vsub.f32 %v2944_v16, %v2950_v12  ;;  %v733_v12 = vsub.f32 %v11958_v40, %v9606_v3  ;;  %v776_v40 = vmul.f32 %v9609_v62, %v736_v30 }
 0x2a2   : > { %v2952_v25 = vmax.f32 %v2951_v54, 0.0  ;;  %v773_v63 = vmul.f32 %v9609_v62, %v733_v12 }
 0x2a4   : > { %v2953_v39 = vsel %vm297_vm2, %v2952_v25, %v2951_v54  ;;  %v11959_v54 = vld [vmem:[#allocation41_spill] sm:$0xff] }
 0x2a5   : > { %5226 = vmatmul.mubr.msk.f32.vlgmr.msra.gmra.mxu0 %vm648_vm4, %v2953_v39  ;;  %v734_v25 = vsub.f32 %v11959_v54, %v9606_v3  ;;  %v11962_v54 = vld [vmem:[#allocation49_spill] sm:$0xff] }
 0x2a6   : > { %5229 = vmatpush3.msra.mxu0 %v9562_v22  ;;  %v11960_v22 = vld [vmem:[#allocation44_spill] sm:$0xff]  ;;  %v737_v12 = vsub.f32 %v11962_v54, %v9606_v3 }
 0x2a7   : > { %5230 = vmatprep.subr.mxu0 %v4745_v19  ;;  %v774_v39 = vmul.f32 %v9609_v62, %v734_v25  ;;  %v735_v16 = vsub.f32 %v11960_v22, %v9606_v3  ;;  %v11963_v25 = vld [vmem:[#allocation52_spill] sm:$0xff] }
 0x2a8   : > { %5231 = vmatpush3.msra.mxu0 %v4745_v19  ;;  %v809_v19 = vadd.f32 %v9620_v55, %v773_v63  ;;  %v738_v17 = vsub.f32 %v11963_v25, %v9606_v3  ;;  %v777_v41 = vmul.f32 %v9609_v62, %v737_v12  ;;  %v812_v63 = vadd.f32 %v9620_v55, %v776_v40 }
 0x2a9   : > { %5232 = vmatprep.subr.mxu0 %v4744_v53  ;;  %v810_v52 = vadd.f32 %v9620_v55, %v774_v39  ;;  %v11964_v39 = vld [vmem:[#allocation54_spill] sm:$0xff] }
 0x2aa   : > { %5233 = vmatpush3.msra.mxu0 %v4744_v53  ;;  %v775_v53 = vmul.f32 %v9609_v62, %v735_v16  ;;  %5145 = vmatmul.mubr.f32.gmra.mxu1 %v809_v19  ;;  %v778_v16 = vmul.f32 %v9609_v62, %v738_v17  ;;  %v739_v30 = vsub.f32 %v11964_v39, %v9606_v3  ;;  %v4743_v19 = vld [vmem:[%s10951_s2 + $0x160] sm:$0xff]  ;;  %v4742_v17 = vld [vmem:[%s10951_s2 + $0x158] sm:$0xff] }
 0x2ab   : > { %5147 = vmatprep.mubr.f32.mxu1 %v810_v52  ;;  %v11965_v52 = vld [vmem:[#allocation57_spill] sm:$0xff]  ;;  %5234 = vmatprep.subr.mxu0 %v4743_v19 }
 0x2ac   : > { %v811_v22 = vadd.f32 %v9620_v55, %v775_v53  ;;  %v740_v25 = vsub.f32 %v11965_v52, %v9606_v3  ;;  %v813_v53 = vadd.f32 %v9620_v55, %v777_v41  ;;  %v779_v12 = vmul.f32 %v9609_v62, %v739_v30  ;;  %5235 = vmatpush3.msra.mxu0 %v4743_v19  ;;  %v4741_v41 = vld [vmem:[%s10951_s2 + $0x150] sm:$0xff]  ;;  %v11967_v30 = vld [vmem:[#allocation62_spill] sm:$0xff] }
 0x2ad   : > { %v814_v40 = vadd.f32 %v9620_v55, %v778_v16  ;;  %5236 = vmatprep.subr.mxu0 %v4742_v17  ;;  %v742_v19 = vsub.f32 %v11967_v30, %v9606_v3 }
 0x2ae   : > { %5148 = vmatmul.mubr.f32.gmra.mxu1 %v811_v22  ;;  %v780_v22 = vmul.f32 %v9609_v62, %v740_v25  ;;  %5237 = vmatpush3.msra.mxu0 %v4742_v17  ;;  %v815_v52 = vadd.f32 %v9620_v55, %v779_v12  ;;  %v4740_v25 = vld [vmem:[%s10951_s2 + $0x148] sm:$0xff]  ;;  %v4739_v12 = vld [vmem:[%s10951_s2 + $0x140] sm:$0xff] }
 0x2af   : > { %5150 = vmatprep.mubr.f32.mxu1 %v812_v63  ;;  %v11966_v63 = vld [vmem:[#allocation59_spill] sm:$0xff]  ;;  %5238 = vmatprep.subr.mxu0 %v4741_v41  ;;  %v782_v17 = vmul.f32 %v9609_v62, %v742_v19 }
 0x2b0   : > { %v741_v39 = vsub.f32 %v11966_v63, %v9606_v3  ;;  %5239 = vmatpush3.msra.mxu0 %v4741_v41 }
 0x2b1   : > { %5240 = vmatprep.subr.mxu0 %v4740_v25  ;;  %v818_v19 = vadd.f32 %v9620_v55, %v782_v17 }
 0x2b2   : > { %5151 = vmatmul.mubr.f32.gmra.mxu1 %v813_v53  ;;  %v781_v16 = vmul.f32 %v9609_v62, %v741_v39  ;;  %v816_v53 = vadd.f32 %v9620_v55, %v780_v22  ;;  %5241 = vmatpush3.msra.mxu0 %v4740_v25  ;;  %v11969_v39 = vld [vmem:[#allocation67_spill] sm:$0xff] }
 0x2b3   : > { %5153 = vmatprep.mubr.f32.mxu1 %v814_v40  ;;  %v11968_v40 = vld [vmem:[#allocation64_spill] sm:$0xff]  ;;  %v744_v41 = vsub.f32 %v11969_v39, %v9606_v3  ;;  %5242 = vmatprep.subr.mxu0 %v4739_v12 }
 0x2b4   : > { %v743_v63 = vsub.f32 %v11968_v40, %v9606_v3  ;;  %v817_v30 = vadd.f32 %v9620_v55, %v781_v16  ;;  %5243 = vmatpush3.msra.mxu0 %v4739_v12  ;;  %v4737_v16 = vld [vmem:[%s10951_s2 + $0x130] sm:$0xff] }
 0x2b5   : > { %v784_v25 = vmul.f32 %v9609_v62, %v744_v41 }
 0x2b6   : > { %5154 = vmatmul.mubr.f32.gmra.mxu1 %v815_v52  ;;  %v783_v22 = vmul.f32 %v9609_v62, %v743_v63  ;;  %v4738_v52 = vld [vmem:[%s10951_s2 + $0x138] sm:$0xff] }
 0x2b7   : > { %5156 = vmatprep.mubr.f32.mxu1 %v816_v53  ;;  %5244 = vmatprep.subr.mxu0 %v4738_v52  ;;  %v11970_v53 = vld [vmem:[#allocation69_spill] sm:$0xff]  ;;  %v11971_v63 = vld [vmem:[#allocation72_spill] sm:$0xff]  ;;  %v820_v41 = vadd.f32 %v9620_v55, %v784_v25 }
 0x2b8   : > { %v745_v40 = vsub.f32 %v11970_v53, %v9606_v3  ;;  %5245 = vmatpush3.msra.mxu0 %v4738_v52  ;;  %v746_v12 = vsub.f32 %v11971_v63, %v9606_v3  ;;  %v819_v39 = vadd.f32 %v9620_v55, %v783_v22  ;;  %v4735_v22 = vld [vmem:[%s10951_s2 + $0x120] sm:$0xff] }
 0x2b9   : > { %5246 = vmatprep.subr.mxu0 %v4737_v16 }
 0x2ba   : > { %5157 = vmatmul.mubr.f32.gmra.mxu1 %v817_v30  ;;  %v785_v17 = vmul.f32 %v9609_v62, %v745_v40  ;;  %5247 = vmatpush3.msra.mxu0 %v4737_v16  ;;  %v4736_v30 = vld [vmem:[%s10951_s2 + $0x128] sm:$0xff]  ;;  %v786_v52 = vmul.f32 %v9609_v62, %v746_v12  ;;  %v11973_v40 = vld [vmem:[#allocation77_spill] sm:$0xff] }
 0x2bb   : > { %5159 = vmatprep.mubr.f32.mxu1 %v818_v19  ;;  %5248 = vmatprep.subr.mxu0 %v4736_v30  ;;  %v11972_v19 = vld [vmem:[#allocation74_spill] sm:$0xff]  ;;  %v748_v16 = vsub.f32 %v11973_v40, %v9606_v3 }
 0x2bc   : > { %v747_v53 = vsub.f32 %v11972_v19, %v9606_v3  ;;  %5249 = vmatpush3.msra.mxu0 %v4736_v30  ;;  %v821_v63 = vadd.f32 %v9620_v55, %v785_v17  ;;  %v822_v12 = vadd.f32 %v9620_v55, %v786_v52  ;;  %v4733_v17 = vld [vmem:[%s10951_s2 + $0x110] sm:$0xff] }
 0x2bd   : > { %5250 = vmatprep.subr.mxu0 %v4735_v22  ;;  %v788_v30 = vmul.f32 %v9609_v62, %v748_v16 }
 0x2be   : > { %5160 = vmatmul.mubr.f32.gmra.mxu1 %v819_v39  ;;  %v787_v25 = vmul.f32 %v9609_v62, %v747_v53  ;;  %5251 = vmatpush3.msra.mxu0 %v4735_v22  ;;  %v4734_v39 = vld [vmem:[%s10951_s2 + $0x118] sm:$0xff]  ;;  %v4732_v53 = vld [vmem:[%s10951_s2 + $0x108] sm:$0xff] }
 0x2bf   : > { %5162 = vmatprep.mubr.f32.mxu1 %v820_v41  ;;  %5252 = vmatprep.subr.mxu0 %v4734_v39  ;;  %v11974_v41 = vld [vmem:[#allocation79_spill] sm:$0xff]  ;;  %v11975_v22 = vld [vmem:[#allocation82_spill] sm:$0xff]  ;;  %v824_v40 = vadd.f32 %v9620_v55, %v788_v30 }
 0x2c0   : > { %v749_v19 = vsub.f32 %v11974_v41, %v9606_v3  ;;  %5253 = vmatpush3.msra.mxu0 %v4734_v39  ;;  %v750_v52 = vsub.f32 %v11975_v22, %v9606_v3  ;;  %v823_v16 = vadd.f32 %v9620_v55, %v787_v25  ;;  %v4731_v39 = vld [vmem:[%s10951_s2 + $0x100] sm:$0xff]  ;;  %v11977_v25 = vld [vmem:[#allocation87_spill] sm:$0xff] }
 0x2c1   : > { %5254 = vmatprep.subr.mxu0 %v4733_v17  ;;  %v752_v22 = vsub.f32 %v11977_v25, %v9606_v3 }
 0x2c2   : > { %5163 = vmatmul.mubr.f32.gmra.mxu1 %v821_v63  ;;  %v789_v63 = vmul.f32 %v9609_v62, %v749_v19  ;;  %5255 = vmatpush3.msra.mxu0 %v4733_v17  ;;  %v790_v41 = vmul.f32 %v9609_v62, %v750_v52 }
 0x2c3   : > { %5165 = vmatprep.mubr.f32.mxu1 %v822_v12  ;;  %5256 = vmatprep.subr.mxu0 %v4732_v53  ;;  %v11976_v12 = vld [vmem:[#allocation85_spill] sm:$0xff]  ;;  %v792_v52 = vmul.f32 %v9609_v62, %v752_v22  ;;  %v11980_v22 = vld [vmem:[#allocation94_spill] sm:$0xff] }
 0x2c4   : > { %v751_v54 = vsub.f32 %v11976_v12, %v9606_v3  ;;  %5257 = vmatpush3.msra.mxu0 %v4732_v53  ;;  %v825_v19 = vadd.f32 %v9620_v55, %v789_v63  ;;  %v826_v30 = vadd.f32 %v9620_v55, %v790_v41 }
 0x2c5   : > { %5258 = vmatprep.subr.mxu0 %v4731_v39 }
 0x2c6   : > { %5166 = vmatmul.mubr.f32.gmra.mxu1 %v823_v16  ;;  %v791_v17 = vmul.f32 %v9609_v62, %v751_v54  ;;  %5259 = vmatpush3.msra.mxu0 %v4731_v39  ;;  %v11978_v16 = vld [vmem:[#allocation91_spill] sm:$0xff]  ;;  %v828_v54 = vadd.f32 %v9620_v55, %v792_v52  ;;  %v755_v39 = vsub.f32 %v11980_v22, %v9606_v3  ;;  %v11982_v52 = vld [vmem:[#allocation100_spill] sm:$0xff] }
 0x2c7   : > { %5168 = vmatprep.mubr.f32.mxu1 %v824_v40  ;;  %v753_v33 = vsub.f32 %v11978_v16, %v9606_v3  ;;  %5430 = vmatprep.subr.mxu0 %v11951_v37  ;;  %v11979_v40 = vld [vmem:[#allocation93_spill] sm:$0xff] }
 0x2c8   : > { %v754_v53 = vsub.f32 %v11979_v40, %v9606_v3  ;;  %v827_v25 = vadd.f32 %v9620_v55, %v791_v17  ;;  %v795_v40 = vmul.f32 %v9609_v62, %v755_v39 }
 0x2c9   : > { %v793_v63 = vmul.f32 %v9609_v62, %v753_v33 }
 0x2ca   : > { %5169 = vmatmul.mubr.f32.gmra.mxu1 %v825_v19  ;;  %v794_v41 = vmul.f32 %v9609_v62, %v754_v53  ;;  %v11981_v19 = vld [vmem:[#allocation98_spill] sm:$0xff]  ;;  %v757_v53 = vsub.f32 %v11982_v52, %v9606_v3 }
 0x2cb   : > { %5171 = vmatprep.mubr.f32.mxu1 %v826_v30  ;;  %v756_v16 = vsub.f32 %v11981_v19, %v9606_v3  ;;  %v829_v30 = vadd.f32 %v9620_v55, %v793_v63 }
 0x2cc   : > { %v830_v17 = vadd.f32 %v9620_v55, %v794_v41  ;;  %v797_v19 = vmul.f32 %v9609_v62, %v757_v53  ;;  %v11984_v41 = vld [vmem:[#allocation104_spill] sm:$0xff] }
 0x2cd   : > { %v796_v33 = vmul.f32 %v9609_v62, %v756_v16  ;;  %v759_v16 = vsub.f32 %v11984_v41, %v9606_v3 }
 0x2ce   : > { %5172 = vmatmul.mubr.f32.gmra.mxu1 %v827_v25  ;;  %v11983_v25 = vld [vmem:[#allocation103_spill] sm:$0xff] }
 0x2cf   : > { %5174 = vmatprep.mubr.f32.mxu1 %v828_v54  ;;  %v758_v22 = vsub.f32 %v11983_v25, %v9606_v3  ;;  %v831_v54 = vadd.f32 %v9620_v55, %v795_v40  ;;  %v832_v63 = vadd.f32 %v9620_v55, %v796_v33  ;;  %v2765_v3 = vld [vmem:[%s10950_s1 + $0x6] sm:$0x1] }
 0x2d1   : > { %v798_v39 = vmul.f32 %v9609_v62, %v758_v22 }
 0x2d2   : > { %5175 = vmatmul.mubr.f32.gmra.mxu1 %v829_v30  ;;  %v833_v30 = vadd.f32 %v9620_v55, %v797_v19  ;;  %v3066_v19 = vrot.slane %v2765_v3, 7 }
 0x2d3   : > { %5177 = vmatprep.mubr.f32.mxu1 %v830_v17  ;;  %v799_v17 = vmul.f32 %v9609_v62, %v759_v16  ;;  %v834_v52 = vadd.f32 %v9620_v55, %v798_v39 }
 0x2d5   : > { %v835_v40 = vadd.f32 %v9620_v55, %v799_v17 }
 0x2d6   : > { %5178 = vmatmul.mubr.f32.gmra.mxu1 %v831_v54 }
 0x2d7   : > { %5180 = vmatprep.mubr.f32.mxu1 %v832_v63 }
 0x2da   : > { %5181 = vmatmul.mubr.f32.gmra.mxu1 %v833_v30  ;;  %v9929_v30 = vld [vmem:[%s10950_s1 + $0x7] ss:$0 sm:$0xff] }
 0x2db   : > { %5183 = vmatprep.mubr.f32.mxu1 %v834_v52 }
 0x2de   : > { %5184 = vmatmul.mubr.f32.gmra.mxu1 %v835_v40 }
 0x2df   : > { %5340 = vmatprep.mubr.msk.f32.mxu1 %vm5866_vm0, %v11951_v37 }
 0x365   : > { %v3023_v22 = vpop.f32.mrf.mxu0 }
 0x366   : > { %v3027_v33 = vadd.f32 1e-05, %v3023_v22  ;;  %v9915_v62 = vrot.slane %v3023_v22, %v9297_v15 }
 0x367   : > { %v5227_v53 = vpop.f32.mrf.mxu0 }
 0x368   : > { %5553 = vrsqrt.f32 %v3027_v33  ;;  %v3033_v63 = vsub.f32 %v9219_v36, %v9915_v62  ;;  %v3034_v39 = vsub.f32 %v9222_v1, %v9915_v62  ;;  %v3035_v16 = vsub.f32 %v9234_v6, %v9915_v62 }
 0x369   : > { %v3036_v36 = vsub.f32 %v9245_v58, %v9915_v62  ;;  %v3037_v6 = vsub.f32 %v9261_v8, %v9915_v62  ;;  %v3039_v58 = vsub.f32 %v9282_v21, %v9915_v62  ;;  %v3041_v21 = vsub.f32 %v9303_v35, %v9915_v62 }
 0x36a   : > { %v3043_v35 = vsub.f32 %v9322_v28, %v9915_v62  ;;  %v3045_v28 = vsub.f32 %v9341_v57, %v9915_v62  ;;  %v3047_v57 = vsub.f32 %v9363_v24, %v9915_v62  ;;  %v3049_v24 = vsub.f32 %v9386_v61, %v9915_v62 }
 0x36b   : > { %v3051_v61 = vsub.f32 %v9409_v10, %v9915_v62  ;;  %v3053_v10 = vsub.f32 %v9430_v2, %v9915_v62  ;;  %v3055_v2 = vsub.f32 %v9451_v56, %v9915_v62  ;;  %v3057_v56 = vsub.f32 %v9470_v45, %v9915_v62 }
 0x36c   : > { %v3059_v45 = vsub.f32 %v9490_v7, %v9915_v62 }
 0x375   : > { %v5554_v54 = vpop.eup %5553 }
 0x376   : > { %v3068_v52 = vmul.f32 %v5554_v54, %v3066_v19  ;;  %v3038_v54 = vsub.f32 %v9269_v4, %v9915_v62  ;;  %v3040_v4 = vsub.f32 %v9290_v14, %v9915_v62  ;;  %v3042_v14 = vsub.f32 %v9312_v0, %v9915_v62 }
 0x377   : > { %v3044_v0 = vsub.f32 %v9333_v18, %v9915_v62  ;;  %v3046_v18 = vsub.f32 %v9352_v47, %v9915_v62  ;;  %v3048_v47 = vsub.f32 %v9376_v49, %v9915_v62  ;;  %v3050_v49 = vsub.f32 %v9399_v9, %v9915_v62 }
 0x378   : > { %v9918_v55 = vrot.slane %v3068_v52, %v9603_v11  ;;  %v3052_v9 = vsub.f32 %v9420_v27, %v9915_v62  ;;  %v3054_v27 = vsub.f32 %v9441_v48, %v9915_v62  ;;  %v3056_v48 = vsub.f32 %v9462_v46, %v9915_v62 }
 0x379   : > { %v3058_v46 = vsub.f32 %v9480_v13, %v9915_v62 }
 0x37a   : > { %v3073_v17 = vmul.f32 %v9918_v55, %v3033_v63  ;;  %v3074_v40 = vmul.f32 %v9918_v55, %v3034_v39  ;;  %v3075_v22 = vmul.f32 %v9918_v55, %v3035_v16  ;;  %v3076_v53 = vmul.f32 %v9918_v55, %v3036_v36 }
 0x37b   : > { %v3077_v19 = vmul.f32 %v9918_v55, %v3037_v6  ;;  %v3078_v63 = vmul.f32 %v9918_v55, %v3038_v54  ;;  %v3079_v39 = vmul.f32 %v9918_v55, %v3039_v58  ;;  %v3082_v36 = vmul.f32 %v9918_v55, %v3042_v14 }
 0x37c   : > { %v3109_v33 = vadd.f32 %v9929_v30, %v3073_v17  ;;  %v3110_v1 = vadd.f32 %v9929_v30, %v3074_v40  ;;  %v3111_v3 = vadd.f32 %v9929_v30, %v3075_v22  ;;  %v3112_v52 = vadd.f32 %v9929_v30, %v3076_v53 }
 0x37d   : > { %v3113_v8 = vadd.f32 %v9929_v30, %v3077_v19  ;;  %v3114_v16 = vadd.f32 %v9929_v30, %v3078_v63  ;;  %v3080_v17 = vmul.f32 %v9918_v55, %v3040_v4  ;;  %v3081_v40 = vmul.f32 %v9918_v55, %v3041_v21 }
 0x37e   : > { %5260 = vmatprep.mubr.f32.mxu0 %v3109_v33  ;;  %v3083_v33 = vmul.f32 %v9918_v55, %v3043_v35  ;;  %v3085_v53 = vmul.f32 %v9918_v55, %v3045_v28  ;;  %v3087_v19 = vmul.f32 %v9918_v55, %v3047_v57  ;;  %v3088_v54 = vmul.f32 %v9918_v55, %v3048_v47  ;;  %v11985_v35 = vld [vmem:[#allocation12_spill] sm:$0xff] }
 0x37f   : > { %5261 = vmatmul.mubr.f32.vlgmr.msra.gmra.mxu0 %v3110_v1  ;;  %v3116_v22 = vadd.f32 %v9929_v30, %v3080_v17  ;;  %v3118_v1 = vadd.f32 %v9929_v30, %v3082_v36  ;;  %v3089_v58 = vmul.f32 %v9918_v55, %v3049_v24  ;;  %v3091_v63 = vmul.f32 %v9918_v55, %v3051_v61  ;;  %v11986_v36 = vld [vmem:[#allocation21_spill] sm:$0xff]  ;;  %v11987_v28 = vld [vmem:[#allocation128_spill] sm:$0xff] }
 0x380   : > { %5263 = vmatprep.mubr.f32.mxu0 %v3111_v3  ;;  %5431 = vmatpush3.msra.mxu0 %v9637_v43  ;;  %v3115_v43 = vadd.f32 %v9929_v30, %v3079_v39  ;;  %v3119_v6 = vadd.f32 %v9929_v30, %v3083_v33  ;;  %v3086_v3 = vmul.f32 %v9918_v55, %v3046_v18 }
 0x381   : > { %5432 = vmatprep.subr.mxu0 %v11951_v37  ;;  %v3093_v39 = vmul.f32 %v9918_v55, %v3053_v10  ;;  %v3094_v4 = vmul.f32 %v9918_v55, %v3054_v27  ;;  %v3095_v21 = vmul.f32 %v9918_v55, %v3055_v2  ;;  %v3097_v17 = vmul.f32 %v9918_v55, %v3057_v56 }
 0x382   : > { %5433 = vmatpush3.msra.mxu0 %v9646_v38  ;;  %v3117_v38 = vadd.f32 %v9929_v30, %v3081_v40  ;;  %v3099_v14 = vmul.f32 %v9918_v55, %v3059_v45  ;;  %v3061_v13 = vsub.f32 %v11986_v36, %v9915_v62 }
 0x383   : > { %5264 = vmatmul.mubr.f32.gmra.mxu0 %v3112_v52  ;;  %5434 = vmatprep.subr.mxu0 %v11951_v37  ;;  %v3090_v52 = vmul.f32 %v9918_v55, %v3050_v49  ;;  %v3133_v40 = vadd.f32 %v9929_v30, %v3097_v17 }
 0x384   : > { %5266 = vmatprep.mubr.f32.mxu0 %v3113_v8  ;;  %5435 = vmatpush3.msra.mxu0 %v9653_v51  ;;  %v3084_v51 = vmul.f32 %v9918_v55, %v3044_v0  ;;  %v3092_v8 = vmul.f32 %v9918_v55, %v3052_v9  ;;  %v3135_v33 = vadd.f32 %v9929_v30, %v3099_v14 }
 0x385   : > { %5436 = vmatprep.subr.mxu0 %v11951_v37  ;;  %v3101_v0 = vmul.f32 %v9918_v55, %v3061_v13 }
 0x386   : > { %5437 = vmatpush3.msra.mxu0 %v9660_v26  ;;  %v3120_v26 = vadd.f32 %v9929_v30, %v3084_v51  ;;  %v11988_v51 = vld [vmem:[#allocation95_spill] sm:$0xff] }
 0x387   : > { %5267 = vmatmul.mubr.f32.gmra.mxu0 %v3114_v16  ;;  %5438 = vmatprep.subr.mxu0 %v11951_v37  ;;  %v3096_v16 = vmul.f32 %v9918_v55, %v3056_v48  ;;  %v3137_v57 = vadd.f32 %v9929_v30, %v3101_v0 }
 0x388   : > { %5269 = vmatprep.mubr.f32.mxu0 %v3115_v43  ;;  %5439 = vmatpush3.msra.mxu0 %v9667_v42  ;;  %v3121_v42 = vadd.f32 %v9929_v30, %v3085_v53  ;;  %v3098_v43 = vmul.f32 %v9918_v55, %v3058_v46 }
 0x389   : > { %5440 = vmatprep.subr.mxu0 %v11951_v37 }
 0x38a   : > { %5441 = vmatpush3.msra.mxu0 %v9674_v20  ;;  %v3122_v20 = vadd.f32 %v9929_v30, %v3086_v3  ;;  %v11989_v3 = vld [vmem:[#allocation101_spill] sm:$0xff] }
 0x38b   : > { %5270 = vmatmul.mubr.f32.gmra.mxu0 %v3116_v22  ;;  %5442 = vmatprep.subr.mxu0 %v11951_v37  ;;  %v3060_v22 = vsub.f32 %v11985_v35, %v9915_v62 }
 0x38c   : > { %5272 = vmatprep.mubr.f32.mxu0 %v3117_v38  ;;  %5443 = vmatpush3.msra.mxu0 %v9681_v5  ;;  %v3123_v5 = vadd.f32 %v9929_v30, %v3087_v19  ;;  %v3134_v38 = vadd.f32 %v9929_v30, %v3098_v43 }
 0x38d   : > { %5444 = vmatprep.subr.mxu0 %v11951_v37  ;;  %v3100_v7 = vmul.f32 %v9918_v55, %v3060_v22 }
 0x38e   : > { %5445 = vmatpush3.msra.mxu0 %v9688_v32  ;;  %v3124_v32 = vadd.f32 %v9929_v30, %v3088_v54  ;;  %v10087_v54 = vpop.f32.mrf.mxu1 }
 0x38f   : > { %5273 = vmatmul.mubr.f32.gmra.mxu0 %v3118_v1  ;;  %5446 = vmatprep.subr.mxu0 %v11951_v37  ;;  %v3062_v1 = vsub.f32 %v11987_v28, %v9915_v62  ;;  %v3136_v53 = vadd.f32 %v9929_v30, %v3100_v7 }
 0x390   : > { %5275 = vmatprep.mubr.f32.mxu0 %v3119_v6  ;;  %5447 = vmatpush3.msra.mxu0 %v9695_v29  ;;  %v3125_v29 = vadd.f32 %v9929_v30, %v3089_v58  ;;  %v3063_v6 = vsub.f32 %v11988_v51, %v9915_v62 }
 0x391   : > { %5448 = vmatprep.subr.mxu0 %v11951_v37  ;;  %v3102_v18 = vmul.f32 %v9918_v55, %v3062_v1 }
 0x392   : > { %5449 = vmatpush3.msra.mxu0 %v9702_v44  ;;  %v3126_v44 = vadd.f32 %v9929_v30, %v3090_v52 }
 0x393   : > { %5276 = vmatmul.mubr.f32.gmra.mxu0 %v3120_v26  ;;  %5450 = vmatprep.subr.mxu0 %v11951_v37  ;;  %v3103_v26 = vmul.f32 %v9918_v55, %v3063_v6  ;;  %v3138_v19 = vadd.f32 %v9929_v30, %v3102_v18 }
 0x394   : > { %5278 = vmatprep.mubr.f32.mxu0 %v3121_v42  ;;  %5451 = vmatpush3.msra.mxu0 %v9709_v31  ;;  %v3127_v31 = vadd.f32 %v9929_v30, %v3091_v63  ;;  %v3064_v42 = vsub.f32 %v11989_v3, %v9915_v62 }
 0x395   : > { %5452 = vmatprep.subr.mxu0 %v11951_v37  ;;  %v3139_v24 = vadd.f32 %v9929_v30, %v3103_v26 }
 0x396   : > { %5453 = vmatpush3.msra.mxu0 %v9716_v23  ;;  %v3128_v23 = vadd.f32 %v9929_v30, %v3092_v8  ;;  %v3104_v47 = vmul.f32 %v9918_v55, %v3064_v42  ;;  %v10100_v55 = vld [vmem:[%s10950_s1 + $0x8] ss:$0 sm:$0xff] }
 0x397   : > { %5279 = vmatmul.mubr.f32.gmra.mxu0 %v3122_v20  ;;  %5454 = vmatprep.subr.mxu0 %v11951_v37 }
 0x398   : > { %5281 = vmatprep.mubr.f32.mxu0 %v3123_v5  ;;  %5455 = vmatpush3.msra.mxu0 %v9723_v59  ;;  %v3129_v59 = vadd.f32 %v9929_v30, %v3093_v39  ;;  %v3140_v20 = vadd.f32 %v9929_v30, %v3104_v47  ;;  %v10089_v5 = vpop.f32.mrf.mxu1 }
 0x399   : > { %5456 = vmatprep.subr.mxu0 %v11951_v37 }
 0x39a   : > { %5457 = vmatpush3.msra.mxu0 %v9730_v50  ;;  %v3130_v50 = vadd.f32 %v9929_v30, %v3094_v4  ;;  %v10091_v62 = vpop.f32.mrf.mxu1 }
 0x39b   : > { %5282 = vmatmul.mubr.f32.gmra.mxu0 %v3124_v32  ;;  %5458 = vmatprep.subr.mxu0 %v11951_v37 }
 0x39c   : > { %5284 = vmatprep.mubr.f32.mxu0 %v3125_v29  ;;  %5459 = vmatpush3.msra.mxu0 %v9737_v34  ;;  %v3131_v34 = vadd.f32 %v9929_v30, %v3095_v21  ;;  %v10093_v58 = vpop.f32.mrf.mxu1 }
 0x39d   : > { %5460 = vmatprep.subr.mxu0 %v11951_v37 }
 0x39e   : > { %5461 = vmatpush3.msra.mxu0 %v9744_v60  ;;  %v3132_v60 = vadd.f32 %v9929_v30, %v3096_v16  ;;  %v10095_v49 = vpop.f32.mrf.mxu1 }
 0x39f   : > { %5285 = vmatmul.mubr.f32.gmra.mxu0 %v3126_v44  ;;  %5465 = vmatprep.subr.mxu0 %v11951_v37 }
 0x3a0   : > { %5287 = vmatprep.mubr.f32.mxu0 %v3127_v31  ;;  %v10102_v61 = vpop.f32.mrf.mxu1 }
 0x3a2   : > { %v10106_v10 = vpop.f32.mrf.mxu1 }
 0x3a3   : > { %5288 = vmatmul.mubr.f32.gmra.mxu0 %v3128_v23 }
 0x3a4   : > { %5290 = vmatprep.mubr.f32.mxu0 %v3129_v59  ;;  %v10110_v23 = vpop.f32.mrf.mxu1 }
 0x3a6   : > { %v10114_v16 = vpop.f32.mrf.mxu1 }
 0x3a7   : > { %5291 = vmatmul.mubr.f32.gmra.mxu0 %v3130_v50 }
 0x3a8   : > { %5293 = vmatprep.mubr.f32.mxu0 %v3131_v34 }
 0x3ab   : > { %5294 = vmatmul.mubr.f32.gmra.mxu0 %v3132_v60 }
 0x3ac   : > { %5296 = vmatprep.mubr.f32.mxu0 %v3133_v40  ;;  %v10118_v40 = vpop.f32.mrf.mxu1 }
 0x3ae   : > { %v10122_v28 = vpop.f32.mrf.mxu1 }
 0x3af   : > { %5297 = vmatmul.mubr.f32.gmra.mxu0 %v3134_v38 }
 0x3b0   : > { %5299 = vmatprep.mubr.f32.mxu0 %v3135_v33  ;;  %v10126_v47 = vpop.f32.mrf.mxu1 }
 0x3b3   : > { %5300 = vmatmul.mubr.f32.gmra.mxu0 %v3136_v53 }
 0x3b4   : > { %5302 = vmatprep.mubr.f32.mxu0 %v3137_v57 }
 0x3b7   : > { %5303 = vmatmul.mubr.f32.gmra.mxu0 %v3138_v19 }
 0x3b8   : > { %5305 = vmatprep.mubr.f32.mxu0 %v3139_v24 }
 0x3bb   : > { %5306 = vmatmul.mubr.f32.gmra.mxu0 %v3140_v20 }
 0x3bc   : > { %5462 = vmatprep.mubr.msk.f32.mxu0 %vm5866_vm0, %v11951_v37 }
 0x43f   : > { %v5262_v30 = vpop.f32.mrf.mxu0 }
 0x440   : > { %v3235_v32 = vadd.f32 %v5262_v30, %v10100_v55 }
 0x441   : > { %v3229_v52 = vpop.f32.mrf.mxu0 }
 0x442   : > { %v4749_v29 = vmul.f32 -1.442695, %v3235_v32  ;;  %v3230_v63 = vadd.f32 %v10100_v55, %v3229_v52 }
 0x443   : > { %v5265_v9 = vpop.f32.mrf.mxu0 }
 0x444   : > { %5555 = vpow2.f32 %v4749_v29  ;;  %v4748_v44 = vmul.f32 -1.442695, %v3230_v63  ;;  %v3245_v8 = vadd.f32 %v5265_v9, %v10100_v55  ;;  %v10132_v29 = vld [vmem:[%s10950_s1 + $0x2] ss:$0 sm:$0xff] }
 0x445   : > { %v3239_v31 = vpop.f32.mrf.mxu0 }
 0x446   : > { %5557 = vpow2.f32 %v4748_v44  ;;  %v4751_v39 = vmul.f32 -1.442695, %v3245_v8  ;;  %v3240_v27 = vadd.f32 %v10100_v55, %v3239_v31 }
 0x447   : > { %v5268_v2 = vpop.f32.mrf.mxu0 }
 0x448   : > { %5559 = vpow2.f32 %v4751_v39  ;;  %v4750_v4 = vmul.f32 -1.442695, %v3240_v27  ;;  %v3255_v59 = vadd.f32 %v5268_v2, %v10100_v55  ;;  %v5158_v39 = vpop.f32.mrf.mxu1 }
 0x449   : > { %v3249_v21 = vpop.f32.mrf.mxu0 }
 0x44a   : > { %5561 = vpow2.f32 %v4750_v4  ;;  %v4753_v48 = vmul.f32 -1.442695, %v3255_v59  ;;  %v3250_v56 = vadd.f32 %v10100_v55, %v3249_v21  ;;  %v929_v21 = vadd.f32 %v10087_v54, %v10132_v29 }
 0x44b   : > { %v5271_v50 = vpop.f32.mrf.mxu0  ;;  %v10147_v54 = vadd.f32 %v10095_v49, %v10132_v29 }
 0x44c   : > { %5563 = vpow2.f32 %v4753_v48  ;;  %v4752_v34 = vmul.f32 -1.442695, %v3250_v56  ;;  %v3265_v17 = vadd.f32 %v5271_v50, %v10100_v55  ;;  %v924_v48 = vadd.f32 %v10132_v29, %v10089_v5 }
 0x44d   : > { %v3259_v46 = vpop.f32.mrf.mxu0 }
 0x44e   : > { %5565 = vpow2.f32 %v4752_v34  ;;  %v4755_v45 = vmul.f32 -1.442695, %v3265_v17  ;;  %v3260_v60 = vadd.f32 %v10100_v55, %v3259_v46 }
 0x44f   : > { %v5274_v43 = vpop.f32.mrf.mxu0 }
 0x450   : > { %5567 = vpow2.f32 %v4755_v45  ;;  %v4754_v14 = vmul.f32 -1.442695, %v3260_v60  ;;  %v3275_v35 = vadd.f32 %v5274_v43, %v10100_v55  ;;  %v939_v45 = vadd.f32 %v10091_v62, %v10132_v29  ;;  %v983_v43 = vpop.f32.mrf.mxu1 }
 0x451   : > { %v5556_v22 = vpop.eup %5555  ;;  %v3269_v36 = vpop.f32.mrf.mxu0  ;;  %v934_v60 = vadd.f32 %v10132_v29, %v10093_v58  ;;  %v10156_v62 = vadd.f32 %v10106_v10, %v10132_v29  ;;  %v10160_v58 = vadd.f32 %v10132_v29, %v10110_v23  ;;  %v10169_v10 = vadd.f32 %v10132_v29, %v10118_v40 }
 0x452   : > { %v3485_v13 = vadd.f32 1.0, %v5556_v22  ;;  %5569 = vpow2.f32 %v4754_v14  ;;  %v4757_v38 = vmul.f32 -1.442695, %v3275_v35  ;;  %v3270_v7 = vadd.f32 %v10100_v55, %v3269_v36 }
 0x453   : > { %v5558_v33 = vpop.eup %5557  ;;  %v5277_v0 = vpop.f32.mrf.mxu0 }
 0x454   : > { %5571 = vrcp.f32 %v3485_v13  ;;  %v3484_v1 = vadd.f32 1.0, %v5558_v33  ;;  %v4756_v51 = vmul.f32 -1.442695, %v3270_v7  ;;  %v3285_v6 = vadd.f32 %v5277_v0, %v10100_v55 }
 0x455   : > { %v5560_v53 = vpop.eup %5559  ;;  %5573 = vpow2.f32 %v4757_v38  ;;  %v3279_v18 = vpop.f32.mrf.mxu0  ;;  %v10152_v13 = vadd.f32 %v10132_v29, %v10102_v61  ;;  %v10165_v61 = vadd.f32 %v10114_v16, %v10132_v29 }
 0x456   : > { %5575 = vrcp.f32 %v3484_v1  ;;  %v3487_v57 = vadd.f32 1.0, %v5560_v53  ;;  %v4759_v26 = vmul.f32 -1.442695, %v3285_v6  ;;  %v3280_v3 = vadd.f32 %v10100_v55, %v3279_v18  ;;  %v5161_v18 = vpop.f32.mrf.mxu1 }
 0x457   : > { %v5562_v42 = vpop.eup %5561  ;;  %5577 = vpow2.f32 %v4756_v51  ;;  %v5280_v19 = vpop.f32.mrf.mxu0  ;;  %v10173_v53 = vadd.f32 %v10122_v28, %v10132_v29  ;;  %v11991_v28 = vld [vmem:[#allocation17_spill] sm:$0xff] }
 0x458   : > { %5579 = vrcp.f32 %v3487_v57  ;;  %v3486_v24 = vadd.f32 1.0, %v5562_v42  ;;  %v4758_v20 = vmul.f32 -1.442695, %v3280_v3  ;;  %v3295_v30 = vadd.f32 %v5280_v19, %v10100_v55  ;;  %v11990_v42 = vld [vmem:[#allocation18_spill] sm:$0xff] }
 0x459   : > { %v5564_v32 = vpop.eup %5563  ;;  %5581 = vpow2.f32 %v4759_v26  ;;  %v3289_v52 = vpop.f32.mrf.mxu0 }
 0x45a   : > { %5583 = vrcp.f32 %v3486_v24  ;;  %v3489_v63 = vadd.f32 1.0, %v5564_v32  ;;  %v4761_v9 = vmul.f32 -1.442695, %v3295_v30  ;;  %v3290_v44 = vadd.f32 %v10100_v55, %v3289_v52 }
 0x45b   : > { %v5566_v8 = vpop.eup %5565  ;;  %5585 = vpow2.f32 %v4758_v20  ;;  %v5283_v31 = vpop.f32.mrf.mxu0  ;;  %v10181_v30 = vadd.f32 %v10132_v29, %v10126_v47  ;;  %v10194_v47 = vadd.f32 %v5161_v18, %v10132_v29 }
 0x45c   : > { %5587 = vrcp.f32 %v3489_v63  ;;  %v3488_v27 = vadd.f32 1.0, %v5566_v8  ;;  %v4760_v2 = vmul.f32 -1.442695, %v3290_v44  ;;  %v3305_v4 = vadd.f32 %v5283_v31, %v10100_v55 }
 0x45d   : > { %v5568_v59 = vpop.eup %5567  ;;  %5589 = vpow2.f32 %v4761_v9  ;;  %v3299_v56 = vpop.f32.mrf.mxu0  ;;  %v10187_v9 = vadd.f32 %v5158_v39, %v10132_v29 }
 0x45e   : > { %5591 = vrcp.f32 %v3488_v27  ;;  %v3491_v50 = vadd.f32 1.0, %v5568_v59  ;;  %v4763_v34 = vmul.f32 -1.442695, %v3305_v4  ;;  %v3300_v17 = vadd.f32 %v10100_v55, %v3299_v56  ;;  %v10196_v4 = vpop.f32.mrf.mxu1 }
 0x45f   : > { %v5570_v46 = vpop.eup %5569  ;;  %5593 = vpow2.f32 %v4760_v2  ;;  %v5286_v5 = vpop.f32.mrf.mxu0  ;;  %v10191_v2 = vadd.f32 %v10132_v29, %v983_v43  ;;  %v11993_v43 = vld [vmem:[#allocation22_spill] sm:$0xff] }
 0x460   : > { %5595 = vrcp.f32 %v3491_v50  ;;  %v3490_v14 = vadd.f32 1.0, %v5570_v46  ;;  %v4762_v35 = vmul.f32 -1.442695, %v3300_v17  ;;  %v3315_v22 = vadd.f32 %v5286_v5, %v10100_v55 }
 0x461   : > { %v5572_v36 = vpop.eup %5571  ;;  %5597 = vpow2.f32 %v4763_v34  ;;  %v3309_v49 = vpop.f32.mrf.mxu0 }
 0x462   : > { %v5574_v38 = vpop.eup %5573  ;;  %v3581_v7 = vmul.f32 %v5572_v36, %v929_v21  ;;  %5599 = vrcp.f32 %v3490_v14  ;;  %v4765_v33 = vmul.f32 -1.442695, %v3315_v22  ;;  %v3310_v0 = vadd.f32 %v10100_v55, %v3309_v49 }
 0x463   : > { %v5576_v1 = vpop.eup %5575  ;;  %v3493_v51 = vadd.f32 1.0, %v5574_v38  ;;  %5601 = vpow2.f32 %v4762_v35  ;;  %v5289_v23 = vpop.f32.mrf.mxu0 }
 0x464   : > { %v5578_v6 = vpop.eup %5577  ;;  %v3580_v57 = vmul.f32 %v5576_v1, %v924_v48  ;;  %5603 = vpow2.f32 %v4765_v33  ;;  %v4764_v26 = vmul.f32 -1.442695, %v3310_v0  ;;  %v10176_v16 = vadd.f32 %v3581_v7, %v11990_v42  ;;  %v10216_v33 = vpop.f32.mrf.mxu1 }
 0x465   : > { %v5580_v3 = vpop.eup %5579  ;;  %5605 = vrcp.f32 %v3493_v51  ;;  %v3492_v19 = vadd.f32 1.0, %v5578_v6  ;;  %v3325_v40 = vadd.f32 %v5289_v23, %v10100_v55  ;;  %v3319_v24 = vpop.f32.mrf.mxu0  ;;  %v11994_v6 = vld [vmem:[#allocation39_spill] sm:$0xff] }
 0x466   : > { %v5582_v20 = vpop.eup %5581  ;;  %v10184_v32 = vadd.f32 %v3580_v57, %v11991_v28  ;;  %v3583_v52 = vmul.f32 %v5580_v3, %v939_v45  ;;  %5607 = vpow2.f32 %v4764_v26  ;;  %v3320_v8 = vadd.f32 %v10100_v55, %v3319_v24  ;;  %v11992_v45 = vld [vmem:[#allocation27_spill] sm:$0xff]  ;;  %v11995_v24 = vld [vmem:[#allocation33_spill] sm:$0xff] }
 0x467   : > { %v5584_v63 = vpop.eup %5583  ;;  %5609 = vrcp.f32 %v3492_v19  ;;  %v3495_v44 = vadd.f32 1.0, %v5582_v20  ;;  %v5292_v31 = vpop.f32.mrf.mxu0  ;;  %v3684_v48 = vmul.f32 %v10176_v16, %v10176_v16  ;;  %v10202_v50 = vmul.f32 -1.442695, %v3325_v40 }
 0x468   : > { %v5586_v27 = vpop.eup %5585  ;;  %v3683_v59 = vmul.f32 %v10184_v32, %v10184_v32  ;;  %v3582_v21 = vmul.f32 %v5584_v63, %v934_v60  ;;  %v3646_v46 = vadd.f32 %v10176_v16, %v10184_v32  ;;  %v10207_v5 = vadd.f32 %v3583_v52, %v11992_v45 }
 0x469   : > { %v5588_v39 = vpop.eup %5587  ;;  %5611 = vrcp.f32 %v3495_v44  ;;  %v3494_v56 = vadd.f32 1.0, %v5586_v27  ;;  %v3329_v34 = vpop.f32.mrf.mxu0  ;;  %v10213_v36 = vmul.f32 -1.442695, %v3320_v8  ;;  %v3335_v49 = vadd.f32 %v5292_v31, %v10100_v55 }
 0x46a   : > { %v5590_v17 = vpop.eup %5589  ;;  %v10210_v14 = vadd.f32 %v3582_v21, %v11993_v43  ;;  %v3585_v60 = vmul.f32 %v5588_v39, %v10147_v54  ;;  %v3715_v0 = vadd.f32 %v3684_v48, %v3683_v59  ;;  %v3330_v26 = vadd.f32 %v10100_v55, %v3329_v34  ;;  %v10233_v27 = vpop.f32.mrf.mxu1 }
 0x46b   : > { %v5592_v35 = vpop.eup %5591  ;;  %5613 = vrcp.f32 %v3494_v56  ;;  %v3497_v22 = vadd.f32 1.0, %v5590_v17  ;;  %v5295_v38 = vpop.f32.mrf.mxu0  ;;  %v3686_v19 = vmul.f32 %v10207_v5, %v10207_v5  ;;  %v4769_v44 = vmul.f32 -1.442695, %v3335_v49 }
 0x46c   : > { %v5594_v7 = vpop.eup %5593  ;;  %v3647_v1 = vadd.f32 %v3646_v46, %v10210_v14  ;;  %v3685_v51 = vmul.f32 %v10210_v14, %v10210_v14  ;;  %v3584_v23 = vmul.f32 %v5592_v35, %v10152_v13  ;;  %v10223_v18 = vadd.f32 %v3585_v60, %v11994_v6  ;;  %v10251_v6 = vpop.f32.mrf.mxu1 }
 0x46d   : > { %v5596_v54 = vpop.eup %5595  ;;  %5615 = vrcp.f32 %v3497_v22  ;;  %v3496_v57 = vadd.f32 1.0, %v5594_v7  ;;  %v3339_v3 = vpop.f32.mrf.mxu0  ;;  %v4768_v45 = vmul.f32 -1.442695, %v3330_v26  ;;  %v11997_v22 = vld [vmem:[#allocation41_spill] sm:$0xff] }
 0x46e   : > { %v5598_v42 = vpop.eup %5597  ;;  %v3716_v40 = vadd.f32 %v3715_v0, %v3685_v51  ;;  %v10229_v20 = vadd.f32 %v3584_v23, %v11995_v24  ;;  %v3648_v28 = vadd.f32 %v3647_v1, %v10207_v5  ;;  %v3587_v52 = vmul.f32 %v5596_v54, %v10156_v62  ;;  %v11996_v62 = vld [vmem:[#allocation44_spill] sm:$0xff] }
 0x46f   : > { %v5600_v13 = vpop.eup %5599  ;;  %5617 = vrcp.f32 %v3496_v57  ;;  %v3499_v63 = vadd.f32 1.0, %v5598_v42  ;;  %v5298_v8 = vpop.f32.mrf.mxu0  ;;  %v3688_v34 = vmul.f32 %v10223_v18, %v10223_v18  ;;  %v3345_v1 = vadd.f32 %v5295_v38, %v10100_v55 }
 0x470   : > { %v5602_v31 = vpop.eup %5601  ;;  %v3649_v59 = vadd.f32 %v3648_v28, %v10229_v20  ;;  %v3687_v21 = vmul.f32 %v10229_v20, %v10229_v20  ;;  %v3717_v39 = vadd.f32 %v3716_v40, %v3686_v19  ;;  %v3586_v48 = vmul.f32 %v5600_v13, %v10160_v58  ;;  %v11998_v13 = vld [vmem:[#allocation49_spill] sm:$0xff] }
 0x471   : > { %v5604_v56 = vpop.eup %5603  ;;  %v10242_v17 = vadd.f32 %v3587_v52, %v11996_v62  ;;  %v3498_v46 = vadd.f32 1.0, %v5602_v31  ;;  %v3349_v43 = vpop.f32.mrf.mxu0  ;;  %5619 = vrcp.f32 %v3499_v63  ;;  %v3340_v51 = vadd.f32 %v10100_v55, %v3339_v3  ;;  %v11999_v31 = vld [vmem:[#allocation47_spill] sm:$0xff] }
 0x472   : > { %v5606_v60 = vpop.eup %5605  ;;  %v3718_v35 = vadd.f32 %v3717_v39, %v3687_v21  ;;  %v10245_v49 = vadd.f32 %v3586_v48, %v11997_v22  ;;  %v3650_v7 = vadd.f32 %v3649_v59, %v10223_v18  ;;  %v3501_v19 = vadd.f32 1.0, %v5604_v56 }
 0x473   : > { %v5608_v0 = vpop.eup %5607  ;;  %v3589_v58 = vmul.f32 %v5606_v60, %v10165_v61  ;;  %5621 = vrcp.f32 %v3498_v46  ;;  %v5301_v23 = vpop.f32.mrf.mxu0  ;;  %v3690_v40 = vmul.f32 %v10242_v17, %v10242_v17  ;;  %v4771_v56 = vmul.f32 -1.442695, %v3345_v1 }
 0x474   : > { %v5610_v54 = vpop.eup %5609  ;;  %v3651_v57 = vadd.f32 %v3650_v7, %v10245_v49  ;;  %v3689_v26 = vmul.f32 %v10245_v49, %v10245_v49  ;;  %v3719_v42 = vadd.f32 %v3718_v35, %v3688_v34  ;;  %v3500_v24 = vadd.f32 1.0, %v5608_v0  ;;  %v12000_v35 = vld [vmem:[#allocation54_spill] sm:$0xff]  ;;  %v12001_v0 = vld [vmem:[#allocation52_spill] sm:$0xff] }
 0x475   : > { %v3588_v61 = vmul.f32 %v5610_v54, %v10169_v10  ;;  %5623 = vpow2.f32 %v10202_v50  ;;  %v3359_v38 = vpop.f32.mrf.mxu0  ;;  %v10261_v52 = vadd.f32 %v3589_v58, %v11998_v13  ;;  %v3355_v10 = vadd.f32 %v5298_v8, %v10100_v55  ;;  %v10270_v50 = vpop.f32.mrf.mxu1 }
 0x476   : > { %v5612_v3 = vpop.eup %5611  ;;  %v3720_v28 = vadd.f32 %v3719_v42, %v3689_v26  ;;  %v3652_v63 = vadd.f32 %v3651_v57, %v10242_v17  ;;  %5625 = vpow2.f32 %v10213_v36  ;;  %v4770_v34 = vmul.f32 -1.442695, %v3340_v51 }
 0x477   : > { %v10266_v59 = vadd.f32 %v3588_v61, %v11999_v31  ;;  %v3591_v21 = vmul.f32 %v5612_v3, %v10173_v53  ;;  %5627 = vrcp.f32 %v3500_v24  ;;  %v5304_v62 = vpop.f32.mrf.mxu0  ;;  %v3692_v8 = vmul.f32 %v10261_v52, %v10261_v52  ;;  %v12002_v3 = vld [vmem:[#allocation59_spill] sm:$0xff] }
 0x478   : > { %v5614_v39 = vpop.eup %5613  ;;  %v3721_v48 = vadd.f32 %v3720_v28, %v3690_v40  ;;  %5629 = vpow2.f32 %v4769_v44  ;;  %v3350_v44 = vadd.f32 %v10100_v55, %v3349_v43  ;;  %v4773_v51 = vmul.f32 -1.442695, %v3355_v10 }
 0x479   : > { %v3653_v46 = vadd.f32 %v3652_v63, %v10266_v59  ;;  %v3691_v36 = vmul.f32 %v10266_v59, %v10266_v59  ;;  %v3590_v60 = vmul.f32 %v5614_v39, %v10181_v30  ;;  %5631 = vrcp.f32 %v3501_v19  ;;  %v10286_v30 = vpop.f32.mrf.mxu1 }
 0x47a   : > { %v5616_v53 = vpop.eup %5615  ;;  %v10279_v22 = vadd.f32 %v3591_v21, %v12000_v35  ;;  %5633 = vpow2.f32 %v4768_v45  ;;  %v3365_v26 = vadd.f32 %v5301_v23, %v10100_v55  ;;  %v3360_v42 = vadd.f32 %v10100_v55, %v3359_v38  ;;  %v3369_v45 = vpop.f32.mrf.mxu0  ;;  %v12003_v38 = vld [vmem:[#allocation57_spill] sm:$0xff] }
 0x47b   : > { %v3722_v7 = vadd.f32 %v3721_v48, %v3691_v36  ;;  %v10283_v58 = vadd.f32 %v3590_v60, %v12001_v0  ;;  %v3654_v1 = vadd.f32 %v3653_v46, %v10261_v52  ;;  %v3593_v57 = vmul.f32 %v5616_v53, %v10187_v9  ;;  %v10309_v48 = vpop.f32.mrf.mxu1 }
 0x47c   : > { %v5618_v54 = vpop.eup %5617  ;;  %5635 = vpow2.f32 %v4771_v56  ;;  %v3694_v24 = vmul.f32 %v10279_v22, %v10279_v22  ;;  %v4772_v9 = vmul.f32 -1.442695, %v3350_v44  ;;  %v3375_v21 = vadd.f32 %v5304_v62, %v10100_v55 }
 0x47d   : > { %v3655_v43 = vadd.f32 %v3654_v1, %v10283_v58  ;;  %v3693_v19 = vmul.f32 %v10283_v58, %v10283_v58  ;;  %v3723_v40 = vadd.f32 %v3722_v7, %v3692_v8  ;;  %v3592_v61 = vmul.f32 %v5618_v54, %v10191_v2  ;;  %v10318_v54 = vpop.f32.mrf.mxu1 }
 0x47e   : > { %v10298_v28 = vadd.f32 %v3593_v57, %v12002_v3  ;;  %5637 = vpow2.f32 %v4770_v34  ;;  %v5620_v23 = vpop.eup %5619  ;;  %v994_v2 = vadd.f32 %v10132_v29, %v10196_v4  ;;  %v1004_v39 = vadd.f32 %v10132_v29, %v10233_v27  ;;  %v5307_v34 = vpop.f32.mrf.mxu0  ;;  %v12004_v57 = vld [vmem:[#allocation62_spill] sm:$0xff] }
 0x47f   : > { %v3724_v13 = vadd.f32 %v3723_v40, %v3693_v19  ;;  %v10301_v63 = vadd.f32 %v3592_v61, %v12003_v38  ;;  %v3656_v31 = vadd.f32 %v3655_v43, %v10279_v22  ;;  %5639 = vpow2.f32 %v4773_v51 }
 0x480   : > { %v5622_v10 = vpop.eup %5621  ;;  %v4775_v56 = vmul.f32 -1.442695, %v3365_v26  ;;  %v4774_v53 = vmul.f32 -1.442695, %v3360_v42  ;;  %v3595_v8 = vmul.f32 %v5620_v23, %v10194_v47  ;;  %5641 = vpow2.f32 %v4772_v9  ;;  %v3379_v43 = vpop.f32.mrf.mxu0 }
 0x481   : > { %v3657_v46 = vadd.f32 %v3656_v31, %v10301_v63  ;;  %v3695_v36 = vmul.f32 %v10301_v63, %v10301_v63  ;;  %v3725_v60 = vadd.f32 %v3724_v13, %v3694_v24  ;;  %v3594_v35 = vmul.f32 %v5622_v10, %v994_v2  ;;  %v10328_v31 = vpop.f32.mrf.mxu1 }
 0x482   : > { %v5624_v62 = vpop.eup %5623  ;;  %v3370_v4 = vadd.f32 %v10100_v55, %v3369_v45  ;;  %v3696_v44 = vmul.f32 %v10298_v28, %v10298_v28  ;;  %v4777_v1 = vmul.f32 -1.442695, %v3375_v21  ;;  %5643 = vpow2.f32 %v4775_v56  ;;  %v12005_v21 = vld [vmem:[#allocation64_spill] sm:$0xff] }
 0x483   : > { %v5626_v27 = vpop.eup %5625  ;;  %v3726_v7 = vadd.f32 %v3725_v60, %v3695_v36  ;;  %v3503_v0 = vadd.f32 1.0, %v5624_v62  ;;  %v10321_v26 = vadd.f32 %v3594_v35, %v12004_v57  ;;  %v3658_v42 = vadd.f32 %v3657_v46, %v10298_v28  ;;  %v12006_v60 = vld [vmem:[#allocation67_spill] sm:$0xff] }
 0x484   : > { %v5628_v51 = vpop.eup %5627  ;;  %v3502_v47 = vadd.f32 1.0, %v5626_v27  ;;  %v3385_v45 = vadd.f32 %v5307_v34, %v10100_v55  ;;  %v4776_v13 = vmul.f32 -1.442695, %v3370_v4  ;;  %v3380_v38 = vadd.f32 %v10100_v55, %v3379_v43  ;;  %v10339_v4 = vpop.f32.mrf.mxu1 }
 0x485   : > { %v5630_v19 = vpop.eup %5629  ;;  %5645 = vrcp.f32 %v3503_v0  ;;  %v3697_v61 = vmul.f32 %v10321_v26, %v10321_v26  ;;  %v3727_v24 = vadd.f32 %v3726_v7, %v3696_v44  ;;  %v3596_v3 = vmul.f32 %v5628_v51, %v1004_v39 }
 0x486   : > { %v5632_v40 = vpop.eup %5631  ;;  %5647 = vrcp.f32 %v3502_v47  ;;  %v3505_v23 = vadd.f32 1.0, %v5630_v19  ;;  %v10331_v10 = vadd.f32 %v3595_v8, %v12005_v21  ;;  %v3659_v2 = vadd.f32 %v3658_v42, %v10321_v26  ;;  %v1043_v42 = vpop.f32.mrf.mxu1  ;;  %v12007_v47 = vld [vmem:[#allocation69_spill] sm:$0xff] }
 0x487   : > { %v5634_v9 = vpop.eup %5633  ;;  %5649 = vpow2.f32 %v4774_v53  ;;  %v1009_v39 = vadd.f32 %v10216_v33, %v10132_v29  ;;  %v4779_v46 = vmul.f32 -1.442695, %v3385_v45  ;;  %v3728_v36 = vadd.f32 %v3727_v24, %v3697_v61 }
 0x488   : > { %v3504_v56 = vadd.f32 1.0, %v5634_v9  ;;  %5651 = vpow2.f32 %v4777_v1  ;;  %v10337_v53 = vadd.f32 %v3596_v3, %v12006_v60  ;;  %v4778_v8 = vmul.f32 -1.442695, %v3380_v38 }
 0x489   : > { %v5636_v34 = vpop.eup %5635  ;;  %5653 = vrcp.f32 %v3505_v23  ;;  %v3597_v35 = vmul.f32 %v5632_v40, %v1009_v39  ;;  %v3698_v27 = vmul.f32 %v10331_v10, %v10331_v10  ;;  %v3660_v44 = vadd.f32 %v3659_v2, %v10331_v10  ;;  %v5179_v2 = vpop.f32.mrf.mxu1 }
 0x48a   : > { %5655 = vrcp.f32 %v3504_v56  ;;  %v3507_v55 = vadd.f32 1.0, %v5636_v34  ;;  %v3699_v0 = vmul.f32 %v10337_v53, %v10337_v53  ;;  %v1019_v61 = vadd.f32 %v10251_v6, %v10132_v29 }
 0x48b   : > { %v5638_v62 = vpop.eup %5637  ;;  %5657 = vpow2.f32 %v4776_v13  ;;  %v3729_v1 = vadd.f32 %v3728_v36, %v3698_v27  ;;  %v10347_v43 = vadd.f32 %v3597_v35, %v12007_v47  ;;  %v3661_v19 = vadd.f32 %v3660_v44, %v10337_v53  ;;  %v12008_v36 = vld [vmem:[#allocation74_spill] sm:$0xff]  ;;  %v12009_v35 = vld [vmem:[#allocation72_spill] sm:$0xff] }
 0x48c   : > { %5659 = vrcp.f32 %v3507_v55  ;;  %v3506_v33 = vadd.f32 1.0, %v5638_v62  ;;  %v5640_v7 = vpop.eup %5639  ;;  %v1014_v3 = vadd.f32 %v10132_v29, %v10270_v50  ;;  %v1029_v6 = vadd.f32 %v10286_v30, %v10132_v29 }
 0x48d   : > { %5661 = vpow2.f32 %v4779_v46  ;;  %v3509_v51 = vadd.f32 1.0, %v5640_v7  ;;  %v5642_v57 = vpop.eup %5641  ;;  %v3730_v9 = vadd.f32 %v3729_v1, %v3699_v0  ;;  %v3700_v56 = vmul.f32 %v10347_v43, %v10347_v43  ;;  %v1053_v1 = vpop.f32.mrf.mxu1 }
 0x48e   : > { %5663 = vrcp.f32 %v3506_v33  ;;  %v3508_v45 = vadd.f32 1.0, %v5642_v57  ;;  %v3662_v39 = vadd.f32 %v3661_v19, %v10347_v43  ;;  %v1024_v62 = vadd.f32 %v10132_v29, %v10309_v48 }
 0x48f   : > { %5665 = vpow2.f32 %v4778_v8  ;;  %v5644_v40 = vpop.eup %5643  ;;  %v3731_v27 = vadd.f32 %v3730_v9, %v3700_v56  ;;  %v1039_v48 = vadd.f32 %v10318_v54, %v10132_v29  ;;  %v12011_v9 = vld [vmem:[#allocation77_spill] sm:$0xff] }
 0x490   : > { %5667 = vrcp.f32 %v3509_v51  ;;  %v3511_v23 = vadd.f32 1.0, %v5644_v40 }
 0x491   : > { %5669 = vrcp.f32 %v3508_v45 }
 0x492   : > { %v5646_v24 = vpop.eup %5645  ;;  %5671 = vrcp.f32 %v3511_v23 }
 0x493   : > { %v5648_v13 = vpop.eup %5647  ;;  %v3599_v38 = vmul.f32 %v5646_v24, %v1019_v61  ;;  %v12010_v24 = vld [vmem:[#allocation79_spill] sm:$0xff] }
 0x494   : > { %v5650_v21 = vpop.eup %5649  ;;  %v3598_v34 = vmul.f32 %v5648_v13, %v1014_v3 }
 0x495   : > { %v5652_v46 = vpop.eup %5651  ;;  %v10360_v50 = vadd.f32 %v3599_v38, %v12008_v36  ;;  %v3510_v60 = vadd.f32 1.0, %v5650_v21  ;;  %v1034_v21 = vadd.f32 %v10132_v29, %v10328_v31  ;;  %v1044_v31 = vadd.f32 %v10132_v29, %v1043_v42 }
 0x496   : > { %v5654_v55 = vpop.eup %5653  ;;  %v10365_v8 = vadd.f32 %v3598_v34, %v12009_v35  ;;  %v3513_v44 = vadd.f32 1.0, %v5652_v46 }
 0x497   : > { %v5656_v33 = vpop.eup %5655  ;;  %v3601_v7 = vmul.f32 %v5654_v55, %v1029_v6  ;;  %5673 = vrcp.f32 %v3510_v60  ;;  %v3702_v19 = vmul.f32 %v10360_v50, %v10360_v50  ;;  %v1049_v55 = vadd.f32 %v10339_v4, %v10132_v29 }
 0x498   : > { %v5658_v0 = vpop.eup %5657  ;;  %v3663_v30 = vadd.f32 %v3662_v39, %v10365_v8  ;;  %v3701_v51 = vmul.f32 %v10365_v8, %v10365_v8  ;;  %v3600_v57 = vmul.f32 %v5656_v33, %v1024_v62  ;;  %5675 = vrcp.f32 %v3513_v44  ;;  %v5182_v39 = vpop.f32.mrf.mxu1 }
 0x499   : > { %v5660_v47 = vpop.eup %5659  ;;  %v3512_v45 = vadd.f32 1.0, %v5658_v0  ;;  %v10375_v3 = vadd.f32 %v3601_v7, %v12010_v24 }
 0x49a   : > { %v5662_v40 = vpop.eup %5661  ;;  %v3732_v61 = vadd.f32 %v3731_v27, %v3701_v51  ;;  %v10378_v23 = vadd.f32 %v3600_v57, %v12011_v9  ;;  %v3664_v13 = vadd.f32 %v3663_v30, %v10360_v50  ;;  %v3603_v56 = vmul.f32 %v5660_v47, %v1039_v48  ;;  %v12012_v30 = vld [vmem:[#allocation82_spill] sm:$0xff]  ;;  %v1063_v4 = vpop.f32.mrf.mxu1 }
 0x49b   : > { %v5664_v38 = vpop.eup %5663  ;;  %5677 = vrcp.f32 %v3512_v45  ;;  %v3515_v54 = vadd.f32 1.0, %v5662_v40  ;;  %v3704_v27 = vmul.f32 %v10375_v3, %v10375_v3  ;;  %v1059_v40 = vadd.f32 %v5179_v2, %v10132_v29 }
 0x49c   : > { %v5666_v34 = vpop.eup %5665  ;;  %v3665_v46 = vadd.f32 %v3664_v13, %v10378_v23  ;;  %v3703_v6 = vmul.f32 %v10378_v23, %v10378_v23  ;;  %v3733_v36 = vadd.f32 %v3732_v61, %v3702_v19  ;;  %v3602_v62 = vmul.f32 %v5664_v38, %v1034_v21  ;;  %v12014_v38 = vld [vmem:[#allocation91_spill] sm:$0xff] }
 0x49d   : > { %v5668_v60 = vpop.eup %5667  ;;  %5679 = vrcp.f32 %v3515_v54  ;;  %v3514_v35 = vadd.f32 1.0, %v5666_v34  ;;  %v10393_v0 = vadd.f32 %v3603_v56, %v11976_v12  ;;  %v1054_v61 = vadd.f32 %v10132_v29, %v1053_v1  ;;  %v12013_v12 = vld [vmem:[#allocation87_spill] sm:$0xff]  ;;  %v5185_v34 = vpop.f32.mrf.mxu1 }
 0x49e   : > { %v3734_v44 = vadd.f32 %v3733_v36, %v3703_v6  ;;  %v3666_v33 = vadd.f32 %v3665_v46, %v10375_v3  ;;  %v5670_v7 = vpop.eup %5669  ;;  %v10396_v51 = vadd.f32 %v3602_v62, %v12012_v30  ;;  %v3605_v57 = vmul.f32 %v5668_v60, %v1049_v55 }
 0x49f   : > { %5681 = vrcp.f32 %v3514_v35  ;;  %v3604_v48 = vmul.f32 %v5670_v7, %v1044_v31  ;;  %v5672_v19 = vpop.eup %5671  ;;  %v3706_v9 = vmul.f32 %v10393_v0, %v10393_v0  ;;  %v1069_v55 = vadd.f32 %v5182_v39, %v10132_v29  ;;  %v12015_v31 = vld [vmem:[#allocation93_spill] sm:$0xff]  ;;  %v1073_v30 = vpop.f32.mrf.mxu1 }
 0x4a0   : > { %v3735_v47 = vadd.f32 %v3734_v44, %v3704_v27  ;;  %v3667_v42 = vadd.f32 %v3666_v33, %v10396_v51  ;;  %v3705_v45 = vmul.f32 %v10396_v51, %v10396_v51  ;;  %v10409_v21 = vadd.f32 %v3605_v57, %v12014_v38  ;;  %v12016_v57 = vld [vmem:[#allocation94_spill] sm:$0xff] }
 0x4a1   : > { %v10404_v24 = vadd.f32 %v3604_v48, %v12013_v12  ;;  %v3607_v2 = vmul.f32 %v5672_v19, %v1059_v40  ;;  %v1064_v62 = vadd.f32 %v10132_v29, %v1063_v4  ;;  %v1079_v40 = vadd.f32 %v5185_v34, %v10132_v29  ;;  %v12017_v12 = vld [vmem:[#allocation98_spill] sm:$0xff] }
 0x4a2   : > { %v3736_v13 = vadd.f32 %v3735_v47, %v3705_v45  ;;  %v3668_v56 = vadd.f32 %v3667_v42, %v10393_v0  ;;  %v3708_v35 = vmul.f32 %v10409_v21, %v10409_v21 }
 0x4a3   : > { %v3707_v46 = vmul.f32 %v10404_v24, %v10404_v24  ;;  %v10424_v47 = vadd.f32 %v3607_v2, %v12016_v57 }
 0x4a4   : > { %v5674_v54 = vpop.eup %5673  ;;  %v3669_v1 = vadd.f32 %v3668_v56, %v10404_v24  ;;  %v3737_v60 = vadd.f32 %v3736_v13, %v3706_v9 }
 0x4a5   : > { %v5676_v6 = vpop.eup %5675  ;;  %v3606_v36 = vmul.f32 %v5674_v54, %v1054_v61  ;;  %v1074_v61 = vadd.f32 %v10132_v29, %v1073_v30  ;;  %v12018_v54 = vld [vmem:[#allocation100_spill] sm:$0xff] }
 0x4a6   : > { %v3670_v44 = vadd.f32 %v3669_v1, %v10409_v21  ;;  %v3738_v33 = vadd.f32 %v3737_v60, %v3707_v46  ;;  %v3609_v48 = vmul.f32 %v5676_v6, %v1069_v55  ;;  %v3710_v6 = vmul.f32 %v10424_v47, %v10424_v47 }
 0x4a7   : > { %v10420_v27 = vadd.f32 %v3606_v36, %v12015_v31 }
 0x4a8   : > { %v5678_v7 = vpop.eup %5677  ;;  %v3739_v42 = vadd.f32 %v3738_v33, %v3708_v35  ;;  %v10436_v46 = vadd.f32 %v3609_v48, %v12018_v54 }
 0x4a9   : > { %v3608_v19 = vmul.f32 %v5678_v7, %v1064_v62  ;;  %v3671_v39 = vadd.f32 %v3670_v44, %v10420_v27  ;;  %v3709_v4 = vmul.f32 %v10420_v27, %v10420_v27 }
 0x4aa   : > { %v5680_v45 = vpop.eup %5679  ;;  %v3712_v35 = vmul.f32 %v10436_v46, %v10436_v46 }
 0x4ab   : > { %v10432_v9 = vadd.f32 %v3608_v19, %v12017_v12  ;;  %v3672_v13 = vadd.f32 %v3671_v39, %v10424_v47  ;;  %v3740_v38 = vadd.f32 %v3739_v42, %v3709_v4  ;;  %v3611_v2 = vmul.f32 %v5680_v45, %v1079_v40 }
 0x4ac   : > { %v5682_v56 = vpop.eup %5681 }
 0x4ad   : > { %v3610_v1 = vmul.f32 %v5682_v56, %v1074_v61  ;;  %v3673_v36 = vadd.f32 %v3672_v13, %v10432_v9  ;;  %v3711_v29 = vmul.f32 %v10432_v9, %v10432_v9  ;;  %v3741_v34 = vadd.f32 %v3740_v38, %v3710_v6  ;;  %v4794_v6 = vld [vmem:[%s10951_s2 + $0xe0] sm:$0xff] }
 0x4ae   : > { %v10448_v62 = vadd.f32 %v3611_v2, %v11984_v41 }
 0x4af   : > { %v10444_v60 = vadd.f32 %v3610_v1, %v11983_v25  ;;  %v3674_v55 = vadd.f32 %v3673_v36, %v10436_v46  ;;  %v3742_v31 = vadd.f32 %v3741_v34, %v3711_v29  ;;  %v5801_v29 = vld [vmem:[%s10953_s4 + $0x8] sm:$0xff]  ;;  %v5802_v34 = vld [vmem:[%s10953_s4] sm:$0xff] }
 0x4b0   : > { %v3714_v25 = vmul.f32 %v10448_v62, %v10448_v62 }
 0x4b1   : > { %v3675_v44 = vadd.f32 %v3674_v55, %v10444_v60  ;;  %v3713_v33 = vmul.f32 %v10444_v60, %v10444_v60  ;;  %v3743_v7 = vadd.f32 %v3742_v31, %v3712_v35  ;;  %v4797_v55 = vld [vmem:[%s10951_s2 + $0xf8] sm:$0xff] }
 0x4b3   : > { %v3676_v30 = vadd.f32 %v3675_v44, %v10448_v62  ;;  %v3744_v57 = vadd.f32 %v3743_v7, %v3713_v33 }
 0x4b5   : > { %v3677_v48 = vrot.slane %v3676_v30, 4  ;;  %v3745_v19 = vadd.f32 %v3744_v57, %v3714_v25 }
 0x4b7   : > { %v3678_v41 = vadd.f32 %v3677_v48, %v3676_v30  ;;  %v3746_v39 = vrot.slane %v3745_v19, 4 }
 0x4b9   : > { %v3679_v4 = vrot.slane %v3678_v41, 2  ;;  %v3747_v42 = vadd.f32 %v3746_v39, %v3745_v19 }
 0x4bb   : > { %v3680_v45 = vadd.f32 %v3679_v4, %v3678_v41  ;;  %v3748_v40 = vrot.slane %v3747_v42, 2 }
 0x4bd   : > { %v3681_v61 = vrot.slane %v3680_v45, 1  ;;  %v3749_v12 = vadd.f32 %v3748_v40, %v3747_v42 }
 0x4bf   : > { %v3682_v13 = vadd.f32 %v3681_v61, %v3680_v45  ;;  %v3750_v38 = vrot.slane %v3749_v12, 1 }
 0x4c1   : > { %v10458_v56 = vmul.f32 0.00390625, %v3682_v13  ;;  %v3751_v54 = vadd.f32 %v3750_v38, %v3749_v12  ;;  %v4796_v12 = vld [vmem:[%s10951_s2 + $0xf0] sm:$0xff] }
 0x4c3   : > { %v4272_v2 = vmul.f32 %v10458_v56, %v10458_v56  ;;  %v3752_v1 = vsel %vm297_vm2, %v3751_v54, %v3682_v13  ;;  %v4815_v13 = vld [vmem:[%s10951_s2 + $0x1f8] sm:$0xff]  ;;  %v4795_v54 = vld [vmem:[%s10951_s2 + $0xe8] sm:$0xff] }
 0x4c4   : > { %5341 = vmatmul.mubr.f32.vlgmr.msra.gmra.mxu1 %v3752_v1  ;;  %v4813_v1 = vld [vmem:[%s10951_s2 + $0x1e8] sm:$0xff] }
 0x4c5   : > { %v4274_v36 = vsel %vm297_vm2, %v4272_v2, %v10458_v56  ;;  %5344 = vmatpush3.msra.mxu1 %v5801_v29  ;;  %5347 = vmatprep.mubr.msk.f32.mxu1 %vm5866_vm0, %v11951_v37  ;;  %v4814_v2 = vld [vmem:[%s10951_s2 + $0x1f0] sm:$0xff] }
 0x4c6   : > { %5463 = vmatmul.mubr.f32.vlgmr.msra.gmra.mxu0 %v4274_v36  ;;  %5345 = vmatprep.subr.mxu1 %v11951_v37  ;;  %v4793_v36 = vld [vmem:[%s10951_s2 + $0xd8] sm:$0xff] }
 0x4c7   : > { %5346 = vmatpush3.msra.mxu1 %v5802_v34  ;;  %5466 = vmatpush3.msra.mxu0 %v5801_v29  ;;  %v4812_v29 = vld [vmem:[%s10951_s2 + $0x1e0] sm:$0xff] }
 0x4c8   : > { %5467 = vmatprep.subr.mxu0 %v11951_v37  ;;  %5469 = vmatprep.mubr.msk.f32.mxu0 %vm5866_vm0, %v11951_v37 }
 0x4c9   : > { %5468 = vmatpush3.msra.mxu0 %v5802_v34  ;;  %5350 = vmatprep.subr.mxu1 %v4797_v55  ;;  %v4792_v34 = vld [vmem:[%s10951_s2 + $0xd0] sm:$0xff] }
 0x4ca   : > { %5472 = vmatprep.subr.mxu0 %v11951_v37 }
 0x584   : > { %v3819_v35 = vpop.f32.mrf.mxu1 }
 0x585   : > { %v3823_v31 = vmul.f32 0.00048828125, %v3819_v35  ;;  %v4791_v35 = vld [vmem:[%s10951_s2 + $0xc8] sm:$0xff] }
 0x586   : > { %v4341_v44 = vpop.f32.mrf.mxu0  ;;  %v5342_v33 = vpop.f32.mrf.mxu1 }
 0x587   : > { %v4345_v7 = vmul.f32 0.125, %v4341_v44  ;;  %v3824_v30 = vmul.f32 %v3823_v31, %v3823_v31  ;;  %v4790_v44 = vld [vmem:[%s10951_s2 + $0xc0] sm:$0xff]  ;;  %v4809_v33 = vld [vmem:[%s10951_s2 + $0x1c8] sm:$0xff] }
 0x588   : > { %v5464_v25 = vpop.f32.mrf.mxu0 }
 0x589   : > { %v4346_v57 = vmul.f32 %v4345_v7, %v4345_v7  ;;  %v3828_v48 = vrot.slane %v3824_v30, %v9297_v15  ;;  %v4808_v30 = vld [vmem:[%s10951_s2 + $0x1c0] sm:$0xff]  ;;  %v4788_v25 = vld [vmem:[%s10951_s2 + $0xb0] sm:$0xff] }
 0x58b   : > { %v4350_v19 = vrot.slane %v4346_v57, %v9297_v15  ;;  %v3829_v41 = vsel %vm297_vm2, %v3828_v48, 0.0  ;;  %v4807_v57 = vld [vmem:[%s10951_s2 + $0x1b8] sm:$0xff]  ;;  %v4787_v48 = vld [vmem:[%s10951_s2 + $0xa8] sm:$0xff] }
 0x58c   : > { %v3830_v39 = vsub.f32 %v3823_v31, %v3829_v41  ;;  %v4810_v31 = vld [vmem:[%s10951_s2 + $0x1d0] sm:$0xff]  ;;  %v4786_v41 = vld [vmem:[%s10951_s2 + $0xa0] sm:$0xff] }
 0x58d   : > { %v4351_v4 = vsel %vm297_vm2, %v4350_v19, 0.0  ;;  %v4806_v19 = vld [vmem:[%s10951_s2 + $0x1b0] sm:$0xff] }
 0x58e   : > { %v4352_v42 = vsub.f32 %v4345_v7, %v4351_v4  ;;  %v3831_v45 = vmax.f32 %v3830_v39, 0.0  ;;  %v4789_v7 = vld [vmem:[%s10951_s2 + $0xb8] sm:$0xff] }
 0x58f   : > { %v4785_v4 = vld [vmem:[%s10951_s2 + $0x98] sm:$0xff] }
 0x590   : > { %v4353_v40 = vmax.f32 %v4352_v42, 0.0  ;;  %v3832_v61 = vsel %vm297_vm2, %v3831_v45, %v3830_v39  ;;  %v4805_v39 = vld [vmem:[%s10951_s2 + $0x1a8] sm:$0xff]  ;;  %v4784_v45 = vld [vmem:[%s10951_s2 + $0x90] sm:$0xff] }
 0x591   : > { %5348 = vmatmul.mubr.msk.f32.vlgmr.msra.gmra.mxu1 %vm648_vm4, %v3832_v61  ;;  %v4783_v61 = vld [vmem:[%s10951_s2 + $0x88] sm:$0xff] }
 0x592   : > { %v4354_v38 = vsel %vm297_vm2, %v4353_v40, %v4352_v42  ;;  %5351 = vmatpush3.msra.mxu1 %v4797_v55  ;;  %v4811_v55 = vld [vmem:[%s10951_s2 + $0x1d8] sm:$0xff]  ;;  %v4804_v42 = vld [vmem:[%s10951_s2 + $0x1a0] sm:$0xff] }
 0x593   : > { %5470 = vmatmul.mubr.msk.f32.vlgmr.msra.gmra.mxu0 %vm648_vm4, %v4354_v38  ;;  %5352 = vmatprep.subr.mxu1 %v4796_v12  ;;  %v4803_v40 = vld [vmem:[%s10951_s2 + $0x198] sm:$0xff]  ;;  %v4801_v38 = vld [vmem:[%s10951_s2 + $0x188] sm:$0xff] }
 0x594   : > { %5473 = vmatpush3.msra.mxu0 %v4815_v13  ;;  %5353 = vmatpush3.msra.mxu1 %v4796_v12  ;;  %v4802_v12 = vld [vmem:[%s10951_s2 + $0x190] sm:$0xff]  ;;  %v4782_v13 = vld [vmem:[%s10951_s2 + $0x80] sm:$0xff] }
 0x595   : > { %5474 = vmatprep.subr.mxu0 %v11951_v37  ;;  %5354 = vmatprep.subr.mxu1 %v4795_v54 }
 0x596   : > { %5475 = vmatpush3.msra.mxu0 %v4814_v2  ;;  %5355 = vmatpush3.msra.mxu1 %v4795_v54  ;;  %v4800_v54 = vld [vmem:[%s10951_s2 + $0x180] sm:$0xff] }
 0x597   : > { %5476 = vmatprep.subr.mxu0 %v11951_v37  ;;  %5504 = vmatprep.mubr.msk.f32.mxu0 %vm5866_vm0, %v11951_v37 }
 0x598   : > { %5356 = vmatprep.subr.mxu1 %v4794_v6  ;;  %5477 = vmatpush3.msra.mxu0 %v4813_v1 }
 0x599   : > { %5357 = vmatpush3.msra.mxu1 %v4794_v6  ;;  %5478 = vmatprep.subr.mxu0 %v11951_v37 }
 0x59a   : > { %5358 = vmatprep.subr.mxu1 %v4793_v36  ;;  %5479 = vmatpush3.msra.mxu0 %v4812_v29 }
 0x59b   : > { %5359 = vmatpush3.msra.mxu1 %v4793_v36  ;;  %5480 = vmatprep.subr.mxu0 %v11951_v37 }
 0x59c   : > { %5360 = vmatprep.subr.mxu1 %v4792_v34  ;;  %5481 = vmatpush3.msra.mxu0 %v4811_v55  ;;  %v3644_v55 = vld [vmem:[%s10950_s1 + $0x3] sm:$0x1] }
 0x59d   : > { %5361 = vmatpush3.msra.mxu1 %v4792_v34  ;;  %5482 = vmatprep.subr.mxu0 %v11951_v37 }
 0x59e   : > { %5362 = vmatprep.subr.mxu1 %v4791_v35  ;;  %5483 = vmatpush3.msra.mxu0 %v4810_v31 }
 0x59f   : > { %5363 = vmatpush3.msra.mxu1 %v4791_v35  ;;  %5484 = vmatprep.subr.mxu0 %v11951_v37  ;;  %v3945_v35 = vrot.slane %v3644_v55, 7 }
 0x5a0   : > { %5364 = vmatprep.subr.mxu1 %v4790_v44  ;;  %5485 = vmatpush3.msra.mxu0 %v4809_v33 }
 0x5a1   : > { %5365 = vmatpush3.msra.mxu1 %v4790_v44  ;;  %5486 = vmatprep.subr.mxu0 %v11951_v37 }
 0x5a2   : > { %5366 = vmatprep.subr.mxu1 %v4789_v7  ;;  %5487 = vmatpush3.msra.mxu0 %v4808_v30 }
 0x5a3   : > { %5367 = vmatpush3.msra.mxu1 %v4789_v7  ;;  %5488 = vmatprep.subr.mxu0 %v11951_v37 }
 0x5a4   : > { %5368 = vmatprep.subr.mxu1 %v4788_v25  ;;  %5489 = vmatpush3.msra.mxu0 %v4807_v57 }
 0x5a5   : > { %5369 = vmatpush3.msra.mxu1 %v4788_v25  ;;  %5490 = vmatprep.subr.mxu0 %v11951_v37 }
 0x5a6   : > { %5370 = vmatprep.subr.mxu1 %v4787_v48  ;;  %5491 = vmatpush3.msra.mxu0 %v4806_v19 }
 0x5a7   : > { %5371 = vmatpush3.msra.mxu1 %v4787_v48  ;;  %5492 = vmatprep.subr.mxu0 %v11951_v37 }
 0x5a8   : > { %5372 = vmatprep.subr.mxu1 %v4786_v41  ;;  %5493 = vmatpush3.msra.mxu0 %v4805_v39 }
 0x5a9   : > { %5373 = vmatpush3.msra.mxu1 %v4786_v41  ;;  %5494 = vmatprep.subr.mxu0 %v11951_v37 }
 0x5aa   : > { %5374 = vmatprep.subr.mxu1 %v4785_v4  ;;  %5495 = vmatpush3.msra.mxu0 %v4804_v42  ;;  %v10627_v42 = vld [vmem:[%s10950_s1 + $0x4] ss:$0 sm:$0xff] }
 0x5ab   : > { %5375 = vmatpush3.msra.mxu1 %v4785_v4  ;;  %5496 = vmatprep.subr.mxu0 %v11951_v37 }
 0x5ac   : > { %5376 = vmatprep.subr.mxu1 %v4784_v45  ;;  %5497 = vmatpush3.msra.mxu0 %v4803_v40 }
 0x5ad   : > { %5377 = vmatpush3.msra.mxu1 %v4784_v45  ;;  %5498 = vmatprep.subr.mxu0 %v11951_v37 }
 0x5ae   : > { %5378 = vmatprep.subr.mxu1 %v4783_v61  ;;  %5499 = vmatpush3.msra.mxu0 %v4802_v12 }
 0x5af   : > { %5379 = vmatpush3.msra.mxu1 %v4783_v61  ;;  %5500 = vmatprep.subr.mxu0 %v11951_v37 }
 0x5b0   : > { %5380 = vmatprep.subr.mxu1 %v4782_v13  ;;  %5501 = vmatpush3.msra.mxu0 %v4801_v38 }
 0x5b1   : > { %5381 = vmatpush3.msra.mxu1 %v4782_v13  ;;  %5502 = vmatprep.subr.mxu0 %v11951_v37  ;;  %v4269_v37 = vld [vmem:[%s10950_s1 + $0x9] sm:$0x1] }
 0x5b2   : > { %5503 = vmatpush3.msra.mxu0 %v4800_v54  ;;  %v4432_v31 = vrot.slane %v4269_v37, 7 }
 0x651   : > { %v3902_v2 = vpop.f32.mrf.mxu1 }
 0x652   : > { %v3906_v6 = vadd.f32 1e-05, %v3902_v2  ;;  %v10612_v44 = vrot.slane %v3902_v2, %v9297_v15 }
 0x653   : > { %v4424_v1 = vpop.f32.mrf.mxu0  ;;  %v5349_v36 = vpop.f32.mrf.mxu1 }
 0x654   : > { %v4428_v29 = vadd.f32 1e-05, %v4424_v1  ;;  %5683 = vrsqrt.f32 %v3906_v6  ;;  %v3912_v48 = vsub.f32 %v10184_v32, %v10612_v44  ;;  %v3913_v19 = vsub.f32 %v10176_v16, %v10612_v44 }
 0x655   : > { %v5471_v34 = vpop.f32.mrf.mxu0  ;;  %v3914_v41 = vsub.f32 %v10210_v14, %v10612_v44  ;;  %v4430_v39 = vsub.f32 %v10458_v56, %v4424_v1  ;;  %v3915_v56 = vsub.f32 %v10207_v5, %v10612_v44  ;;  %v3916_v54 = vsub.f32 %v10229_v20, %v10612_v44 }
 0x656   : > { %5685 = vrsqrt.f32 %v4428_v29  ;;  %v3917_v29 = vsub.f32 %v10223_v18, %v10612_v44  ;;  %v3918_v34 = vsub.f32 %v10245_v49, %v10612_v44 }
 0x661   : > { %v5684_v33 = vpop.eup %5683 }
 0x662   : > { %v3947_v30 = vmul.f32 %v5684_v33, %v3945_v35  ;;  %v3919_v33 = vsub.f32 %v10242_v17, %v10612_v44 }
 0x663   : > { %v5686_v7 = vpop.eup %5685 }
 0x664   : > { %v4434_v25 = vmul.f32 %v5686_v7, %v4432_v31  ;;  %v10615_v57 = vrot.slane %v3947_v30, %v9603_v11  ;;  %v4270_v11 = vld [vmem:[%s10950_s1 + $0xa] sm:$0x1]  ;;  %v3920_v7 = vsub.f32 %v10266_v59, %v10612_v44 }
 0x666   : > { %v4436_v4 = vrot.slane %v4434_v25, 1  ;;  %v3952_v45 = vmul.f32 %v10615_v57, %v3912_v48  ;;  %v3953_v40 = vmul.f32 %v10615_v57, %v3913_v19  ;;  %v3954_v61 = vmul.f32 %v10615_v57, %v3914_v41 }
 0x667   : > { %v3955_v6 = vmul.f32 %v10615_v57, %v3915_v56  ;;  %v3956_v36 = vmul.f32 %v10615_v57, %v3916_v54  ;;  %v3957_v37 = vmul.f32 %v10615_v57, %v3917_v29  ;;  %v3958_v31 = vmul.f32 %v10615_v57, %v3918_v34 }
 0x668   : > { %v4438_v12 = vmul.f32 %v4436_v4, %v4430_v39  ;;  %v3988_v13 = vadd.f32 %v10627_v42, %v3952_v45  ;;  %v3989_v38 = vadd.f32 %v10627_v42, %v3953_v40  ;;  %v3990_v1 = vadd.f32 %v10627_v42, %v3954_v61 }
 0x669   : > { %v3991_v55 = vadd.f32 %v10627_v42, %v3955_v6  ;;  %v3992_v35 = vadd.f32 %v10627_v42, %v3956_v36  ;;  %v3993_v30 = vadd.f32 %v10627_v42, %v3957_v37  ;;  %v3959_v25 = vmul.f32 %v10615_v57, %v3919_v33 }
 0x66a   : > { %v4439_v2 = vadd.f32 %v4438_v12, %v4270_v11  ;;  %5382 = vmatprep.mubr.f32.mxu1 %v3988_v13  ;;  %v3994_v48 = vadd.f32 %v10627_v42, %v3958_v31  ;;  %v3960_v19 = vmul.f32 %v10615_v57, %v3920_v7  ;;  %v3921_v41 = vsub.f32 %v10261_v52, %v10612_v44 }
 0x66b   : > { %5383 = vmatmul.mubr.f32.vlgmr.msra.gmra.mxu1 %v3989_v38  ;;  %v3922_v39 = vsub.f32 %v10283_v58, %v10612_v44  ;;  %v3995_v4 = vadd.f32 %v10627_v42, %v3959_v25  ;;  %v3923_v61 = vsub.f32 %v10279_v22, %v10612_v44  ;;  %v3924_v12 = vsub.f32 %v10301_v63, %v10612_v44 }
 0x66c   : > { %5505 = vmatmul.mubr.f32.vlgmr.msra.gmra.mxu0 %v4439_v2  ;;  %5385 = vmatprep.mubr.f32.mxu1 %v3990_v1  ;;  %v3961_v11 = vmul.f32 %v10615_v57, %v3921_v41  ;;  %v3996_v45 = vadd.f32 %v10627_v42, %v3960_v19  ;;  %v3925_v2 = vsub.f32 %v10298_v28, %v10612_v44 }
 0x66d   : > { %v3962_v40 = vmul.f32 %v10615_v57, %v3922_v39  ;;  %v3963_v13 = vmul.f32 %v10615_v57, %v3923_v61  ;;  %v3964_v54 = vmul.f32 %v10615_v57, %v3924_v12  ;;  %v3926_v6 = vsub.f32 %v10321_v26, %v10612_v44 }
 0x66e   : > { %v3997_v56 = vadd.f32 %v10627_v42, %v3961_v11  ;;  %v3965_v36 = vmul.f32 %v10615_v57, %v3925_v2  ;;  %v3928_v37 = vsub.f32 %v10337_v53, %v10612_v44  ;;  %v3930_v25 = vsub.f32 %v10365_v8, %v10612_v44 }
 0x66f   : > { %5386 = vmatmul.mubr.f32.gmra.mxu1 %v3991_v55  ;;  %v3998_v38 = vadd.f32 %v10627_v42, %v3962_v40  ;;  %v3999_v1 = vadd.f32 %v10627_v42, %v3963_v13  ;;  %v4000_v29 = vadd.f32 %v10627_v42, %v3964_v54  ;;  %v3966_v34 = vmul.f32 %v10615_v57, %v3926_v6 }
 0x670   : > { %5388 = vmatprep.mubr.f32.mxu1 %v3992_v35  ;;  %v3927_v55 = vsub.f32 %v10331_v10, %v10612_v44  ;;  %v4001_v35 = vadd.f32 %v10627_v42, %v3965_v36  ;;  %v3968_v7 = vmul.f32 %v10615_v57, %v3928_v37  ;;  %v3970_v39 = vmul.f32 %v10615_v57, %v3930_v25 }
 0x671   : > { %v4002_v33 = vadd.f32 %v10627_v42, %v3966_v34  ;;  %v3932_v11 = vsub.f32 %v10378_v23, %v10612_v44  ;;  %v3934_v13 = vsub.f32 %v10396_v51, %v10612_v44  ;;  %v3936_v36 = vsub.f32 %v10404_v24, %v10612_v44 }
 0x672   : > { %v3967_v31 = vmul.f32 %v10615_v57, %v3927_v55  ;;  %v4004_v41 = vadd.f32 %v10627_v42, %v3968_v7  ;;  %v4006_v61 = vadd.f32 %v10627_v42, %v3970_v39 }
 0x673   : > { %5389 = vmatmul.mubr.f32.gmra.mxu1 %v3993_v30  ;;  %v3929_v30 = vsub.f32 %v10347_v43, %v10612_v44  ;;  %v3972_v12 = vmul.f32 %v10615_v57, %v3932_v11  ;;  %v3974_v6 = vmul.f32 %v10615_v57, %v3934_v13  ;;  %v3976_v37 = vmul.f32 %v10615_v57, %v3936_v36  ;;  %v4457_v36 = vld [vmem:[%s10950_s1 + $0xb] sm:$0x1] }
 0x674   : > { %5391 = vmatprep.mubr.f32.mxu1 %v3994_v48  ;;  %v4003_v48 = vadd.f32 %v10627_v42, %v3967_v31  ;;  %v3938_v31 = vsub.f32 %v10420_v27, %v10612_v44 }
 0x675   : > { %v3969_v19 = vmul.f32 %v10615_v57, %v3929_v30  ;;  %v4008_v2 = vadd.f32 %v10627_v42, %v3972_v12  ;;  %v4010_v55 = vadd.f32 %v10627_v42, %v3974_v6  ;;  %v4012_v30 = vadd.f32 %v10627_v42, %v3976_v37 }
 0x676   : > { %v3978_v25 = vmul.f32 %v10615_v57, %v3938_v31 }
 0x677   : > { %5392 = vmatmul.mubr.f32.gmra.mxu1 %v3995_v4  ;;  %v3931_v4 = vsub.f32 %v10360_v50, %v10612_v44 }
 0x678   : > { %5394 = vmatprep.mubr.f32.mxu1 %v3996_v45  ;;  %v4005_v45 = vadd.f32 %v10627_v42, %v3969_v19  ;;  %v3940_v19 = vsub.f32 %v10432_v9, %v10612_v44 }
 0x679   : > { %v3971_v40 = vmul.f32 %v10615_v57, %v3931_v4  ;;  %v4014_v4 = vadd.f32 %v10627_v42, %v3978_v25 }
 0x67a   : > { %v3980_v11 = vmul.f32 %v10615_v57, %v3940_v19 }
 0x67b   : > { %5395 = vmatmul.mubr.f32.gmra.mxu1 %v3997_v56  ;;  %v3933_v56 = vsub.f32 %v10375_v3, %v10612_v44 }
 0x67c   : > { %5397 = vmatprep.mubr.f32.mxu1 %v3998_v38  ;;  %v4007_v38 = vadd.f32 %v10627_v42, %v3971_v40  ;;  %v3942_v40 = vsub.f32 %v10444_v60, %v10612_v44 }
 0x67d   : > { %v3973_v54 = vmul.f32 %v10615_v57, %v3933_v56  ;;  %v4016_v56 = vadd.f32 %v10627_v42, %v3980_v11 }
 0x67e   : > { %v3982_v13 = vmul.f32 %v10615_v57, %v3942_v40 }
 0x67f   : > { %5398 = vmatmul.mubr.f32.gmra.mxu1 %v3999_v1  ;;  %v3935_v1 = vsub.f32 %v10393_v0, %v10612_v44 }
 0x680   : > { %5400 = vmatprep.mubr.f32.mxu1 %v4000_v29  ;;  %v4009_v29 = vadd.f32 %v10627_v42, %v3973_v54  ;;  %v4018_v6 = vadd.f32 %v10627_v42, %v3982_v13 }
 0x681   : > { %v3975_v34 = vmul.f32 %v10615_v57, %v3935_v1 }
 0x683   : > { %5401 = vmatmul.mubr.f32.gmra.mxu1 %v4001_v35  ;;  %v3937_v35 = vsub.f32 %v10409_v21, %v10612_v44 }
 0x684   : > { %5403 = vmatprep.mubr.f32.mxu1 %v4002_v33  ;;  %v4011_v33 = vadd.f32 %v10627_v42, %v3975_v34 }
 0x685   : > { %v3977_v7 = vmul.f32 %v10615_v57, %v3937_v35 }
 0x687   : > { %5404 = vmatmul.mubr.f32.gmra.mxu1 %v4003_v48  ;;  %v3939_v48 = vsub.f32 %v10424_v47, %v10612_v44 }
 0x688   : > { %5406 = vmatprep.mubr.f32.mxu1 %v4004_v41  ;;  %v4013_v41 = vadd.f32 %v10627_v42, %v3977_v7 }
 0x689   : > { %v3979_v39 = vmul.f32 %v10615_v57, %v3939_v48 }
 0x68b   : > { %5407 = vmatmul.mubr.f32.gmra.mxu1 %v4005_v45  ;;  %v3941_v45 = vsub.f32 %v10436_v46, %v10612_v44 }
 0x68c   : > { %5409 = vmatprep.mubr.f32.mxu1 %v4006_v61  ;;  %v4015_v61 = vadd.f32 %v10627_v42, %v3979_v39 }
 0x68d   : > { %v3981_v12 = vmul.f32 %v10615_v57, %v3941_v45 }
 0x68f   : > { %5410 = vmatmul.mubr.f32.gmra.mxu1 %v4007_v38  ;;  %v3943_v38 = vsub.f32 %v10448_v62, %v10612_v44  ;;  %v4017_v54 = vadd.f32 %v10627_v42, %v3981_v12 }
 0x690   : > { %5412 = vmatprep.mubr.f32.mxu1 %v4008_v2 }
 0x691   : > { %v3983_v2 = vmul.f32 %v10615_v57, %v3943_v38 }
 0x693   : > { %5413 = vmatmul.mubr.f32.gmra.mxu1 %v4009_v29  ;;  %v4019_v1 = vadd.f32 %v10627_v42, %v3983_v2 }
 0x694   : > { %5415 = vmatprep.mubr.f32.mxu1 %v4010_v55 }
 0x697   : > { %5416 = vmatmul.mubr.f32.gmra.mxu1 %v4011_v33 }
 0x698   : > { %5418 = vmatprep.mubr.f32.mxu1 %v4012_v30 }
 0x69b   : > { %5419 = vmatmul.mubr.f32.gmra.mxu1 %v4013_v41 }
 0x69c   : > { %5421 = vmatprep.mubr.f32.mxu1 %v4014_v4 }
 0x69f   : > { %5422 = vmatmul.mubr.f32.gmra.mxu1 %v4015_v61  ;;  %v10760_v61 = vld [vmem:[%s10950_s1 + $0x5] ss:$0 sm:$0xff] }
 0x6a0   : > { %5424 = vmatprep.mubr.f32.mxu1 %v4016_v56 }
 0x6a3   : > { %5425 = vmatmul.mubr.f32.gmra.mxu1 %v4017_v54 }
 0x6a4   : > { %5427 = vmatprep.mubr.f32.mxu1 %v4018_v6 }
 0x6a7   : > { %5428 = vmatmul.mubr.f32.gmra.mxu1 %v4019_v1 }
 0x72b   : > { %v5384_v29 = vpop.f32.mrf.mxu1 }
 0x72c   : > { %v4524_v34 = vpop.f32.mrf.mxu0  ;;  %v4114_v56 = vadd.f32 %v5384_v29, %v10760_v61 }
 0x72d   : > { %v4525_v55 = vadd.f32 %v4524_v34, %v4457_v36  ;;  %v4108_v44 = vpop.f32.mrf.mxu1 }
 0x72e   : > { %v5506_v37 = vpop.f32.mrf.mxu0  ;;  %v4109_v13 = vadd.f32 %v10760_v61, %v4108_v44 }
 0x72f   : > { %v4816_v35 = vmul.f32 -1.442695, %v4525_v55  ;;  %v5387_v31 = vpop.f32.mrf.mxu1 }
 0x730   : > { %v4124_v38 = vadd.f32 %v5387_v31, %v10760_v61 }
 0x731   : > { %5687 = vpow2.f32 %v4816_v35  ;;  %v4118_v57 = vpop.f32.mrf.mxu1 }
 0x732   : > { %v4119_v2 = vadd.f32 %v10760_v61, %v4118_v57 }
 0x733   : > { %v5390_v33 = vpop.f32.mrf.mxu1 }
 0x734   : > { %v4134_v6 = vadd.f32 %v5390_v33, %v10760_v61 }
 0x735   : > { %v4128_v7 = vpop.f32.mrf.mxu1 }
 0x736   : > { %v4129_v1 = vadd.f32 %v10760_v61, %v4128_v7 }
 0x737   : > { %v5393_v30 = vpop.f32.mrf.mxu1 }
 0x738   : > { %v4144_v36 = vadd.f32 %v5393_v30, %v10760_v61 }
 0x739   : > { %v4138_v25 = vpop.f32.mrf.mxu1 }
 0x73a   : > { %v4139_v55 = vadd.f32 %v10760_v61, %v4138_v25 }
 0x73b   : > { %v5396_v42 = vpop.f32.mrf.mxu1 }
 0x73c   : > { %v4154_v37 = vadd.f32 %v5396_v42, %v10760_v61 }
 0x73d   : > { %v4148_v19 = vpop.f32.mrf.mxu1 }
 0x73e   : > { %v5688_v48 = vpop.eup %5687  ;;  %v4149_v29 = vadd.f32 %v10760_v61, %v4148_v19 }
 0x73f   : > { %v4531_v41 = vadd.f32 1.0, %v5688_v48  ;;  %v5399_v39 = vpop.f32.mrf.mxu1 }
 0x740   : > { %v4164_v44 = vadd.f32 %v5399_v39, %v10760_v61 }
 0x741   : > { %5689 = vrcp.f32 %v4531_v41  ;;  %v4158_v4 = vpop.f32.mrf.mxu1 }
 0x742   : > { %v4159_v57 = vadd.f32 %v10760_v61, %v4158_v4 }
 0x743   : > { %v5402_v11 = vpop.f32.mrf.mxu1 }
 0x744   : > { %v4174_v33 = vadd.f32 %v5402_v11, %v10760_v61 }
 0x745   : > { %v4168_v45 = vpop.f32.mrf.mxu1 }
 0x746   : > { %v4169_v7 = vadd.f32 %v10760_v61, %v4168_v45 }
 0x747   : > { %v5405_v40 = vpop.f32.mrf.mxu1 }
 0x748   : > { %v4184_v30 = vadd.f32 %v5405_v40, %v10760_v61 }
 0x749   : > { %v4178_v12 = vpop.f32.mrf.mxu1 }
 0x74a   : > { %v4179_v25 = vadd.f32 %v10760_v61, %v4178_v12 }
 0x74b   : > { %v5408_v54 = vpop.f32.mrf.mxu1 }
 0x74c   : > { %v4194_v42 = vadd.f32 %v5408_v54, %v10760_v61 }
 0x74d   : > { %v4188_v35 = vpop.f32.mrf.mxu1 }
 0x74e   : > { %v5690_v34 = vpop.eup %5689  ;;  %v4189_v48 = vadd.f32 %v10760_v61, %v4188_v35 }
 0x74f   : > { %v10777_v31 = vrot.slane %v5690_v34, %v9297_v15  ;;  %v5411_v19 = vpop.f32.mrf.mxu1 }
 0x751   : > { %v4539_v41 = vmul.f32 %v10777_v31, %v4114_v56  ;;  %v4538_v15 = vmul.f32 %v10777_v31, %v4109_v13  ;;  %v4541_v39 = vmul.f32 %v10777_v31, %v4124_v38  ;;  %v4540_v4 = vmul.f32 %v10777_v31, %v4119_v2  ;;  %v4198_v54 = vpop.f32.mrf.mxu1 }
 0x752   : > { %v4543_v11 = vmul.f32 %v10777_v31, %v4134_v6  ;;  %v4542_v45 = vmul.f32 %v10777_v31, %v4129_v1  ;;  %v4545_v40 = vmul.f32 %v10777_v31, %v4144_v36  ;;  %v4544_v12 = vmul.f32 %v10777_v31, %v4139_v55 }
 0x753   : > { %v4570_v34 = vadd.f32 %v4538_v15, %v10184_v32  ;;  %v4571_v35 = vadd.f32 %v4539_v41, %v10176_v16  ;;  %v4573_v56 = vadd.f32 %v4541_v39, %v10207_v5  ;;  %v4572_v13 = vadd.f32 %v4540_v4, %v10210_v14  ;;  %v5414_v36 = vpop.f32.mrf.mxu1 }
 0x754   : > { %v4575_v38 = vadd.f32 %v4543_v11, %v10223_v18  ;;  %v4574_v2 = vadd.f32 %v4542_v45, %v10229_v20  ;;  %v4577_v6 = vadd.f32 %v4545_v40, %v10242_v17  ;;  %v4576_v1 = vadd.f32 %v4544_v12, %v10245_v49 }
 0x755   : > { %4602 = vst [vmem:[%s10802_s30] sm:$0xff] %v4570_v34  ;;  %4603 = vst [vmem:[%s10802_s30 + $0x8] sm:$0xff] %v4571_v35  ;;  %v4547_v16 = vmul.f32 %v10777_v31, %v4154_v37  ;;  %v4546_v32 = vmul.f32 %v10777_v31, %v4149_v29  ;;  %v4549_v5 = vmul.f32 %v10777_v31, %v4164_v44  ;;  %v4208_v55 = vpop.f32.mrf.mxu1 }
 0x756   : > { %4605 = vst [vmem:[%s10802_s30 + $0x18] sm:$0xff] %v4573_v56  ;;  %4604 = vst [vmem:[%s10802_s30 + $0x10] sm:$0xff] %v4572_v13  ;;  %v4548_v14 = vmul.f32 %v10777_v31, %v4159_v57  ;;  %v4551_v18 = vmul.f32 %v10777_v31, %v4174_v33  ;;  %v4550_v20 = vmul.f32 %v10777_v31, %v4169_v7 }
 0x757   : > { %4607 = vst [vmem:[%s10802_s30 + $0x28] sm:$0xff] %v4575_v38  ;;  %4606 = vst [vmem:[%s10802_s30 + $0x20] sm:$0xff] %v4574_v2  ;;  %v4553_v17 = vmul.f32 %v10777_v31, %v4184_v30  ;;  %v4552_v49 = vmul.f32 %v10777_v31, %v4179_v25  ;;  %v4579_v37 = vadd.f32 %v4547_v16, %v10261_v52  ;;  %v5417_v41 = vpop.f32.mrf.mxu1 }
 0x758   : > { %4609 = vst [vmem:[%s10802_s30 + $0x38] sm:$0xff] %v4577_v6  ;;  %4608 = vst [vmem:[%s10802_s30 + $0x30] sm:$0xff] %v4576_v1  ;;  %v4578_v29 = vadd.f32 %v4546_v32, %v10266_v59  ;;  %v4581_v44 = vadd.f32 %v4549_v5, %v10279_v22  ;;  %v4580_v57 = vadd.f32 %v4548_v14, %v10283_v58 }
 0x759   : > { %v4583_v33 = vadd.f32 %v4551_v18, %v10298_v28  ;;  %v4582_v7 = vadd.f32 %v4550_v20, %v10301_v63  ;;  %v4585_v30 = vadd.f32 %v4553_v17, %v10331_v10  ;;  %v4584_v25 = vadd.f32 %v4552_v49, %v10321_v26  ;;  %4611 = vst [vmem:[%s10802_s30 + $0x48] sm:$0xff] %v4579_v37  ;;  %v4218_v10 = vpop.f32.mrf.mxu1 }
 0x75a   : > { %4610 = vst [vmem:[%s10802_s30 + $0x40] sm:$0xff] %v4578_v29  ;;  %4613 = vst [vmem:[%s10802_s30 + $0x58] sm:$0xff] %v4581_v44  ;;  %v4555_v52 = vmul.f32 %v10777_v31, %v4194_v42  ;;  %v4554_v59 = vmul.f32 %v10777_v31, %v4189_v48  ;;  %v4204_v22 = vadd.f32 %v5411_v19, %v10760_v61 }
 0x75b   : > { %4612 = vst [vmem:[%s10802_s30 + $0x50] sm:$0xff] %v4580_v57  ;;  %v4199_v58 = vadd.f32 %v10760_v61, %v4198_v54  ;;  %4615 = vst [vmem:[%s10802_s30 + $0x68] sm:$0xff] %v4583_v33  ;;  %v4214_v28 = vadd.f32 %v5414_v36, %v10760_v61  ;;  %v4209_v63 = vadd.f32 %v10760_v61, %v4208_v55  ;;  %v5420_v40 = vpop.f32.mrf.mxu1 }
 0x75c   : > { %4614 = vst [vmem:[%s10802_s30 + $0x60] sm:$0xff] %v4582_v7  ;;  %4617 = vst [vmem:[%s10802_s30 + $0x78] sm:$0xff] %v4585_v30  ;;  %v4224_v26 = vadd.f32 %v5417_v41, %v10760_v61  ;;  %v4587_v42 = vadd.f32 %v4555_v52, %v10347_v43  ;;  %v4586_v48 = vadd.f32 %v4554_v59, %v10337_v53 }
 0x75d   : > { %4616 = vst [vmem:[%s10802_s30 + $0x70] sm:$0xff] %v4584_v25  ;;  %v4557_v19 = vmul.f32 %v10777_v31, %v4204_v22  ;;  %v4556_v15 = vmul.f32 %v10777_v31, %v4199_v58  ;;  %v4559_v39 = vmul.f32 %v10777_v31, %v4214_v28  ;;  %v4558_v4 = vmul.f32 %v10777_v31, %v4209_v63  ;;  %v4228_v13 = vpop.f32.mrf.mxu1 }
 0x75e   : > { %v4561_v11 = vmul.f32 %v10777_v31, %v4224_v26  ;;  %v4219_v45 = vadd.f32 %v10760_v61, %v4218_v10  ;;  %4619 = vst [vmem:[%s10802_s30 + $0x88] sm:$0xff] %v4587_v42  ;;  %4618 = vst [vmem:[%s10802_s30 + $0x80] sm:$0xff] %v4586_v48  ;;  %v4234_v12 = vadd.f32 %v5420_v40, %v10760_v61 }
 0x75f   : > { %v4589_v53 = vadd.f32 %v4557_v19, %v10360_v50  ;;  %v4588_v43 = vadd.f32 %v4556_v15, %v10365_v8  ;;  %v4591_v54 = vadd.f32 %v4559_v39, %v10375_v3  ;;  %v4590_v34 = vadd.f32 %v4558_v4, %v10378_v23  ;;  %v5423_v3 = vpop.f32.mrf.mxu1 }
 0x760   : > { %v4593_v35 = vadd.f32 %v4561_v11, %v10393_v0  ;;  %v4560_v56 = vmul.f32 %v10777_v31, %v4219_v45  ;;  %v4563_v38 = vmul.f32 %v10777_v31, %v4234_v12  ;;  %v4229_v50 = vadd.f32 %v10760_v61, %v4228_v13 }
 0x761   : > { %4621 = vst [vmem:[%s10802_s30 + $0x98] sm:$0xff] %v4589_v53  ;;  %4620 = vst [vmem:[%s10802_s30 + $0x90] sm:$0xff] %v4588_v43  ;;  %v4244_v2 = vadd.f32 %v5423_v3, %v10760_v61  ;;  %v4238_v6 = vpop.f32.mrf.mxu1 }
 0x762   : > { %4623 = vst [vmem:[%s10802_s30 + $0xa8] sm:$0xff] %v4591_v54  ;;  %4622 = vst [vmem:[%s10802_s30 + $0xa0] sm:$0xff] %v4590_v34  ;;  %v4592_v8 = vadd.f32 %v4560_v56, %v10396_v51  ;;  %v4595_v23 = vadd.f32 %v4563_v38, %v10409_v21  ;;  %v4562_v0 = vmul.f32 %v10777_v31, %v4229_v50 }
 0x763   : > { %4625 = vst [vmem:[%s10802_s30 + $0xb8] sm:$0xff] %v4593_v35  ;;  %v4565_v36 = vmul.f32 %v10777_v31, %v4244_v2  ;;  %v4239_v16 = vadd.f32 %v10760_v61, %v4238_v6  ;;  %v5426_v32 = vpop.f32.mrf.mxu1 }
 0x764   : > { %4624 = vst [vmem:[%s10802_s30 + $0xb0] sm:$0xff] %v4592_v8  ;;  %4627 = vst [vmem:[%s10802_s30 + $0xc8] sm:$0xff] %v4595_v23  ;;  %v4594_v1 = vadd.f32 %v4562_v0, %v10404_v24  ;;  %v4254_v5 = vadd.f32 %v5426_v32, %v10760_v61 }
 0x765   : > { %v4597_v51 = vadd.f32 %v4565_v36, %v10424_v47  ;;  %v4564_v21 = vmul.f32 %v10777_v31, %v4239_v16  ;;  %v4248_v14 = vpop.f32.mrf.mxu1 }
 0x766   : > { %4626 = vst [vmem:[%s10802_s30 + $0xc0] sm:$0xff] %v4594_v1  ;;  %v4567_v18 = vmul.f32 %v10777_v31, %v4254_v5  ;;  %v4249_v20 = vadd.f32 %v10760_v61, %v4248_v14 }
 0x767   : > { %4629 = vst [vmem:[%s10802_s30 + $0xd8] sm:$0xff] %v4597_v51  ;;  %v4596_v24 = vadd.f32 %v4564_v21, %v10420_v27  ;;  %v5429_v17 = vpop.f32.mrf.mxu1 }
 0x768   : > { %v4599_v47 = vadd.f32 %v4567_v18, %v10436_v46  ;;  %v4566_v49 = vmul.f32 %v10777_v31, %v4249_v20  ;;  %v4264_v55 = vadd.f32 %v5429_v17, %v10760_v61 }
 0x769   : > { %4628 = vst [vmem:[%s10802_s30 + $0xd0] sm:$0xff] %v4596_v24  ;;  %v4258_v37 = vpop.f32.mrf.mxu1 }
 0x76a   : > { %4631 = vst [vmem:[%s10802_s30 + $0xe8] sm:$0xff] %v4599_v47  ;;  %v4598_v29 = vadd.f32 %v4566_v49, %v10432_v9  ;;  %v4569_v27 = vmul.f32 %v10777_v31, %v4264_v55  ;;  %v4259_v44 = vadd.f32 %v10760_v61, %v4258_v37 }
 0x76c   : > { %4630 = vst [vmem:[%s10802_s30 + $0xe0] sm:$0xff] %v4598_v29  ;;  %v4601_v46 = vadd.f32 %v4569_v27, %v10448_v62  ;;  %v4568_v57 = vmul.f32 %v10777_v31, %v4259_v44 }
 0x76e   : > { %4633 = vst [vmem:[%s10802_s30 + $0xf8] sm:$0xff] %v4601_v46  ;;  %v4600_v9 = vadd.f32 %v4568_v57, %v10444_v60 }
 0x770   : > { %4632 = vst [vmem:[%s10802_s30 + $0xf0] sm:$0xff] %v4600_v9 }
 0x771   : > { %5816 = shalt.err (!%p5813_p3)
}
 0x772   : > { %s5817_s14 = scalar_lea.hbm %s10900_s9, 4096  ;;  %s5821_s17 = scalar_lea.hbm %s10954_s5, 8192 }
 0x773   : > { %p5818_p4 = scmp.ne.s32.totalorder %s10900_s9, %s5817_s14  ;;  %p5822_p9 = scmp.lt.s32.totalorder %s10900_s9, %s10954_s5 }
 0x774   : > { %p5823_p10 = scmp.lt.s32.totalorder %s5821_s17, %s5817_s14 }
 0x775   : > { %p5819_p7 = pnand %p5818_p4, %p5938_p5 }
 0x776   : > { %p5824_p11 = por %p5823_p10, %p5822_p9 }
 0x777   : > { %p5820_p8 = pneg %p5819_p7 }
 0x779   : > { %p5825_p12 = pnand %p5824_p11, %p5820_p8 }
 0x77b   : > { %5828 = shalt.err (!%p5825_p12)
}
 0x77c   : > { %s5868_s30 = smov 128   ;;  %s5869_s6 = smov 8  }
 0x77d   : > { %5508 = dma.vmem_to_hbm [thread:$0]  (%p5938_p5), %s10902_s25, 4096, %s10900_s9, %s10909_s22, %s5868_s30, %s5868_s30, %s5869_s6  }
 0x77e PF: > { %p5514_p13 = scmp.ge.s32.totalorder %s5863_s21, 2  ;;  %s4663_s7 = sand.u32 1, %s5851_s18  }
 0x77f   : > { %s4664_s8 = scalar_lea.sflag [#allocation3], %s4663_s7 }
 0x780   : > { %p5511_p0 = pnand %p5514_p13, %p5942_p6 }
 0x782   : > { %p5512_p1 = pneg %p5511_p0 }
 0x784   : > { %5846 = dma.done.wait (%p5512_p1), %s4664_s8, 4096  }
 0x785   : > { %5848 = vsyncadd (%p5512_p1), %s4664_s8, 4294963200  ;;  %p15_p2 = scmp.ge.s32.totalorder %s5925_s24, 4   ;;  %s12020_s18 = smov %s5855_s19 }
 0x786   : > { %s12021_s19 = smov %s5859_s20  ;;  %s12022_s20 = smov %s5936_s27 }
 0x787   : > { %s12023_s21 = smov %s5925_s24  ;;  %17 = sbr.rel (!%p15_p2) target bundleno = 3 (0x3), region = 78 }
 0x78c   :  { %4669 = vsyncpa [#allocation3], 1 }
 0x78d   :  { %4671 = vsyncpa [#allocation3 + $0x1], 1 }

</bundles_post_ra>
